<compile_context>
chip_gen: v7x
topology: tpu7x:2x2x1
jax: 0.10.0
libtpu: 0.0.40
codegen_flags: <defaults>
</compile_context>

<pallas_src>
import functools

import jax
import jax.numpy as jnp
from jax.experimental import pallas as pl
from jax.experimental.pallas import tpu as pltpu


def _round_up(x, m):
    return ((x + m - 1) // m) * m


# ----------------------------------------------------------------------------
# Kernel 1: CNN encoder (fused-K banded conv -> ReLU -> GAP) folded with the
#           FC(512) and the LSTM input projection: outputs gates_x per frame.
# ----------------------------------------------------------------------------
def _cnn_gates_kernel(HH, WW, F, WCp,
                      xpad_ref, feat_ref, wconv_ref, bconv_ref,
                      wtail_ref, wihx_ref, btail_ref, out_ref):
    # xpad_ref : (tile_n, H+2, WCp)  bf16  zero-padded frames (lane-padded)
    # feat_ref : (tile_n, 1)         f32   scalar feature per frame
    # wconv_ref: (3*WCp, W*F)        bf16  fused banded conv weight (K=3*WCp)
    # bconv_ref: (1, W*F)            f32   conv bias tiled over width
    # wtail_ref: (W*F, 4H)           bf16  folded GAP->FC->W_ih weight (/H*W)
    # wihx_ref : (1, 4H)             f32   scalar-feature column of W_ih
    # btail_ref: (1, 4H)             f32   folded biases (b_fc@W_ih + b_ih+b_hh)
    # out_ref  : (tile_n, 4H)        f32   gates_x for the recurrence
    tile_n = xpad_ref.shape[0]
    WF = WW * F

    # In-kernel im2col with a single fused-K matmul: concatenate the three
    # row-shifted views along lanes (each WCp-wide, 128-aligned) so the conv
    # is one (tile_n*H, 3*WCp) @ (3*WCp, W*F) MXU pass.
    shifted = [xpad_ref[:, dy:dy + HH, :] for dy in range(3)]
    lhs = jnp.concatenate(shifted, axis=-1).reshape(tile_n * HH, 3 * WCp)
    conv = jnp.dot(lhs, wconv_ref[...], preferred_element_type=jnp.float32)
    conv = jnp.maximum(conv + bconv_ref[...], 0.0)            # ReLU, (tile_n*H, W*F)

    # Global-avg-pool + FC + LSTM input projection folded into one matmul:
    # sublane reduce over H, then row_sum @ W_tail (K = W*F, bf16 operands).
    row_sum = jnp.sum(conv.reshape(tile_n, HH, WF), axis=1)   # (tile_n, W*F) f32
    out_ref[...] = (jnp.dot(row_sum.astype(jnp.bfloat16), wtail_ref[...],
                            preferred_element_type=jnp.float32)
                    + feat_ref[...] * wihx_ref[...]           # scalar-feature column
                    + btail_ref[...])


def cnn_gates_pallas(xpad, feat, wconv, bconv, wtail, wihx, btail,
                     *, H, W, F, WCp, tile_n, vmem_limit):
    N = xpad.shape[0]
    G = wtail.shape[1]
    WF = W * F
    Kc = 3 * WCp
    return pl.pallas_call(
        functools.partial(_cnn_gates_kernel, H, W, F, WCp),
        out_shape=jax.ShapeDtypeStruct((N, G), jnp.float32),
        grid=(N // tile_n,),
        in_specs=[
            pl.BlockSpec((tile_n, H + 2, WCp), lambda i: (i, 0, 0)),  # frames
            pl.BlockSpec((tile_n, 1), lambda i: (i, 0)),              # scalar feature
            pl.BlockSpec((Kc, WF), lambda i: (0, 0)),                 # fused conv W
            pl.BlockSpec((1, WF), lambda i: (0, 0)),                  # conv bias
            pl.BlockSpec((WF, G), lambda i: (0, 0)),                  # folded tail W
            pl.BlockSpec((1, G), lambda i: (0, 0)),                   # W_ih scalar row
            pl.BlockSpec((1, G), lambda i: (0, 0)),                   # folded biases
        ],
        out_specs=pl.BlockSpec((tile_n, G), lambda i: (i, 0)),
        compiler_params=pltpu.CompilerParams(
            dimension_semantics=("parallel",),          # v7x: 2 TCs split frames
            vmem_limit_bytes=vmem_limit),
    )(xpad, feat, wconv, bconv, wtail, wihx, btail)


# ----------------------------------------------------------------------------
# Kernel 2: batch-parallel, time-blocked LSTM recurrence + fused final Linear
# ----------------------------------------------------------------------------
def _lstm_kernel(Tt, Hh, gx_ref, whh_ref, wlin_ref, blin_ref, out_ref,
                 h_sc, c_sc):
    t_blk = pl.program_id(1)

    @pl.when(t_blk == 0)
    def _():
        h_sc[...] = jnp.zeros_like(h_sc)
        c_sc[...] = jnp.zeros_like(c_sc)

    whh = whh_ref[...]              # hoisted: bf16 recurrent weight, loaded once
    gate_sliced = (Hh % 128 == 0)   # static: lane-aligned hidden -> slice first

    def step(tt, carry):
        h, c = carry
        # Input projection + all biases were precomputed (gates_x); only the
        # recurrent matmul (bf16 operands, f32 accumulate) stays serial.
        gates = gx_ref[tt] + jnp.dot(h.astype(jnp.bfloat16), whh,
                                     preferred_element_type=jnp.float32)
        if gate_sliced:
            # sigmoid only on i/f/o, tanh only on g: ~2x less EUP work/step.
            i_g = jax.nn.sigmoid(gates[:, 0 * Hh:1 * Hh])
            f_g = jax.nn.sigmoid(gates[:, 1 * Hh:2 * Hh])
            g_g = jnp.tanh(gates[:, 2 * Hh:3 * Hh])
            o_g = jax.nn.sigmoid(gates[:, 3 * Hh:4 * Hh])
        else:
            # 4H <= 128 demo sizes: keep full-vreg activations, slice after.
            sig = jax.nn.sigmoid(gates)
            th = jnp.tanh(gates)
            i_g = sig[:, 0 * Hh:1 * Hh]   # PyTorch gate order i, f, g, o
            f_g = sig[:, 1 * Hh:2 * Hh]
            g_g = th[:, 2 * Hh:3 * Hh]
            o_g = sig[:, 3 * Hh:4 * Hh]
        c_new = f_g * c + i_g * g_g       # state math stays f32
        h_new = o_g * jnp.tanh(c_new)
        return h_new, c_new

    h, c = jax.lax.fori_loop(0, Tt, step, (h_sc[...], c_sc[...]), unroll=True)
    h_sc[...] = h
    c_sc[...] = c

    @pl.when(t_blk == pl.num_programs(1) - 1)
    def _():
        # Dropout(p=0.1) on h_n is identity at inference.
        out_ref[...] = (jnp.dot(h, wlin_ref[...],
                                preferred_element_type=jnp.float32)
                        + blin_ref[...])


def lstm_linear_pallas(gates_x, w_hh_t, w_lin_t, b_lin, *, time_block,
                       batch_block):
    T, B, G = gates_x.shape
    Hh = w_hh_t.shape[0]
    O = w_lin_t.shape[1]
    return pl.pallas_call(
        functools.partial(_lstm_kernel, time_block, Hh),
        out_shape=jax.ShapeDtypeStruct((B, O), jnp.float32),
        grid=(B // batch_block, T // time_block),
        in_specs=[
            pl.BlockSpec((time_block, batch_block, G), lambda b, t: (t, b, 0)),
            pl.BlockSpec((Hh, G), lambda b, t: (0, 0)),
            pl.BlockSpec((Hh, O), lambda b, t: (0, 0)),
            pl.BlockSpec((1, O), lambda b, t: (0, 0)),
        ],
        out_specs=pl.BlockSpec((batch_block, O), lambda b, t: (b, 0)),
        scratch_shapes=[pltpu.VMEM((batch_block, Hh), jnp.float32),
                        pltpu.VMEM((batch_block, Hh), jnp.float32)],
        compiler_params=pltpu.CompilerParams(
            dimension_semantics=("parallel", "arbitrary")),
    )(gates_x, w_hh_t.astype(jnp.bfloat16), w_lin_t, b_lin)


# ----------------------------------------------------------------------------
# JAX glue: fused banded conv weights, folded tail, tiling heuristics, forward
# ----------------------------------------------------------------------------
def build_fused_conv_weight(w_conv, C, F, W, WCp):
    """w_conv: (9C, F), row index (3*dy+dx)*C + c -> (3*WCp, W*F) fused banded."""
    w9 = w_conv.reshape(3, 3, C, F)
    WC = (W + 2) * C
    blocks = []
    for dy in range(3):
        band = sum(jnp.kron(jnp.eye(W + 2, W, k=-dx, dtype=w_conv.dtype), w9[dy, dx])
                   for dx in range(3))                       # ((W+2)*C, W*F)
        blocks.append(jnp.pad(band, ((0, WCp - WC), (0, 0))))  # lane-pad rows
    return jnp.concatenate(blocks, axis=0)                   # (3*WCp, W*F)


def _vmem_limit_bytes():
    """Scoped-VMEM request: ~3/4 of physical VMEM (v5e/v6e 128 MiB, v7x 64 MiB)."""
    try:
        cap = int(pltpu.get_tpu_info().vmem_capacity_bytes)
    except Exception:
        cap = 64 * 1024 * 1024
    return max(32 * 1024 * 1024, min((cap * 3) // 4, 96 * 1024 * 1024))


def _pick_tile_frames(N, per_frame_bytes, const_bytes, vmem_budget):
    """Largest divisor of N (multiple of 8, or == N) whose double-buffered
    per-tile footprint, PLUS the double-buffered resident constants, fits
    within ~75% of the scoped VMEM budget."""
    usable = int(vmem_budget * 0.75) - 2 * const_bytes
    cap = max(1, usable // max(1, 2 * per_frame_bytes))
    best = None
    for d in range(1, N + 1):
        if N % d == 0 and d <= cap and (d % 8 == 0 or d == N):
            best = d
    if best is None:
        # Smallest layout-legal tile (still %8 / ==N); may de-pipeline for
        # extreme shapes but never silently breaks the block-layout rule.
        best = next((d for d in range(8, N + 1, 8) if N % d == 0), N)
    return best


def _pick_time_block(T, max_block=32):
    best = 1
    for d in range(1, T + 1):
        if T % d == 0 and d <= max_block:
            best = d
    return best


def _pick_batch_block(B):
    # v7x: split the batch across the 2 TensorCores when each chunk keeps >= 8
    # rows (layout rule); otherwise run the whole batch on one core.
    if B % 2 == 0 and (B // 2) % 8 == 0:
        return B // 2
    return B


def image_sequence_model_forward(params, image_sequence, feature_sequence,
                                 *, tile_frames=None, time_block=None):
    """image_sequence: (B, T, C, H, W) float32; feature_sequence: (B, T, 1)."""
    B, T, C, H, W = image_sequence.shape
    N = T * B
    F = params["w_conv"].shape[1]
    E = params["w_fc"].shape[1]          # 512
    Hh = params["w_hh_t"].shape[0]
    G = 4 * Hh
    WC = (W + 2) * C
    WCp = _round_up(WC, 128)             # lane-aligned K block per dy
    WF = W * F

    # Time-major NHWC frames with 'same' zero padding + lane padding, bf16.
    # Only ~1.3x raw bytes cross HBM into the kernel (im2col is in-kernel).
    # TODO(synk): for production shapes, move this pad/transpose in-kernel via
    # manual DMA (pl.ANY + make_async_copy into zero-initialized VMEM scratch)
    # to remove the host-side HBM pass (matters most on v5e's ~0.8 TB/s HBM).
    frames = jnp.transpose(image_sequence, (1, 0, 3, 4, 2)).reshape(N, H, W, C)
    xpad = jnp.pad(frames, ((0, 0), (1, 1), (1, 1), (0, 0))).reshape(N, H + 2, WC)
    xpad = jnp.pad(xpad, ((0, 0), (0, 0), (0, WCp - WC))).astype(jnp.bfloat16)
    feat_flat = jnp.transpose(feature_sequence, (1, 0, 2)).reshape(N, 1)
    feat_flat = feat_flat.astype(jnp.float32)

    # Grid-invariant operands.
    # TODO(synk): for very large W, tile the width axis of the fused banded
    # weight (it grows ~quadratically in W) instead of holding it whole.
    wconv_fused = build_fused_conv_weight(params["w_conv"], C, F, W, WCp)
    wconv_fused = wconv_fused.astype(jnp.bfloat16)            # (3*WCp, W*F)
    bconv_t = jnp.tile(params["b_conv"], (1, W))              # (1, W*F)
    w_ih_t = params["w_ih_t"]                                 # (513, 4H)
    w_ih_feat = w_ih_t[:E]                                    # (512, 4H)
    w_ih_x = w_ih_t[E:E + 1].astype(jnp.float32)              # (1, 4H)
    # Folded GAP -> FC -> W_ih tail (one bf16 weight) and folded biases.
    w_tail = (jnp.tile(params["w_fc"] @ w_ih_feat, (W, 1))
              * (1.0 / (H * W))).astype(jnp.bfloat16)         # (W*F, 4H)
    b_tail = params["b_fc"] @ w_ih_feat + params["b_gates"]   # (1, 4H)

    vmem_limit = _vmem_limit_bytes()
    if tile_frames is None:
        per_frame = (H + 2) * WCp * 2 + 4 + G * 4
        const_bytes = (wconv_fused.size * 2 + bconv_t.size * 4
                       + w_tail.size * 2 + 2 * G * 4)
        tile_frames = _pick_tile_frames(N, per_frame, const_bytes, vmem_limit)
    assert N % tile_frames == 0

    gates_x = cnn_gates_pallas(
        xpad, feat_flat, wconv_fused, bconv_t, w_tail, w_ih_x, b_tail,
        H=H, W=W, F=F, WCp=WCp, tile_n=tile_frames,
        vmem_limit=vmem_limit)                                # (N, 4H)
    gates_x = gates_x.reshape(T, B, G)

    if time_block is None:
        time_block = _pick_time_block(T)
    assert T % time_block == 0
    batch_block = _pick_batch_block(B)

    return lstm_linear_pallas(gates_x, params["w_hh_t"], params["w_lin_t"],
                              params["b_lin"], time_block=time_block,
                              batch_block=batch_block)        # (B, O)


def make_params(key, C, conv_f, cnn_out, hidden, output_size):
    ks = jax.random.split(key, 8)
    s = 0.1
    return {
        # synthesized cnn_encoder: conv3x3 -> relu -> GAP -> linear(conv_f -> 512)
        "w_conv": s * jax.random.normal(ks[0], (9 * C, conv_f), jnp.float32),
        "b_conv": s * jax.random.normal(ks[1], (1, conv_f), jnp.float32),
        "w_fc":   s * jax.random.normal(ks[2], (conv_f, cnn_out), jnp.float32),
        "b_fc":   s * jax.random.normal(ks[3], (1, cnn_out), jnp.float32),
        # LSTM (PyTorch layout transposed for right-multiply): D_in = 512 + 1
        "w_ih_t": s * jax.random.normal(ks[4], (cnn_out + 1, 4 * hidden), jnp.float32),
        "w_hh_t": s * jax.random.normal(ks[5], (hidden, 4 * hidden), jnp.float32),
        "b_gates": s * jax.random.normal(ks[6], (1, 4 * hidden), jnp.float32),  # b_ih+b_hh
        # final Linear(hidden -> output)
        "w_lin_t": s * jax.random.normal(ks[7], (hidden, output_size), jnp.float32),
        "b_lin":  jnp.zeros((1, output_size), jnp.float32),
    }


# ----------------------------------------------------------------------------
# Pure-JAX float32 reference (unfused, module-faithful math) for validation
# ----------------------------------------------------------------------------
def im2col_3x3_same(x_nhwc):
    """x: (N, H, W, C) -> patches (N*H*W, 9*C), inner order (dy, dx, c)."""
    N, H, W, C = x_nhwc.shape
    xp = jnp.pad(x_nhwc, ((0, 0), (1, 1), (1, 1), (0, 0)))
    taps = [xp[:, dy:dy + H, dx:dx + W, :] for dy in range(3) for dx in range(3)]
    patches = jnp.stack(taps, axis=3)                   # (N, H, W, 9, C)
    return patches.reshape(N * H * W, 9 * C)


def reference_forward(params, image_sequence, feature_sequence):
    B, T, C, H, W = image_sequence.shape
    F = params["w_conv"].shape[1]
    Hh = params["w_hh_t"].shape[0]
    hi = jax.lax.Precision.HIGHEST

    frames = jnp.transpose(image_sequence, (1, 0, 3, 4, 2)).reshape(T * B, H, W, C)
    conv = jnp.maximum(
        jnp.dot(im2col_3x3_same(frames), params["w_conv"], precision=hi)
        + params["b_conv"], 0.0)
    pooled = conv.reshape(T * B, H * W, F).mean(axis=1)
    feats = jnp.dot(pooled, params["w_fc"], precision=hi) + params["b_fc"]

    feat_flat = jnp.transpose(feature_sequence, (1, 0, 2)).reshape(T * B, 1)
    rnn_in = jnp.concatenate([feats, feat_flat], axis=-1)          # cat([cnn, feat])
    gates_x = (jnp.dot(rnn_in, params["w_ih_t"], precision=hi)
               + params["b_gates"]).reshape(T, B, 4 * Hh)

    h = jnp.zeros((B, Hh), jnp.float32)
    c = jnp.zeros((B, Hh), jnp.float32)
    for t in range(T):
        gates = gates_x[t] + jnp.dot(h, params["w_hh_t"], precision=hi)
        i = jax.nn.sigmoid(gates[:, 0 * Hh:1 * Hh])
        f = jax.nn.sigmoid(gates[:, 1 * Hh:2 * Hh])
        g = jnp.tanh(gates[:, 2 * Hh:3 * Hh])
        o = jax.nn.sigmoid(gates[:, 3 * Hh:4 * Hh])
        c = f * c + i * g
        h = o * jnp.tanh(c)
    return jnp.dot(h, params["w_lin_t"], precision=hi) + params["b_lin"]


if __name__ == "__main__":
    B, T, C, H, W = 2, 8, 4, 16, 16
    hidden, output_size = 32, 16
    conv_f, cnn_out = 128, 512   # conv width 128 for MXU lane fill; 512-d features

    key = jax.random.PRNGKey(0)
    k_img, k_feat, k_par = jax.random.split(key, 3)
    image_sequence = jax.random.normal(k_img, (B, T, C, H, W), jnp.float32)
    feature_sequence = jax.random.normal(k_feat, (B, T, 1), jnp.float32)
    params = make_params(k_par, C, conv_f, cnn_out, hidden, output_size)

    out = image_sequence_model_forward(
        params, image_sequence, feature_sequence,
        tile_frames=8)   # 2 pipelined frame-grid steps at this demo size
    out = jax.block_until_ready(out)
    assert out.shape == (B, output_size)

    ref = jax.block_until_ready(
        reference_forward(params, image_sequence, feature_sequence))
    max_err = float(jnp.max(jnp.abs(out - ref)))
    # Tolerance vs. the float32 reference: bf16 MXU operands in the fused conv,
    # the folded GAP/FC/W_ih tail and the recurrent matmul introduce ~0.2-0.4%
    # relative rounding per matmul, accumulated over an 8-step recurrence.
    assert jnp.allclose(out, ref, atol=4e-2, rtol=4e-2), max_err

    print("KERNEL_OK")
</pallas_src>

<mosaic_0001>
module attributes {stable_mosaic.version = 11 : i64} {
  func.func @_cnn_gates_kernel(%arg0: i32, %arg1: memref<8x18x128xbf16, #tpu.memory_space<vmem>>, %arg2: memref<8x1xf32, #tpu.memory_space<vmem>>, %arg3: memref<384x2048xbf16, #tpu.memory_space<vmem>>, %arg4: memref<1x2048xf32, #tpu.memory_space<vmem>>, %arg5: memref<2048x128xbf16, #tpu.memory_space<vmem>>, %arg6: memref<1x128xf32, #tpu.memory_space<vmem>>, %arg7: memref<1x128xf32, #tpu.memory_space<vmem>>, %arg8: memref<8x128xf32, #tpu.memory_space<vmem>>) attributes {dimension_semantics = [#tpu.dimension_semantics<parallel>], iteration_bounds = array<i64: 2>, scalar_prefetch = 0 : i64, scratch_operands = 0 : i64, tpu.core_type = #tpu.core_type<tc>, window_params = [{transform_indices = @transform_0, window_bounds = array<i64: 8, 18, 128>}, {transform_indices = @transform_1, window_bounds = array<i64: 8, 1>}, {pipeline_mode = #tpu.pipeline_mode<synchronous>, transform_indices = @transform_2, window_bounds = array<i64: 384, 2048>}, {pipeline_mode = #tpu.pipeline_mode<synchronous>, transform_indices = @transform_3, window_bounds = array<i64: 1, 2048>}, {pipeline_mode = #tpu.pipeline_mode<synchronous>, transform_indices = @transform_4, window_bounds = array<i64: 2048, 128>}, {pipeline_mode = #tpu.pipeline_mode<synchronous>, transform_indices = @transform_5, window_bounds = array<i64: 1, 128>}, {pipeline_mode = #tpu.pipeline_mode<synchronous>, transform_indices = @transform_6, window_bounds = array<i64: 1, 128>}, {transform_indices = @transform_7, window_bounds = array<i64: 8, 128>}]} {
    %c0 = arith.constant 0 : index
    %c0_0 = arith.constant 0 : index
    %c0_1 = arith.constant 0 : index
    %0 = vector.load %arg1[%c0, %c0_0, %c0_1] : memref<8x18x128xbf16, #tpu.memory_space<vmem>>, vector<8x16x128xbf16>
    %c0_2 = arith.constant 0 : index
    %c1 = arith.constant 1 : index
    %c0_3 = arith.constant 0 : index
    %1 = vector.load %arg1[%c0_2, %c1, %c0_3] : memref<8x18x128xbf16, #tpu.memory_space<vmem>>, vector<8x16x128xbf16>
    %c0_4 = arith.constant 0 : index
    %c2 = arith.constant 2 : index
    %c0_5 = arith.constant 0 : index
    %2 = vector.load %arg1[%c0_4, %c2, %c0_5] : memref<8x18x128xbf16, #tpu.memory_space<vmem>>, vector<8x16x128xbf16>
    %3 = tpu.concatenate %0, %1, %2 in 2 : vector<8x16x128xbf16>, vector<8x16x128xbf16>, vector<8x16x128xbf16> -> vector<8x16x384xbf16>
    %4 = vector.shape_cast %3 : vector<8x16x384xbf16> to vector<128x384xbf16>
    %c0_6 = arith.constant 0 : index
    %c0_7 = arith.constant 0 : index
    %5 = vector.load %arg3[%c0_6, %c0_7] : memref<384x2048xbf16, #tpu.memory_space<vmem>>, vector<384x2048xbf16>
    %cst = arith.constant dense<0.000000e+00> : vector<128x2048xf32>
    %6 = tpu.matmul %4, %5, %cst {dimension_numbers = #tpu.dot_dimension_numbers<[1], [0], [0], [1], [0, 0, 1, 1], [], []>} : vector<128x384xbf16>, vector<384x2048xbf16>, vector<128x2048xf32> -> vector<128x2048xf32>
    %c0_8 = arith.constant 0 : index
    %c0_9 = arith.constant 0 : index
    %7 = vector.load %arg4[%c0_8, %c0_9] : memref<1x2048xf32, #tpu.memory_space<vmem>>, vector<1x2048xf32>
    %8 = vector.broadcast %7 : vector<1x2048xf32> to vector<128x2048xf32>
    %9 = arith.addf %6, %8 : vector<128x2048xf32>
    %cst_10 = arith.constant 0.000000e+00 : f32
    %10 = vector.broadcast %cst_10 : f32 to vector<128x2048xf32>
    %11 = arith.maximumf %9, %10 : vector<128x2048xf32>
    %12 = vector.shape_cast %11 : vector<128x2048xf32> to vector<8x16x2048xf32>
    %cst_11 = arith.constant dense<0.000000e+00> : vector<8x2048xf32>
    %13 = vector.multi_reduction <add>, %12, %cst_11 [1] : vector<8x16x2048xf32> to vector<8x2048xf32>
    %14 = arith.truncf %13 : vector<8x2048xf32> to vector<8x2048xbf16>
    %c0_12 = arith.constant 0 : index
    %c0_13 = arith.constant 0 : index
    %15 = vector.load %arg5[%c0_12, %c0_13] : memref<2048x128xbf16, #tpu.memory_space<vmem>>, vector<2048x128xbf16>
    %cst_14 = arith.constant dense<0.000000e+00> : vector<8x128xf32>
    %16 = tpu.matmul %14, %15, %cst_14 {dimension_numbers = #tpu.dot_dimension_numbers<[1], [0], [0], [1], [0, 0, 1, 1], [], []>} : vector<8x2048xbf16>, vector<2048x128xbf16>, vector<8x128xf32> -> vector<8x128xf32>
    %c0_15 = arith.constant 0 : index
    %c0_16 = arith.constant 0 : index
    %17 = vector.load %arg2[%c0_15, %c0_16] : memref<8x1xf32, #tpu.memory_space<vmem>>, vector<8x1xf32>
    %c0_17 = arith.constant 0 : index
    %c0_18 = arith.constant 0 : index
    %18 = vector.load %arg6[%c0_17, %c0_18] : memref<1x128xf32, #tpu.memory_space<vmem>>, vector<1x128xf32>
    %19 = vector.broadcast %17 : vector<8x1xf32> to vector<8x128xf32>
    %20 = vector.broadcast %18 : vector<1x128xf32> to vector<8x128xf32>
    %21 = arith.mulf %19, %20 : vector<8x128xf32>
    %22 = arith.addf %16, %21 : vector<8x128xf32>
    %c0_19 = arith.constant 0 : index
    %c0_20 = arith.constant 0 : index
    %23 = vector.load %arg7[%c0_19, %c0_20] : memref<1x128xf32, #tpu.memory_space<vmem>>, vector<1x128xf32>
    %24 = vector.broadcast %23 : vector<1x128xf32> to vector<8x128xf32>
    %25 = arith.addf %22, %24 : vector<8x128xf32>
    %c0_21 = arith.constant 0 : index
    %c0_22 = arith.constant 0 : index
    %26 = vector.load %arg8[%c0_21, %c0_22] : memref<8x128xf32, #tpu.memory_space<vmem>>, vector<8x128xf32>
    tpu.vector_store %arg8[%c0_21, %c0_22], %25 {strides = array<i32>} : memref<8x128xf32, #tpu.memory_space<vmem>>, vector<8x128xf32>,
    return
  }
  func.func @transform_0(%arg0: i32) -> (i32, i32, i32) {
    %c0_i32 = arith.constant 0 : i32
    %c0_i32_0 = arith.constant 0 : i32
    %c0_i32_1 = arith.constant 0 : i32
    return %arg0, %c0_i32, %c0_i32_0 : i32, i32, i32
  }
  func.func @transform_1(%arg0: i32) -> (i32, i32) {
    %c0_i32 = arith.constant 0 : i32
    %c0_i32_0 = arith.constant 0 : i32
    return %arg0, %c0_i32 : i32, i32
  }
  func.func @transform_2(%arg0: i32) -> (i32, i32) {
    %c0_i32 = arith.constant 0 : i32
    %c0_i32_0 = arith.constant 0 : i32
    %c0_i32_1 = arith.constant 0 : i32
    return %c0_i32, %c0_i32_0 : i32, i32
  }
  func.func @transform_3(%arg0: i32) -> (i32, i32) {
    %c0_i32 = arith.constant 0 : i32
    %c0_i32_0 = arith.constant 0 : i32
    %c0_i32_1 = arith.constant 0 : i32
    return %c0_i32, %c0_i32_0 : i32, i32
  }
  func.func @transform_4(%arg0: i32) -> (i32, i32) {
    %c0_i32 = arith.constant 0 : i32
    %c0_i32_0 = arith.constant 0 : i32
    %c0_i32_1 = arith.constant 0 : i32
    return %c0_i32, %c0_i32_0 : i32, i32
  }
  func.func @transform_5(%arg0: i32) -> (i32, i32) {
    %c0_i32 = arith.constant 0 : i32
    %c0_i32_0 = arith.constant 0 : i32
    %c0_i32_1 = arith.constant 0 : i32
    return %c0_i32, %c0_i32_0 : i32, i32
  }
  func.func @transform_6(%arg0: i32) -> (i32, i32) {
    %c0_i32 = arith.constant 0 : i32
    %c0_i32_0 = arith.constant 0 : i32
    %c0_i32_1 = arith.constant 0 : i32
    return %c0_i32, %c0_i32_0 : i32, i32
  }
  func.func @transform_7(%arg0: i32) -> (i32, i32) {
    %c0_i32 = arith.constant 0 : i32
    %c0_i32_0 = arith.constant 0 : i32
    return %arg0, %c0_i32 : i32, i32
  }
}

</mosaic_0001>

<bundles_post_ra>
// kernel: tpu_custom_call.1
= control target key start
LH: loop header
LB: loop body
LE: loop exit
PB: predicated region body
PF: predicated region fallthrough
CT: control target
= control target key end

     0   :  { %s12632_s0 = inlined_call_operand.vmem [shape: bf16[16,18,128], index: 0, kind: input, shape index: {}]   ;;  %s12633_s1 = inlined_call_operand.vmem [shape: f32[16,1], index: 1, kind: input, shape index: {}]   ;;  %s12634_s2 = inlined_call_operand.hbm [shape: bf16[384,2048], index: 2, kind: input, shape index: {}]   ;;  %s12635_s3 = inlined_call_operand.hbm [shape: f32[1,2048], index: 3, kind: input, shape index: {}]   ;;  %s12636_s4 = inlined_call_operand.hbm [shape: bf16[2048,128], index: 4, kind: input, shape index: {}]   ;;  %s12637_s5 = inlined_call_operand.hbm [shape: f32[1,128], index: 5, kind: input, shape index: {}]   ;;  %s12638_s6 = inlined_call_operand.hbm [shape: f32[1,128], index: 6, kind: input, shape index: {}]   ;;  %s12639_s7 = inlined_call_operand.hbm [shape: f32[16,128], index: 7, kind: output, shape index: {}]  }
   0x1   :  { %12831 = sst [smem:[#allocation95_spill]] %s12635_s3 }
   0x2   :  { %12832 = sst [smem:[#allocation96_spill]] %s12637_s5 }
   0x3   :  { %12 = vsyncpa [#allocation3], 0 }
   0x4   :  { %13 = vsyncpa [#allocation6], 0 }
   0x5   :  { %14 = vsyncpa [#allocation9], 0 }
   0x6   :  { %15 = vsyncpa [#allocation4], 0 }
   0x7   :  { %17 = vsyncpa [#allocation4 + $0x1], 0  ;;  %s9782_s24 = smov 0   ;;  %s9784_s25 = smov 0  }
   0x8   :  { %s9786_s26 = smov 0   ;;  %s9788_s27 = smov 0  }
   0x9 LB: > { %s9803_s28 = sadd.s32 4294967295, %s9730_s27   ;;  %s8018_s29 = sadd.s32 4294967294, %s9730_s27   ;;  %s9730_s27 = sphi %s9788_s27, %s13164_s27   ;;  %s9726_s26 = sphi %s9786_s26, %s13163_s26   ;;  %s9722_s25 = sphi %s9784_s25, %s13162_s25   ;;  %s9718_s24 = sphi %s9782_s24, %s13161_s24  }
   0xa   : > { %s9807_s30 = sadd.s32 1, %s9730_s27   ;;  %s187_s8 = sadd.s32 1, %s9726_s26 }
   0xb   : > { %s184_s9 = ssub.s32 %s9730_s27, %s9807_s30  ;;  %p197_p0 = scmp.ne.s32.totalorder %s9726_s26, %s9722_s25 }
   0xc   : > { %p185_p1 = scmp.eq.s32.totalorder %s184_s9, 0  ;;  %p198_p2 = scmp.eq.s32.totalorder %s9803_s28, 1 }
   0xd   : > { %p203_p3 = scmp.ne.s32.totalorder %s9722_s25, %s9718_s24  ;;  %p204_p4 = scmp.eq.s32.totalorder %s8018_s29, 1 }
   0xe   : > { %s9818_s10 = scalar_select %p185_p1, %s9726_s26, %s187_s8  }
   0xf   : > { %p9820_p5 = por %p198_p2, %p197_p0  ;;  %p9824_p6 = por %p204_p4, %p203_p3 }
  0x10   : > { %12833 = sst [smem:[#allocation16_spill]] %s9818_s10  ;;  %p8019_p7 = scmp.ge.s32.totalorder %s9730_s27, 1 }
  0x11   : > { %s12834_s11 = scalar_select %p9820_p5, 1, 0 }
  0x12   : > { %s12835_s12 = scalar_select %p9824_p6, 1, 0 }
  0x13   : > { %p211_p8 = scmp.lt.s32.totalorder %s9730_s27, 3  ;;  %p12640_p9 = scmp.eq.s32.totalorder %s9803_s28, 0 }
  0x14   : > { %s9732_s14 = smov [#allocation5]   ;;  %s9733_s16 = smov [#allocation8]  }
  0x15   : > { %p9831_p10 = pnand %p8019_p7, %p211_p8  ;;  %s237_s15 = sshll.u32 %s9732_s14, 4  ;;  %s238_s15 = int_to_ptr.vmem [resolvable:$true] %s237_s15 }
  0x16   : > { %s261_s17 = sshll.u32 %s9733_s16, 4  ;;  %s9734_s19 = smov [#allocation2]   ;;  %s9843_s17 = int_to_ptr.vmem [resolvable:$true] %s261_s17 }
  0x17   : > { %s12836_s13 = scalar_select %p9831_p10, 1, 0 }
  0x18   : > { %p9289_p11 = pneg %p9831_p10  ;;  %s223_s20 = sshll.u32 %s9734_s19, 4  ;;  %s9845_s20 = int_to_ptr.vmem [resolvable:$true] %s223_s20 }
  0x19   : > { %s12838_s3 = sld [smem:[#allocation95_spill]] }
  0x1a   : > { %p9839_p12 = pnand %p12640_p9, %p9289_p11 }
  0x1c   : > { %p9855_p0 = pneg %p9839_p12 }
  0x1f   : > { %s9516_s23 = scalar_lea.hbm %s12838_s3, 256 }
  0x20   : > { %p9517_p13 = scmp.ne.s32.totalorder %s12838_s3, %s9516_s23  ;;  %p9523_p3 = scmp.lt.u32.totalorder %s9516_s23, %s12838_s3 }
  0x22   : > { %p9519_p1 = pnand %p9855_p0, %p9517_p13 }
  0x24   : > { %p9520_p2 = pneg %p9519_p1 }
  0x26   : > { %p9525_p4 = pnand %p9523_p3, %p9520_p2 }
  0x28   : > { %9528 = shalt.err (!%p9525_p4)
}
  0x29   : > { %s9529_s19 = scalar_lea.vmem %s238_s15, 256  ;;  %p9537_p9 = scmp.lt.s32.totalorder %s238_s15, %s238_s15 }
  0x2a   : > { %p9530_p7 = scmp.ne.s32.totalorder %s238_s15, %s9529_s19  ;;  %p9538_p6 = scmp.lt.s32.totalorder %s9529_s19, %s9529_s19 }
  0x2c   : > { %p9532_p8 = pnand %p9530_p7, %p9855_p0  ;;  %p9539_p5 = por %p9538_p6, %p9537_p9 }
  0x2e   : > { %p9533_p11 = pneg %p9532_p8 }
  0x30   : > { %p9540_p10 = pnand %p9539_p5, %p9533_p11 }
  0x32   : > { %9543 = shalt.err (!%p9540_p10)
}
  0x33   : > { %9295 = dma.hbm_to_vmem [thread:$0]  (!%p9839_p12), %s12838_s3, 256, %s238_s15, [#allocation6]  }
  0x34   : > { %s12840_s5 = sld [smem:[#allocation96_spill]] }
  0x3a   : > { %s9544_s8 = scalar_lea.hbm %s12840_s5, 16 }
  0x3b   : > { %p9545_p13 = scmp.ne.s32.totalorder %s12840_s5, %s9544_s8  ;;  %p9551_p5 = scmp.lt.u32.totalorder %s9544_s8, %s12840_s5 }
  0x3d   : > { %p9547_p1 = pnand %p9545_p13, %p9855_p0 }
  0x3f   : > { %p9548_p6 = pneg %p9547_p1 }
  0x41   : > { %p9553_p9 = pnand %p9551_p5, %p9548_p6 }
  0x43   : > { %9556 = shalt.err (!%p9553_p9)
}
  0x44   : > { %s9557_s15 = scalar_lea.vmem %s9843_s17, 16  ;;  %s9564_s21 = scalar_lea.vmem %s9843_s17, 32 }
  0x45   : > { %p9558_p10 = scmp.ne.s32.totalorder %s9843_s17, %s9557_s15  ;;  %p9565_p4 = scmp.lt.s32.totalorder %s9843_s17, %s9843_s17 }
  0x46   : > { %p9566_p7 = scmp.lt.s32.totalorder %s9564_s21, %s9557_s15 }
  0x47   : > { %p9560_p2 = pnand %p9558_p10, %p9855_p0 }
  0x48   : > { %p9567_p8 = por %p9566_p7, %p9565_p4 }
  0x49   : > { %p9561_p3 = pneg %p9560_p2 }
  0x4b   : > { %p9568_p11 = pnand %p9567_p8, %p9561_p3 }
  0x4d   : > { %9571 = shalt.err (!%p9568_p11)
}
  0x4e   : > { %9301 = dma.hbm_to_vmem [thread:$0]  (!%p9839_p12), %s12840_s5, 16, %s9843_s17, [#allocation9]  }
  0x4f   : > { %s9572_s8 = scalar_lea.hbm %s12634_s2, 49152 }
  0x50   : > { %p9573_p13 = scmp.ne.s32.totalorder %s12634_s2, %s9572_s8  ;;  %p9579_p5 = scmp.lt.u32.totalorder %s9572_s8, %s12634_s2 }
  0x52   : > { %p9575_p1 = pnand %p9573_p13, %p9855_p0 }
  0x54   : > { %p9576_p6 = pneg %p9575_p1 }
  0x56   : > { %p9581_p9 = pnand %p9579_p5, %p9576_p6 }
  0x58   : > { %9584 = shalt.err (!%p9581_p9)
}
  0x59   : > { %s9585_s17 = scalar_lea.vmem %s9845_s20, 49152  ;;  %p9593_p4 = scmp.lt.s32.totalorder %s9845_s20, %s9845_s20 }
  0x5a   : > { %p9586_p10 = scmp.ne.s32.totalorder %s9845_s20, %s9585_s17  ;;  %p9594_p7 = scmp.lt.s32.totalorder %s9585_s17, %s9585_s17 }
  0x5c   : > { %p9588_p2 = pnand %p9586_p10, %p9855_p0  ;;  %p9595_p8 = por %p9594_p7, %p9593_p4 }
  0x5e   : > { %p9589_p3 = pneg %p9588_p2 }
  0x60   : > { %p9596_p11 = pnand %p9595_p8, %p9589_p3 }
  0x62   : > { %9599 = shalt.err (!%p9596_p11)
}
  0x63   : > { %s9735_s21 = smov 1024   ;;  %s9736_s10 = smov 64  }
  0x64   : > { %9292 = dma.hbm_to_vmem [thread:$0]  (!%p9839_p12), %s12634_s2, 49152, %s9845_s20, [#allocation3], %s9735_s21, %s9735_s21, %s9736_s10  }
  0x65   : > { %s9737_s29 = smov [#allocation7]   ;;  %s9600_s19 = scalar_lea.hbm %s12636_s4, 16384 }
  0x66   : > { %s247_s8 = sshll.u32 %s9737_s29, 4  ;;  %p9601_p13 = scmp.ne.s32.totalorder %s12636_s4, %s9600_s19  ;;  %s248_s8 = int_to_ptr.vmem [resolvable:$true] %s247_s8 }
  0x67   : > { %p9607_p5 = scmp.lt.u32.totalorder %s9600_s19, %s12636_s4 }
  0x68   : > { %p9603_p1 = pnand %p9601_p13, %p9855_p0 }
  0x6a   : > { %p9604_p6 = pneg %p9603_p1 }
  0x6c   : > { %p9609_p9 = pnand %p9607_p5, %p9604_p6 }
  0x6e   : > { %9612 = shalt.err (!%p9609_p9)
}
  0x6f   : > { %s9613_s20 = scalar_lea.vmem %s248_s8, 16384  ;;  %p9621_p4 = scmp.lt.s32.totalorder %s248_s8, %s248_s8 }
  0x70   : > { %p9614_p10 = scmp.ne.s32.totalorder %s248_s8, %s9613_s20  ;;  %p9622_p7 = scmp.lt.s32.totalorder %s9613_s20, %s9613_s20 }
  0x72   : > { %p9616_p2 = pnand %p9614_p10, %p9855_p0  ;;  %p9623_p8 = por %p9622_p7, %p9621_p4 }
  0x74   : > { %p9617_p3 = pneg %p9616_p2 }
  0x76   : > { %p9624_p11 = pnand %p9623_p8, %p9617_p3 }
  0x78   : > { %9627 = shalt.err (!%p9624_p11)
}
  0x79   : > { %s9738_s21 = smov 4   ;;  %s9739_s3 = smov [#allocation10]  }
  0x7a   : > { %9298 = dma.hbm_to_vmem [thread:$0]  (!%p9839_p12), %s12636_s4, 16384, %s248_s8, [#allocation6], %s9736_s10, %s9736_s10, %s9738_s21  }
  0x7b   : > { %s272_s5 = sshll.u32 %s9739_s3, 4  ;;  %s9628_s16 = scalar_lea.hbm %s12638_s6, 16  ;;  %s273_s5 = int_to_ptr.vmem [resolvable:$true] %s272_s5 }
  0x7c   : > { %p9629_p13 = scmp.ne.s32.totalorder %s12638_s6, %s9628_s16  ;;  %p9635_p5 = scmp.lt.u32.totalorder %s9628_s16, %s12638_s6 }
  0x7e   : > { %p9631_p1 = pnand %p9629_p13, %p9855_p0 }
  0x80   : > { %p9632_p6 = pneg %p9631_p1 }
  0x82   : > { %p9637_p9 = pnand %p9635_p5, %p9632_p6 }
  0x84   : > { %9640 = shalt.err (!%p9637_p9)
}
  0x85   : > { %s9641_s10 = scalar_lea.vmem %s273_s5, 16  ;;  %s9648_s8 = scalar_lea.vmem %s273_s5, 32 }
  0x86   : > { %p9642_p10 = scmp.ne.s32.totalorder %s273_s5, %s9641_s10  ;;  %p9649_p4 = scmp.lt.s32.totalorder %s273_s5, %s273_s5 }
  0x87   : > { %p9650_p7 = scmp.lt.s32.totalorder %s9648_s8, %s9641_s10 }
  0x88   : > { %p9644_p2 = pnand %p9642_p10, %p9855_p0 }
  0x89   : > { %p9651_p8 = por %p9650_p7, %p9649_p4 }
  0x8a   : > { %p9645_p3 = pneg %p9644_p2 }
  0x8c   : > { %p9652_p11 = pnand %p9651_p8, %p9645_p3 }
  0x8e   : > { %9655 = shalt.err (!%p9652_p11)
}
  0x8f   : > { %9304 = dma.hbm_to_vmem [thread:$0]  (!%p9839_p12), %s12638_s6, 16, %s273_s5, [#allocation9]  }
  0x90   : > { %p12841_p13 = scmp.ne.s32.totalorder %s12836_s13, 0 }
  0x92   : > { %302 = sbr.rel (%p12841_p13) target bundleno = 1265 (0x4f1), region = 48 }
  0x99   : > { %p12842_p1 = scmp.eq.s32.totalorder %s9803_s28, 0 }
  0x9b   : > { %9701 = dma.done.wait (%p12842_p1), [#allocation3], 49152   ;;  %p12843_p0 = pmov %p12842_p1 }
  0x9d   : > { %9703 = vsyncadd (%p12843_p0), [#allocation3], 4294918144  ;;  %p12844_p6 = pmov %p12843_p0 }
  0x9e   : > { %p12845_p5 = pmov %p12843_p0 }
  0x9f   : > { %9705 = dma.done.wait (%p12844_p6), [#allocation6], 16640  }
  0xa0   : > { %9707 = vsyncadd (%p12845_p5), [#allocation6], 4294950656  ;;  %p12846_p9 = pmov %p12843_p0 }
  0xa1   : > { %p12847_p12 = pmov %p12843_p0 }
  0xa2   : > { %9709 = dma.done.wait (%p12846_p9), [#allocation9], 32  }
  0xa3   : > { %9711 = vsyncadd (%p12847_p12), [#allocation9], 4294967264  ;;  %v12643_v0 = vmov 0   ;;  %v633_v1 = vld [vmem:[#allocation2] sm:$0xff]  ;;  %v634_v3 = vld [vmem:[#allocation2 + $0x8] sm:$0xff]  ;;  %s8033_s13 = sshll.u32 %s9803_s28, 3 }
  0xa4   : > { %9361 = vset.pattern.permute.xlu0 %v12643_v0  ;;  %v641_v2 = vld [vmem:[#allocation2 + $0x40] sm:$0xff]  ;;  %v642_v5 = vld [vmem:[#allocation2 + $0x48] sm:$0xff]  ;;  %p356_p10 = scmp.lt.s32.totalorder %s8033_s13, 15  ;;  %vm471_vm0 = vsmask.f32 7424  ;;  %vm600_vm1 = vcmask 1046528  }
  0xa5   : > { %v8061_v4 = vcombine.high %v633_v1, %v641_v2  ;;  %v8060_v6 = vcombine.low %v633_v1, %v641_v2  ;;  %v649_v7 = vld [vmem:[#allocation2 + $0x80] sm:$0xff]  ;;  %v8063_v9 = vcombine.high %v634_v3, %v642_v5  ;;  %v8062_v10 = vcombine.low %v634_v3, %v642_v5  ;;  %v650_v12 = vld [vmem:[#allocation2 + $0x88] sm:$0xff]  ;;  %p362_p2 = scmp.lt.s32.totalorder %s9803_s28, 1  ;;  %s352_s15 = sand.u32 1, %s9722_s25  }
  0xa6   : > { %v657_v8 = vld [vmem:[#allocation2 + $0xc0] sm:$0xff]  ;;  %v658_v13 = vld [vmem:[#allocation2 + $0xc8] sm:$0xff]  ;;  %s13166_s13 = smov (!%p356_p10, %s8033_s13), 15  ;;  %vm6635_vm2 = vcmask 1041409   ;;  %vm6637_vm3 = vcmask 1042434   ;;  %vm6639_vm4 = vcmask 1043459  }
  0xa7   : > { %v8077_v11 = vcombine.high %v649_v7, %v657_v8  ;;  %v665_v14 = vld [vmem:[#allocation2 + $0x100] sm:$0xff]  ;;  %3021 = vmatprep.subr.bf16.mxu0 %v8061_v4  ;;  %v8079_v15 = vcombine.high %v650_v12, %v658_v13  ;;  %v666_v17 = vld [vmem:[#allocation2 + $0x108] sm:$0xff]  ;;  %3247 = vmatprep.subr.bf16.mxu1 %v8063_v9  ;;  %v8076_v19 = vcombine.low %v649_v7, %v657_v8  ;;  %s9266_s18 = smul.u32 12, %s13166_s13  ;;  %vm6641_vm5 = vcmask 1044484   ;;  %s8032_s17 = sshll.u32 %s352_s15, 3 }
  0xa8   : > { %v673_v16 = vld [vmem:[#allocation2 + $0x140] sm:$0xff]  ;;  %v674_v18 = vld [vmem:[#allocation2 + $0x148] sm:$0xff]  ;;  %3022 = vmatpush1.bf16.msra.mxu0 %v8060_v6  ;;  %3248 = vmatpush1.bf16.msra.mxu1 %v8062_v10  ;;  %v8078_v20 = vcombine.low %v650_v12, %v658_v13  ;;  %vm6643_vm6 = vcmask 1045509   ;;  %vm6645_vm7 = vcmask 1046534   ;;  %vm6647_vm8 = vcmask 1047559   ;;  %s363_s5 = scalar_select %p362_p2, %s9803_s28, 1 }
  0xa9   : > { %3023 = vmatprep.subr.bf16.mxu0 %v8077_v11  ;;  %v8093_v21 = vcombine.high %v665_v14, %v673_v16  ;;  %3249 = vmatprep.subr.bf16.mxu1 %v8079_v15  ;;  %v8095_v22 = vcombine.high %v666_v17, %v674_v18  ;;  %v681_v23 = vld [vmem:[#allocation2 + $0x180] sm:$0xff]  ;;  %v682_v25 = vld [vmem:[#allocation2 + $0x188] sm:$0xff]  ;;  %v8092_v27 = vcombine.low %v665_v14, %v673_v16  ;;  %s9973_s3 = scalar_lea.vmem %s12632_s0, %s9266_s18  ;;  %s8575_s20 = sshll.u32 %s9803_s28, 7 }
  0xaa   : > { %v689_v24 = vld [vmem:[#allocation2 + $0x1c0] sm:$0xff]  ;;  %v690_v26 = vld [vmem:[#allocation2 + $0x1c8] sm:$0xff]  ;;  %v8094_v28 = vcombine.low %v666_v17, %v674_v18  ;;  %s8035_s29 = sshll.u32 %s363_s5, 3  ;;  %s354_s10 = scalar_lea.vmem [#allocation11], %s8032_s17 }
  0xab   : > { %v8109_v29 = vcombine.high %v681_v23, %v689_v24  ;;  %v8111_v30 = vcombine.high %v682_v25, %v690_v26  ;;  %v697_v31 = vld [vmem:[#allocation2 + $0x200] sm:$0xff]  ;;  %v698_v33 = vld [vmem:[#allocation2 + $0x208] sm:$0xff]  ;;  %v8108_v35 = vcombine.low %v681_v23, %v689_v24  ;;  %v8110_v36 = vcombine.low %v682_v25, %v690_v26  ;;  %s365_s19 = scalar_lea.vmem %s12633_s1, %s8035_s29  ;;  %s7897_s8 = sshll.u32 %s354_s10, 4  ;;  %s12592_s8 = int_to_ptr.vmem [resolvable:$true] %s7897_s8 }
  0xac   : > { %3024 = vmatpush1.bf16.msra.mxu0 %v8076_v19  ;;  %3250 = vmatpush1.bf16.msra.mxu1 %v8078_v20  ;;  %v705_v32 = vld [vmem:[#allocation2 + $0x240] sm:$0xff]  ;;  %v706_v34 = vld [vmem:[#allocation2 + $0x248] sm:$0xff]  ;;  %s12590_s13 = scalar_lea.hbm %s12639_s7, %s8575_s20  ;;  %s7884_s18 = scalar_lea.sflag [#allocation4], %s352_s15 }
  0xad   : > { %3025 = vmatprep.subr.bf16.mxu0 %v8093_v21  ;;  %3251 = vmatprep.subr.bf16.mxu1 %v8095_v22  ;;  %v8125_v37 = vcombine.high %v697_v31, %v705_v32  ;;  %v8127_v38 = vcombine.high %v698_v33, %v706_v34  ;;  %v713_v39 = vld [vmem:[#allocation2 + $0x280] sm:$0xff]  ;;  %v714_v41 = vld [vmem:[#allocation2 + $0x288] sm:$0xff]  ;;  %v8124_v43 = vcombine.low %v697_v31, %v705_v32  ;;  %v377_v32 = vld [vmem:[%s9973_s3 + $0x3c] sm:$0xf]  ;;  %s9656_s9 = scalar_lea.vmem %s12592_s8, 128  ;;  %p13158_p4 = scmp.ne.s32.totalorder %s12834_s11, 0 }
  0xae   : > { %v721_v40 = vld [vmem:[#allocation2 + $0x2c0] sm:$0xff]  ;;  %v722_v42 = vld [vmem:[#allocation2 + $0x2c8] sm:$0xff]  ;;  %v8126_v44 = vcombine.low %v698_v33, %v706_v34  ;;  %p9657_p3 = scmp.ne.s32.totalorder %s12592_s8, %s9656_s9  ;;  %s9741_s28 = smov [#allocation11]  }
  0xaf   : > { %v8141_v45 = vcombine.high %v713_v39, %v721_v40  ;;  %v8143_v46 = vcombine.high %v714_v41, %v722_v42  ;;  %v729_v47 = vld [vmem:[#allocation2 + $0x300] sm:$0xff]  ;;  %v730_v49 = vld [vmem:[#allocation2 + $0x308] sm:$0xff]  ;;  %v8140_v51 = vcombine.low %v713_v39, %v721_v40  ;;  %v8142_v52 = vcombine.low %v714_v41, %v722_v42  ;;  %s9660_s23 = sshll.u32 %s9741_s28, 4  ;;  %s9661_s23 = int_to_ptr.vmem [resolvable:$false] %s9660_s23 }
  0xb0   : > { %3026 = vmatpush1.bf16.msra.mxu0 %v8092_v27  ;;  %3252 = vmatpush1.bf16.msra.mxu1 %v8094_v28  ;;  %v737_v48 = vld [vmem:[#allocation2 + $0x340] sm:$0xff]  ;;  %v738_v50 = vld [vmem:[#allocation2 + $0x348] sm:$0xff]  ;;  %p9658_p7 = pnand %p9657_p3, %p13158_p4  ;;  %p9663_p11 = scmp.lt.s32.totalorder %s12592_s8, %s9661_s23 }
  0xb1   : > { %3027 = vmatprep.subr.bf16.mxu0 %v8109_v29  ;;  %3253 = vmatprep.subr.bf16.mxu1 %v8111_v30  ;;  %v8157_v53 = vcombine.high %v729_v47, %v737_v48  ;;  %v745_v54 = vld [vmem:[#allocation2 + $0x380] sm:$0xff]  ;;  %v8159_v57 = vcombine.high %v730_v49, %v738_v50  ;;  %v9983_v60 = vld [vmem:[%s9973_s3 + $0x8] ss:$0 sps:$4 sm:$0x11]   ;;  %v8156_v63 = vcombine.low %v729_v47, %v737_v48 }
  0xb2   : > { %v367_v55 = vld [vmem:[%s9973_s3] sm:$0xf]  ;;  %v9977_v56 = vld [vmem:[%s9973_s3 + $0x4] sm:$0xf]  ;;  %v746_v61 = vld [vmem:[#allocation2 + $0x388] sm:$0xff]  ;;  %v480_v3 = vshll.u32 %v9983_v60, 16  ;;  %v8158_v4 = vcombine.low %v730_v49, %v738_v50  ;;  %p9659_p8 = pneg %p9658_p7 }
  0xb3   : > { %v753_v58 = vld [vmem:[#allocation2 + $0x3c0] sm:$0xff]  ;;  %v9980_v59 = vcombine.low %v367_v55, %v9977_v56  ;;  %v754_v62 = vld [vmem:[#allocation2 + $0x3c8] sm:$0xff] }
  0xb4   : > { %3028 = vmatpush1.bf16.msra.mxu0 %v8108_v35  ;;  %3254 = vmatpush1.bf16.msra.mxu1 %v8110_v36  ;;  %v8173_v5 = vcombine.high %v745_v54, %v753_v58  ;;  %v8175_v6 = vcombine.high %v746_v61, %v754_v62  ;;  %v761_v7 = vld [vmem:[#allocation2 + $0x400] sm:$0xff]  ;;  %v482_v10 = vrot.slane %v480_v3, 1  ;;  %v762_v11 = vld [vmem:[#allocation2 + $0x408] sm:$0xff]  ;;  %v8172_v13 = vcombine.low %v745_v54, %v753_v58  ;;  %v10027_v3 = vld [vmem:[%s9973_s3 + $0x58] sm:$0xf] }
  0xb5   : > { %3029 = vmatprep.subr.bf16.mxu0 %v8125_v37  ;;  %3255 = vmatprep.subr.bf16.mxu1 %v8127_v38  ;;  %12848 = vst [vmem:[#allocation17_spill] sm:$0xff] %v9980_v59  ;;  %v473_v1 = vshrl.u32 %v9980_v59, 16  ;;  %v475_v2 = vshll.u32 %v9980_v59, 16  ;;  %v769_v8 = vld [vmem:[#allocation2 + $0x440] sm:$0xff]  ;;  %v770_v12 = vld [vmem:[#allocation2 + $0x448] sm:$0xff]  ;;  %v8174_v15 = vcombine.low %v746_v61, %v754_v62 }
  0xb6   : > { %v8189_v16 = vcombine.high %v761_v7, %v769_v8  ;;  %v8191_v17 = vcombine.high %v762_v11, %v770_v12  ;;  %v777_v18 = vld [vmem:[#allocation2 + $0x480] sm:$0xff]  ;;  %v778_v21 = vld [vmem:[#allocation2 + $0x488] sm:$0xff]  ;;  %v8188_v23 = vcombine.low %v761_v7, %v769_v8  ;;  %v8190_v24 = vcombine.low %v762_v11, %v770_v12  ;;  %v10032_v8 = vld [vmem:[%s9973_s3 + $0x5c] ss:$0 sps:$4 sm:$0x11]  }
  0xb7   : > { %v477_v9 = vrot.slane %v475_v2, 1  ;;  %v785_v19 = vld [vmem:[#allocation2 + $0x4c0] sm:$0xff]  ;;  %v786_v22 = vld [vmem:[#allocation2 + $0x4c8] sm:$0xff] }
  0xb8   : > { %3030 = vmatpush1.bf16.msra.mxu0 %v8124_v43  ;;  %3256 = vmatpush1.bf16.msra.mxu1 %v8126_v44  ;;  %v8205_v25 = vcombine.high %v777_v18, %v785_v19  ;;  %v8207_v26 = vcombine.high %v778_v21, %v786_v22  ;;  %v793_v27 = vld [vmem:[#allocation2 + $0x500] sm:$0xff]  ;;  %v794_v29 = vld [vmem:[#allocation2 + $0x508] sm:$0xff]  ;;  %v8204_v31 = vcombine.low %v777_v18, %v785_v19 }
  0xb9   : > { %3031 = vmatprep.subr.bf16.mxu0 %v8141_v45  ;;  %3257 = vmatprep.subr.bf16.mxu1 %v8143_v46  ;;  %v478_v14 = vor.u32 %v477_v9, %v473_v1  ;;  %v801_v28 = vld [vmem:[#allocation2 + $0x540] sm:$0xff]  ;;  %v802_v30 = vld [vmem:[#allocation2 + $0x548] sm:$0xff]  ;;  %v8206_v33 = vcombine.low %v778_v21, %v786_v22  ;;  %v564_v21 = vshll.u32 %v10032_v8, 16 }
  0xba   : > { %v8221_v34 = vcombine.high %v793_v27, %v801_v28  ;;  %v809_v35 = vld [vmem:[#allocation2 + $0x580] sm:$0xff]  ;;  %v8223_v37 = vcombine.high %v794_v29, %v802_v30  ;;  %v810_v41 = vld [vmem:[#allocation2 + $0x588] sm:$0xff]  ;;  %v8220_v44 = vcombine.low %v793_v27, %v801_v28  ;;  %v8222_v50 = vcombine.low %v794_v29, %v802_v30 }
  0xbb   : > { %v9989_v20 = vsel %vm471_vm0, %v478_v14, %v482_v10  ;;  %v9995_v36 = vld [vmem:[%s9973_s3 + $0x40] sm:$0xf]  ;;  %v10001_v40 = vld [vmem:[%s9973_s3 + $0x44] ss:$0 sps:$4 sm:$0x11]   ;;  %v818_v42 = vld [vmem:[#allocation2 + $0x5c8] sm:$0xff] }
  0xbc   : > { %3032 = vmatpush1.bf16.msra.mxu0 %v8140_v51  ;;  %3258 = vmatpush1.bf16.msra.mxu1 %v8142_v52  ;;  %12849 = vst [vmem:[#allocation18_spill] sm:$0xff] %v9989_v20  ;;  %v817_v38 = vld [vmem:[#allocation2 + $0x5c0] sm:$0xff]  ;;  %v9998_v39 = vcombine.low %v377_v32, %v9995_v36  ;;  %v379_v43 = vld [vmem:[%s9973_s3 + $0x48] sm:$0xf]  ;;  %v540_v48 = vshll.u32 %v10001_v40, 16  ;;  %v8239_v54 = vcombine.high %v810_v41, %v818_v42  ;;  %v602_v27 = vrot.slane %v9983_v60, 1 }
  0xbd   : > { %3033 = vmatprep.subr.bf16.mxu0 %v8157_v53  ;;  %3259 = vmatprep.subr.bf16.mxu1 %v8159_v57  ;;  %v10004_v45 = vld [vmem:[#allocation2 + $0x600] sm:$0xff]  ;;  %v10010_v49 = vld [vmem:[%s9973_s3 + $0x4c] sm:$0xf]  ;;  %v8237_v51 = vcombine.high %v809_v35, %v817_v38  ;;  %v10015_v53 = vld [vmem:[%s9973_s3 + $0x50] ss:$0 sps:$4 sm:$0x11]   ;;  %v8236_v1 = vcombine.low %v809_v35, %v817_v38 }
  0xbe   : > { %3053 = vmatprep.mubr.bf16.mxu0 %v9989_v20  ;;  %3279 = vmatprep.mubr.bf16.mxu1 %v9989_v20  ;;  %12850 = vst [vmem:[#allocation19_spill] sm:$0xff] %v9998_v39  ;;  %v533_v46 = vshrl.u32 %v9998_v39, 16  ;;  %v535_v47 = vshll.u32 %v9998_v39, 16  ;;  %v10012_v52 = vld [vmem:[#allocation2 + $0x640] sm:$0xff]  ;;  %v10017_v55 = vld [vmem:[#allocation2 + $0x608] sm:$0xff]  ;;  %v542_v61 = vrot.slane %v540_v48, 1  ;;  %v10022_v62 = vcombine.low %v379_v43, %v10010_v49 }
  0xbf   : > { %v10019_v57 = vld [vmem:[#allocation2 + $0x648] sm:$0xff]  ;;  %v552_v2 = vshll.u32 %v10015_v53, 16  ;;  %v8253_v9 = vcombine.high %v10004_v45, %v10012_v52  ;;  %v10038_v11 = vld [vmem:[#allocation2 + $0x680] sm:$0xff]  ;;  %v8252_v28 = vcombine.low %v10004_v45, %v10012_v52  ;;  %v566_v60 = vrot.slane %v564_v21, 1 }
  0xc0   : > { %3034 = vmatpush1.bf16.msra.mxu0 %v8156_v63  ;;  %3260 = vmatpush1.bf16.msra.mxu1 %v8158_v4  ;;  %v537_v58 = vrot.slane %v535_v47, 1  ;;  %12851 = vst [vmem:[#allocation20_spill] sm:$0xff] %v10022_v62  ;;  %v381_v63 = vld [vmem:[%s9973_s3 + $0x54] sm:$0xf]  ;;  %v8238_v4 = vcombine.low %v810_v41, %v818_v42  ;;  %v547_v7 = vshll.u32 %v10022_v62, 16  ;;  %v8255_v10 = vcombine.high %v10017_v55, %v10019_v57  ;;  %v10040_v12 = vld [vmem:[#allocation2 + $0x6c0] sm:$0xff] }
  0xc1   : > { %3035 = vmatprep.subr.bf16.mxu0 %v8173_v5  ;;  %3261 = vmatprep.subr.bf16.mxu1 %v8175_v6  ;;  %v545_v6 = vshrl.u32 %v10022_v62, 16  ;;  %v391_v14 = vld [vmem:[%s9973_s3] sm:$0xe]  ;;  %v554_v19 = vrot.slane %v552_v2, 1  ;;  %v10053_v22 = vld [vmem:[#allocation2 + $0x6c8] sm:$0xff]  ;;  %v8254_v29 = vcombine.low %v10017_v55, %v10019_v57  ;;  %v8269_v32 = vcombine.high %v10038_v11, %v10040_v12 }
  0xc2   : > { %v538_v5 = vor.u32 %v537_v58, %v533_v46  ;;  %v549_v18 = vrot.slane %v547_v7, 1  ;;  %v865_v38 = vld [vmem:[#allocation2 + $0x740] sm:$0xff]  ;;  %v858_v43 = vld [vmem:[#allocation2 + $0x708] sm:$0xff]  ;;  %v371_v7 = vld [vmem:[%s9973_s3 + $0x18] sm:$0xf] }
  0xc3   : > { %v10084_v52 = vld [vmem:[#allocation2 + $0x780] sm:$0xff] }
  0xc4   : > { %3036 = vmatpush1.bf16.msra.mxu0 %v8172_v13  ;;  %3262 = vmatpush1.bf16.msra.mxu1 %v8174_v15  ;;  %v10043_v13 = vcombine.low %v381_v63, %v10027_v3  ;;  %v10046_v15 = vld [vmem:[#allocation2 + $0x688] sm:$0xff]  ;;  %v550_v30 = vor.u32 %v549_v18, %v545_v6  ;;  %v10089_v55 = vld [vmem:[%s9973_s3 + $0x20] ss:$0 sps:$4 sm:$0x11]  }
  0xc5   : > { %3037 = vmatprep.subr.bf16.mxu0 %v8189_v16  ;;  %3263 = vmatprep.subr.bf16.mxu1 %v8191_v17  ;;  %v369_v16 = vld [vmem:[%s9973_s3 + $0xc] sm:$0xf]  ;;  %v10050_v17 = vsel %vm471_vm0, %v538_v5, %v542_v61  ;;  %v8271_v35 = vcombine.high %v10046_v15, %v10053_v22  ;;  %v8270_v57 = vcombine.low %v10046_v15, %v10053_v22  ;;  %v10115_v21 = vld [vmem:[#allocation2 + $0x840] sm:$0xff]  ;;  %v374_v22 = vld [vmem:[%s9973_s3 + $0x28] sm:$0xf] }
  0xc6   : > { %12852 = vst [vmem:[#allocation21_spill] sm:$0xff] %v10043_v13  ;;  %12853 = vst [vmem:[#allocation22_spill] sm:$0xff] %v10050_v17  ;;  %v10075_v42 = vsel %vm471_vm0, %v550_v30, %v554_v19  ;;  %v10093_v61 = vld [vmem:[#allocation2 + $0x788] sm:$0xff]  ;;  %v10113_v19 = vld [vmem:[#allocation2 + $0x800] sm:$0xff] }
  0xc7   : > { %12855 = vst [vmem:[#allocation24_spill] sm:$0xff] %v10075_v42  ;;  %v10095_v63 = vld [vmem:[#allocation2 + $0x7c8] sm:$0xff]  ;;  %v395_v30 = vld [vmem:[%s9973_s3 + $0x30] sm:$0xe] }
  0xc8   : > { %3038 = vmatpush1.bf16.msra.mxu0 %v8188_v23  ;;  %3264 = vmatpush1.bf16.msra.mxu1 %v8190_v24  ;;  %v370_v23 = vld [vmem:[%s9973_s3 + $0x10] sm:$0xf]  ;;  %v557_v24 = vshrl.u32 %v10043_v13, 16 }
  0xc9   : > { %3039 = vmatprep.subr.bf16.mxu0 %v8205_v25  ;;  %3265 = vmatprep.subr.bf16.mxu1 %v8207_v26  ;;  %v559_v25 = vshll.u32 %v10043_v13, 16  ;;  %v8052_v26 = vcombine.low %v391_v14, %v9977_v56  ;;  %v10072_v41 = vcombine.low %v369_v16, %v370_v23 }
  0xcb   : > { %v561_v56 = vrot.slane %v559_v25, 1  ;;  %12854 = vst [vmem:[#allocation23_spill] sm:$0xff] %v10072_v41  ;;  %v487_v6 = vshll.u32 %v10072_v41, 16  ;;  %v10120_v25 = vld [vmem:[#allocation2 + $0x808] sm:$0xff] }
  0xcc   : > { %3040 = vmatpush1.bf16.msra.mxu0 %v8204_v31  ;;  %3266 = vmatpush1.bf16.msra.mxu1 %v8206_v33  ;;  %v392_v31 = vld [vmem:[%s9973_s3 + $0xc] sm:$0xe]  ;;  %v10068_v33 = vld [vmem:[%s9973_s3 + $0x14] ss:$0 sps:$4 sm:$0x11]  }
  0xcd   : > { %3041 = vmatprep.subr.bf16.mxu0 %v8221_v34  ;;  %3267 = vmatprep.subr.bf16.mxu1 %v8223_v37  ;;  %v601_v34 = vrot.slane %v8052_v26, 1  ;;  %v857_v37 = vld [vmem:[#allocation2 + $0x700] sm:$0xff]  ;;  %v562_v45 = vor.u32 %v561_v56, %v557_v24  ;;  %v8053_v47 = vcombine.low %v392_v31, %v370_v23  ;;  %v605_v48 = vrot.slane %v10068_v33, 1  ;;  %v10122_v26 = vld [vmem:[#allocation2 + $0x848] sm:$0xff] }
  0xce   : > { %v8285_v58 = vcombine.high %v857_v37, %v865_v38  ;;  %v8284_v15 = vcombine.low %v857_v37, %v865_v38  ;;  %v8303_v24 = vcombine.high %v10093_v61, %v10095_v63  ;;  %v485_v31 = vshrl.u32 %v10072_v41, 16  ;;  %v376_v37 = vld [vmem:[%s9973_s3 + $0x34] sm:$0xf] }
  0xcf   : > { %v10078_v46 = vsel %vm600_vm1, %v601_v34, %v602_v27  ;;  %v10099_v2 = vsel %vm471_vm0, %v562_v45, %v566_v60  ;;  %v492_v56 = vshll.u32 %v10068_v33, 16  ;;  %v10131_v60 = vld [vmem:[%s9973_s3 + $0x38] ss:$0 sps:$4 sm:$0x11]   ;;  %v8056_v45 = vcombine.low %v395_v30, %v376_v37 }
  0xd0   : > { %3042 = vmatpush1.bf16.msra.mxu0 %v8220_v44  ;;  %3268 = vmatpush1.bf16.msra.mxu1 %v8222_v50  ;;  %v866_v44 = vld [vmem:[#allocation2 + $0x748] sm:$0xff]  ;;  %12856 = vst [vmem:[#allocation25_spill] sm:$0xff] %v10078_v46  ;;  %v393_v50 = vld [vmem:[%s9973_s3 + $0x18] sm:$0xe]  ;;  %12857 = vst [vmem:[#allocation26_spill] sm:$0xff] %v10099_v2  ;;  %v8317_v33 = vcombine.high %v10113_v19, %v10115_v21  ;;  %v620_v30 = vrot.slane %v10015_v53, 1 }
  0xd1   : > { %3043 = vmatprep.subr.bf16.mxu0 %v8237_v51  ;;  %3269 = vmatprep.subr.bf16.mxu1 %v8239_v54  ;;  %v8268_v51 = vcombine.low %v10038_v11, %v10040_v12  ;;  %v10086_v54 = vld [vmem:[#allocation2 + $0x7c0] sm:$0xff]  ;;  %v8287_v5 = vcombine.high %v858_v43, %v866_v44  ;;  %v10106_v12 = vld [vmem:[%s9973_s3 + $0x2c] ss:$0 sps:$4 sm:$0x11]   ;;  %v8286_v16 = vcombine.low %v858_v43, %v866_v44 }
  0xd2   : > { %v394_v11 = vld [vmem:[%s9973_s3 + $0x24] sm:$0xe]  ;;  %v8301_v18 = vcombine.high %v10084_v52, %v10086_v54  ;;  %v8300_v43 = vcombine.low %v10084_v52, %v10086_v54  ;;  %v8302_v44 = vcombine.low %v10093_v61, %v10095_v63  ;;  %v494_v61 = vrot.slane %v492_v56, 1 }
  0xd4   : > { %3044 = vmatpush1.bf16.msra.mxu0 %v8236_v1  ;;  %3270 = vmatpush1.bf16.msra.mxu1 %v8238_v4  ;;  %v372_v1 = vld [vmem:[%s9973_s3 + $0x1c] sm:$0xf]  ;;  %v604_v4 = vrot.slane %v8053_v47, 1  ;;  %v614_v47 = vrot.slane %v10131_v60, 1 }
  0xd5   : > { %3045 = vmatprep.subr.bf16.mxu0 %v8253_v9  ;;  %3271 = vmatprep.subr.bf16.mxu1 %v8255_v10  ;;  %v8054_v9 = vcombine.low %v393_v50, %v372_v1  ;;  %v608_v10 = vrot.slane %v10089_v55, 1  ;;  %v10124_v27 = vcombine.low %v371_v7, %v372_v1  ;;  %v8319_v50 = vcombine.high %v10120_v25, %v10122_v26 }
  0xd6   : > { %v10109_v14 = vsel %vm600_vm1, %v604_v4, %v605_v48  ;;  %v396_v48 = vld [vmem:[%s9973_s3 + $0x3c] sm:$0xe]  ;;  %v613_v1 = vrot.slane %v8056_v45, 1  ;;  %v906_v4 = vld [vmem:[#allocation2 + $0x888] sm:$0xff]  ;;  %v617_v7 = vrot.slane %v10001_v40, 1  ;;  %v937_v45 = vld [vmem:[#allocation2 + $0x980] sm:$0xff] }
  0xd7   : > { %12858 = vst [vmem:[#allocation27_spill] sm:$0xff] %v10109_v14  ;;  %v607_v23 = vrot.slane %v8054_v9, 1  ;;  %12859 = vst [vmem:[#allocation28_spill] sm:$0xff] %v10124_v27  ;;  %v499_v52 = vshll.u32 %v10124_v27, 16  ;;  %v397_v9 = vld [vmem:[%s9973_s3 + $0x48] sm:$0xe] }
  0xd8   : > { %3046 = vmatpush1.bf16.msra.mxu0 %v8252_v28  ;;  %3272 = vmatpush1.bf16.msra.mxu1 %v8254_v29  ;;  %v8055_v28 = vcombine.low %v394_v11, %v374_v22  ;;  %v611_v29 = vrot.slane %v10106_v12, 1  ;;  %v8318_v11 = vcombine.low %v10120_v25, %v10122_v26  ;;  %v497_v40 = vshrl.u32 %v10124_v27, 16 }
  0xd9   : > { %3047 = vmatprep.subr.bf16.mxu0 %v8269_v32  ;;  %3273 = vmatprep.subr.bf16.mxu1 %v8271_v35  ;;  %v489_v32 = vrot.slane %v487_v6, 1  ;;  %v10134_v34 = vsel %vm600_vm1, %v607_v23, %v608_v10  ;;  %v373_v35 = vld [vmem:[%s9973_s3 + $0x24] sm:$0xf]  ;;  %v8057_v6 = vcombine.low %v396_v48, %v9995_v36  ;;  %v8316_v10 = vcombine.low %v10113_v19, %v10115_v21  ;;  %v10177_v23 = vld [vmem:[#allocation2 + $0x908] sm:$0xff] }
  0xda   : > { %12860 = vst [vmem:[#allocation29_spill] sm:$0xff] %v10134_v34  ;;  %v610_v38 = vrot.slane %v8055_v28, 1  ;;  %v10156_v63 = vcombine.low %v373_v35, %v374_v22  ;;  %v375_v22 = vld [vmem:[%s9973_s3 + $0x30] sm:$0xf]  ;;  %v10173_v36 = vsel %vm600_vm1, %v613_v1, %v614_v47  ;;  %v501_v19 = vrot.slane %v499_v52, 1  ;;  %v945_v47 = vld [vmem:[#allocation2 + $0x9c0] sm:$0xff] }
  0xdb   : > { %12863 = vst [vmem:[#allocation32_spill] sm:$0xff] %v10173_v36  ;;  %v504_v21 = vshll.u32 %v10089_v55, 16  ;;  %v616_v25 = vrot.slane %v8057_v6, 1  ;;  %v10191_v56 = vcombine.low %v375_v22, %v376_v37  ;;  %v938_v52 = vld [vmem:[#allocation2 + $0x988] sm:$0xff]  ;;  %v528_v22 = vshll.u32 %v10131_v60, 16 }
  0xdc   : > { %3048 = vmatpush1.bf16.msra.mxu0 %v8268_v51  ;;  %3274 = vmatpush1.bf16.msra.mxu1 %v8270_v57  ;;  %v10148_v51 = vld [vmem:[#allocation2 + $0x880] sm:$0xff]  ;;  %v10154_v54 = vsel %vm600_vm1, %v610_v38, %v611_v29  ;;  %12862 = vst [vmem:[#allocation31_spill] sm:$0xff] %v10156_v63  ;;  %v511_v28 = vshll.u32 %v10156_v63, 16  ;;  %v8058_v29 = vcombine.low %v397_v9, %v10010_v49 }
  0xdd   : > { %3049 = vmatprep.subr.bf16.mxu0 %v8285_v58  ;;  %3275 = vmatprep.subr.bf16.mxu1 %v8287_v5  ;;  %v10150_v57 = vld [vmem:[#allocation2 + $0x8c0] sm:$0xff]  ;;  %12861 = vst [vmem:[#allocation30_spill] sm:$0xff] %v10154_v54  ;;  %v490_v58 = vor.u32 %v489_v32, %v485_v31  ;;  %v914_v5 = vld [vmem:[#allocation2 + $0x8c8] sm:$0xff]  ;;  %v398_v31 = vld [vmem:[%s9973_s3 + $0x54] sm:$0xe]  ;;  %v10194_v35 = vsel %vm600_vm1, %v616_v25, %v617_v7  ;;  %v506_v37 = vrot.slane %v504_v21, 1 }
  0xde   : > { %v8332_v55 = vcombine.low %v10148_v51, %v10150_v57  ;;  %v8335_v32 = vcombine.high %v906_v4, %v914_v5  ;;  %12865 = vst [vmem:[#allocation34_spill] sm:$0xff] %v10191_v56  ;;  %12866 = vst [vmem:[#allocation35_spill] sm:$0xff] %v10194_v35  ;;  %v8334_v38 = vcombine.low %v906_v4, %v914_v5  ;;  %v523_v1 = vshll.u32 %v10191_v56, 16  ;;  %v953_v5 = vld [vmem:[#allocation2 + $0xa00] sm:$0xff]  ;;  %s9662_s3 = scalar_lea.vmem %s9661_s23, 256 }
  0xdf   : > { %v10182_v26 = vsel %vm471_vm0, %v490_v58, %v494_v61  ;;  %v8059_v48 = vcombine.low %v398_v31, %v10027_v3  ;;  %v946_v58 = vld [vmem:[#allocation2 + $0x9c8] sm:$0xff]  ;;  %v8365_v7 = vcombine.high %v937_v45, %v945_v47  ;;  %v8364_v21 = vcombine.low %v937_v45, %v945_v47  ;;  %p9664_p13 = scmp.lt.s32.totalorder %s9662_s3, %s9656_s9 }
  0xe0   : > { %3050 = vmatpush1.bf16.msra.mxu0 %v8284_v15  ;;  %3276 = vmatpush1.bf16.msra.mxu1 %v8286_v16  ;;  %v8333_v15 = vcombine.high %v10148_v51, %v10150_v57  ;;  %v10167_v16 = vld [vmem:[#allocation2 + $0x900] sm:$0xff]  ;;  %12864 = vst [vmem:[#allocation33_spill] sm:$0xff] %v10182_v26  ;;  %v513_v51 = vrot.slane %v511_v28, 1  ;;  %v516_v57 = vshll.u32 %v10106_v12, 16  ;;  %v8366_v25 = vcombine.low %v938_v52, %v946_v58  ;;  %v994_v45 = vld [vmem:[#allocation2 + $0xb48] sm:$0xff] }
  0xe1   : > { %3051 = vmatprep.subr.bf16.mxu0 %v8301_v18  ;;  %3277 = vmatprep.subr.bf16.mxu1 %v8303_v24  ;;  %v10169_v18 = vld [vmem:[#allocation2 + $0x940] sm:$0xff]  ;;  %v10179_v24 = vld [vmem:[#allocation2 + $0x948] sm:$0xff]  ;;  %v622_v4 = vrot.slane %v8059_v48, 1  ;;  %p9665_p1 = por %p9664_p13, %p9663_p11 }
  0xe2   : > { %v8349_v49 = vcombine.high %v10167_v16, %v10169_v18  ;;  %v8351_v53 = vcombine.high %v10177_v23, %v10179_v24  ;;  %v8350_v6 = vcombine.low %v10177_v23, %v10179_v24  ;;  %v518_v9 = vrot.slane %v516_v57, 1  ;;  %v969_v23 = vld [vmem:[#allocation2 + $0xa80] sm:$0xff] }
  0xe3   : > { %v977_v24 = vld [vmem:[#allocation2 + $0xac0] sm:$0xff]  ;;  %p9666_p0 = pnand %p9665_p1, %p9659_p8 }
  0xe4   : > { %3052 = vmatpush1.bf16.msra.mxu0 %v8300_v43  ;;  %3278 = vmatpush1.bf16.msra.mxu1 %v8302_v44  ;;  %v619_v43 = vrot.slane %v8058_v29, 1  ;;  %v502_v44 = vor.u32 %v501_v19, %v497_v40  ;;  %v962_v40 = vld [vmem:[#allocation2 + $0xa48] sm:$0xff]  ;;  %v8396_v48 = vcombine.low %v969_v23, %v977_v24 }
  0xe5   : > { %3134 = vmatprep.subr.bf16.mxu0 %v8317_v33  ;;  %3360 = vmatprep.subr.bf16.mxu1 %v8319_v50  ;;  %v623_v33 = vrot.slane %v10032_v8, 1  ;;  %v509_v50 = vshrl.u32 %v10156_v63, 16  ;;  %v8348_v8 = vcombine.low %v10167_v16, %v10169_v18  ;;  %v521_v16 = vshrl.u32 %v10191_v56, 16  ;;  %v970_v29 = vld [vmem:[#allocation2 + $0xa88] sm:$0xff] }
  0xe6   : > { %v10208_v61 = vsel %vm600_vm1, %v619_v43, %v620_v30  ;;  %v10212_v3 = vsel %vm471_vm0, %v502_v44, %v506_v37  ;;  %v525_v18 = vrot.slane %v523_v1, 1  ;;  %v978_v30 = vld [vmem:[#allocation2 + $0xac8] sm:$0xff]  ;;  %v993_v43 = vld [vmem:[#allocation2 + $0xb40] sm:$0xff]  ;;  %v530_v44 = vrot.slane %v528_v22, 1 }
  0xe7   : > { %3054 = vmatmul.mubr.bf16.vlgmr.msra.gmra.mrb[0].mxu0 %v9980_v59  ;;  %3280 = vmatmul.mubr.bf16.vlgmr.msra.gmra.mrb[0].mxu1 %v9980_v59  ;;  %12867 = vst [vmem:[#allocation36_spill] sm:$0xff] %v10208_v61  ;;  %12868 = vst [vmem:[#allocation37_spill] sm:$0xff] %v10212_v3  ;;  %v10217_v12 = vsel %vm600_vm1, %v622_v4, %v623_v33  ;;  %v514_v19 = vor.u32 %v513_v51, %v509_v50  ;;  %v986_v37 = vld [vmem:[#allocation2 + $0xb08] sm:$0xff]  ;;  %v1001_v33 = vld [vmem:[#allocation2 + $0xb80] sm:$0xff] }
  0xe8   : > { %3135 = vmatpush1.bf16.msra.mxu0 %v8316_v10  ;;  %3361 = vmatpush1.bf16.msra.mxu1 %v8318_v11  ;;  %12869 = vst [vmem:[#allocation38_spill] sm:$0xff] %v10217_v12  ;;  %v8367_v10 = vcombine.high %v938_v52, %v946_v58  ;;  %v961_v11 = vld [vmem:[#allocation2 + $0xa40] sm:$0xff]  ;;  %v526_v47 = vor.u32 %v525_v18, %v521_v16  ;;  %v1002_v52 = vld [vmem:[#allocation2 + $0xb88] sm:$0xff] }
  0xe9   : > { %3063 = vmatprep.mubr.bf16.mxu0 %v10182_v26  ;;  %3289 = vmatprep.mubr.bf16.mxu1 %v10182_v26  ;;  %v8381_v28 = vcombine.high %v953_v5, %v961_v11  ;;  %v8380_v60 = vcombine.low %v953_v5, %v961_v11  ;;  %v1009_v50 = vld [vmem:[#allocation2 + $0xbc0] sm:$0xff]  ;;  %v8398_v51 = vcombine.low %v970_v29, %v978_v30  ;;  %v1010_v58 = vld [vmem:[#allocation2 + $0xbc8] sm:$0xff]  ;;  %v636_v11 = vld [vmem:[#allocation2 + $0x18] sm:$0xff] }
  0xea   : > { %3136 = vmatprep.subr.bf16.mxu0 %v8333_v15  ;;  %3362 = vmatprep.subr.bf16.mxu1 %v8335_v32  ;;  %v954_v15 = vld [vmem:[#allocation2 + $0xa08] sm:$0xff]  ;;  %v8415_v1 = vcombine.high %v986_v37, %v994_v45  ;;  %v10235_v4 = vsel %vm471_vm0, %v526_v47, %v530_v44  ;;  %v8414_v5 = vcombine.low %v986_v37, %v994_v45  ;;  %v683_v44 = vld [vmem:[#allocation2 + $0x190] sm:$0xff]  ;;  %v684_v45 = vld [vmem:[#allocation2 + $0x198] sm:$0xff] }
  0xeb   : > { %v8383_v31 = vcombine.high %v954_v15, %v962_v40  ;;  %v8382_v32 = vcombine.low %v954_v15, %v962_v40  ;;  %12871 = vst [vmem:[#allocation40_spill] sm:$0xff] %v10235_v4  ;;  %v644_v15 = vld [vmem:[#allocation2 + $0x58] sm:$0xff]  ;;  %v8428_v16 = vcombine.low %v1001_v33, %v1009_v50  ;;  %v8430_v18 = vcombine.low %v1002_v52, %v1010_v58  ;;  %v691_v37 = vld [vmem:[#allocation2 + $0x1d0] sm:$0xff] }
  0xec   : > { %3137 = vmatpush1.bf16.msra.mxu0 %v8332_v55  ;;  %3363 = vmatpush1.bf16.msra.mxu1 %v8334_v38  ;;  %v10228_v55 = vsel %vm471_vm0, %v514_v19, %v518_v9  ;;  %v8397_v38 = vcombine.high %v969_v23, %v977_v24  ;;  %v635_v9 = vld [vmem:[#allocation2 + $0x10] sm:$0xff]  ;;  %v8067_v40 = vcombine.high %v636_v11, %v644_v15  ;;  %v652_v23 = vld [vmem:[#allocation2 + $0x98] sm:$0xff] }
  0xed   : > { %3138 = vmatprep.subr.bf16.mxu0 %v8349_v49  ;;  %3364 = vmatprep.subr.bf16.mxu1 %v8351_v53  ;;  %12870 = vst [vmem:[#allocation39_spill] sm:$0xff] %v10228_v55  ;;  %v8399_v49 = vcombine.high %v970_v29, %v978_v30  ;;  %v985_v53 = vld [vmem:[#allocation2 + $0xb00] sm:$0xff]  ;;  %v651_v19 = vld [vmem:[#allocation2 + $0x90] sm:$0xff]  ;;  %v660_v24 = vld [vmem:[#allocation2 + $0xd8] sm:$0xff] }
  0xee   : > { %v8413_v57 = vcombine.high %v985_v53, %v993_v43  ;;  %v667_v30 = vld [vmem:[#allocation2 + $0x110] sm:$0xff] }
  0xef   : > { %3064 = vmatmul.mubr.bf16.gmra.mrb[4].mxu0 %v10072_v41  ;;  %3290 = vmatmul.mubr.bf16.gmra.mrb[4].mxu1 %v10072_v41 }
  0xf0   : > { %3073 = vmatprep.mubr.bf16.mxu0 %v10212_v3  ;;  %3299 = vmatprep.mubr.bf16.mxu1 %v10212_v3 }
  0xf1   : > { %3139 = vmatpush1.bf16.msra.mxu0 %v8348_v8  ;;  %3365 = vmatpush1.bf16.msra.mxu1 %v8350_v6  ;;  %v8412_v8 = vcombine.low %v985_v53, %v993_v43  ;;  %v8429_v6 = vcombine.high %v1001_v33, %v1009_v50  ;;  %v8082_v53 = vcombine.low %v652_v23, %v660_v24 }
  0xf2   : > { %3140 = vmatprep.subr.bf16.mxu0 %v8365_v7  ;;  %3366 = vmatprep.subr.bf16.mxu1 %v8367_v10  ;;  %v8431_v7 = vcombine.high %v1002_v52, %v1010_v58  ;;  %v643_v10 = vld [vmem:[#allocation2 + $0x50] sm:$0xff]  ;;  %v700_v58 = vld [vmem:[#allocation2 + $0x218] sm:$0xff] }
  0xf3   : > { %v8065_v22 = vcombine.high %v635_v9, %v643_v10  ;;  %v707_v52 = vld [vmem:[#allocation2 + $0x250] sm:$0xff] }
  0xf5   : > { %3141 = vmatpush1.bf16.msra.mxu0 %v8364_v21  ;;  %3367 = vmatpush1.bf16.msra.mxu1 %v8366_v25  ;;  %v659_v21 = vld [vmem:[#allocation2 + $0xd0] sm:$0xff]  ;;  %v8064_v25 = vcombine.low %v635_v9, %v643_v10 }
  0xf6   : > { %3142 = vmatprep.subr.bf16.mxu0 %v8381_v28  ;;  %3368 = vmatprep.subr.bf16.mxu1 %v8383_v31  ;;  %v8066_v28 = vcombine.low %v636_v11, %v644_v15  ;;  %v8081_v29 = vcombine.high %v651_v19, %v659_v21  ;;  %v675_v31 = vld [vmem:[#allocation2 + $0x150] sm:$0xff]  ;;  %v716_v11 = vld [vmem:[#allocation2 + $0x298] sm:$0xff] }
  0xf7   : > { %3074 = vmatmul.mubr.bf16.gmra.mrb[8].mxu0 %v10124_v27  ;;  %3300 = vmatmul.mubr.bf16.gmra.mrb[8].mxu1 %v10124_v27  ;;  %v8097_v43 = vcombine.high %v667_v30, %v675_v31  ;;  %v8096_v33 = vcombine.low %v667_v30, %v675_v31  ;;  %v715_v9 = vld [vmem:[#allocation2 + $0x290] sm:$0xff] }
  0xf8   : > { %3083 = vmatprep.mubr.bf16.mxu0 %v10228_v55  ;;  %3309 = vmatprep.mubr.bf16.mxu1 %v10228_v55  ;;  %v723_v10 = vld [vmem:[#allocation2 + $0x2d0] sm:$0xff] }
  0xf9   : > { %3143 = vmatpush1.bf16.msra.mxu0 %v8380_v60  ;;  %3369 = vmatpush1.bf16.msra.mxu1 %v8382_v32  ;;  %v668_v60 = vld [vmem:[#allocation2 + $0x118] sm:$0xff]  ;;  %v8083_v32 = vcombine.high %v652_v23, %v660_v24  ;;  %v747_v31 = vld [vmem:[#allocation2 + $0x390] sm:$0xff] }
  0xfa   : > { %3144 = vmatprep.subr.bf16.mxu0 %v8397_v38  ;;  %3370 = vmatprep.subr.bf16.mxu1 %v8399_v49  ;;  %v676_v38 = vld [vmem:[#allocation2 + $0x158] sm:$0xff]  ;;  %v8080_v49 = vcombine.low %v651_v19, %v659_v21  ;;  %v731_v19 = vld [vmem:[#allocation2 + $0x310] sm:$0xff] }
  0xfb   : > { %v8099_v47 = vcombine.high %v668_v60, %v676_v38  ;;  %v8098_v50 = vcombine.low %v668_v60, %v676_v38  ;;  %v739_v21 = vld [vmem:[#allocation2 + $0x350] sm:$0xff]  ;;  %v732_v23 = vld [vmem:[#allocation2 + $0x318] sm:$0xff] }
  0xfc   : > { %v8161_v30 = vcombine.high %v731_v19, %v739_v21  ;;  %v755_v60 = vld [vmem:[#allocation2 + $0x3d0] sm:$0xff] }
  0xfd   : > { %3145 = vmatpush1.bf16.msra.mxu0 %v8396_v48  ;;  %3371 = vmatpush1.bf16.msra.mxu1 %v8398_v51  ;;  %v692_v48 = vld [vmem:[#allocation2 + $0x1d8] sm:$0xff]  ;;  %v8113_v51 = vcombine.high %v683_v44, %v691_v37 }
  0xfe   : > { %3146 = vmatprep.subr.bf16.mxu0 %v8413_v57  ;;  %3372 = vmatprep.subr.bf16.mxu1 %v8415_v1  ;;  %v699_v57 = vld [vmem:[#allocation2 + $0x210] sm:$0xff]  ;;  %v8115_v1 = vcombine.high %v684_v45, %v692_v48 }
  0xff   : > { %3084 = vmatmul.mubr.bf16.gmra.mrb[12].mxu0 %v10156_v63  ;;  %3310 = vmatmul.mubr.bf16.gmra.mrb[12].mxu1 %v10156_v63 }
 0x100   : > { %3093 = vmatprep.mubr.bf16.mxu0 %v10235_v4  ;;  %3319 = vmatprep.mubr.bf16.mxu1 %v10235_v4 }
 0x101   : > { %3147 = vmatpush1.bf16.msra.mxu0 %v8412_v8  ;;  %3373 = vmatpush1.bf16.msra.mxu1 %v8414_v5  ;;  %v708_v8 = vld [vmem:[#allocation2 + $0x258] sm:$0xff]  ;;  %v8112_v5 = vcombine.low %v683_v44, %v691_v37  ;;  %v8177_v44 = vcombine.high %v747_v31, %v755_v60  ;;  %v763_v37 = vld [vmem:[#allocation2 + $0x410] sm:$0xff] }
 0x102   : > { %3148 = vmatprep.subr.bf16.mxu0 %v8429_v6  ;;  %3374 = vmatprep.subr.bf16.mxu1 %v8431_v7  ;;  %v8114_v6 = vcombine.low %v684_v45, %v692_v48  ;;  %v8129_v7 = vcombine.high %v699_v57, %v707_v52  ;;  %v8131_v15 = vcombine.high %v700_v58, %v708_v8  ;;  %v771_v45 = vld [vmem:[#allocation2 + $0x450] sm:$0xff] }
 0x105   : > { %3149 = vmatpush1.bf16.msra.mxu0 %v8428_v16  ;;  %3375 = vmatpush1.bf16.msra.mxu1 %v8430_v18  ;;  %v724_v16 = vld [vmem:[#allocation2 + $0x2d8] sm:$0xff]  ;;  %v8128_v18 = vcombine.low %v699_v57, %v707_v52  ;;  %v8193_v57 = vcombine.high %v763_v37, %v771_v45  ;;  %v779_v52 = vld [vmem:[#allocation2 + $0x490] sm:$0xff] }
 0x106   : > { %3473 = vmatprep.subr.bf16.mxu0 %v8065_v22  ;;  %3699 = vmatprep.subr.bf16.mxu1 %v8067_v40  ;;  %v8130_v22 = vcombine.low %v700_v58, %v708_v8  ;;  %v8145_v40 = vcombine.high %v715_v9, %v723_v10  ;;  %v8147_v24 = vcombine.high %v716_v11, %v724_v16  ;;  %v787_v58 = vld [vmem:[#allocation2 + $0x4d0] sm:$0xff] }
 0x107   : > { %3094 = vmatmul.mubr.bf16.gmra.mrb[16].mxu0 %v10191_v56  ;;  %3320 = vmatmul.mubr.bf16.gmra.mrb[16].mxu1 %v10191_v56 }
 0x108   : > { %3103 = vmatprep.mubr.bf16.mxu0 %v10050_v17  ;;  %3329 = vmatprep.mubr.bf16.mxu1 %v10050_v17 }
 0x10f   : > { %3104 = vmatmul.mubr.bf16.gmra.mrb[20].mxu0 %v9998_v39  ;;  %3330 = vmatmul.mubr.bf16.gmra.mrb[20].mxu1 %v9998_v39 }
 0x110   : > { %3113 = vmatprep.mubr.bf16.mxu0 %v10075_v42  ;;  %3339 = vmatprep.mubr.bf16.mxu1 %v10075_v42 }
 0x117   : > { %3114 = vmatmul.mubr.bf16.gmra.mrb[24].mxu0 %v10022_v62  ;;  %3340 = vmatmul.mubr.bf16.gmra.mrb[24].mxu1 %v10022_v62 }
 0x118   : > { %3123 = vmatprep.mubr.bf16.mxu0 %v10099_v2  ;;  %3349 = vmatprep.mubr.bf16.mxu1 %v10099_v2 }
 0x11f   : > { %3124 = vmatmul.mubr.bf16.gmra.mrb[28].mxu0 %v10043_v13  ;;  %3350 = vmatmul.mubr.bf16.gmra.mrb[28].mxu1 %v10043_v13 }
 0x120   : > { %3166 = vmatprep.mubr.bf16.mxu0 %v12643_v0  ;;  %3392 = vmatprep.mubr.bf16.mxu1 %v12643_v0 }
 0x127   : > { %3167 = vmatmul.mubr.bf16.vlgmr.msra.gmra.mrb[0].mxu0 %v10078_v46  ;;  %3393 = vmatmul.mubr.bf16.vlgmr.msra.gmra.mrb[0].mxu1 %v10078_v46 }
 0x128   : > { %3474 = vmatpush1.bf16.msra.mxu0 %v8064_v25  ;;  %3700 = vmatpush1.bf16.msra.mxu1 %v8066_v28  ;;  %v740_v25 = vld [vmem:[#allocation2 + $0x358] sm:$0xff]  ;;  %v8144_v28 = vcombine.low %v715_v9, %v723_v10  ;;  %v8209_v9 = vcombine.high %v779_v52, %v787_v58  ;;  %v795_v10 = vld [vmem:[#allocation2 + $0x510] sm:$0xff] }
 0x129   : > { %3475 = vmatprep.subr.bf16.mxu0 %v8081_v29  ;;  %3701 = vmatprep.subr.bf16.mxu1 %v8083_v32  ;;  %v8146_v29 = vcombine.low %v716_v11, %v724_v16  ;;  %v748_v32 = vld [vmem:[#allocation2 + $0x398] sm:$0xff]  ;;  %v8163_v38 = vcombine.high %v732_v23, %v740_v25  ;;  %v803_v11 = vld [vmem:[#allocation2 + $0x550] sm:$0xff] }
 0x12a   : > { %3176 = vmatprep.mubr.bf16.mxu0 %v12643_v0  ;;  %3402 = vmatprep.mubr.bf16.mxu1 %v12643_v0 }
 0x12c   : > { %3476 = vmatpush1.bf16.msra.mxu0 %v8080_v49  ;;  %3702 = vmatpush1.bf16.msra.mxu1 %v8082_v53  ;;  %v756_v49 = vld [vmem:[#allocation2 + $0x3d8] sm:$0xff]  ;;  %v8160_v53 = vcombine.low %v731_v19, %v739_v21  ;;  %v8225_v19 = vcombine.high %v795_v10, %v803_v11  ;;  %v811_v21 = vld [vmem:[#allocation2 + $0x590] sm:$0xff] }
 0x12d   : > { %3477 = vmatprep.subr.bf16.mxu0 %v8097_v43  ;;  %3703 = vmatprep.subr.bf16.mxu1 %v8099_v47  ;;  %v8162_v43 = vcombine.low %v732_v23, %v740_v25  ;;  %v764_v47 = vld [vmem:[#allocation2 + $0x418] sm:$0xff]  ;;  %v8179_v48 = vcombine.high %v748_v32, %v756_v49  ;;  %v819_v23 = vld [vmem:[#allocation2 + $0x5d0] sm:$0xff] }
 0x12f   : > { %3177 = vmatmul.mubr.bf16.gmra.mrb[4].mxu0 %v10109_v14  ;;  %3403 = vmatmul.mubr.bf16.gmra.mrb[4].mxu1 %v10109_v14 }
 0x130   : > { %3478 = vmatpush1.bf16.msra.mxu0 %v8096_v33  ;;  %3704 = vmatpush1.bf16.msra.mxu1 %v8098_v50  ;;  %v772_v33 = vld [vmem:[#allocation2 + $0x458] sm:$0xff]  ;;  %v8176_v50 = vcombine.low %v747_v31, %v755_v60  ;;  %v8241_v31 = vcombine.high %v811_v21, %v819_v23  ;;  %v827_v60 = vld [vmem:[#allocation2 + $0x610] sm:$0xff] }
 0x131   : > { %3479 = vmatprep.subr.bf16.mxu0 %v8113_v51  ;;  %3705 = vmatprep.subr.bf16.mxu1 %v8115_v1  ;;  %v8178_v51 = vcombine.low %v748_v32, %v756_v49  ;;  %v780_v1 = vld [vmem:[#allocation2 + $0x498] sm:$0xff]  ;;  %v8195_v8 = vcombine.high %v764_v47, %v772_v33  ;;  %v835_v32 = vld [vmem:[#allocation2 + $0x650] sm:$0xff] }
 0x132   : > { %3186 = vmatprep.mubr.bf16.mxu0 %v12643_v0  ;;  %3412 = vmatprep.mubr.bf16.mxu1 %v12643_v0 }
 0x134   : > { %3480 = vmatpush1.bf16.msra.mxu0 %v8112_v5  ;;  %3706 = vmatpush1.bf16.msra.mxu1 %v8114_v6  ;;  %v788_v5 = vld [vmem:[#allocation2 + $0x4d8] sm:$0xff]  ;;  %v8192_v6 = vcombine.low %v763_v37, %v771_v45  ;;  %v8257_v37 = vcombine.high %v827_v60, %v835_v32  ;;  %v843_v45 = vld [vmem:[#allocation2 + $0x690] sm:$0xff] }
 0x135   : > { %3481 = vmatprep.subr.bf16.mxu0 %v8129_v7  ;;  %3707 = vmatprep.subr.bf16.mxu1 %v8131_v15  ;;  %v8194_v7 = vcombine.low %v764_v47, %v772_v33  ;;  %v796_v15 = vld [vmem:[#allocation2 + $0x518] sm:$0xff]  ;;  %v8211_v16 = vcombine.high %v780_v1, %v788_v5  ;;  %v851_v47 = vld [vmem:[#allocation2 + $0x6d0] sm:$0xff] }
 0x137   : > { %3187 = vmatmul.mubr.bf16.gmra.mrb[8].mxu0 %v10134_v34  ;;  %3413 = vmatmul.mubr.bf16.gmra.mrb[8].mxu1 %v10134_v34 }
 0x138   : > { %3482 = vmatpush1.bf16.msra.mxu0 %v8128_v18  ;;  %3708 = vmatpush1.bf16.msra.mxu1 %v8130_v22  ;;  %v804_v18 = vld [vmem:[#allocation2 + $0x558] sm:$0xff]  ;;  %v8208_v22 = vcombine.low %v779_v52, %v787_v58  ;;  %v8273_v52 = vcombine.high %v843_v45, %v851_v47  ;;  %v859_v58 = vld [vmem:[#allocation2 + $0x710] sm:$0xff] }
 0x139   : > { %3483 = vmatprep.subr.bf16.mxu0 %v8145_v40  ;;  %3709 = vmatprep.subr.bf16.mxu1 %v8147_v24  ;;  %v8210_v40 = vcombine.low %v780_v1, %v788_v5  ;;  %v812_v24 = vld [vmem:[#allocation2 + $0x598] sm:$0xff]  ;;  %v8227_v25 = vcombine.high %v796_v15, %v804_v18  ;;  %v867_v1 = vld [vmem:[#allocation2 + $0x750] sm:$0xff] }
 0x13a   : > { %3196 = vmatprep.mubr.bf16.mxu0 %v12643_v0  ;;  %3422 = vmatprep.mubr.bf16.mxu1 %v12643_v0 }
 0x13c   : > { %3484 = vmatpush1.bf16.msra.mxu0 %v8144_v28  ;;  %3710 = vmatpush1.bf16.msra.mxu1 %v8146_v29  ;;  %v820_v28 = vld [vmem:[#allocation2 + $0x5d8] sm:$0xff]  ;;  %v8224_v29 = vcombine.low %v795_v10, %v803_v11  ;;  %v8289_v10 = vcombine.high %v859_v58, %v867_v1  ;;  %v875_v11 = vld [vmem:[#allocation2 + $0x790] sm:$0xff] }
 0x13d   : > { %3485 = vmatprep.subr.bf16.mxu0 %v8161_v30  ;;  %3711 = vmatprep.subr.bf16.mxu1 %v8163_v38  ;;  %v8226_v30 = vcombine.low %v796_v15, %v804_v18  ;;  %v828_v38 = vld [vmem:[#allocation2 + $0x618] sm:$0xff]  ;;  %v8243_v49 = vcombine.high %v812_v24, %v820_v28  ;;  %v883_v15 = vld [vmem:[#allocation2 + $0x7d0] sm:$0xff] }
 0x13f   : > { %3197 = vmatmul.mubr.bf16.gmra.mrb[12].mxu0 %v10154_v54  ;;  %3423 = vmatmul.mubr.bf16.gmra.mrb[12].mxu1 %v10154_v54 }
 0x140   : > { %3486 = vmatpush1.bf16.msra.mxu0 %v8160_v53  ;;  %3712 = vmatpush1.bf16.msra.mxu1 %v8162_v43  ;;  %v836_v53 = vld [vmem:[#allocation2 + $0x658] sm:$0xff]  ;;  %v8240_v43 = vcombine.low %v811_v21, %v819_v23  ;;  %v8305_v21 = vcombine.high %v875_v11, %v883_v15 }
 0x141   : > { %3487 = vmatprep.subr.bf16.mxu0 %v8177_v44  ;;  %3713 = vmatprep.subr.bf16.mxu1 %v8179_v48  ;;  %v8242_v44 = vcombine.low %v812_v24, %v820_v28  ;;  %v844_v48 = vld [vmem:[#allocation2 + $0x698] sm:$0xff]  ;;  %v8259_v33 = vcombine.high %v828_v38, %v836_v53  ;;  %v891_v24 = vld [vmem:[#allocation2 + $0x810] sm:$0xff] }
 0x142   : > { %3206 = vmatprep.mubr.bf16.mxu0 %v12643_v0  ;;  %3432 = vmatprep.mubr.bf16.mxu1 %v12643_v0  ;;  %v892_v28 = vld [vmem:[#allocation2 + $0x818] sm:$0xff] }
 0x144   : > { %3488 = vmatpush1.bf16.msra.mxu0 %v8176_v50  ;;  %3714 = vmatpush1.bf16.msra.mxu1 %v8178_v51  ;;  %v852_v50 = vld [vmem:[#allocation2 + $0x6d8] sm:$0xff]  ;;  %v8256_v51 = vcombine.low %v827_v60, %v835_v32 }
 0x145   : > { %3489 = vmatprep.subr.bf16.mxu0 %v8193_v57  ;;  %3715 = vmatprep.subr.bf16.mxu1 %v8195_v8  ;;  %v8258_v57 = vcombine.low %v828_v38, %v836_v53  ;;  %v860_v8 = vld [vmem:[#allocation2 + $0x718] sm:$0xff]  ;;  %v8275_v5 = vcombine.high %v844_v48, %v852_v50  ;;  %v907_v38 = vld [vmem:[#allocation2 + $0x890] sm:$0xff] }
 0x147   : > { %3207 = vmatmul.mubr.bf16.gmra.mrb[16].mxu0 %v10173_v36  ;;  %3433 = vmatmul.mubr.bf16.gmra.mrb[16].mxu1 %v10173_v36 }
 0x148   : > { %3490 = vmatpush1.bf16.msra.mxu0 %v8192_v6  ;;  %3716 = vmatpush1.bf16.msra.mxu1 %v8194_v7  ;;  %v868_v6 = vld [vmem:[#allocation2 + $0x758] sm:$0xff]  ;;  %v8272_v7 = vcombine.low %v843_v45, %v851_v47  ;;  %v923_v47 = vld [vmem:[#allocation2 + $0x910] sm:$0xff] }
 0x149   : > { %3491 = vmatprep.subr.bf16.mxu0 %v8209_v9  ;;  %3717 = vmatprep.subr.bf16.mxu1 %v8211_v16  ;;  %v8274_v9 = vcombine.low %v844_v48, %v852_v50  ;;  %v876_v16 = vld [vmem:[#allocation2 + $0x798] sm:$0xff]  ;;  %v8291_v18 = vcombine.high %v860_v8, %v868_v6  ;;  %v931_v48 = vld [vmem:[#allocation2 + $0x950] sm:$0xff] }
 0x14a   : > { %3216 = vmatprep.mubr.bf16.mxu0 %v12643_v0  ;;  %3442 = vmatprep.mubr.bf16.mxu1 %v12643_v0  ;;  %v924_v50 = vld [vmem:[#allocation2 + $0x918] sm:$0xff] }
 0x14c   : > { %3492 = vmatpush1.bf16.msra.mxu0 %v8208_v22  ;;  %3718 = vmatpush1.bf16.msra.mxu1 %v8210_v40  ;;  %v884_v22 = vld [vmem:[#allocation2 + $0x7d8] sm:$0xff]  ;;  %v8288_v40 = vcombine.low %v859_v58, %v867_v1  ;;  %v8353_v58 = vcombine.high %v923_v47, %v931_v48 }
 0x14d   : > { %3493 = vmatprep.subr.bf16.mxu0 %v8225_v19  ;;  %3719 = vmatprep.subr.bf16.mxu1 %v8227_v25  ;;  %v8290_v19 = vcombine.low %v860_v8, %v868_v6  ;;  %v8307_v23 = vcombine.high %v876_v16, %v884_v22  ;;  %v899_v25 = vld [vmem:[#allocation2 + $0x850] sm:$0xff]  ;;  %v940_v6 = vld [vmem:[#allocation2 + $0x998] sm:$0xff] }
 0x14e   : > { %v8321_v60 = vcombine.high %v891_v24, %v899_v25  ;;  %v8320_v53 = vcombine.low %v891_v24, %v899_v25  ;;  %v939_v8 = vld [vmem:[#allocation2 + $0x990] sm:$0xff] }
 0x14f   : > { %3217 = vmatmul.mubr.bf16.gmra.mrb[20].mxu0 %v10194_v35  ;;  %3443 = vmatmul.mubr.bf16.gmra.mrb[20].mxu1 %v10194_v35  ;;  %v971_v25 = vld [vmem:[#allocation2 + $0xa90] sm:$0xff] }
 0x150   : > { %3494 = vmatpush1.bf16.msra.mxu0 %v8224_v29  ;;  %3720 = vmatpush1.bf16.msra.mxu1 %v8226_v30  ;;  %v900_v29 = vld [vmem:[#allocation2 + $0x858] sm:$0xff]  ;;  %v8304_v30 = vcombine.low %v875_v11, %v883_v15 }
 0x151   : > { %3495 = vmatprep.subr.bf16.mxu0 %v8241_v31  ;;  %3721 = vmatprep.subr.bf16.mxu1 %v8243_v49  ;;  %v8306_v31 = vcombine.low %v876_v16, %v884_v22  ;;  %v8323_v32 = vcombine.high %v892_v28, %v900_v29  ;;  %v915_v49 = vld [vmem:[#allocation2 + $0x8d0] sm:$0xff]  ;;  %v956_v22 = vld [vmem:[#allocation2 + $0xa18] sm:$0xff] }
 0x152   : > { %3226 = vmatprep.mubr.bf16.mxu0 %v12643_v0  ;;  %3452 = vmatprep.mubr.bf16.mxu1 %v12643_v0  ;;  %v8337_v45 = vcombine.high %v907_v38, %v915_v49  ;;  %v955_v16 = vld [vmem:[#allocation2 + $0xa10] sm:$0xff] }
 0x154   : > { %3496 = vmatpush1.bf16.msra.mxu0 %v8240_v43  ;;  %3722 = vmatpush1.bf16.msra.mxu1 %v8242_v44  ;;  %v908_v43 = vld [vmem:[#allocation2 + $0x898] sm:$0xff] }
 0x155   : > { %3497 = vmatprep.subr.bf16.mxu0 %v8257_v37  ;;  %3723 = vmatprep.subr.bf16.mxu1 %v8259_v33  ;;  %v916_v44 = vld [vmem:[#allocation2 + $0x8d8] sm:$0xff]  ;;  %v8322_v37 = vcombine.low %v892_v28, %v900_v29  ;;  %v979_v28 = vld [vmem:[#allocation2 + $0xad0] sm:$0xff] }
 0x156   : > { %v8339_v33 = vcombine.high %v908_v43, %v916_v44  ;;  %v972_v29 = vld [vmem:[#allocation2 + $0xa98] sm:$0xff] }
 0x157   : > { %3227 = vmatmul.mubr.bf16.gmra.mrb[24].mxu0 %v10208_v61  ;;  %3453 = vmatmul.mubr.bf16.gmra.mrb[24].mxu1 %v10208_v61 }
 0x158   : > { %3498 = vmatpush1.bf16.msra.mxu0 %v8256_v51  ;;  %3724 = vmatpush1.bf16.msra.mxu1 %v8258_v57  ;;  %v932_v51 = vld [vmem:[#allocation2 + $0x958] sm:$0xff]  ;;  %v8336_v57 = vcombine.low %v907_v38, %v915_v49  ;;  %v987_v49 = vld [vmem:[#allocation2 + $0xb10] sm:$0xff] }
 0x159   : > { %3499 = vmatprep.subr.bf16.mxu0 %v8273_v52  ;;  %3725 = vmatprep.subr.bf16.mxu1 %v8275_v5  ;;  %v8338_v52 = vcombine.low %v908_v43, %v916_v44  ;;  %v8355_v1 = vcombine.high %v924_v50, %v932_v51  ;;  %v947_v5 = vld [vmem:[#allocation2 + $0x9d0] sm:$0xff]  ;;  %v988_v43 = vld [vmem:[#allocation2 + $0xb18] sm:$0xff] }
 0x15a   : > { %3236 = vmatprep.mubr.bf16.mxu0 %v12643_v0  ;;  %3462 = vmatprep.mubr.bf16.mxu1 %v12643_v0  ;;  %v8369_v11 = vcombine.high %v939_v8, %v947_v5  ;;  %v996_v44 = vld [vmem:[#allocation2 + $0xb58] sm:$0xff] }
 0x15c   : > { %3500 = vmatpush1.bf16.msra.mxu0 %v8272_v7  ;;  %3726 = vmatpush1.bf16.msra.mxu1 %v8274_v9  ;;  %v948_v7 = vld [vmem:[#allocation2 + $0x9d8] sm:$0xff]  ;;  %v8352_v9 = vcombine.low %v923_v47, %v931_v48  ;;  %v8419_v48 = vcombine.high %v988_v43, %v996_v44 }
 0x15d   : > { %3501 = vmatprep.subr.bf16.mxu0 %v8289_v10  ;;  %3727 = vmatprep.subr.bf16.mxu1 %v8291_v18  ;;  %v8354_v10 = vcombine.low %v924_v50, %v932_v51  ;;  %v8371_v15 = vcombine.high %v940_v6, %v948_v7  ;;  %v963_v18 = vld [vmem:[#allocation2 + $0xa50] sm:$0xff]  ;;  %v1004_v51 = vld [vmem:[#allocation2 + $0xb98] sm:$0xff] }
 0x15e   : > { %v1011_v50 = vld [vmem:[#allocation2 + $0xbd0] sm:$0xff] }
 0x15f   : > { %3237 = vmatmul.mubr.bf16.gmra.mrb[28].mxu0 %v10217_v12  ;;  %3463 = vmatmul.mubr.bf16.gmra.mrb[28].mxu1 %v10217_v12 }
 0x160   : > { %3502 = vmatpush1.bf16.msra.mxu0 %v8288_v40  ;;  %3728 = vmatpush1.bf16.msra.mxu1 %v8290_v19  ;;  %v964_v40 = vld [vmem:[#allocation2 + $0xa58] sm:$0xff]  ;;  %v8368_v19 = vcombine.low %v939_v8, %v947_v5  ;;  %v637_v5 = vld [vmem:[#allocation2 + $0x20] sm:$0xff] }
 0x161   : > { %3503 = vmatprep.subr.bf16.mxu0 %v8305_v21  ;;  %3729 = vmatprep.subr.bf16.mxu1 %v8307_v23  ;;  %v8370_v21 = vcombine.low %v940_v6, %v948_v7  ;;  %v8385_v23 = vcombine.high %v955_v16, %v963_v18  ;;  %v8387_v24 = vcombine.high %v956_v22, %v964_v40  ;;  %v645_v6 = vld [vmem:[#allocation2 + $0x60] sm:$0xff]  ;;  %v638_v7 = vld [vmem:[#allocation2 + $0x28] sm:$0xff] }
 0x162   : > { %3505 = vmatprep.mubr.bf16.mxu0 %v9989_v20  ;;  %3731 = vmatprep.mubr.bf16.mxu1 %v9989_v20 }
 0x164   : > { %3504 = vmatpush1.bf16.msra.mxu0 %v8304_v30  ;;  %3730 = vmatpush1.bf16.msra.mxu1 %v8306_v31  ;;  %v980_v30 = vld [vmem:[#allocation2 + $0xad8] sm:$0xff]  ;;  %v8384_v31 = vcombine.low %v955_v16, %v963_v18  ;;  %v653_v18 = vld [vmem:[#allocation2 + $0xa0] sm:$0xff] }
 0x165   : > { %3586 = vmatprep.subr.bf16.mxu0 %v8321_v60  ;;  %3812 = vmatprep.subr.bf16.mxu1 %v8323_v32  ;;  %v8386_v60 = vcombine.low %v956_v22, %v964_v40  ;;  %v8401_v32 = vcombine.high %v971_v25, %v979_v28  ;;  %v8403_v38 = vcombine.high %v972_v29, %v980_v30  ;;  %v661_v22 = vld [vmem:[#allocation2 + $0xe0] sm:$0xff]  ;;  %v654_v40 = vld [vmem:[#allocation2 + $0xa8] sm:$0xff] }
 0x167   : > { %3506 = vmatmul.mubr.bf16.vlgmr.msra.gmra.mrb[32].mxu0 %v9980_v59  ;;  %3732 = vmatmul.mubr.bf16.vlgmr.msra.gmra.mrb[32].mxu1 %v9980_v59 }
 0x168   : > { %3587 = vmatpush1.bf16.msra.mxu0 %v8320_v53  ;;  %3813 = vmatpush1.bf16.msra.mxu1 %v8322_v37  ;;  %v995_v53 = vld [vmem:[#allocation2 + $0xb50] sm:$0xff]  ;;  %v8400_v37 = vcombine.low %v971_v25, %v979_v28  ;;  %v669_v28 = vld [vmem:[#allocation2 + $0x120] sm:$0xff] }
 0x169   : > { %3515 = vmatprep.mubr.bf16.mxu0 %v10182_v26  ;;  %3741 = vmatprep.mubr.bf16.mxu1 %v10182_v26  ;;  %v8417_v47 = vcombine.high %v987_v49, %v995_v53 }
 0x16a   : > { %3588 = vmatprep.subr.bf16.mxu0 %v8337_v45  ;;  %3814 = vmatprep.subr.bf16.mxu1 %v8339_v33  ;;  %v8402_v45 = vcombine.low %v972_v29, %v980_v30  ;;  %v1003_v33 = vld [vmem:[#allocation2 + $0xb90] sm:$0xff]  ;;  %v677_v29 = vld [vmem:[#allocation2 + $0x160] sm:$0xff]  ;;  %v670_v30 = vld [vmem:[#allocation2 + $0x128] sm:$0xff] }
 0x16c   : > { %3589 = vmatpush1.bf16.msra.mxu0 %v8336_v57  ;;  %3815 = vmatpush1.bf16.msra.mxu1 %v8338_v52  ;;  %v1012_v57 = vld [vmem:[#allocation2 + $0xbd8] sm:$0xff]  ;;  %v8416_v52 = vcombine.low %v987_v49, %v995_v53  ;;  %v685_v53 = vld [vmem:[#allocation2 + $0x1a0] sm:$0xff] }
 0x16d   : > { %3590 = vmatprep.subr.bf16.mxu0 %v8353_v58  ;;  %3816 = vmatprep.subr.bf16.mxu1 %v8355_v1  ;;  %v8418_v58 = vcombine.low %v988_v43, %v996_v44  ;;  %v8433_v1 = vcombine.high %v1003_v33, %v1011_v50  ;;  %v8435_v8 = vcombine.high %v1004_v51, %v1012_v57  ;;  %v693_v43 = vld [vmem:[#allocation2 + $0x1e0] sm:$0xff]  ;;  %v686_v44 = vld [vmem:[#allocation2 + $0x1a8] sm:$0xff] }
 0x16f   : > { %3516 = vmatmul.mubr.bf16.gmra.mrb[36].mxu0 %v10072_v41  ;;  %3742 = vmatmul.mubr.bf16.gmra.mrb[36].mxu1 %v10072_v41 }
 0x170   : > { %3525 = vmatprep.mubr.bf16.mxu0 %v10212_v3  ;;  %3751 = vmatprep.mubr.bf16.mxu1 %v10212_v3 }
 0x171   : > { %3591 = vmatpush1.bf16.msra.mxu0 %v8352_v9  ;;  %3817 = vmatpush1.bf16.msra.mxu1 %v8354_v10  ;;  %v646_v9 = vld [vmem:[#allocation2 + $0x68] sm:$0xff]  ;;  %v8432_v10 = vcombine.low %v1003_v33, %v1011_v50  ;;  %v701_v50 = vld [vmem:[#allocation2 + $0x220] sm:$0xff] }
 0x172   : > { %3592 = vmatprep.subr.bf16.mxu0 %v8369_v11  ;;  %3818 = vmatprep.subr.bf16.mxu1 %v8371_v15  ;;  %v8434_v11 = vcombine.low %v1004_v51, %v1012_v57  ;;  %v8069_v15 = vcombine.high %v637_v5, %v645_v6  ;;  %v8071_v16 = vcombine.high %v638_v7, %v646_v9  ;;  %v709_v51 = vld [vmem:[#allocation2 + $0x260] sm:$0xff]  ;;  %v702_v57 = vld [vmem:[#allocation2 + $0x228] sm:$0xff] }
 0x175   : > { %3593 = vmatpush1.bf16.msra.mxu0 %v8368_v19  ;;  %3819 = vmatpush1.bf16.msra.mxu1 %v8370_v21  ;;  %v662_v19 = vld [vmem:[#allocation2 + $0xe8] sm:$0xff]  ;;  %v8068_v21 = vcombine.low %v637_v5, %v645_v6  ;;  %v717_v6 = vld [vmem:[#allocation2 + $0x2a0] sm:$0xff] }
 0x176   : > { %3594 = vmatprep.subr.bf16.mxu0 %v8385_v23  ;;  %3820 = vmatprep.subr.bf16.mxu1 %v8387_v24  ;;  %v8070_v23 = vcombine.low %v638_v7, %v646_v9  ;;  %v8085_v24 = vcombine.high %v653_v18, %v661_v22  ;;  %v8087_v25 = vcombine.high %v654_v40, %v662_v19  ;;  %v725_v7 = vld [vmem:[#allocation2 + $0x2e0] sm:$0xff]  ;;  %v718_v9 = vld [vmem:[#allocation2 + $0x2a8] sm:$0xff] }
 0x177   : > { %3526 = vmatmul.mubr.bf16.gmra.mrb[40].mxu0 %v10124_v27  ;;  %3752 = vmatmul.mubr.bf16.gmra.mrb[40].mxu1 %v10124_v27 }
 0x178   : > { %3535 = vmatprep.mubr.bf16.mxu0 %v10228_v55  ;;  %3761 = vmatprep.mubr.bf16.mxu1 %v10228_v55 }
 0x179   : > { %3595 = vmatpush1.bf16.msra.mxu0 %v8384_v31  ;;  %3821 = vmatpush1.bf16.msra.mxu1 %v8386_v60  ;;  %v678_v31 = vld [vmem:[#allocation2 + $0x168] sm:$0xff]  ;;  %v8084_v60 = vcombine.low %v653_v18, %v661_v22  ;;  %v733_v22 = vld [vmem:[#allocation2 + $0x320] sm:$0xff] }
 0x17a   : > { %3596 = vmatprep.subr.bf16.mxu0 %v8401_v32  ;;  %3822 = vmatprep.subr.bf16.mxu1 %v8403_v38  ;;  %v8086_v32 = vcombine.low %v654_v40, %v662_v19  ;;  %v8101_v38 = vcombine.high %v669_v28, %v677_v29  ;;  %v8103_v49 = vcombine.high %v670_v30, %v678_v31  ;;  %v741_v40 = vld [vmem:[#allocation2 + $0x360] sm:$0xff]  ;;  %v734_v19 = vld [vmem:[#allocation2 + $0x328] sm:$0xff] }
 0x17d   : > { %3597 = vmatpush1.bf16.msra.mxu0 %v8400_v37  ;;  %3823 = vmatpush1.bf16.msra.mxu1 %v8402_v45  ;;  %v694_v37 = vld [vmem:[#allocation2 + $0x1e8] sm:$0xff]  ;;  %v8100_v45 = vcombine.low %v669_v28, %v677_v29  ;;  %v749_v29 = vld [vmem:[#allocation2 + $0x3a0] sm:$0xff] }
 0x17e   : > { %3598 = vmatprep.subr.bf16.mxu0 %v8417_v47  ;;  %3824 = vmatprep.subr.bf16.mxu1 %v8419_v48  ;;  %v8102_v47 = vcombine.low %v670_v30, %v678_v31  ;;  %v8117_v48 = vcombine.high %v685_v53, %v693_v43  ;;  %v8119_v33 = vcombine.high %v686_v44, %v694_v37  ;;  %v757_v30 = vld [vmem:[#allocation2 + $0x3e0] sm:$0xff]  ;;  %v750_v31 = vld [vmem:[#allocation2 + $0x3a8] sm:$0xff] }
 0x17f   : > { %3536 = vmatmul.mubr.bf16.gmra.mrb[44].mxu0 %v10156_v63  ;;  %3762 = vmatmul.mubr.bf16.gmra.mrb[44].mxu1 %v10156_v63 }
 0x180   : > { %3545 = vmatprep.mubr.bf16.mxu0 %v10235_v4  ;;  %3771 = vmatprep.mubr.bf16.mxu1 %v10235_v4 }
 0x181   : > { %3599 = vmatpush1.bf16.msra.mxu0 %v8416_v52  ;;  %3825 = vmatpush1.bf16.msra.mxu1 %v8418_v58  ;;  %v710_v52 = vld [vmem:[#allocation2 + $0x268] sm:$0xff]  ;;  %v8116_v58 = vcombine.low %v685_v53, %v693_v43  ;;  %v765_v43 = vld [vmem:[#allocation2 + $0x420] sm:$0xff] }
 0x182   : > { %3600 = vmatprep.subr.bf16.mxu0 %v8433_v1  ;;  %3826 = vmatprep.subr.bf16.mxu1 %v8435_v8  ;;  %v8118_v1 = vcombine.low %v686_v44, %v694_v37  ;;  %v8133_v8 = vcombine.high %v701_v50, %v709_v51  ;;  %v8135_v5 = vcombine.high %v702_v57, %v710_v52  ;;  %v773_v44 = vld [vmem:[#allocation2 + $0x460] sm:$0xff]  ;;  %v766_v37 = vld [vmem:[#allocation2 + $0x428] sm:$0xff] }
 0x185   : > { %3601 = vmatpush1.bf16.msra.mxu0 %v8432_v10  ;;  %3827 = vmatpush1.bf16.msra.mxu1 %v8434_v11  ;;  %v726_v10 = vld [vmem:[#allocation2 + $0x2e8] sm:$0xff]  ;;  %v8132_v11 = vcombine.low %v701_v50, %v709_v51  ;;  %v781_v51 = vld [vmem:[#allocation2 + $0x4a0] sm:$0xff] }
 0x186   : > { %3925 = vmatprep.subr.bf16.mxu0 %v8069_v15  ;;  %4151 = vmatprep.subr.bf16.mxu1 %v8071_v16  ;;  %v8134_v15 = vcombine.low %v702_v57, %v710_v52  ;;  %v8149_v16 = vcombine.high %v717_v6, %v725_v7  ;;  %v8151_v18 = vcombine.high %v718_v9, %v726_v10  ;;  %v789_v57 = vld [vmem:[#allocation2 + $0x4e0] sm:$0xff]  ;;  %v782_v52 = vld [vmem:[#allocation2 + $0x4a8] sm:$0xff] }
 0x187   : > { %3546 = vmatmul.mubr.bf16.gmra.mrb[48].mxu0 %v10191_v56  ;;  %3772 = vmatmul.mubr.bf16.gmra.mrb[48].mxu1 %v10191_v56 }
 0x188   : > { %3555 = vmatprep.mubr.bf16.mxu0 %v10050_v17  ;;  %3781 = vmatprep.mubr.bf16.mxu1 %v10050_v17 }
 0x18f   : > { %3556 = vmatmul.mubr.bf16.gmra.mrb[52].mxu0 %v9998_v39  ;;  %3782 = vmatmul.mubr.bf16.gmra.mrb[52].mxu1 %v9998_v39 }
 0x190   : > { %3565 = vmatprep.mubr.bf16.mxu0 %v10075_v42  ;;  %3791 = vmatprep.mubr.bf16.mxu1 %v10075_v42  ;;  %v10577_v42 = vld [vmem:[#allocation2 + $0x2f0] sm:$0xff] }
 0x191   : > { %12886 = vst [vmem:[#allocation51_spill] sm:$0xff] %v10577_v42 }
 0x197   : > { %3566 = vmatmul.mubr.bf16.gmra.mrb[56].mxu0 %v10022_v62  ;;  %3792 = vmatmul.mubr.bf16.gmra.mrb[56].mxu1 %v10022_v62  ;;  %v10560_v62 = vld [vmem:[#allocation2 + $0x238] sm:$0xff] }
 0x198   : > { %3575 = vmatprep.mubr.bf16.mxu0 %v10099_v2  ;;  %3801 = vmatprep.mubr.bf16.mxu1 %v10099_v2  ;;  %v10542_v2 = vld [vmem:[#allocation2 + $0x1f8] sm:$0xff] }
 0x19f   : > { %3576 = vmatmul.mubr.bf16.gmra.mrb[60].mxu0 %v10043_v13  ;;  %3802 = vmatmul.mubr.bf16.gmra.mrb[60].mxu1 %v10043_v13  ;;  %v10540_v13 = vld [vmem:[#allocation2 + $0x1b8] sm:$0xff] }
 0x1a0   : > { %3618 = vmatprep.mubr.bf16.mxu0 %v12643_v0  ;;  %3844 = vmatprep.mubr.bf16.mxu1 %v12643_v0 }
 0x1a7   : > { %3619 = vmatmul.mubr.bf16.vlgmr.msra.gmra.mrb[32].mxu0 %v10078_v46  ;;  %3845 = vmatmul.mubr.bf16.vlgmr.msra.gmra.mrb[32].mxu1 %v10078_v46  ;;  %v10538_v46 = vld [vmem:[#allocation2 + $0x1f0] sm:$0xff] }
 0x1a8   : > { %3926 = vmatpush1.bf16.msra.mxu0 %v8068_v21  ;;  %4152 = vmatpush1.bf16.msra.mxu1 %v8070_v23  ;;  %v742_v21 = vld [vmem:[#allocation2 + $0x368] sm:$0xff]  ;;  %v8148_v23 = vcombine.low %v717_v6, %v725_v7  ;;  %v797_v7 = vld [vmem:[#allocation2 + $0x520] sm:$0xff]  ;;  %12880 = vst [vmem:[#allocation48_spill] sm:$0xff] %v10538_v46  ;;  %v10618_v46 = vld [vmem:[#allocation2 + $0x3b0] sm:$0xff] }
 0x1a9   : > { %3927 = vmatprep.subr.bf16.mxu0 %v8085_v24  ;;  %4153 = vmatprep.subr.bf16.mxu1 %v8087_v25  ;;  %v8150_v24 = vcombine.low %v718_v9, %v726_v10  ;;  %v8165_v25 = vcombine.high %v733_v22, %v741_v40  ;;  %v8167_v28 = vcombine.high %v734_v19, %v742_v21  ;;  %v805_v9 = vld [vmem:[#allocation2 + $0x560] sm:$0xff]  ;;  %v798_v10 = vld [vmem:[#allocation2 + $0x528] sm:$0xff] }
 0x1aa   : > { %3628 = vmatprep.mubr.bf16.mxu0 %v12643_v0  ;;  %3854 = vmatprep.mubr.bf16.mxu1 %v12643_v0  ;;  %12894 = vst [vmem:[#allocation58_spill] sm:$0xff] %v10618_v46  ;;  %v12957_v46 = vld [vmem:[#allocation25_spill] sm:$0xff] }
 0x1ac   : > { %3928 = vmatpush1.bf16.msra.mxu0 %v8084_v60  ;;  %4154 = vmatpush1.bf16.msra.mxu1 %v8086_v32  ;;  %v758_v60 = vld [vmem:[#allocation2 + $0x3e8] sm:$0xff]  ;;  %v8164_v32 = vcombine.low %v733_v22, %v741_v40  ;;  %v813_v40 = vld [vmem:[#allocation2 + $0x5a0] sm:$0xff] }
 0x1ad   : > { %3929 = vmatprep.subr.bf16.mxu0 %v8101_v38  ;;  %4155 = vmatprep.subr.bf16.mxu1 %v8103_v49  ;;  %v8166_v38 = vcombine.low %v734_v19, %v742_v21  ;;  %v8181_v49 = vcombine.high %v749_v29, %v757_v30  ;;  %v8183_v53 = vcombine.high %v750_v31, %v758_v60  ;;  %v821_v19 = vld [vmem:[#allocation2 + $0x5e0] sm:$0xff]  ;;  %v814_v21 = vld [vmem:[#allocation2 + $0x5a8] sm:$0xff] }
 0x1af   : > { %3629 = vmatmul.mubr.bf16.gmra.mrb[36].mxu0 %v10109_v14  ;;  %3855 = vmatmul.mubr.bf16.gmra.mrb[36].mxu1 %v10109_v14  ;;  %v10525_v14 = vld [vmem:[#allocation2 + $0x1b0] sm:$0xff] }
 0x1b0   : > { %3930 = vmatpush1.bf16.msra.mxu0 %v8100_v45  ;;  %4156 = vmatpush1.bf16.msra.mxu1 %v8102_v47  ;;  %v774_v45 = vld [vmem:[#allocation2 + $0x468] sm:$0xff]  ;;  %v8180_v47 = vcombine.low %v749_v29, %v757_v30  ;;  %v829_v30 = vld [vmem:[#allocation2 + $0x620] sm:$0xff]  ;;  %12878 = vst [vmem:[#allocation47_spill] sm:$0xff] %v10525_v14  ;;  %v10620_v14 = vld [vmem:[#allocation2 + $0x3f0] sm:$0xff] }
 0x1b1   : > { %3931 = vmatprep.subr.bf16.mxu0 %v8117_v48  ;;  %4157 = vmatprep.subr.bf16.mxu1 %v8119_v33  ;;  %v8182_v48 = vcombine.low %v750_v31, %v758_v60  ;;  %v8197_v33 = vcombine.high %v765_v43, %v773_v44  ;;  %v8199_v50 = vcombine.high %v766_v37, %v774_v45  ;;  %v837_v31 = vld [vmem:[#allocation2 + $0x660] sm:$0xff]  ;;  %v830_v60 = vld [vmem:[#allocation2 + $0x628] sm:$0xff] }
 0x1b2   : > { %3638 = vmatprep.mubr.bf16.mxu0 %v12643_v0  ;;  %3864 = vmatprep.mubr.bf16.mxu1 %v12643_v0  ;;  %12895 = vst [vmem:[#allocation59_spill] sm:$0xff] %v10620_v14 }
 0x1b4   : > { %3932 = vmatpush1.bf16.msra.mxu0 %v8116_v58  ;;  %4158 = vmatpush1.bf16.msra.mxu1 %v8118_v1  ;;  %v790_v58 = vld [vmem:[#allocation2 + $0x4e8] sm:$0xff]  ;;  %v8196_v1 = vcombine.low %v765_v43, %v773_v44  ;;  %v845_v44 = vld [vmem:[#allocation2 + $0x6a0] sm:$0xff] }
 0x1b5   : > { %3933 = vmatprep.subr.bf16.mxu0 %v8133_v8  ;;  %4159 = vmatprep.subr.bf16.mxu1 %v8135_v5  ;;  %v8198_v8 = vcombine.low %v766_v37, %v774_v45  ;;  %v8213_v5 = vcombine.high %v781_v51, %v789_v57  ;;  %v8215_v6 = vcombine.high %v782_v52, %v790_v58  ;;  %v853_v37 = vld [vmem:[#allocation2 + $0x6e0] sm:$0xff]  ;;  %v846_v45 = vld [vmem:[#allocation2 + $0x6a8] sm:$0xff] }
 0x1b7   : > { %3639 = vmatmul.mubr.bf16.gmra.mrb[40].mxu0 %v10134_v34  ;;  %3865 = vmatmul.mubr.bf16.gmra.mrb[40].mxu1 %v10134_v34  ;;  %v10523_v34 = vld [vmem:[#allocation2 + $0x178] sm:$0xff] }
 0x1b8   : > { %3934 = vmatpush1.bf16.msra.mxu0 %v8132_v11  ;;  %4160 = vmatpush1.bf16.msra.mxu1 %v8134_v15  ;;  %v806_v11 = vld [vmem:[#allocation2 + $0x568] sm:$0xff]  ;;  %v8212_v15 = vcombine.low %v781_v51, %v789_v57  ;;  %v861_v57 = vld [vmem:[#allocation2 + $0x720] sm:$0xff]  ;;  %12877 = vst [vmem:[#allocation46_spill] sm:$0xff] %v10523_v34  ;;  %v10604_v34 = vld [vmem:[#allocation2 + $0x338] sm:$0xff] }
 0x1b9   : > { %3935 = vmatprep.subr.bf16.mxu0 %v8149_v16  ;;  %4161 = vmatprep.subr.bf16.mxu1 %v8151_v18  ;;  %v8214_v16 = vcombine.low %v782_v52, %v790_v58  ;;  %v8229_v18 = vcombine.high %v797_v7, %v805_v9  ;;  %v8231_v22 = vcombine.high %v798_v10, %v806_v11  ;;  %v869_v52 = vld [vmem:[#allocation2 + $0x760] sm:$0xff]  ;;  %v862_v58 = vld [vmem:[#allocation2 + $0x728] sm:$0xff] }
 0x1ba   : > { %3648 = vmatprep.mubr.bf16.mxu0 %v12643_v0  ;;  %3874 = vmatprep.mubr.bf16.mxu1 %v12643_v0  ;;  %12891 = vst [vmem:[#allocation56_spill] sm:$0xff] %v10604_v34  ;;  %v10686_v34 = vld [vmem:[#allocation2 + $0x570] sm:$0xff] }
 0x1bb   : > { %12911 = vst [vmem:[#allocation71_spill] sm:$0xff] %v10686_v34  ;;  %v10748_v34 = vld [vmem:[#allocation2 + $0x6b0] sm:$0xff] }
 0x1bc   : > { %3936 = vmatpush1.bf16.msra.mxu0 %v8148_v23  ;;  %4162 = vmatpush1.bf16.msra.mxu1 %v8150_v24  ;;  %v822_v23 = vld [vmem:[#allocation2 + $0x5e8] sm:$0xff]  ;;  %v8228_v24 = vcombine.low %v797_v7, %v805_v9  ;;  %v1021_v7 = vlaneseq  ;;  %12926 = vst [vmem:[#allocation82_spill] sm:$0xff] %v10748_v34  ;;  %v12950_v34 = vld [vmem:[#allocation20_spill] sm:$0xff] }
 0x1bd   : > { %3937 = vmatprep.subr.bf16.mxu0 %v8165_v25  ;;  %4163 = vmatprep.subr.bf16.mxu1 %v8167_v28  ;;  %v8230_v25 = vcombine.low %v798_v10, %v806_v11  ;;  %v8245_v28 = vcombine.high %v813_v40, %v821_v19  ;;  %v8247_v29 = vcombine.high %v814_v21, %v822_v23  ;;  %v877_v10 = vld [vmem:[#allocation2 + $0x7a0] sm:$0xff] }
 0x1be   : > { %v885_v11 = vld [vmem:[#allocation2 + $0x7e0] sm:$0xff] }
 0x1bf   : > { %3649 = vmatmul.mubr.bf16.gmra.mrb[44].mxu0 %v10154_v54  ;;  %3875 = vmatmul.mubr.bf16.gmra.mrb[44].mxu1 %v10154_v54  ;;  %v10511_v54 = vld [vmem:[#allocation2 + $0x170] sm:$0xff] }
 0x1c0   : > { %3938 = vmatpush1.bf16.msra.mxu0 %v8164_v32  ;;  %4164 = vmatpush1.bf16.msra.mxu1 %v8166_v38  ;;  %v838_v32 = vld [vmem:[#allocation2 + $0x668] sm:$0xff]  ;;  %v8244_v38 = vcombine.low %v813_v40, %v821_v19  ;;  %v8309_v40 = vcombine.high %v877_v10, %v885_v11  ;;  %v10349_v19 = vld [vmem:[#allocation2 + $0x820] sm:$0xff]  ;;  %12875 = vst [vmem:[#allocation44_spill] sm:$0xff] %v10511_v54  ;;  %v10622_v54 = vld [vmem:[#allocation2 + $0x3b8] sm:$0xff] }
 0x1c1   : > { %3939 = vmatprep.subr.bf16.mxu0 %v8181_v49  ;;  %4165 = vmatprep.subr.bf16.mxu1 %v8183_v53  ;;  %v8246_v49 = vcombine.low %v814_v21, %v822_v23  ;;  %v8261_v53 = vcombine.high %v829_v30, %v837_v31  ;;  %v8263_v43 = vcombine.high %v830_v60, %v838_v32  ;;  %v10351_v21 = vshrl.u32 %v1021_v7, 7  ;;  %v10401_v7 = vld [vmem:[#allocation2 + $0xa20] sm:$0xff] }
 0x1c2   : > { %3658 = vmatprep.mubr.bf16.mxu0 %v12643_v0  ;;  %3884 = vmatprep.mubr.bf16.mxu1 %v12643_v0  ;;  %12896 = vst [vmem:[#allocation60_spill] sm:$0xff] %v10622_v54 }
 0x1c3   : > { %12872 = vst [vmem:[#allocation41_spill] sm:$0xff] %v10351_v21 }
 0x1c4   : > { %3940 = vmatpush1.bf16.msra.mxu0 %v8180_v47  ;;  %4166 = vmatpush1.bf16.msra.mxu1 %v8182_v48  ;;  %v854_v47 = vld [vmem:[#allocation2 + $0x6e8] sm:$0xff]  ;;  %v8260_v48 = vcombine.low %v829_v30, %v837_v31  ;;  %v10362_v30 = vld [vmem:[#allocation2 + $0x8e0] sm:$0xff] }
 0x1c5   : > { %3941 = vmatprep.subr.bf16.mxu0 %v8197_v33  ;;  %4167 = vmatprep.subr.bf16.mxu1 %v8199_v50  ;;  %v8262_v33 = vcombine.low %v830_v60, %v838_v32  ;;  %v8277_v50 = vcombine.high %v845_v44, %v853_v37  ;;  %v8279_v51 = vcombine.high %v846_v45, %v854_v47  ;;  %v10364_v31 = vld [vmem:[#allocation2 + $0x8a8] sm:$0xff] }
 0x1c6   : > { %v8308_v60 = vcombine.low %v877_v10, %v885_v11  ;;  %v10367_v32 = vld [vmem:[#allocation2 + $0x8e8] sm:$0xff] }
 0x1c7   : > { %3659 = vmatmul.mubr.bf16.gmra.mrb[48].mxu0 %v10173_v36  ;;  %3885 = vmatmul.mubr.bf16.gmra.mrb[48].mxu1 %v10173_v36  ;;  %v10405_v10 = vld [vmem:[#allocation2 + $0xa28] sm:$0xff]  ;;  %v10507_v36 = vld [vmem:[#allocation2 + $0xf8] sm:$0xff] }
 0x1c8   : > { %3942 = vmatpush1.bf16.msra.mxu0 %v8196_v1  ;;  %4168 = vmatpush1.bf16.msra.mxu1 %v8198_v8  ;;  %v870_v1 = vld [vmem:[#allocation2 + $0x768] sm:$0xff]  ;;  %v8276_v8 = vcombine.low %v845_v44, %v853_v37  ;;  %12874 = vst [vmem:[#allocation43_spill] sm:$0xff] %v10507_v36  ;;  %v10590_v36 = vld [vmem:[#allocation2 + $0x2f8] sm:$0xff] }
 0x1c9   : > { %3943 = vmatprep.subr.bf16.mxu0 %v8213_v5  ;;  %4169 = vmatprep.subr.bf16.mxu1 %v8215_v6  ;;  %v8278_v5 = vcombine.low %v846_v45, %v854_v47  ;;  %v8293_v6 = vcombine.high %v861_v57, %v869_v52  ;;  %v8295_v9 = vcombine.high %v862_v58, %v870_v1  ;;  %v10375_v44 = vld [vmem:[#allocation2 + $0x928] sm:$0xff]  ;;  %v1017_v45 = vld [vmem:[#allocation5] sm:$0xff]  ;;  %v12645_v47 = vsub.s32 0, %v10351_v21 }
 0x1ca   : > { %3668 = vmatprep.mubr.bf16.mxu0 %v12643_v0  ;;  %3894 = vmatprep.mubr.bf16.mxu1 %v12643_v0  ;;  %v10377_v37 = vld [vmem:[#allocation2 + $0x968] sm:$0xff]  ;;  %12888 = vst [vmem:[#allocation53_spill] sm:$0xff] %v10590_v36  ;;  %v10667_v36 = vld [vmem:[#allocation2 + $0x4f0] sm:$0xff] }
 0x1cb   : > { %12906 = vst [vmem:[#allocation67_spill] sm:$0xff] %v10667_v36  ;;  %v10734_v36 = vld [vmem:[#allocation2 + $0x638] sm:$0xff] }
 0x1cc   : > { %3944 = vmatpush1.bf16.msra.mxu0 %v8212_v15  ;;  %4170 = vmatpush1.bf16.msra.mxu1 %v8214_v16  ;;  %v878_v15 = vld [vmem:[#allocation2 + $0x7a8] sm:$0xff]  ;;  %12923 = vst [vmem:[#allocation80_spill] sm:$0xff] %v10734_v36 }
 0x1cd   : > { %3945 = vmatprep.subr.bf16.mxu0 %v8229_v18  ;;  %4171 = vmatprep.subr.bf16.mxu1 %v8231_v22  ;;  %v886_v16 = vld [vmem:[#allocation2 + $0x7e8] sm:$0xff]  ;;  %v8292_v18 = vcombine.low %v861_v57, %v869_v52  ;;  %v8294_v22 = vcombine.low %v862_v58, %v870_v1  ;;  %v10386_v57 = vld [vmem:[#allocation2 + $0x9a0] sm:$0xff] }
 0x1ce   : > { %v8311_v23 = vcombine.high %v878_v15, %v886_v16  ;;  %v10388_v52 = vld [vmem:[#allocation2 + $0x9e0] sm:$0xff]  ;;  %v10390_v58 = vld [vmem:[#allocation2 + $0x9a8] sm:$0xff] }
 0x1cf   : > { %3669 = vmatmul.mubr.bf16.gmra.mrb[52].mxu0 %v10194_v35  ;;  %3895 = vmatmul.mubr.bf16.gmra.mrb[52].mxu1 %v10194_v35  ;;  %v10392_v1 = vld [vmem:[#allocation2 + $0x9e8] sm:$0xff]  ;;  %v10498_v35 = vld [vmem:[#allocation2 + $0xb8] sm:$0xff]  ;;  %v12909_v42 = vcombine.low %v10386_v57, %v10388_v52 }
 0x1d0   : > { %3946 = vmatpush1.bf16.msra.mxu0 %v8228_v24  ;;  %4172 = vmatpush1.bf16.msra.mxu1 %v8230_v25  ;;  %v10353_v24 = vld [vmem:[#allocation2 + $0x860] sm:$0xff]  ;;  %v10355_v25 = vld [vmem:[#allocation2 + $0x828] sm:$0xff]  ;;  %12873 = vst [vmem:[#allocation42_spill] sm:$0xff] %v10498_v35  ;;  %v10592_v35 = vld [vmem:[#allocation2 + $0x330] sm:$0xff] }
 0x1d1   : > { %3947 = vmatprep.subr.bf16.mxu0 %v8245_v28  ;;  %4173 = vmatprep.subr.bf16.mxu1 %v8247_v29  ;;  %v10357_v28 = vld [vmem:[#allocation2 + $0x868] sm:$0xff]  ;;  %v10360_v29 = vld [vmem:[#allocation2 + $0x8a0] sm:$0xff]  ;;  %12889 = vst [vmem:[#allocation54_spill] sm:$0xff] %v10592_v35 }
 0x1d2   : > { %3678 = vmatprep.mubr.bf16.mxu0 %v12643_v0  ;;  %3904 = vmatprep.mubr.bf16.mxu1 %v12643_v0  ;;  %v8341_v11 = vcombine.high %v10360_v29, %v10362_v30 }
 0x1d4   : > { %3948 = vmatpush1.bf16.msra.mxu0 %v8244_v38  ;;  %4174 = vmatpush1.bf16.msra.mxu1 %v8246_v49  ;;  %v10369_v38 = vld [vmem:[#allocation2 + $0x920] sm:$0xff] }
 0x1d5   : > { %3949 = vmatprep.subr.bf16.mxu0 %v8261_v53  ;;  %4175 = vmatprep.subr.bf16.mxu1 %v8263_v43  ;;  %v10371_v49 = vld [vmem:[#allocation2 + $0x960] sm:$0xff]  ;;  %v8310_v53 = vcombine.low %v878_v15, %v886_v16  ;;  %v8325_v43 = vcombine.high %v10349_v19, %v10353_v24  ;;  %v8343_v16 = vcombine.high %v10364_v31, %v10367_v32  ;;  %v10453_v15 = vld [vmem:[#allocation2 + $0xb68] sm:$0xff] }
 0x1d7   : > { %3679 = vmatmul.mubr.bf16.gmra.mrb[56].mxu0 %v10208_v61  ;;  %3905 = vmatmul.mubr.bf16.gmra.mrb[56].mxu1 %v10208_v61  ;;  %v10485_v61 = vld [vmem:[#allocation2 + $0x78] sm:$0xff] }
 0x1d8   : > { %3950 = vmatpush1.bf16.msra.mxu0 %v8260_v48  ;;  %4176 = vmatpush1.bf16.msra.mxu1 %v8262_v33  ;;  %v8327_v48 = vcombine.high %v10355_v25, %v10357_v28  ;;  %v12646_v33 = vsub.s32 2, %v10351_v21 }
 0x1d9   : > { %3951 = vmatprep.subr.bf16.mxu0 %v8277_v50  ;;  %4177 = vmatprep.subr.bf16.mxu1 %v8279_v51  ;;  %v12647_v50 = vsub.s32 1, %v10351_v21  ;;  %v12648_v51 = vsub.s32 3, %v10351_v21  ;;  %v10470_v21 = vld [vmem:[#allocation2 + $0xbe8] sm:$0xff] }
 0x1da   : > { %3688 = vmatprep.mubr.bf16.mxu0 %v12643_v0  ;;  %3914 = vmatprep.mubr.bf16.mxu1 %v12643_v0  ;;  %v10431_v0 = vld [vmem:[#allocation2 + $0xb20] sm:$0xff] }
 0x1dc   : > { %3952 = vmatpush1.bf16.msra.mxu0 %v8276_v8  ;;  %4178 = vmatpush1.bf16.msra.mxu1 %v8278_v5  ;;  %v8324_v8 = vcombine.low %v10349_v19, %v10353_v24  ;;  %v8326_v5 = vcombine.low %v10355_v25, %v10357_v28  ;;  %v10419_v19 = vld [vmem:[#allocation2 + $0xae0] sm:$0xff]  ;;  %v10427_v28 = vld [vmem:[#allocation2 + $0xaa8] sm:$0xff]  ;;  %v10445_v24 = vrot.slane %v1017_v45, %v12647_v50  ;;  %v10509_v50 = vld [vmem:[#allocation2 + $0x130] sm:$0xff] }
 0x1dd   : > { %3953 = vmatprep.subr.bf16.mxu0 %v8293_v6  ;;  %4179 = vmatprep.subr.bf16.mxu1 %v8295_v9  ;;  %v10403_v9 = vld [vmem:[#allocation2 + $0xa60] sm:$0xff]  ;;  %v10449_v25 = vrot.slane %v1017_v45, %v12648_v51  ;;  %v10468_v6 = vld [vmem:[#allocation2 + $0xba8] sm:$0xff]  ;;  %v10483_v51 = vld [vmem:[#allocation2 + $0x38] sm:$0xff] }
 0x1df   : > { %3689 = vmatmul.mubr.bf16.gmra.mrb[60].mxu0 %v10217_v12  ;;  %3915 = vmatmul.mubr.bf16.gmra.mrb[60].mxu1 %v10217_v12  ;;  %v10481_v12 = vld [vmem:[#allocation2 + $0x70] sm:$0xff] }
 0x1e0   : > { %3954 = vmatpush1.bf16.msra.mxu0 %v8292_v18  ;;  %4180 = vmatpush1.bf16.msra.mxu1 %v8294_v22  ;;  %v10415_v22 = vld [vmem:[#allocation2 + $0xa68] sm:$0xff]  ;;  %v10433_v18 = vld [vmem:[#allocation2 + $0xb60] sm:$0xff] }
 0x1e1   : > { %3955 = vmatprep.subr.bf16.mxu0 %v8309_v40  ;;  %4181 = vmatprep.subr.bf16.mxu1 %v8311_v23  ;;  %v10417_v40 = vld [vmem:[#allocation2 + $0xaa0] sm:$0xff]  ;;  %v10451_v23 = vld [vmem:[#allocation2 + $0xb28] sm:$0xff] }
 0x1e2   : > { %3957 = vmatprep.mubr.bf16.mxu0 %v9989_v20  ;;  %4183 = vmatprep.mubr.bf16.mxu1 %v9989_v20  ;;  %v10472_v20 = vld [vmem:[#allocation2 + $0x30] sm:$0xff] }
 0x1e4   : > { %3956 = vmatpush1.bf16.msra.mxu0 %v8308_v60  ;;  %4182 = vmatpush1.bf16.msra.mxu1 %v8310_v53  ;;  %v10429_v60 = vld [vmem:[#allocation2 + $0xae8] sm:$0xff]  ;;  %v10437_v53 = vrot.slane %v1017_v45, %v12645_v47  ;;  %v10457_v47 = vld [vmem:[#allocation2 + $0xbe0] sm:$0xff] }
 0x1e5   : > { %4038 = vmatprep.subr.bf16.mxu0 %v8325_v43  ;;  %4264 = vmatprep.subr.bf16.mxu1 %v8327_v48  ;;  %v10441_v43 = vrot.slane %v1017_v45, %v12646_v33  ;;  %v10455_v48 = vld [vmem:[#allocation2 + $0xba0] sm:$0xff]  ;;  %v10496_v45 = vld [vmem:[#allocation2 + $0xf0] sm:$0xff]  ;;  %v10521_v33 = vld [vmem:[#allocation2 + $0x138] sm:$0xff] }
 0x1e6   : > { %12876 = vst [vmem:[#allocation45_spill] sm:$0xff] %v10521_v33  ;;  %v10606_v33 = vld [vmem:[#allocation2 + $0x378] sm:$0xff] }
 0x1e7   : > { %3958 = vmatmul.mubr.bf16.vlgmr.msra.gmra.mrb[64].mxu0 %v9980_v59  ;;  %4184 = vmatmul.mubr.bf16.vlgmr.msra.gmra.mrb[64].mxu1 %v9980_v59  ;;  %v10494_v59 = vld [vmem:[#allocation2 + $0xb0] sm:$0xff]  ;;  %12892 = vst [vmem:[#allocation57_spill] sm:$0xff] %v10606_v33 }
 0x1e8   : > { %4039 = vmatpush1.bf16.msra.mxu0 %v8324_v8  ;;  %4265 = vmatpush1.bf16.msra.mxu1 %v8326_v5  ;;  %v10558_v5 = vld [vmem:[#allocation2 + $0x270] sm:$0xff] }
 0x1e9   : > { %3967 = vmatprep.mubr.bf16.mxu0 %v10182_v26  ;;  %4193 = vmatprep.mubr.bf16.mxu1 %v10182_v26  ;;  %v10556_v26 = vld [vmem:[#allocation2 + $0x230] sm:$0xff]  ;;  %12883 = vst [vmem:[#allocation49_spill] sm:$0xff] %v10558_v5 }
 0x1ea   : > { %4040 = vmatprep.subr.bf16.mxu0 %v8341_v11  ;;  %4266 = vmatprep.subr.bf16.mxu1 %v8343_v16  ;;  %v12879_v16 = vcombine.low %v10360_v29, %v10362_v30  ;;  %v12881_v29 = vcombine.low %v10364_v31, %v10367_v32  ;;  %v12882_v30 = vcombine.high %v10369_v38, %v10371_v49  ;;  %v10575_v11 = vld [vmem:[#allocation2 + $0x2b0] sm:$0xff]  ;;  %v10669_v32 = vld [vmem:[#allocation2 + $0x4b8] sm:$0xff] }
 0x1eb   : > { %v12884_v31 = vcombine.high %v10375_v44, %v10377_v37  ;;  %v10602_v8 = vld [vmem:[#allocation2 + $0x370] sm:$0xff]  ;;  %12907 = vst [vmem:[#allocation68_spill] sm:$0xff] %v10669_v32 }
 0x1ec   : > { %4041 = vmatpush1.bf16.msra.mxu0 %v12879_v16  ;;  %4267 = vmatpush1.bf16.msra.mxu1 %v12881_v29  ;;  %v10573_v16 = vld [vmem:[#allocation2 + $0x278] sm:$0xff]  ;;  %12890 = vst [vmem:[#allocation55_spill] sm:$0xff] %v10602_v8  ;;  %v10640_v5 = vld [vmem:[#allocation2 + $0x470] sm:$0xff] }
 0x1ed   : > { %4042 = vmatprep.subr.bf16.mxu0 %v12882_v30  ;;  %4268 = vmatprep.subr.bf16.mxu1 %v12884_v31  ;;  %12885 = vst [vmem:[#allocation50_spill] sm:$0xff] %v10573_v16  ;;  %v10588_v29 = vld [vmem:[#allocation2 + $0x2b8] sm:$0xff]  ;;  %v10638_v31 = vld [vmem:[#allocation2 + $0x430] sm:$0xff]  ;;  %12901 = vst [vmem:[#allocation63_spill] sm:$0xff] %v10640_v5 }
 0x1ee   : > { %12887 = vst [vmem:[#allocation52_spill] sm:$0xff] %v10588_v29  ;;  %v10636_v30 = vld [vmem:[#allocation2 + $0x3f8] sm:$0xff]  ;;  %12900 = vst [vmem:[#allocation62_spill] sm:$0xff] %v10638_v31  ;;  %v10657_v16 = vld [vmem:[#allocation2 + $0x4b0] sm:$0xff] }
 0x1ef   : > { %3968 = vmatmul.mubr.bf16.gmra.mrb[68].mxu0 %v10072_v41  ;;  %4194 = vmatmul.mubr.bf16.gmra.mrb[68].mxu1 %v10072_v41  ;;  %v12893_v41 = vcombine.low %v10369_v38, %v10371_v49  ;;  %12899 = vst [vmem:[#allocation61_spill] sm:$0xff] %v10636_v30  ;;  %v10653_v38 = vld [vmem:[#allocation2 + $0x438] sm:$0xff]  ;;  %12905 = vst [vmem:[#allocation66_spill] sm:$0xff] %v10657_v16  ;;  %v10684_v33 = vld [vmem:[#allocation2 + $0x530] sm:$0xff] }
 0x1f0   : > { %3977 = vmatprep.mubr.bf16.mxu0 %v10212_v3  ;;  %4203 = vmatprep.mubr.bf16.mxu1 %v10212_v3  ;;  %v12897_v3 = vcombine.low %v10375_v44, %v10377_v37  ;;  %12903 = vst [vmem:[#allocation64_spill] sm:$0xff] %v10653_v38  ;;  %v10655_v49 = vld [vmem:[#allocation2 + $0x478] sm:$0xff]  ;;  %12910 = vst [vmem:[#allocation70_spill] sm:$0xff] %v10684_v33  ;;  %v10704_v37 = vld [vmem:[#allocation2 + $0x5b0] sm:$0xff] }
 0x1f1   : > { %4043 = vmatpush1.bf16.msra.mxu0 %v12893_v41  ;;  %v12898_v41 = vcombine.high %v10386_v57, %v10388_v52  ;;  %12904 = vst [vmem:[#allocation65_spill] sm:$0xff] %v10655_v49  ;;  %v10671_v29 = vld [vmem:[#allocation2 + $0x4f8] sm:$0xff]  ;;  %v12914_v57 = vcombine.high %v10401_v7, %v10403_v9  ;;  %12916 = vst [vmem:[#allocation74_spill] sm:$0xff] %v10704_v37  ;;  %v10706_v30 = vld [vmem:[#allocation2 + $0x5f0] sm:$0xff] }
 0x1f2   : > { %4269 = vmatpush1.bf16.msra.mxu1 %v12897_v3  ;;  %v12902_v3 = vcombine.high %v10390_v58, %v10392_v1  ;;  %12908 = vst [vmem:[#allocation69_spill] sm:$0xff] %v10671_v29  ;;  %v10688_v8 = vld [vmem:[#allocation2 + $0x538] sm:$0xff]  ;;  %12917 = vst [vmem:[#allocation75_spill] sm:$0xff] %v10706_v30  ;;  %v10722_v44 = vld [vmem:[#allocation2 + $0x630] sm:$0xff] }
 0x1f3   : > { %4044 = vmatprep.subr.bf16.mxu0 %v12898_v41  ;;  %12912 = vst [vmem:[#allocation72_spill] sm:$0xff] %v10688_v8  ;;  %v10718_v41 = vld [vmem:[#allocation2 + $0x5b8] sm:$0xff]  ;;  %12921 = vst [vmem:[#allocation78_spill] sm:$0xff] %v10722_v44  ;;  %v10750_v33 = vld [vmem:[#allocation2 + $0x6f0] sm:$0xff] }
 0x1f4   : > { %4270 = vmatprep.subr.bf16.mxu1 %v12902_v3  ;;  %v10702_v3 = vld [vmem:[#allocation2 + $0x578] sm:$0xff]  ;;  %12919 = vst [vmem:[#allocation76_spill] sm:$0xff] %v10718_v41  ;;  %12927 = vst [vmem:[#allocation83_spill] sm:$0xff] %v10750_v33 }
 0x1f5   : > { %4045 = vmatpush1.bf16.msra.mxu0 %v12909_v42  ;;  %v12913_v42 = vcombine.low %v10390_v58, %v10392_v1  ;;  %12915 = vst [vmem:[#allocation73_spill] sm:$0xff] %v10702_v3  ;;  %v12918_v58 = vcombine.high %v10405_v10, %v10415_v22  ;;  %v10720_v52 = vld [vmem:[#allocation2 + $0x5f8] sm:$0xff]  ;;  %v10784_v3 = vld [vmem:[#allocation2 + $0x730] sm:$0xff] }
 0x1f6   : > { %4046 = vmatprep.subr.bf16.mxu0 %v12914_v57  ;;  %12920 = vst [vmem:[#allocation77_spill] sm:$0xff] %v10720_v52  ;;  %v10732_v57 = vld [vmem:[#allocation2 + $0x670] sm:$0xff]  ;;  %v10736_v16 = vld [vmem:[#allocation2 + $0x678] sm:$0xff]  ;;  %12933 = vst [vmem:[#allocation86_spill] sm:$0xff] %v10784_v3 }
 0x1f7   : > { %4271 = vmatpush1.bf16.msra.mxu1 %v12913_v42  ;;  %3978 = vmatmul.mubr.bf16.gmra.mrb[72].mxu0 %v10124_v27  ;;  %12922 = vst [vmem:[#allocation79_spill] sm:$0xff] %v10732_v57  ;;  %12924 = vst [vmem:[#allocation81_spill] sm:$0xff] %v10736_v16  ;;  %v10766_v1 = vld [vmem:[#allocation2 + $0x6f8] sm:$0xff] }
 0x1f8   : > { %4272 = vmatprep.subr.bf16.mxu1 %v12918_v58  ;;  %4204 = vmatmul.mubr.bf16.gmra.mrb[72].mxu1 %v10124_v27  ;;  %v12925_v27 = vcombine.low %v10401_v7, %v10403_v9  ;;  %v10764_v58 = vld [vmem:[#allocation2 + $0x6b8] sm:$0xff]  ;;  %12931 = vst [vmem:[#allocation85_spill] sm:$0xff] %v10766_v1  ;;  %v10786_v7 = vld [vmem:[#allocation2 + $0x770] sm:$0xff] }
 0x1f9   : > { %3987 = vmatprep.mubr.bf16.mxu0 %v10228_v55  ;;  %4213 = vmatprep.mubr.bf16.mxu1 %v10228_v55  ;;  %v12928_v55 = vcombine.low %v10405_v10, %v10415_v22  ;;  %12930 = vst [vmem:[#allocation84_spill] sm:$0xff] %v10764_v58  ;;  %12934 = vst [vmem:[#allocation87_spill] sm:$0xff] %v10786_v7 }
 0x1fa   : > { %4047 = vmatpush1.bf16.msra.mxu0 %v12925_v27  ;;  %v3168_v29 = vpop.f32.mrb[0].mxu0  ;;  %v12929_v27 = vcombine.high %v10417_v40, %v10419_v19 }
 0x1fb   : > { %4273 = vmatpush1.bf16.msra.mxu1 %v12928_v55  ;;  %v8754_v10 = vadd.f32 %v3168_v29, %v10437_v53  ;;  %v3394_v55 = vpop.f32.mrb[0].mxu1  ;;  %v3170_v22 = vpop.f32.mrb[1].mxu0 }
 0x1fc   : > { %4048 = vmatprep.subr.bf16.mxu0 %v12929_v27  ;;  %v12932_v27 = vcombine.high %v10427_v28, %v10429_v60  ;;  %v8786_v52 = vadd.f32 %v3394_v55, %v10441_v43  ;;  %v8755_v41 = vadd.f32 %v3170_v22, %v10445_v24  ;;  %v3396_v29 = vpop.f32.mrb[1].mxu1  ;;  %v3172_v30 = vpop.f32.mrb[2].mxu0  ;;  %v12935_v22 = vcombine.low %v10417_v40, %v10419_v19 }
 0x1fd   : > { %v8787_v9 = vadd.f32 %v3396_v29, %v10449_v25  ;;  %v8756_v42 = vadd.f32 %v3172_v30, %v10437_v53  ;;  %v3398_v57 = vpop.f32.mrb[2].mxu1  ;;  %v3174_v55 = vpop.f32.mrb[3].mxu0  ;;  %v12936_v30 = vcombine.low %v10427_v28, %v10429_v60  ;;  %v12937_v29 = vcombine.high %v10431_v0, %v10433_v18  ;;  %v10814_v60 = vld [vmem:[#allocation2 + $0x738] sm:$0xff] }
 0x1fe   : > { %4274 = vmatprep.subr.bf16.mxu1 %v12932_v27  ;;  %4049 = vmatpush1.bf16.msra.mxu0 %v12935_v22  ;;  %v8788_v16 = vadd.f32 %v3398_v57, %v10441_v43  ;;  %v8757_v36 = vadd.f32 %v3174_v55, %v10445_v24  ;;  %v3400_v44 = vpop.f32.mrb[3].mxu1  ;;  %v4829_v19 = vmax.f32 %v8754_v10, 0.0  ;;  %v12938_v57 = vcombine.high %v10451_v23, %v10453_v15  ;;  %v10816_v55 = vld [vmem:[#allocation2 + $0x778] sm:$0xff] }
 0x1ff   : > { %4275 = vmatpush1.bf16.msra.mxu1 %v12936_v30  ;;  %4050 = vmatprep.subr.bf16.mxu0 %v12937_v29  ;;  %v4845_v22 = vmax.f32 %v8756_v42, 0.0  ;;  %v8789_v27 = vadd.f32 %v3400_v44, %v10449_v25  ;;  %12939 = vst [vmem:[#allocation88_spill] sm:$0xff] %v10814_v60  ;;  %12940 = vst [vmem:[#allocation89_spill] sm:$0xff] %v10816_v55  ;;  %v4831_v30 = vmax.f32 %v8786_v52, 0.0  ;;  %v4830_v29 = vmax.f32 %v8755_v41, 0.0 }
 0x200   : > { %3988 = vmatmul.mubr.bf16.gmra.mrb[76].mxu0 %v10156_v63  ;;  %4276 = vmatprep.subr.bf16.mxu1 %v12938_v57  ;;  %v4847_v40 = vmax.f32 %v8788_v16, 0.0  ;;  %v4846_v10 = vmax.f32 %v8757_v36, 0.0  ;;  %v4832_v44 = vmax.f32 %v8787_v9, 0.0  ;;  %v12941_v57 = vcombine.low %v10431_v0, %v10433_v18 }
 0x201   : > { %4214 = vmatmul.mubr.bf16.gmra.mrb[76].mxu1 %v10156_v63  ;;  %3997 = vmatprep.mubr.bf16.mxu0 %v10235_v4  ;;  %v5085_v42 = vadd.f32 %v4845_v22, %v4829_v19  ;;  %v4848_v37 = vmax.f32 %v8789_v27, 0.0  ;;  %v12942_v36 = vcombine.low %v10451_v23, %v10453_v15  ;;  %v12943_v9 = vcombine.high %v10455_v48, %v10457_v47 }
 0x202   : > { %4223 = vmatprep.mubr.bf16.mxu1 %v10235_v4  ;;  %4051 = vmatpush1.bf16.msra.mxu0 %v12941_v57  ;;  %v5099_v52 = vadd.f32 %v4847_v40, %v4831_v30  ;;  %v5092_v41 = vadd.f32 %v4846_v10, %v4830_v29  ;;  %v3178_v16 = vpop.f32.mrb[4].mxu0  ;;  %v3404_v22 = vpop.f32.mrb[4].mxu1  ;;  %v12944_v40 = vcombine.high %v10468_v6, %v10470_v21 }
 0x203   : > { %4277 = vmatpush1.bf16.msra.mxu1 %v12942_v36  ;;  %4052 = vmatprep.subr.bf16.mxu0 %v12943_v9  ;;  %v5086_v19 = vrot.slane %v5085_v42, 4  ;;  %v5106_v0 = vadd.f32 %v4848_v37, %v4832_v44  ;;  %v8758_v18 = vadd.f32 %v3178_v16, %v10437_v53  ;;  %v3180_v57 = vpop.f32.mrb[5].mxu0  ;;  %v8790_v29 = vadd.f32 %v3404_v22, %v10441_v43  ;;  %v3406_v36 = vpop.f32.mrb[5].mxu1 }
 0x204   : > { %4278 = vmatprep.subr.bf16.mxu1 %v12944_v40  ;;  %v5100_v23 = vrot.slane %v5099_v52, 4  ;;  %v5093_v30 = vrot.slane %v5092_v41, 4  ;;  %v8759_v10 = vadd.f32 %v3180_v57, %v10445_v24  ;;  %v3182_v9 = vpop.f32.mrb[6].mxu0  ;;  %v8791_v27 = vadd.f32 %v3406_v36, %v10449_v25  ;;  %v3408_v28 = vpop.f32.mrb[6].mxu1 }
 0x205   : > { %v5087_v37 = vadd.f32 %v5086_v19, %v5085_v42  ;;  %v5107_v44 = vrot.slane %v5106_v0, 4  ;;  %v4861_v16 = vmax.f32 %v8758_v18, 0.0  ;;  %v3184_v4 = vpop.f32.mrb[7].mxu0  ;;  %v12945_v40 = vcombine.low %v10455_v48, %v10457_v47  ;;  %v3410_v22 = vpop.f32.mrb[7].mxu1 }
 0x206   : > { %v5101_v15 = vadd.f32 %v5100_v23, %v5099_v52  ;;  %v5094_v63 = vadd.f32 %v5093_v30, %v5092_v41  ;;  %v4863_v55 = vmax.f32 %v8790_v29, 0.0  ;;  %v4862_v60 = vmax.f32 %v8759_v10, 0.0 }
 0x207   : > { %4053 = vmatpush1.bf16.msra.mxu0 %v12945_v40  ;;  %v12946_v57 = vcombine.low %v10468_v6, %v10470_v21  ;;  %v12947_v42 = vcombine.high %v10472_v20, %v10481_v12  ;;  %v5088_v19 = vrot.slane %v5087_v37, 2  ;;  %v5108_v18 = vadd.f32 %v5107_v44, %v5106_v0 }
 0x208   : > { %v4864_v36 = vmax.f32 %v8791_v27, 0.0  ;;  %v8760_v7 = vadd.f32 %v3182_v9, %v10437_v53  ;;  %3998 = vmatmul.mubr.bf16.gmra.mrb[80].mxu0 %v10191_v56  ;;  %v12948_v47 = vcombine.high %v10483_v51, %v10485_v61  ;;  %v5102_v48 = vrot.slane %v5101_v15, 2 }
 0x209   : > { %4279 = vmatpush1.bf16.msra.mxu1 %v12946_v57  ;;  %4377 = vmatprep.subr.bf16.mxu0 %v12947_v42  ;;  %v5095_v52 = vrot.slane %v5094_v63, 2  ;;  %v8792_v21 = vadd.f32 %v3408_v28, %v10441_v43  ;;  %v8761_v6 = vadd.f32 %v3184_v4, %v10445_v24  ;;  %v5089_v41 = vadd.f32 %v5088_v19, %v5087_v37 }
 0x20a   : > { %4603 = vmatprep.subr.bf16.mxu1 %v12948_v47  ;;  %4224 = vmatmul.mubr.bf16.gmra.mrb[80].mxu1 %v10191_v56  ;;  %v5109_v27 = vrot.slane %v5108_v18, 2  ;;  %v4877_v0 = vmax.f32 %v8760_v7, 0.0  ;;  %v8793_v23 = vadd.f32 %v3410_v22, %v10449_v25  ;;  %v5103_v30 = vadd.f32 %v5102_v48, %v5101_v15  ;;  %v3188_v44 = vpop.f32.mrb[8].mxu0  ;;  %v3414_v42 = vpop.f32.mrb[8].mxu1 }
 0x20b   : > { %4007 = vmatprep.mubr.bf16.mxu0 %v10050_v17  ;;  %4233 = vmatprep.mubr.bf16.mxu1 %v10050_v17  ;;  %v5096_v29 = vadd.f32 %v5095_v52, %v5094_v63  ;;  %v4879_v10 = vmax.f32 %v8792_v21, 0.0  ;;  %v4878_v9 = vmax.f32 %v8761_v6, 0.0  ;;  %v5090_v40 = vrot.slane %v5089_v41, 1  ;;  %v3190_v47 = vpop.f32.mrb[9].mxu0  ;;  %v3416_v7 = vpop.f32.mrb[9].mxu1 }
 0x20c   : > { %v5110_v28 = vadd.f32 %v5109_v27, %v5108_v18  ;;  %v5197_v57 = vadd.f32 %v4877_v0, %v4861_v16  ;;  %v4880_v4 = vmax.f32 %v8793_v23, 0.0  ;;  %v5104_v56 = vrot.slane %v5103_v30, 1  ;;  %v3192_v1 = vpop.f32.mrb[10].mxu0  ;;  %v3418_v63 = vpop.f32.mrb[10].mxu1 }
 0x20d   : > { %v5097_v3 = vrot.slane %v5096_v29, 1  ;;  %v5211_v37 = vadd.f32 %v4879_v10, %v4863_v55  ;;  %v5204_v19 = vadd.f32 %v4878_v9, %v4862_v60  ;;  %v5091_v22 = vadd.f32 %v5090_v40, %v5089_v41  ;;  %v3194_v48 = vpop.f32.mrb[11].mxu0  ;;  %v3420_v16 = vpop.f32.mrb[11].mxu1 }
 0x20e   : > { %v5111_v58 = vrot.slane %v5110_v28, 1  ;;  %v5198_v17 = vrot.slane %v5197_v57, 4  ;;  %v5218_v15 = vadd.f32 %v4880_v4, %v4864_v36  ;;  %v5105_v52 = vadd.f32 %v5104_v56, %v5103_v30  ;;  %v12949_v30 = vld [vmem:[#allocation24_spill] sm:$0xff] }
 0x20f   : > { %v5098_v21 = vadd.f32 %v5097_v3, %v5096_v29  ;;  %v5212_v6 = vrot.slane %v5211_v37, 4  ;;  %v5205_v18 = vrot.slane %v5204_v19, 4  ;;  %v5981_v27 = vpack.c.bf16 %v5091_v22, %v5091_v22 }
 0x210   : > { %v5112_v0 = vadd.f32 %v5111_v58, %v5110_v28  ;;  %v5199_v23 = vadd.f32 %v5198_v17, %v5197_v57  ;;  %v5219_v33 = vrot.slane %v5218_v15, 4  ;;  %4008 = vmatmul.mubr.bf16.gmra.mrb[84].mxu0 %v9998_v39  ;;  %v5983_v60 = vpack.c.bf16 %v5105_v52, %v5105_v52 }
 0x211   : > { %v5982_v55 = vpack.c.bf16 %v5098_v21, %v5098_v21  ;;  %v5213_v10 = vadd.f32 %v5212_v6, %v5211_v37  ;;  %v5206_v41 = vadd.f32 %v5205_v18, %v5204_v19  ;;  %v10865_v36 = vunpack.c.l.b16 %v5981_v27  ;;  %4017 = vmatprep.mubr.bf16.mxu0 %v12949_v30 }
 0x212   : > { %4234 = vmatmul.mubr.bf16.gmra.mrb[84].mxu1 %v9998_v39  ;;  %v5984_v9 = vpack.c.bf16 %v5112_v0, %v5112_v0  ;;  %v5200_v56 = vrot.slane %v5199_v23, 2  ;;  %v5220_v3 = vadd.f32 %v5219_v33, %v5218_v15  ;;  %v10869_v58 = vunpack.c.l.b16 %v5983_v60  ;;  %v10873_v28 = vpop.f32.mrb[12].mxu0  ;;  %v10878_v33 = vpop.f32.mrb[12].mxu1 }
 0x213   : > { %4243 = vmatprep.mubr.bf16.mxu1 %v12949_v30  ;;  %v10871_v17 = vunpack.c.l.b16 %v5982_v55  ;;  %v5214_v29 = vrot.slane %v5213_v10, 2  ;;  %v5207_v40 = vrot.slane %v5206_v41, 2  ;;  %v8762_v19 = vadd.f32 %v3188_v44, %v10437_v53  ;;  %v10880_v22 = vpop.f32.mrb[13].mxu0  ;;  %v10884_v18 = vpop.f32.mrb[13].mxu1 }
 0x214   : > { %v10875_v57 = vunpack.c.l.b16 %v5984_v9  ;;  %v5201_v4 = vadd.f32 %v5200_v56, %v5199_v23  ;;  %v5221_v37 = vrot.slane %v5220_v3, 2  ;;  %v8794_v21 = vadd.f32 %v3414_v42, %v10441_v43  ;;  %v10886_v27 = vpop.f32.mrb[14].mxu0  ;;  %v10889_v44 = vpop.f32.mrb[14].mxu1 }
 0x215   : > { %v5215_v15 = vadd.f32 %v5214_v29, %v5213_v10  ;;  %v5208_v52 = vadd.f32 %v5207_v40, %v5206_v41  ;;  %v8763_v6 = vadd.f32 %v3190_v47, %v10445_v24  ;;  %v4893_v23 = vmax.f32 %v8762_v19, 0.0  ;;  %v10891_v9 = vpop.f32.mrb[15].mxu0  ;;  %v10893_v42 = vpop.f32.mrb[15].mxu1 }
 0x216   : > { %v5202_v0 = vrot.slane %v5201_v4, 1  ;;  %v5222_v60 = vadd.f32 %v5221_v37, %v5220_v3  ;;  %v8795_v55 = vadd.f32 %v3416_v7, %v10449_v25  ;;  %v4895_v41 = vmax.f32 %v8794_v21, 0.0 }
 0x217   : > { %v5216_v56 = vrot.slane %v5215_v15, 1  ;;  %v5209_v10 = vrot.slane %v5208_v52, 1  ;;  %v4894_v29 = vmax.f32 %v8763_v6, 0.0  ;;  %v8764_v39 = vadd.f32 %v3192_v1, %v10437_v53 }
 0x218   : > { %v5203_v47 = vadd.f32 %v5202_v0, %v5201_v4  ;;  %v5223_v40 = vrot.slane %v5222_v60, 1  ;;  %v4896_v30 = vmax.f32 %v8795_v55, 0.0  ;;  %4018 = vmatmul.mubr.bf16.gmra.mrb[88].mxu0 %v12950_v34  ;;  %v8796_v7 = vadd.f32 %v3418_v63, %v10441_v43  ;;  %v12951_v4 = vld [vmem:[#allocation26_spill] sm:$0xff] }
 0x219   : > { %v5217_v3 = vadd.f32 %v5216_v56, %v5215_v15  ;;  %v5210_v37 = vadd.f32 %v5209_v10, %v5208_v52  ;;  %v8765_v19 = vadd.f32 %v3194_v48, %v10445_v24  ;;  %v4909_v6 = vmax.f32 %v8764_v39, 0.0  ;;  %4027 = vmatprep.mubr.bf16.mxu0 %v12951_v4 }
 0x21a   : > { %4244 = vmatmul.mubr.bf16.gmra.mrb[88].mxu1 %v12950_v34  ;;  %v5997_v8 = vpack.c.bf16 %v5203_v47, %v5203_v47  ;;  %v5224_v21 = vadd.f32 %v5223_v40, %v5222_v60  ;;  %v8797_v32 = vadd.f32 %v3420_v16, %v10449_v25  ;;  %v4911_v55 = vmax.f32 %v8796_v7, 0.0  ;;  %v10903_v52 = vpop.f32.mrb[16].mxu0  ;;  %v10905_v34 = vpop.f32.mrb[16].mxu1 }
 0x21b   : > { %4253 = vmatprep.mubr.bf16.mxu1 %v12951_v4  ;;  %v5999_v1 = vpack.c.bf16 %v5217_v3, %v5217_v3  ;;  %v5998_v0 = vpack.c.bf16 %v5210_v37, %v5210_v37  ;;  %v4910_v15 = vmax.f32 %v8765_v19, 0.0  ;;  %v5309_v48 = vadd.f32 %v4909_v6, %v4893_v23  ;;  %v10907_v60 = vpop.f32.mrb[17].mxu0  ;;  %v10909_v49 = vpop.f32.mrb[17].mxu1 }
 0x21c   : > { %v6523_v63 = vunpack.c.l.b16 %v5997_v8  ;;  %v6000_v56 = vpack.c.bf16 %v5224_v21, %v5224_v21  ;;  %v4912_v10 = vmax.f32 %v8797_v32, 0.0  ;;  %v5323_v47 = vadd.f32 %v4911_v55, %v4895_v41  ;;  %v10911_v3 = vpop.f32.mrb[18].mxu0  ;;  %v10917_v32 = vpop.f32.mrb[18].mxu1 }
 0x21d   : > { %v6525_v39 = vunpack.c.l.b16 %v5999_v1  ;;  %v6524_v16 = vunpack.c.l.b16 %v5998_v0  ;;  %v5316_v40 = vadd.f32 %v4910_v15, %v4894_v29  ;;  %v5310_v7 = vrot.slane %v5309_v48, 4  ;;  %v10919_v19 = vpop.f32.mrb[19].mxu0  ;;  %v10929_v1 = vpop.f32.mrb[19].mxu1  ;;  %v12952_v15 = vld [vmem:[#allocation21_spill] sm:$0xff] }
 0x21e   : > { %v10915_v37 = vsel %vm6635_vm2, %v6523_v63, %v10865_v36  ;;  %v6526_v8 = vunpack.c.l.b16 %v6000_v56  ;;  %v5330_v23 = vadd.f32 %v4912_v10, %v4896_v30  ;;  %v5324_v29 = vrot.slane %v5323_v47, 4 }
 0x21f   : > { %v10923_v21 = vsel %vm6635_vm2, %v6525_v39, %v10869_v58  ;;  %v10927_v41 = vsel %vm6635_vm2, %v6524_v16, %v10871_v17  ;;  %v5317_v6 = vrot.slane %v5316_v40, 4  ;;  %v5311_v30 = vadd.f32 %v5310_v7, %v5309_v48 }
 0x220   : > { %v10933_v36 = vsel %vm6635_vm2, %v6526_v8, %v10875_v57  ;;  %v5331_v0 = vrot.slane %v5330_v23, 4  ;;  %v8766_v55 = vadd.f32 %v10873_v28, %v10437_v53  ;;  %4028 = vmatmul.mubr.bf16.gmra.mrb[92].mxu0 %v12952_v15  ;;  %v5325_v58 = vadd.f32 %v5324_v29, %v5323_v47 }
 0x221   : > { %v5318_v63 = vadd.f32 %v5317_v6, %v5316_v40  ;;  %v8798_v17 = vadd.f32 %v10878_v33, %v10441_v43  ;;  %v8767_v56 = vadd.f32 %v10880_v22, %v10445_v24  ;;  %v5312_v10 = vrot.slane %v5311_v30, 2 }
 0x222   : > { %4254 = vmatmul.mubr.bf16.gmra.mrb[92].mxu1 %v12952_v15  ;;  %v5332_v57 = vadd.f32 %v5331_v0, %v5330_v23  ;;  %v4925_v39 = vmax.f32 %v8766_v55, 0.0  ;;  %v8799_v48 = vadd.f32 %v10884_v18, %v10449_v25  ;;  %v12953_v16 = vmov 0   ;;  %v10947_v8 = vpop.f32.mrb[20].mxu0  ;;  %v10951_v6 = vpop.f32.mrb[20].mxu1 }
 0x223   : > { %4070 = vmatprep.mubr.bf16.mxu0 %v12953_v16  ;;  %4296 = vmatprep.mubr.bf16.mxu1 %v12953_v16  ;;  %v5326_v28 = vrot.slane %v5325_v58, 2  ;;  %v5319_v47 = vrot.slane %v5318_v63, 2  ;;  %v4927_v40 = vmax.f32 %v8798_v17, 0.0  ;;  %v4926_v33 = vmax.f32 %v8767_v56, 0.0  ;;  %v10953_v18 = vpop.f32.mrb[21].mxu0  ;;  %v10959_v56 = vpop.f32.mrb[21].mxu1 }
 0x224   : > { %v5313_v22 = vadd.f32 %v5312_v10, %v5311_v30  ;;  %v5333_v7 = vrot.slane %v5332_v57, 2  ;;  %v4928_v29 = vmax.f32 %v8799_v48, 0.0  ;;  %v8768_v23 = vadd.f32 %v10886_v27, %v10437_v53  ;;  %v10961_v30 = vpop.f32.mrb[22].mxu0  ;;  %v10965_v38 = vpop.f32.mrb[22].mxu1 }
 0x225   : > { %v5327_v0 = vadd.f32 %v5326_v28, %v5325_v58  ;;  %v5320_v55 = vadd.f32 %v5319_v47, %v5318_v63  ;;  %v8800_v15 = vadd.f32 %v10889_v44, %v10441_v43  ;;  %v8769_v17 = vadd.f32 %v10891_v9, %v10445_v24  ;;  %12954 = vst [vmem:[#allocation90_spill] sm:$0xff] %v10965_v38  ;;  %v10967_v58 = vpop.f32.mrb[23].mxu0  ;;  %v10969_v5 = vpop.f32.mrb[23].mxu1 }
 0x226   : > { %v5314_v10 = vrot.slane %v5313_v22, 1  ;;  %v5334_v48 = vadd.f32 %v5333_v7, %v5332_v57  ;;  %v4941_v4 = vmax.f32 %v8768_v23, 0.0  ;;  %v8801_v27 = vadd.f32 %v10893_v42, %v10449_v25  ;;  %12955 = vst [vmem:[#allocation91_spill] sm:$0xff] %v10967_v58  ;;  %12956 = vst [vmem:[#allocation92_spill] sm:$0xff] %v10969_v5  ;;  %v10972_v57 = vld [vmem:[#allocation2 + $0x7b0] sm:$0xff] }
 0x227   : > { %v5328_v63 = vrot.slane %v5327_v0, 1  ;;  %v5321_v28 = vrot.slane %v5320_v55, 1  ;;  %v4943_v44 = vmax.f32 %v8800_v15, 0.0  ;;  %v4942_v47 = vmax.f32 %v8769_v17, 0.0  ;;  %v10974_v7 = vld [vmem:[#allocation2 + $0x7f0] sm:$0xff] }
 0x228   : > { %v5315_v9 = vadd.f32 %v5314_v10, %v5313_v22  ;;  %v5335_v31 = vrot.slane %v5334_v48, 1  ;;  %v5421_v54 = vadd.f32 %v4941_v4, %v4925_v39  ;;  %v4944_v14 = vmax.f32 %v8801_v27, 0.0  ;;  %4071 = vmatmul.mubr.bf16.vlgmr.msra.gmra.mrb[64].mxu0 %v12957_v46 }
 0x229   : > { %v5329_v42 = vadd.f32 %v5328_v63, %v5327_v0  ;;  %v5322_v23 = vadd.f32 %v5321_v28, %v5320_v55  ;;  %v5435_v38 = vadd.f32 %v4943_v44, %v4927_v40  ;;  %v5428_v58 = vadd.f32 %v4942_v47, %v4926_v33  ;;  %4080 = vmatprep.mubr.bf16.mxu0 %v12953_v16 }
 0x22a   : > { %4297 = vmatmul.mubr.bf16.vlgmr.msra.gmra.mrb[64].mxu1 %v12957_v46  ;;  %v6013_v15 = vpack.c.bf16 %v5315_v9, %v5315_v9  ;;  %v5336_v17 = vadd.f32 %v5335_v31, %v5334_v48  ;;  %v5422_v35 = vrot.slane %v5421_v54, 4  ;;  %v10977_v5 = vadd.f32 %v4944_v14, %v4928_v29  ;;  %v10985_v40 = vpop.f32.mrb[24].mxu0  ;;  %v12961_v31 = vld [vmem:[#allocation42_spill] sm:$0xff]  ;;  %v12962_v14 = vld [vmem:[#allocation43_spill] sm:$0xff]  ;;  %v10999_v63 = vpop.f32.mrb[24].mxu1 }
 0x22b   : > { %v12958_v4 = vcombine.low %v10472_v20, %v10481_v12  ;;  %v12959_v39 = vcombine.low %v10483_v51, %v10485_v61  ;;  %v6015_v22 = vpack.c.bf16 %v5329_v42, %v5329_v42  ;;  %v6014_v0 = vpack.c.bf16 %v5322_v23, %v5322_v23  ;;  %v10995_v12 = vld [vmem:[#allocation2 + $0x7b8] sm:$0xff]  ;;  %v11001_v28 = vpop.f32.mrb[25].mxu0  ;;  %4306 = vmatprep.mubr.bf16.mxu1 %v12953_v16  ;;  %v11005_v42 = vpop.f32.mrb[25].mxu1  ;;  %v11063_v46 = vld [vmem:[#allocation2 + $0x8f0] sm:$0xff] }
 0x22c   : > { %v5436_v55 = vrot.slane %v5435_v38, 4  ;;  %v12960_v33 = vcombine.high %v10494_v59, %v10496_v45  ;;  %v12963_v29 = vcombine.high %v12961_v31, %v12962_v14  ;;  %v10997_v61 = vld [vmem:[#allocation2 + $0x7f8] sm:$0xff]  ;;  %v6539_v51 = vunpack.c.l.b16 %v6013_v15  ;;  %v11007_v23 = vpop.f32.mrb[26].mxu0  ;;  %v11061_v15 = vld [vmem:[#allocation2 + $0x8b0] sm:$0xff]  ;;  %12978 = vst [vmem:[#allocation94_spill] sm:$0xff] %v11063_v46 }
 0x22d   : > { %4378 = vmatpush1.bf16.msra.mxu0 %v12958_v4  ;;  %4604 = vmatpush1.bf16.msra.mxu1 %v12959_v39  ;;  %v6016_v10 = vpack.c.bf16 %v5336_v17, %v5336_v17  ;;  %v5423_v48 = vadd.f32 %v5422_v35, %v5421_v54  ;;  %v5429_v27 = vrot.slane %v5428_v58, 4  ;;  %v6541_v44 = vunpack.c.l.b16 %v6015_v22  ;;  %v11015_v4 = vpop.f32.mrb[26].mxu1  ;;  %v11023_v22 = vpop.f32.mrb[27].mxu0  ;;  %v12977_v20 = vld [vmem:[#allocation27_spill] sm:$0xff] }
 0x22e   : > { %4379 = vmatprep.subr.bf16.mxu0 %v12960_v33  ;;  %4605 = vmatprep.subr.bf16.mxu1 %v12963_v29  ;;  %v6540_v47 = vunpack.c.l.b16 %v6014_v0  ;;  %v5437_v9 = vadd.f32 %v5436_v55, %v5435_v38  ;;  %v11013_v54 = vsel %vm6637_vm3, %v6539_v51, %v10915_v37  ;;  %v12964_v39 = vcombine.low %v10494_v59, %v10496_v45  ;;  %v11027_v55 = vld [vmem:[#allocation2 + $0x830] sm:$0xff]  ;;  %v12969_v29 = vld [vmem:[#allocation44_spill] sm:$0xff] }
 0x22f   : > { %v6542_v35 = vunpack.c.l.b16 %v6016_v10  ;;  %v5424_v17 = vrot.slane %v5423_v48, 2  ;;  %v12965_v38 = vcombine.low %v12961_v31, %v12962_v14  ;;  %12966 = vst [vmem:[#allocation42_spill] sm:$0xff] %v11027_v55  ;;  %v11029_v37 = vld [vmem:[#allocation2 + $0x870] sm:$0xff]  ;;  %v11033_v33 = vsel %vm6637_vm3, %v6541_v44, %v10923_v21  ;;  %v11040_v14 = vpop.f32.mrb[27].mxu1  ;;  %v12971_v10 = vld [vmem:[#allocation45_spill] sm:$0xff]  ;;  %v11048_v21 = vld [vmem:[#allocation2 + $0x838] sm:$0xff] }
 0x230   : > { %12967 = vst [vmem:[#allocation43_spill] sm:$0xff] %v11029_v37  ;;  %v11037_v59 = vsel %vm6637_vm3, %v6540_v47, %v10927_v41  ;;  %v5438_v45 = vrot.slane %v5437_v9, 2  ;;  %v5443_v31 = vrot.slane %v10977_v5, 4  ;;  %v12970_v51 = vcombine.high %v10509_v50, %v12969_v29  ;;  %12974 = vst [vmem:[#allocation44_spill] sm:$0xff] %v11048_v21  ;;  %v11050_v44 = vld [vmem:[#allocation2 + $0x878] sm:$0xff]  ;;  %4081 = vmatmul.mubr.bf16.gmra.mrb[68].mxu0 %v12977_v20  ;;  %v12989_v37 = vld [vmem:[#allocation50_spill] sm:$0xff] }
 0x231   : > { %4380 = vmatpush1.bf16.msra.mxu0 %v12964_v39  ;;  %4606 = vmatpush1.bf16.msra.mxu1 %v12965_v38  ;;  %12968 = vst [vmem:[#allocation93_spill] sm:$0xff] %v11037_v59  ;;  %v12972_v39 = vld [vmem:[#allocation46_spill] sm:$0xff]  ;;  %12975 = vst [vmem:[#allocation45_spill] sm:$0xff] %v11050_v44  ;;  %v11054_v41 = vsel %vm6637_vm3, %v6542_v35, %v10933_v36  ;;  %v5425_v47 = vadd.f32 %v5424_v17, %v5423_v48  ;;  %v11144_v55 = vld [vmem:[#allocation2 + $0x8f8] sm:$0xff] }
 0x232   : > { %4381 = vmatprep.subr.bf16.mxu0 %v12970_v51  ;;  %v12973_v38 = vcombine.high %v12971_v10, %v12972_v39  ;;  %12976 = vst [vmem:[#allocation46_spill] sm:$0xff] %v11054_v41  ;;  %v11056_v0 = vadd.f32 %v5429_v27, %v5428_v58  ;;  %v8770_v59 = vadd.f32 %v10903_v52, %v10437_v53  ;;  %v11089_v58 = vpop.f32.mrb[28].mxu0  ;;  %v11104_v52 = vpop.f32.mrb[28].mxu1 }
 0x233   : > { %4307 = vmatmul.mubr.bf16.gmra.mrb[68].mxu1 %v12977_v20  ;;  %v5426_v48 = vrot.slane %v5425_v47, 1  ;;  %v8802_v27 = vadd.f32 %v10905_v34, %v10441_v43  ;;  %v12979_v35 = vcombine.low %v10509_v50, %v12969_v29  ;;  %v11085_v36 = vadd.f32 %v5443_v31, %v10977_v5  ;;  %v12981_v50 = vld [vmem:[#allocation47_spill] sm:$0xff]  ;;  %v12982_v29 = vld [vmem:[#allocation48_spill] sm:$0xff]  ;;  %v11106_v17 = vpop.f32.mrb[29].mxu0  ;;  %4090 = vmatprep.mubr.bf16.mxu0 %v12953_v16 }
 0x234   : > { %4607 = vmatprep.subr.bf16.mxu1 %v12973_v38  ;;  %v5439_v38 = vadd.f32 %v5438_v45, %v5437_v9  ;;  %v12980_v9 = vcombine.low %v12971_v10, %v12972_v39  ;;  %v8771_v34 = vadd.f32 %v10907_v60, %v10445_v24  ;;  %v12984_v10 = vcombine.high %v10540_v13, %v10542_v2  ;;  %v11116_v39 = vpop.f32.mrb[30].mxu0 }
 0x235   : > { %4382 = vmatpush1.bf16.msra.mxu0 %v12979_v35  ;;  %v12983_v35 = vcombine.high %v12981_v50, %v12982_v29  ;;  %v5431_v5 = vrot.slane %v11056_v0, 2  ;;  %v8803_v31 = vadd.f32 %v10909_v49, %v10449_v25  ;;  %v8772_v60 = vadd.f32 %v10911_v3, %v10437_v53  ;;  %4316 = vmatprep.mubr.bf16.mxu1 %v12953_v16  ;;  %v11114_v49 = vpop.f32.mrb[29].mxu1 }
 0x236   : > { %4608 = vmatpush1.bf16.msra.mxu1 %v12980_v9  ;;  %v5440_v45 = vrot.slane %v5439_v38, 1  ;;  %v5427_v9 = vadd.f32 %v5426_v48, %v5425_v47  ;;  %v8804_v47 = vadd.f32 %v10917_v32, %v10441_v43  ;;  %v8773_v48 = vadd.f32 %v10919_v19, %v10445_v24  ;;  %v11120_v44 = vpop.f32.mrb[30].mxu1  ;;  %v11128_v19 = vpop.f32.mrb[31].mxu0  ;;  %12993 = vst [vmem:[#allocation48_spill] sm:$0xff] %v11144_v55 }
 0x237   : > { %4383 = vmatprep.subr.bf16.mxu0 %v12983_v35  ;;  %4609 = vmatprep.subr.bf16.mxu1 %v12984_v10  ;;  %v4957_v10 = vmax.f32 %v8770_v59, 0.0  ;;  %v4959_v51 = vmax.f32 %v8802_v27, 0.0  ;;  %v4973_v20 = vmax.f32 %v8772_v60, 0.0  ;;  %v8805_v41 = vadd.f32 %v10929_v1, %v10449_v25  ;;  %v11130_v60 = vpop.f32.mrb[31].mxu1  ;;  %v12987_v1 = vld [vmem:[#allocation49_spill] sm:$0xff] }
 0x238   : > { %v5441_v35 = vadd.f32 %v5440_v45, %v5439_v38  ;;  %v6029_v3 = vpack.c.bf16 %v5427_v9, %v5427_v9  ;;  %v12985_v59 = vcombine.low %v12981_v50, %v12982_v29  ;;  %v12986_v32 = vcombine.low %v10540_v13, %v10542_v2 }
 0x239   : > { %v4958_v45 = vmax.f32 %v8771_v34, 0.0  ;;  %v4975_v9 = vmax.f32 %v8804_v47, 0.0  ;;  %v4974_v27 = vmax.f32 %v8773_v48, 0.0  ;;  %v12988_v21 = vcombine.high %v10556_v26, %v12987_v1 }
 0x23a   : > { %4384 = vmatpush1.bf16.msra.mxu0 %v12985_v59  ;;  %4610 = vmatpush1.bf16.msra.mxu1 %v12986_v32  ;;  %v6031_v38 = vpack.c.bf16 %v5441_v35, %v5441_v35  ;;  %v12990_v50 = vcombine.high %v10560_v62, %v12989_v37  ;;  %v6555_v29 = vunpack.c.l.b16 %v6029_v3  ;;  %v4960_v59 = vmax.f32 %v8803_v31, 0.0  ;;  %v12991_v32 = vld [vmem:[#allocation29_spill] sm:$0xff] }
 0x23b   : > { %4385 = vmatprep.subr.bf16.mxu0 %v12988_v21  ;;  %v5533_v13 = vadd.f32 %v4973_v20, %v4957_v10  ;;  %v4976_v2 = vmax.f32 %v8805_v41, 0.0  ;;  %4091 = vmatmul.mubr.bf16.gmra.mrb[72].mxu0 %v12991_v32  ;;  %v5445_v34 = vrot.slane %v11085_v36, 2  ;;  %v5547_v47 = vadd.f32 %v4975_v9, %v4959_v51  ;;  %v11142_v21 = vld [vmem:[#allocation2 + $0x8b8] sm:$0xff] }
 0x23c   : > { %4611 = vmatprep.subr.bf16.mxu1 %v12990_v50  ;;  %v6557_v35 = vunpack.c.l.b16 %v6031_v38  ;;  %v5540_v48 = vadd.f32 %v4974_v27, %v4958_v45  ;;  %4317 = vmatmul.mubr.bf16.gmra.mrb[72].mxu1 %v12991_v32  ;;  %12992 = vst [vmem:[#allocation47_spill] sm:$0xff] %v11142_v21  ;;  %v11148_v31 = vsel %vm6639_vm4, %v6555_v29, %v11013_v54  ;;  %v12998_v27 = vld [vmem:[#allocation52_spill] sm:$0xff] }
 0x23d   : > { %4100 = vmatprep.mubr.bf16.mxu0 %v12953_v16  ;;  %v11151_v20 = vadd.f32 %v5431_v5, %v11056_v0  ;;  %v5534_v41 = vrot.slane %v5533_v13, 4  ;;  %v5554_v10 = vadd.f32 %v4976_v2, %v4960_v59  ;;  %v12994_v51 = vcombine.low %v10556_v26, %v12987_v1  ;;  %v12996_v5 = vld [vmem:[#allocation51_spill] sm:$0xff]  ;;  %v12999_v26 = vld [vmem:[#allocation53_spill] sm:$0xff]  ;;  %4326 = vmatprep.mubr.bf16.mxu1 %v12953_v16  ;;  %v13018_v32 = vld [vmem:[#allocation60_spill] sm:$0xff] }
 0x23e   : > { %v12995_v3 = vcombine.low %v10560_v62, %v12989_v37  ;;  %v11161_v38 = vsel %vm6639_vm4, %v6557_v35, %v11033_v33  ;;  %v5548_v45 = vrot.slane %v5547_v47, 4  ;;  %v5541_v54 = vrot.slane %v5540_v48, 4  ;;  %v13012_v37 = vld [vmem:[#allocation92_spill] sm:$0xff] }
 0x23f   : > { %4386 = vmatpush1.bf16.msra.mxu0 %v12994_v51  ;;  %v8774_v0 = vadd.f32 %v10947_v8, %v10437_v53  ;;  %v12997_v9 = vcombine.high %v10575_v11, %v12996_v5  ;;  %v13000_v1 = vcombine.high %v12998_v27, %v12999_v26  ;;  %v5535_v50 = vadd.f32 %v5534_v41, %v5533_v13 }
 0x240   : > { %4612 = vmatpush1.bf16.msra.mxu1 %v12995_v3  ;;  %v5555_v62 = vrot.slane %v5554_v10, 4  ;;  %v11177_v8 = vadd.f32 %v5445_v34, %v11085_v36  ;;  %v5549_v29 = vadd.f32 %v5548_v45, %v5547_v47  ;;  %v8806_v59 = vadd.f32 %v10951_v6, %v10441_v43  ;;  %v13003_v45 = vld [vmem:[#allocation54_spill] sm:$0xff] }
 0x241   : > { %4387 = vmatprep.subr.bf16.mxu0 %v12997_v9  ;;  %4613 = vmatprep.subr.bf16.mxu1 %v13000_v1  ;;  %v5433_v13 = vrot.slane %v11151_v20, 1  ;;  %v5536_v35 = vrot.slane %v5535_v50, 2  ;;  %v11184_v41 = vadd.f32 %v5541_v54, %v5540_v48  ;;  %v8775_v51 = vadd.f32 %v10953_v18, %v10445_v24  ;;  %v13004_v54 = vld [vmem:[#allocation55_spill] sm:$0xff]  ;;  %v13006_v9 = vld [vmem:[#allocation56_spill] sm:$0xff] }
 0x242   : > { %v13001_v3 = vcombine.low %v10575_v11, %v12996_v5  ;;  %v13002_v36 = vcombine.low %v12998_v27, %v12999_v26  ;;  %v5550_v6 = vrot.slane %v5549_v29, 2  ;;  %v4989_v34 = vmax.f32 %v8774_v0, 0.0  ;;  %v13007_v11 = vld [vmem:[#allocation57_spill] sm:$0xff]  ;;  %v13009_v26 = vld [vmem:[#allocation90_spill] sm:$0xff]  ;;  %v13010_v0 = vld [vmem:[#allocation91_spill] sm:$0xff] }
 0x243   : > { %v8807_v47 = vadd.f32 %v10959_v56, %v10449_v25  ;;  %v8776_v48 = vadd.f32 %v10961_v30, %v10437_v53  ;;  %v13005_v18 = vcombine.high %v13003_v45, %v13004_v54  ;;  %v13008_v5 = vcombine.high %v13006_v9, %v13007_v11  ;;  %v13011_v56 = vld [vmem:[#allocation30_spill] sm:$0xff] }
 0x244   : > { %4388 = vmatpush1.bf16.msra.mxu0 %v13001_v3  ;;  %4614 = vmatpush1.bf16.msra.mxu1 %v13002_v36  ;;  %v5537_v1 = vadd.f32 %v5536_v35, %v5535_v50  ;;  %v5556_v27 = vadd.f32 %v5555_v62, %v5554_v10  ;;  %v8808_v3 = vadd.f32 %v13009_v26, %v10441_v43  ;;  %v4991_v30 = vmax.f32 %v8806_v59, 0.0  ;;  %v13015_v26 = vld [vmem:[#allocation58_spill] sm:$0xff] }
 0x245   : > { %4389 = vmatprep.subr.bf16.mxu0 %v13005_v18  ;;  %4615 = vmatprep.subr.bf16.mxu1 %v13008_v5  ;;  %v8777_v36 = vadd.f32 %v13010_v0, %v10445_v24  ;;  %v5551_v33 = vadd.f32 %v5550_v6, %v5549_v29  ;;  %v5005_v2 = vmax.f32 %v8776_v48, 0.0  ;;  %v8809_v18 = vadd.f32 %v13012_v37, %v10449_v25  ;;  %v13016_v0 = vld [vmem:[#allocation59_spill] sm:$0xff] }
 0x246   : > { %4101 = vmatmul.mubr.bf16.gmra.mrb[76].mxu0 %v13011_v56  ;;  %4327 = vmatmul.mubr.bf16.gmra.mrb[76].mxu1 %v13011_v56  ;;  %v5538_v50 = vrot.slane %v5537_v1, 1  ;;  %v4990_v10 = vmax.f32 %v8775_v51, 0.0  ;;  %v5007_v62 = vmax.f32 %v8808_v3, 0.0  ;;  %v13013_v5 = vcombine.low %v13003_v45, %v13004_v54  ;;  %v13019_v51 = vld [vmem:[#allocation61_spill] sm:$0xff]  ;;  %v11227_v45 = vld [vmem:[#allocation2 + $0x970] sm:$0xff] }
 0x247   : > { %4110 = vmatprep.mubr.bf16.mxu0 %v12953_v16  ;;  %v5006_v35 = vmax.f32 %v8777_v36, 0.0  ;;  %v13014_v29 = vcombine.low %v13006_v9, %v13007_v11  ;;  %v5552_v59 = vrot.slane %v5551_v33, 1  ;;  %v4992_v6 = vmax.f32 %v8807_v47, 0.0  ;;  %v11225_v36 = vld [vmem:[#allocation2 + $0x930] sm:$0xff]  ;;  %4336 = vmatprep.mubr.bf16.mxu1 %v12953_v16 }
 0x248   : > { %4390 = vmatpush1.bf16.msra.mxu0 %v13013_v5  ;;  %v5645_v48 = vadd.f32 %v5005_v2, %v4989_v34  ;;  %v5008_v37 = vmax.f32 %v8809_v18, 0.0  ;;  %v13017_v56 = vcombine.high %v13015_v26, %v13016_v0  ;;  %v13020_v3 = vcombine.high %v13018_v32, %v13019_v51  ;;  %v11232_v18 = vld [vmem:[#allocation2 + $0x938] sm:$0xff] }
 0x249   : > { %4616 = vmatpush1.bf16.msra.mxu1 %v13014_v29  ;;  %v5447_v54 = vrot.slane %v11177_v8, 1  ;;  %v5539_v9 = vadd.f32 %v5538_v50, %v5537_v1  ;;  %v5659_v11 = vadd.f32 %v5007_v62, %v4991_v30  ;;  %v5652_v5 = vadd.f32 %v5006_v35, %v4990_v10  ;;  %v11234_v29 = vld [vmem:[#allocation2 + $0x978] sm:$0xff]  ;;  %v13023_v62 = vld [vmem:[#allocation62_spill] sm:$0xff] }
 0x24a   : > { %4391 = vmatprep.subr.bf16.mxu0 %v13017_v56  ;;  %4617 = vmatprep.subr.bf16.mxu1 %v13020_v3  ;;  %v5553_v2 = vadd.f32 %v5552_v59, %v5551_v33  ;;  %v5543_v34 = vrot.slane %v11184_v41, 2  ;;  %v5646_v47 = vrot.slane %v5645_v48, 4  ;;  %v5666_v56 = vadd.f32 %v5008_v37, %v4992_v6  ;;  %v13024_v35 = vld [vmem:[#allocation63_spill] sm:$0xff]  ;;  %v13026_v6 = vld [vmem:[#allocation64_spill] sm:$0xff]  ;;  %v13027_v37 = vld [vmem:[#allocation65_spill] sm:$0xff] }
 0x24b   : > { %v6045_v3 = vpack.c.bf16 %v5539_v9, %v5539_v9  ;;  %v5557_v55 = vrot.slane %v5556_v27, 2  ;;  %v5660_v21 = vrot.slane %v5659_v11, 4  ;;  %v13021_v46 = vcombine.low %v13015_v26, %v13016_v0  ;;  %v13049_v33 = vld [vmem:[#allocation74_spill] sm:$0xff] }
 0x24c   : > { %v13022_v1 = vcombine.low %v13018_v32, %v13019_v51  ;;  %v6047_v30 = vpack.c.bf16 %v5553_v2, %v5553_v2  ;;  %v5647_v50 = vadd.f32 %v5646_v47, %v5645_v48  ;;  %v5653_v10 = vrot.slane %v5652_v5, 4  ;;  %v13029_v51 = vld [vmem:[#allocation32_spill] sm:$0xff] }
 0x24d   : > { %4392 = vmatpush1.bf16.msra.mxu0 %v13021_v46  ;;  %v13025_v59 = vcombine.high %v13023_v62, %v13024_v35  ;;  %v13028_v9 = vcombine.high %v13026_v6, %v13027_v37  ;;  %v11253_v32 = vadd.f32 %v5433_v13, %v11151_v20  ;;  %v6571_v26 = vunpack.c.l.b16 %v6045_v3  ;;  %v13043_v48 = vld [vmem:[#allocation72_spill] sm:$0xff] }
 0x24e   : > { %4618 = vmatpush1.bf16.msra.mxu1 %v13022_v1  ;;  %v5661_v0 = vadd.f32 %v5660_v21, %v5659_v11  ;;  %4111 = vmatmul.mubr.bf16.gmra.mrb[80].mxu0 %v13029_v51  ;;  %v11259_v2 = vadd.f32 %v5447_v54, %v11177_v8  ;;  %v6573_v47 = vunpack.c.l.b16 %v6047_v30  ;;  %v11262_v1 = vadd.f32 %v5543_v34, %v11184_v41  ;;  %v13035_v30 = vld [vmem:[#allocation68_spill] sm:$0xff] }
 0x24f   : > { %4393 = vmatprep.subr.bf16.mxu0 %v13025_v59  ;;  %4619 = vmatprep.subr.bf16.mxu1 %v13028_v9  ;;  %v5648_v59 = vrot.slane %v5647_v50, 2  ;;  %v11268_v21 = vsel %vm6641_vm5, %v6571_v26, %v11148_v31  ;;  %v11270_v20 = vadd.f32 %v5557_v55, %v5556_v27  ;;  %v5667_v11 = vrot.slane %v5666_v56, 4  ;;  %v13032_v31 = vld [vmem:[#allocation66_spill] sm:$0xff]  ;;  %v13033_v55 = vld [vmem:[#allocation67_spill] sm:$0xff]  ;;  %v13036_v9 = vld [vmem:[#allocation69_spill] sm:$0xff] }
 0x250   : > { %4337 = vmatmul.mubr.bf16.gmra.mrb[80].mxu1 %v13029_v51  ;;  %4120 = vmatprep.mubr.bf16.mxu0 %v12953_v16  ;;  %v5662_v13 = vrot.slane %v5661_v0, 2  ;;  %v13030_v8 = vcombine.low %v13023_v62, %v13024_v35  ;;  %v13031_v41 = vcombine.low %v13026_v6, %v13027_v37  ;;  %v6659_v54 = vsel %vm6641_vm5, %v6573_v47, %v11161_v38  ;;  %v13050_v38 = vld [vmem:[#allocation75_spill] sm:$0xff] }
 0x251   : > { %v5649_v34 = vadd.f32 %v5648_v59, %v5647_v50  ;;  %v11280_v3 = vadd.f32 %v5653_v10, %v5652_v5  ;;  %v13034_v27 = vcombine.high %v13032_v31, %v13033_v55  ;;  %v13037_v26 = vcombine.high %v13035_v30, %v13036_v9  ;;  %4346 = vmatprep.mubr.bf16.mxu1 %v12953_v16 }
 0x252   : > { %4394 = vmatpush1.bf16.msra.mxu0 %v13030_v8  ;;  %4620 = vmatpush1.bf16.msra.mxu1 %v13031_v41  ;;  %v6030_v62 = vpack.c.bf16 %v11253_v32, %v11253_v32  ;;  %v5663_v35 = vadd.f32 %v5662_v13, %v5661_v0  ;;  %v8778_v6 = vadd.f32 %v10985_v40, %v10437_v53  ;;  %v5545_v50 = vrot.slane %v11262_v1, 1 }
 0x253   : > { %4395 = vmatprep.subr.bf16.mxu0 %v13034_v27  ;;  %4621 = vmatprep.subr.bf16.mxu1 %v13037_v26  ;;  %v5650_v10 = vrot.slane %v5649_v34, 1  ;;  %v8810_v37 = vadd.f32 %v10999_v63, %v10441_v43  ;;  %v5559_v47 = vrot.slane %v11270_v20, 1  ;;  %v5668_v59 = vadd.f32 %v5667_v11, %v5666_v56  ;;  %v13040_v11 = vld [vmem:[#allocation70_spill] sm:$0xff]  ;;  %v13041_v26 = vld [vmem:[#allocation71_spill] sm:$0xff] }
 0x254   : > { %v5664_v0 = vrot.slane %v5663_v35, 1  ;;  %v8779_v40 = vadd.f32 %v11001_v28, %v10445_v24  ;;  %v13038_v13 = vcombine.low %v13032_v31, %v13033_v55  ;;  %v13039_v8 = vcombine.low %v13035_v30, %v13036_v9  ;;  %v13044_v31 = vld [vmem:[#allocation73_spill] sm:$0xff] }
 0x255   : > { %v5651_v41 = vadd.f32 %v5650_v10, %v5649_v34  ;;  %v5655_v27 = vrot.slane %v11280_v3, 2  ;;  %v8811_v63 = vadd.f32 %v11005_v42, %v10449_v25  ;;  %v8780_v56 = vadd.f32 %v11007_v23, %v10437_v53  ;;  %v13046_v42 = vld [vmem:[#allocation35_spill] sm:$0xff] }
 0x256   : > { %4396 = vmatpush1.bf16.msra.mxu0 %v13038_v13  ;;  %4622 = vmatpush1.bf16.msra.mxu1 %v13039_v8  ;;  %v13042_v28 = vcombine.high %v13040_v11, %v13041_v26  ;;  %v13045_v55 = vcombine.high %v13043_v48, %v13044_v31  ;;  %v5665_v13 = vadd.f32 %v5664_v0, %v5663_v35  ;;  %v5021_v30 = vmax.f32 %v8778_v6, 0.0 }
 0x257   : > { %v8812_v34 = vadd.f32 %v11015_v4, %v10441_v43  ;;  %v8781_v9 = vadd.f32 %v11023_v22, %v10445_v24  ;;  %4121 = vmatmul.mubr.bf16.gmra.mrb[84].mxu0 %v13046_v42  ;;  %v6061_v10 = vpack.c.bf16 %v5651_v41, %v5651_v41  ;;  %v5023_v23 = vmax.f32 %v8810_v37, 0.0 }
 0x258   : > { %4397 = vmatprep.subr.bf16.mxu0 %v13042_v28  ;;  %4623 = vmatprep.subr.bf16.mxu1 %v13045_v55  ;;  %v5037_v8 = vmax.f32 %v8780_v56, 0.0  ;;  %v8813_v28 = vadd.f32 %v11040_v14, %v10449_v25  ;;  %v6063_v35 = vpack.c.bf16 %v5665_v13, %v5665_v13  ;;  %v5022_v6 = vmax.f32 %v8779_v40, 0.0  ;;  %v13052_v13 = vld [vmem:[#allocation76_spill] sm:$0xff]  ;;  %v13053_v40 = vld [vmem:[#allocation77_spill] sm:$0xff] }
 0x259   : > { %4347 = vmatmul.mubr.bf16.gmra.mrb[84].mxu1 %v13046_v42  ;;  %4130 = vmatprep.mubr.bf16.mxu0 %v12953_v16  ;;  %v5039_v0 = vmax.f32 %v8812_v34, 0.0  ;;  %v5038_v55 = vmax.f32 %v8781_v9, 0.0  ;;  %v13047_v4 = vcombine.low %v13040_v11, %v13041_v26  ;;  %v13048_v22 = vcombine.low %v13043_v48, %v13044_v31 }
 0x25a   : > { %v6587_v37 = vunpack.c.l.b16 %v6061_v10  ;;  %v5024_v41 = vmax.f32 %v8811_v63, 0.0  ;;  %v5757_v56 = vadd.f32 %v5037_v8, %v5021_v30  ;;  %v5040_v14 = vmax.f32 %v8813_v28, 0.0  ;;  %4356 = vmatprep.mubr.bf16.mxu1 %v12953_v16 }
 0x25b   : > { %4398 = vmatpush1.bf16.msra.mxu0 %v13047_v4  ;;  %4624 = vmatpush1.bf16.msra.mxu1 %v13048_v22  ;;  %v13051_v46 = vcombine.high %v13049_v33, %v13050_v38  ;;  %v13054_v34 = vcombine.high %v13052_v13, %v13053_v40  ;;  %v6589_v9 = vunpack.c.l.b16 %v6063_v35  ;;  %v5669_v5 = vrot.slane %v5668_v59, 2  ;;  %v13061_v4 = vld [vmem:[#allocation81_spill] sm:$0xff] }
 0x25c   : > { %v5771_v11 = vadd.f32 %v5039_v0, %v5023_v23  ;;  %v5764_v26 = vadd.f32 %v5038_v55, %v5022_v6  ;;  %v11343_v48 = vadd.f32 %v5545_v50, %v11262_v1  ;;  %v11347_v63 = vsel %vm6643_vm6, %v6587_v37, %v11268_v21  ;;  %v13057_v6 = vld [vmem:[#allocation78_spill] sm:$0xff]  ;;  %v13058_v0 = vld [vmem:[#allocation79_spill] sm:$0xff] }
 0x25d   : > { %4399 = vmatprep.subr.bf16.mxu0 %v13051_v46  ;;  %4625 = vmatprep.subr.bf16.mxu1 %v13054_v34  ;;  %v5758_v31 = vrot.slane %v5757_v56, 4  ;;  %v5778_v30 = vadd.f32 %v5040_v14, %v5024_v41  ;;  %v11350_v46 = vsel %vm6643_vm6, %v6589_v9, %v6659_v54  ;;  %v8782_v23 = vadd.f32 %v11089_v58, %v10437_v53  ;;  %v13060_v58 = vld [vmem:[#allocation80_spill] sm:$0xff] }
 0x25e   : > { %v5772_v10 = vrot.slane %v5771_v11, 4  ;;  %v5765_v8 = vrot.slane %v5764_v26, 4  ;;  %v13055_v28 = vcombine.low %v13049_v33, %v13050_v38  ;;  %v13056_v1 = vcombine.low %v13052_v13, %v13053_v40 }
 0x25f   : > { %v5759_v21 = vadd.f32 %v5758_v31, %v5757_v56  ;;  %v5779_v50 = vrot.slane %v5778_v30, 4  ;;  %v8814_v35 = vadd.f32 %v11104_v52, %v10441_v43  ;;  %v8783_v54 = vadd.f32 %v11106_v17, %v10445_v24  ;;  %v13063_v56 = vld [vmem:[#allocation36_spill] sm:$0xff]  ;;  %v13066_v31 = vld [vmem:[#allocation82_spill] sm:$0xff] }
 0x260   : > { %4400 = vmatpush1.bf16.msra.mxu0 %v13055_v28  ;;  %4626 = vmatpush1.bf16.msra.mxu1 %v13056_v1  ;;  %v13059_v55 = vcombine.high %v13057_v6, %v13058_v0  ;;  %v13062_v33 = vcombine.high %v13060_v58, %v13061_v4  ;;  %v5656_v38 = vadd.f32 %v5655_v27, %v11280_v3  ;;  %v5053_v13 = vmax.f32 %v8782_v23, 0.0 }
 0x261   : > { %v5670_v22 = vadd.f32 %v5669_v5, %v5668_v59  ;;  %v5773_v37 = vadd.f32 %v5772_v10, %v5771_v11  ;;  %v5766_v41 = vadd.f32 %v5765_v8, %v5764_v26  ;;  %4131 = vmatmul.mubr.bf16.gmra.mrb[88].mxu0 %v13063_v56  ;;  %v5760_v14 = vrot.slane %v5759_v21, 2  ;;  %4357 = vmatmul.mubr.bf16.gmra.mrb[88].mxu1 %v13063_v56 }
 0x262   : > { %4401 = vmatprep.subr.bf16.mxu0 %v13059_v55  ;;  %4627 = vmatprep.subr.bf16.mxu1 %v13062_v33  ;;  %v5780_v52 = vadd.f32 %v5779_v50, %v5778_v30  ;;  %v8815_v17 = vadd.f32 %v11114_v49, %v10449_v25  ;;  %v5055_v9 = vmax.f32 %v8814_v35, 0.0  ;;  %v8784_v3 = vadd.f32 %v11116_v39, %v10437_v53  ;;  %v13067_v30 = vld [vmem:[#allocation83_spill] sm:$0xff]  ;;  %v13069_v53 = vld [vmem:[#allocation84_spill] sm:$0xff]  ;;  %v13070_v39 = vld [vmem:[#allocation85_spill] sm:$0xff] }
 0x263   : > { %4140 = vmatprep.mubr.bf16.mxu0 %v12953_v16  ;;  %v5774_v40 = vrot.slane %v5773_v37, 2  ;;  %v5767_v34 = vrot.slane %v5766_v41, 2  ;;  %v13064_v5 = vcombine.low %v13057_v6, %v13058_v0  ;;  %v13065_v59 = vcombine.low %v13060_v58, %v13061_v4  ;;  %4366 = vmatprep.mubr.bf16.mxu1 %v12953_v16  ;;  %v13074_v33 = vld [vmem:[#allocation86_spill] sm:$0xff] }
 0x264   : > { %v5781_v27 = vrot.slane %v5780_v52, 2  ;;  %v5054_v49 = vmax.f32 %v8783_v54, 0.0  ;;  %v8816_v11 = vadd.f32 %v11120_v44, %v10441_v43  ;;  %v8785_v26 = vadd.f32 %v11128_v19, %v10445_v24 }
 0x265   : > { %4402 = vmatpush1.bf16.msra.mxu0 %v13064_v5  ;;  %4628 = vmatpush1.bf16.msra.mxu1 %v13065_v59  ;;  %v13068_v10 = vcombine.high %v13066_v31, %v13067_v30  ;;  %v13071_v8 = vcombine.high %v13069_v53, %v13070_v39  ;;  %v5761_v23 = vadd.f32 %v5760_v14, %v5759_v21  ;;  %v5069_v1 = vmax.f32 %v8784_v3, 0.0  ;;  %v13077_v14 = vld [vmem:[#allocation88_spill] sm:$0xff]  ;;  %v13080_v5 = vld [vmem:[#allocation38_spill] sm:$0xff] }
 0x266   : > { %v5775_v28 = vadd.f32 %v5774_v40, %v5773_v37  ;;  %v8817_v50 = vadd.f32 %v11130_v60, %v10449_v25  ;;  %v5768_v43 = vadd.f32 %v5767_v34, %v5766_v41  ;;  %v5782_v44 = vadd.f32 %v5781_v27, %v5780_v52  ;;  %v13075_v37 = vld [vmem:[#allocation87_spill] sm:$0xff]  ;;  %v13078_v52 = vld [vmem:[#allocation89_spill] sm:$0xff] }
 0x267   : > { %4403 = vmatprep.subr.bf16.mxu0 %v13068_v10  ;;  %4629 = vmatprep.subr.bf16.mxu1 %v13071_v8  ;;  %v5071_v35 = vmax.f32 %v8816_v11, 0.0  ;;  %v5070_v24 = vmax.f32 %v8785_v26, 0.0  ;;  %v5657_v19 = vrot.slane %v5656_v38, 1  ;;  %v5056_v54 = vmax.f32 %v8815_v17, 0.0 }
 0x268   : > { %v5869_v6 = vadd.f32 %v5069_v1, %v5053_v13  ;;  %v5072_v0 = vmax.f32 %v8817_v50, 0.0  ;;  %v13072_v55 = vcombine.low %v13066_v31, %v13067_v30  ;;  %v13073_v21 = vcombine.low %v13069_v53, %v13070_v39 }
 0x269   : > { %v11406_v25 = vadd.f32 %v5559_v47, %v11270_v20  ;;  %v5671_v60 = vrot.slane %v5670_v22, 1  ;;  %v5883_v58 = vadd.f32 %v5071_v35, %v5055_v9  ;;  %v5876_v4 = vadd.f32 %v5070_v24, %v5054_v49  ;;  %4141 = vmatmul.mubr.bf16.gmra.mrb[92].mxu0 %v13080_v5  ;;  %4367 = vmatmul.mubr.bf16.gmra.mrb[92].mxu1 %v13080_v5  ;;  %v13081_v9 = vld [vmem:[#allocation18_spill] sm:$0xff] }
 0x26a   : > { %4404 = vmatpush1.bf16.msra.mxu0 %v13072_v55  ;;  %4630 = vmatpush1.bf16.msra.mxu1 %v13073_v21  ;;  %v13076_v41 = vcombine.high %v13074_v33, %v13075_v37  ;;  %v13079_v13 = vcombine.high %v13077_v14, %v13078_v52  ;;  %v5762_v17 = vrot.slane %v5761_v23, 1  ;;  %v5776_v40 = vrot.slane %v5775_v28, 1 }
 0x26b   : > { %v5870_v34 = vrot.slane %v5869_v6, 4  ;;  %v5890_v3 = vadd.f32 %v5072_v0, %v5056_v54  ;;  %v5769_v59 = vrot.slane %v5768_v43, 1  ;;  %v5783_v20 = vrot.slane %v5782_v44, 1  ;;  %4409 = vmatprep.mubr.bf16.mxu0 %v13081_v9  ;;  %4635 = vmatprep.mubr.bf16.mxu1 %v13081_v9 }
 0x26c   : > { %4405 = vmatprep.subr.bf16.mxu0 %v13076_v41  ;;  %4631 = vmatprep.subr.bf16.mxu1 %v13079_v13  ;;  %v5884_v47 = vrot.slane %v5883_v58, 4  ;;  %v5877_v27 = vrot.slane %v5876_v4, 4  ;;  %v6046_v49 = vpack.c.bf16 %v11343_v48, %v11343_v48  ;;  %v5658_v11 = vadd.f32 %v5657_v19, %v5656_v38  ;;  %v13091_v41 = vld [vmem:[#allocation44_spill] sm:$0xff] }
 0x26d   : > { %v5871_v26 = vadd.f32 %v5870_v34, %v5869_v6  ;;  %v5891_v31 = vrot.slane %v5890_v3, 4  ;;  %v13082_v30 = vcombine.low %v13074_v33, %v13075_v37  ;;  %v13083_v10 = vcombine.low %v13077_v14, %v13078_v52  ;;  %v13089_v33 = vld [vmem:[#allocation43_spill] sm:$0xff]  ;;  %v13092_v14 = vld [vmem:[#allocation45_spill] sm:$0xff] }
 0x26e   : > { %v5672_v53 = vadd.f32 %v5671_v60, %v5670_v22  ;;  %v5885_v39 = vadd.f32 %v5884_v47, %v5883_v58  ;;  %v5878_v8 = vadd.f32 %v5877_v27, %v5876_v4  ;;  %v13084_v1 = vcombine.high %v10972_v57, %v10974_v7 }
 0x26f   : > { %4406 = vmatpush1.bf16.msra.mxu0 %v13082_v30  ;;  %4632 = vmatpush1.bf16.msra.mxu1 %v13083_v10  ;;  %v13085_v48 = vcombine.high %v10995_v12, %v10997_v61  ;;  %v5763_v38 = vadd.f32 %v5762_v17, %v5761_v23  ;;  %v5777_v50 = vadd.f32 %v5776_v40, %v5775_v28  ;;  %v5872_v35 = vrot.slane %v5871_v26, 2 }
 0x270   : > { %4407 = vmatprep.subr.bf16.mxu0 %v13084_v1  ;;  %v5892_v24 = vadd.f32 %v5891_v31, %v5890_v3  ;;  %v5770_v19 = vadd.f32 %v5769_v59, %v5768_v43  ;;  %v5784_v54 = vadd.f32 %v5783_v20, %v5782_v44  ;;  %v5886_v6 = vrot.slane %v5885_v39, 2 }
 0x271   : > { %4633 = vmatprep.subr.bf16.mxu1 %v13085_v48  ;;  %v5879_v22 = vrot.slane %v5878_v8, 2  ;;  %v6048_v0 = vpack.c.bf16 %v11406_v25, %v11406_v25  ;;  %v6062_v55 = vpack.c.bf16 %v5658_v11, %v5658_v11  ;;  %v5873_v21 = vadd.f32 %v5872_v35, %v5871_v26  ;;  %v13088_v25 = vld [vmem:[#allocation42_spill] sm:$0xff] }
 0x272   : > { %v5893_v60 = vrot.slane %v5892_v24, 2  ;;  %v13086_v58 = vcombine.low %v10972_v57, %v10974_v7  ;;  %v13087_v23 = vcombine.low %v10995_v12, %v10997_v61  ;;  %v6556_v28 = vunpack.c.l.b16 %v6030_v62  ;;  %v13094_v62 = vld [vmem:[#allocation17_spill] sm:$0xff]  ;;  %v11460_v11 = vld [vmem:[#allocation2 + $0x9b0] sm:$0xff] }
 0x273   : > { %v6064_v43 = vpack.c.bf16 %v5672_v53, %v5672_v53  ;;  %v5887_v44 = vadd.f32 %v5886_v6, %v5885_v39  ;;  %v5880_v4 = vadd.f32 %v5879_v22, %v5878_v8  ;;  %v13090_v37 = vcombine.high %v13088_v25, %v13089_v33  ;;  %v13098_v53 = vld [vmem:[#allocation33_spill] sm:$0xff]  ;;  %v952_v39 = vld [vmem:[#allocation2 + $0x9f8] sm:$0xff]  ;;  %v11474_v6 = vld [vmem:[#allocation2 + $0xa30] sm:$0xff] }
 0x274   : > { %4408 = vmatpush1.bf16.msra.mxu0 %v13086_v58  ;;  %4634 = vmatpush1.bf16.msra.mxu1 %v13087_v23  ;;  %v13093_v57 = vcombine.high %v13091_v41, %v13092_v14  ;;  %v6077_v7 = vpack.c.bf16 %v5763_v38, %v5763_v38  ;;  %v6079_v52 = vpack.c.bf16 %v5777_v50, %v5777_v50  ;;  %v5874_v12 = vrot.slane %v5873_v21, 1  ;;  %v13099_v50 = vld [vmem:[#allocation94_spill] sm:$0xff] }
 0x275   : > { %4490 = vmatprep.subr.bf16.mxu0 %v13090_v37  ;;  %v5894_v61 = vadd.f32 %v5893_v60, %v5892_v24  ;;  %v6078_v13 = vpack.c.bf16 %v5770_v19, %v5770_v19  ;;  %v6080_v17 = vpack.c.bf16 %v5784_v54, %v5784_v54  ;;  %v5888_v40 = vrot.slane %v5887_v44, 1  ;;  %v13101_v24 = vld [vmem:[#allocation47_spill] sm:$0xff]  ;;  %v13102_v19 = vld [vmem:[#allocation48_spill] sm:$0xff] }
 0x276   : > { %4716 = vmatprep.subr.bf16.mxu1 %v13093_v57  ;;  %v5881_v32 = vrot.slane %v5880_v4, 1  ;;  %v13095_v34 = vpack.c.bf16 %v11259_v2, %v11259_v2  ;;  %v6572_v59 = vunpack.c.l.b16 %v6046_v49  ;;  %v5875_v20 = vadd.f32 %v5874_v12, %v5873_v21  ;;  %v11464_v2 = vld [vmem:[#allocation2 + $0x9f0] sm:$0xff]  ;;  %v11466_v49 = vld [vmem:[#allocation2 + $0x9b8] sm:$0xff]  ;;  %v13108_v12 = vld [vmem:[#allocation93_spill] sm:$0xff] }
 0x277   : > { %4410 = vmatmul.mubr.bf16.vlgmr.msra.gmra.mrb[96].mxu0 %v13094_v62  ;;  %4636 = vmatmul.mubr.bf16.vlgmr.msra.gmra.mrb[96].mxu1 %v13094_v62  ;;  %v5895_v47 = vrot.slane %v5894_v61, 1  ;;  %v13096_v27 = vcombine.low %v13088_v25, %v13089_v33  ;;  %v13097_v9 = vcombine.low %v13091_v41, %v13092_v14  ;;  %v6574_v26 = vunpack.c.l.b16 %v6048_v0  ;;  %v11476_v22 = vld [vmem:[#allocation2 + $0xa70] sm:$0xff]  ;;  %v960_v57 = vld [vmem:[#allocation2 + $0xa38] sm:$0xff] }
 0x278   : > { %v6558_v3 = vunpack.c.l.b16 %v13095_v34  ;;  %v6588_v31 = vunpack.c.l.b16 %v6062_v55  ;;  %v5889_v30 = vadd.f32 %v5888_v40, %v5887_v44  ;;  %v5882_v10 = vadd.f32 %v5881_v32, %v5880_v4  ;;  %4419 = vmatprep.mubr.bf16.mxu0 %v13098_v53  ;;  %4645 = vmatprep.mubr.bf16.mxu1 %v13098_v53  ;;  %v13110_v62 = vld [vmem:[#allocation23_spill] sm:$0xff] }
 0x279   : > { %4491 = vmatpush1.bf16.msra.mxu0 %v13096_v27  ;;  %4717 = vmatpush1.bf16.msra.mxu1 %v13097_v9  ;;  %v6590_v8 = vunpack.c.l.b16 %v6064_v43  ;;  %v6603_v1 = vunpack.c.l.b16 %v6077_v7  ;;  %v6093_v48 = vpack.c.bf16 %v5875_v20, %v5875_v20  ;;  %v5896_v38 = vadd.f32 %v5895_v47, %v5894_v61  ;;  %v968_v7 = vld [vmem:[#allocation2 + $0xa78] sm:$0xff] }
 0x27a   : > { %v13100_v35 = vcombine.high %v11061_v15, %v13099_v50  ;;  %v13103_v54 = vcombine.high %v13101_v24, %v13102_v19  ;;  %v6605_v0 = vunpack.c.l.b16 %v6079_v52  ;;  %v6604_v55 = vunpack.c.l.b16 %v6078_v13 }
 0x27b   : > { %v6606_v21 = vunpack.c.l.b16 %v6080_v17  ;;  %v6095_v60 = vpack.c.bf16 %v5889_v30, %v5889_v30  ;;  %v6619_v58 = vunpack.c.l.b16 %v6093_v48  ;;  %v13104_v23 = vcombine.low %v11061_v15, %v13099_v50  ;;  %v13109_v17 = vld [vmem:[#allocation46_spill] sm:$0xff] }
 0x27c   : > { %4492 = vmatprep.subr.bf16.mxu0 %v13100_v35  ;;  %4718 = vmatprep.subr.bf16.mxu1 %v13103_v54  ;;  %v13105_v43 = vcombine.low %v13101_v24, %v13102_v19  ;;  %v8376_v44 = vcombine.low %v11460_v11, %v11464_v2  ;;  %v8377_v4 = vcombine.high %v11460_v11, %v11464_v2  ;;  %v13115_v2 = vld [vmem:[#allocation41_spill] sm:$0xff] }
 0x27d   : > { %4493 = vmatpush1.bf16.msra.mxu0 %v13104_v23  ;;  %v8378_v25 = vcombine.low %v11466_v49, %v952_v39  ;;  %v6621_v33 = vunpack.c.l.b16 %v6095_v60  ;;  %v13106_v37 = vcombine.high %v11225_v36, %v11227_v45  ;;  %v13107_v15 = vcombine.high %v11232_v18, %v11234_v29  ;;  %v9514_v35 = vld [vmem:[#allocation5] sm:$0xff]  ;;  %v992_v60 = vld [vmem:[#allocation2 + $0xb38] sm:$0xff] }
 0x27e   : > { %4719 = vmatpush1.bf16.msra.mxu1 %v13105_v43  ;;  %v8379_v41 = vcombine.high %v11466_v49, %v952_v39  ;;  %v8393_v14 = vcombine.high %v11474_v6, %v11476_v22  ;;  %v6094_v52 = vpack.c.bf16 %v5882_v10, %v5882_v10  ;;  %v6651_v61 = vsel %vm6639_vm4, %v6556_v28, %v13108_v12  ;;  %v13112_v28 = vld [vmem:[#allocation37_spill] sm:$0xff]  ;;  %v11526_v49 = vld [vmem:[#allocation2 + $0xab0] sm:$0xff] }
 0x27f   : > { %4494 = vmatprep.subr.bf16.mxu0 %v13106_v37  ;;  %4720 = vmatprep.subr.bf16.mxu1 %v13107_v15  ;;  %v6096_v13 = vpack.c.bf16 %v5896_v38, %v5896_v38  ;;  %v6665_v40 = vsel %vm6639_vm4, %v6558_v3, %v13109_v17  ;;  %v6646_v32 = vsel %vm6645_vm7, %v6603_v1, %v11347_v63  ;;  %v12818_v39 = vsub.s32 5, %v13115_v2  ;;  %v984_v1 = vld [vmem:[#allocation2 + $0xaf8] sm:$0xff] }
 0x280   : > { %4420 = vmatmul.mubr.bf16.gmra.mrb[100].mxu0 %v13110_v62  ;;  %4646 = vmatmul.mubr.bf16.gmra.mrb[100].mxu1 %v13110_v62  ;;  %v6620_v34 = vunpack.c.l.b16 %v6094_v52  ;;  %v6652_v20 = vsel %vm6641_vm5, %v6572_v59, %v6651_v61  ;;  %v6666_v47 = vsel %vm6641_vm5, %v6574_v26, %v6665_v40  ;;  %v11509_v27 = vsel %vm6647_vm8, %v6619_v58, %v6646_v32  ;;  %v1000_v58 = vld [vmem:[#allocation2 + $0xb78] sm:$0xff] }
 0x281   : > { %13111 = vst [vmem:[#allocation49_spill] sm:$0xff] %v11509_v27  ;;  %4429 = vmatprep.mubr.bf16.mxu0 %v13112_v28  ;;  %4655 = vmatprep.mubr.bf16.mxu1 %v13112_v28  ;;  %v8395_v3 = vcombine.high %v960_v57, %v968_v7  ;;  %v6653_v9 = vsel %vm6643_vm6, %v6588_v31, %v6652_v20  ;;  %v6622_v63 = vunpack.c.l.b16 %v6096_v13  ;;  %v12820_v31 = vsub.s32 4, %v13115_v2  ;;  %v13120_v43 = vld [vmem:[#allocation39_spill] sm:$0xff] }
 0x282   : > { %v6667_v11 = vsel %vm6643_vm6, %v6590_v8, %v6666_v47  ;;  %v13113_v30 = vcombine.low %v11225_v36, %v11227_v45  ;;  %v13114_v59 = vcombine.low %v11232_v18, %v11234_v29  ;;  %v6654_v26 = vsel %vm6645_vm7, %v6604_v55, %v6653_v9  ;;  %v976_v8 = vld [vmem:[#allocation2 + $0xab8] sm:$0xff]  ;;  %v11549_v55 = vld [vmem:[#allocation2 + $0xb70] sm:$0xff] }
 0x283   : > { %v6668_v10 = vsel %vm6645_vm7, %v6606_v21, %v6667_v11  ;;  %v6661_v53 = vsel %vm6645_vm7, %v6605_v0, %v11350_v46  ;;  %v11529_v36 = vsel %vm6647_vm8, %v6620_v34, %v6654_v26  ;;  %v12819_v29 = vsub.s32 6, %v13115_v2  ;;  %v983_v46 = vld [vmem:[#allocation2 + $0xaf0] sm:$0xff]  ;;  %v13119_v21 = vld [vmem:[#allocation28_spill] sm:$0xff] }
 0x284   : > { %4495 = vmatpush1.bf16.msra.mxu0 %v13113_v30  ;;  %4721 = vmatpush1.bf16.msra.mxu1 %v13114_v59  ;;  %13116 = vst [vmem:[#allocation50_spill] sm:$0xff] %v11529_v36  ;;  %v11532_v45 = vsel %vm6647_vm8, %v6622_v63, %v6668_v10  ;;  %v11535_v18 = vsel %vm6647_vm8, %v6621_v33, %v6661_v53  ;;  %v12817_v48 = vsub.s32 7, %v13115_v2  ;;  %v11547_v0 = vld [vmem:[#allocation2 + $0xb30] sm:$0xff] }
 0x285   : > { %4496 = vmatprep.subr.bf16.mxu0 %v8377_v4  ;;  %4722 = vmatprep.subr.bf16.mxu1 %v8379_v41  ;;  %13117 = vst [vmem:[#allocation51_spill] sm:$0xff] %v11532_v45  ;;  %13118 = vst [vmem:[#allocation52_spill] sm:$0xff] %v11535_v18  ;;  %v8392_v38 = vcombine.low %v11474_v6, %v11476_v22  ;;  %v8394_v50 = vcombine.low %v960_v57, %v968_v7  ;;  %v11569_v4 = vld [vmem:[#allocation2 + $0xbf0] sm:$0xff]  ;;  %v11574_v41 = vld [vmem:[#allocation2 + $0xbb8] sm:$0xff]  ;;  %v3846_v7 = vpop.f32.mrb[32].mxu1 }
 0x286   : > { %v11544_v24 = vrot.slane %v9514_v35, %v12820_v31  ;;  %v8409_v19 = vcombine.high %v11526_v49, %v983_v46  ;;  %v8411_v54 = vcombine.high %v976_v8, %v984_v1  ;;  %v11555_v6 = vrot.slane %v9514_v35, %v12819_v29  ;;  %v3848_v40 = vpop.f32.mrb[33].mxu1 }
 0x287   : > { %v11559_v22 = vrot.slane %v9514_v35, %v12818_v39  ;;  %v11563_v23 = vrot.slane %v9514_v35, %v12817_v48  ;;  %v8408_v33 = vcombine.low %v11526_v49, %v983_v46  ;;  %v8410_v37 = vcombine.low %v976_v8, %v984_v1  ;;  %v3850_v28 = vpop.f32.mrb[34].mxu1  ;;  %v13121_v35 = vld [vmem:[#allocation31_spill] sm:$0xff] }
 0x288   : > { %4497 = vmatpush1.bf16.msra.mxu0 %v8376_v44  ;;  %4723 = vmatpush1.bf16.msra.mxu1 %v8378_v25  ;;  %v11567_v44 = vld [vmem:[#allocation2 + $0xbb0] sm:$0xff]  ;;  %v3620_v25 = vpop.f32.mrb[32].mxu0  ;;  %v8424_v15 = vcombine.low %v11547_v0, %v11549_v55  ;;  %v8425_v12 = vcombine.high %v11547_v0, %v11549_v55  ;;  %v8427_v61 = vcombine.high %v992_v60, %v1000_v58  ;;  %v3852_v59 = vpop.f32.mrb[35].mxu1  ;;  %v13122_v55 = vld [vmem:[#allocation40_spill] sm:$0xff] }
 0x289   : > { %4498 = vmatprep.subr.bf16.mxu0 %v8393_v14  ;;  %4724 = vmatprep.subr.bf16.mxu1 %v8395_v3  ;;  %v11576_v14 = vld [vmem:[#allocation2 + $0xbf8] sm:$0xff]  ;;  %v8818_v57 = vadd.f32 %v3620_v25, %v11544_v24  ;;  %v3622_v52 = vpop.f32.mrb[33].mxu0  ;;  %v8850_v13 = vadd.f32 %v3846_v7, %v11555_v6  ;;  %v8426_v62 = vcombine.low %v992_v60, %v1000_v58  ;;  %v9386_v7 = vld [vmem:[#allocation7 + $0x40] sm:$0xff]   ;;  %v13130_v25 = vld [vmem:[#allocation25_spill] sm:$0xff] }
 0x28a   : > { %4430 = vmatmul.mubr.bf16.gmra.mrb[104].mxu0 %v13119_v21  ;;  %4656 = vmatmul.mubr.bf16.gmra.mrb[104].mxu1 %v13119_v21  ;;  %v8819_v17 = vadd.f32 %v3622_v52, %v11559_v22  ;;  %v3624_v32 = vpop.f32.mrb[34].mxu0  ;;  %v8440_v34 = vcombine.low %v11567_v44, %v11569_v4  ;;  %v8851_v20 = vadd.f32 %v3848_v40, %v11563_v23  ;;  %v9387_v52 = vld [vmem:[#allocation7 + $0xc0] sm:$0xff]   ;;  %v9391_v21 = vld [vmem:[#allocation7 + $0xc8] sm:$0xff]  }
 0x28b   : > { %4439 = vmatprep.mubr.bf16.mxu0 %v13120_v43  ;;  %4665 = vmatprep.mubr.bf16.mxu1 %v13120_v43  ;;  %v8820_v47 = vadd.f32 %v3624_v32, %v11544_v24  ;;  %v3626_v3 = vpop.f32.mrb[35].mxu0  ;;  %v8441_v9 = vcombine.high %v11567_v44, %v11569_v4  ;;  %v8442_v63 = vcombine.low %v11574_v41, %v11576_v14  ;;  %v4833_v10 = vmax.f32 %v8818_v57, 0.0 }
 0x28c   : > { %4499 = vmatpush1.bf16.msra.mxu0 %v8392_v38  ;;  %4725 = vmatpush1.bf16.msra.mxu1 %v8394_v50  ;;  %v8852_v11 = vadd.f32 %v3850_v28, %v11555_v6  ;;  %v8821_v30 = vadd.f32 %v3626_v3, %v11559_v22  ;;  %v8443_v26 = vcombine.high %v11574_v41, %v11576_v14  ;;  %v4835_v8 = vmax.f32 %v8850_v13, 0.0  ;;  %v3630_v43 = vpop.f32.mrb[36].mxu0  ;;  %v3856_v14 = vpop.f32.mrb[36].mxu1 }
 0x28d   : > { %4500 = vmatprep.subr.bf16.mxu0 %v8409_v19  ;;  %4726 = vmatprep.subr.bf16.mxu1 %v8411_v54  ;;  %v4849_v53 = vmax.f32 %v8820_v47, 0.0  ;;  %v8853_v49 = vadd.f32 %v3852_v59, %v11563_v23  ;;  %v4834_v1 = vmax.f32 %v8819_v17, 0.0  ;;  %v4836_v19 = vmax.f32 %v8851_v20, 0.0  ;;  %v3632_v57 = vpop.f32.mrb[37].mxu0  ;;  %v3858_v40 = vpop.f32.mrb[37].mxu1 }
 0x28e   : > { %v4851_v38 = vmax.f32 %v8852_v11, 0.0  ;;  %v4850_v50 = vmax.f32 %v8821_v30, 0.0  ;;  %v8822_v41 = vadd.f32 %v3630_v43, %v11544_v24  ;;  %v8823_v17 = vadd.f32 %v3632_v57, %v11559_v22  ;;  %v3634_v32 = vpop.f32.mrb[38].mxu0  ;;  %v3860_v3 = vpop.f32.mrb[38].mxu1 }
 0x28f   : > { %v5113_v54 = vadd.f32 %v4849_v53, %v4833_v10  ;;  %v4852_v0 = vmax.f32 %v8853_v49, 0.0  ;;  %v8855_v28 = vadd.f32 %v3858_v40, %v11563_v23  ;;  %v3862_v10 = vpop.f32.mrb[39].mxu1 }
 0x290   : > { %4501 = vmatpush1.bf16.msra.mxu0 %v8408_v33  ;;  %4727 = vmatpush1.bf16.msra.mxu1 %v8410_v37  ;;  %v5127_v60 = vadd.f32 %v4851_v38, %v4835_v8  ;;  %v5120_v58 = vadd.f32 %v4850_v50, %v4834_v1  ;;  %v4865_v47 = vmax.f32 %v8822_v41, 0.0  ;;  %v8824_v1 = vadd.f32 %v3634_v32, %v11544_v24 }
 0x291   : > { %4502 = vmatprep.subr.bf16.mxu0 %v8425_v12  ;;  %4728 = vmatprep.subr.bf16.mxu1 %v8427_v61  ;;  %v5114_v33 = vrot.slane %v5113_v54, 4  ;;  %v5134_v37 = vadd.f32 %v4852_v0, %v4836_v19  ;;  %v4868_v8 = vmax.f32 %v8855_v28, 0.0  ;;  %v13124_v0 = vld [vmem:[#allocation22_spill] sm:$0xff] }
 0x292   : > { %4440 = vmatmul.mubr.bf16.gmra.mrb[108].mxu0 %v13121_v35  ;;  %4666 = vmatmul.mubr.bf16.gmra.mrb[108].mxu1 %v13121_v35  ;;  %v5128_v61 = vrot.slane %v5127_v60, 4  ;;  %v5121_v13 = vrot.slane %v5120_v58, 4  ;;  %v8856_v35 = vadd.f32 %v3860_v3, %v11555_v6 }
 0x293   : > { %4449 = vmatprep.mubr.bf16.mxu0 %v13122_v55  ;;  %4675 = vmatprep.mubr.bf16.mxu1 %v13122_v55  ;;  %v5135_v20 = vrot.slane %v5134_v37, 4 }
 0x294   : > { %4503 = vmatpush1.bf16.msra.mxu0 %v8424_v15  ;;  %4729 = vmatpush1.bf16.msra.mxu1 %v8426_v62  ;;  %v8854_v15 = vadd.f32 %v3856_v14, %v11555_v6  ;;  %v5115_v62 = vadd.f32 %v5114_v33, %v5113_v54  ;;  %v5129_v11 = vadd.f32 %v5128_v61, %v5127_v60  ;;  %v13123_v54 = vld [vmem:[#allocation34_spill] sm:$0xff] }
 0x295   : > { %4504 = vmatprep.subr.bf16.mxu0 %v8441_v9  ;;  %4730 = vmatprep.subr.bf16.mxu1 %v8443_v26  ;;  %v3636_v9 = vpop.f32.mrb[39].mxu0  ;;  %v5122_v30 = vadd.f32 %v5121_v13, %v5120_v58  ;;  %v4866_v26 = vmax.f32 %v8823_v17, 0.0  ;;  %v5136_v49 = vadd.f32 %v5135_v20, %v5134_v37  ;;  %v4883_v58 = vmax.f32 %v8856_v35, 0.0 }
 0x296   : > { %v4867_v59 = vmax.f32 %v8854_v15, 0.0  ;;  %v5116_v53 = vrot.slane %v5115_v62, 2  ;;  %v5130_v38 = vrot.slane %v5129_v11, 2  ;;  %v8825_v19 = vadd.f32 %v3636_v9, %v11559_v22  ;;  %v3640_v33 = vpop.f32.mrb[40].mxu0 }
 0x297   : > { %v5123_v50 = vrot.slane %v5122_v30, 2  ;;  %v5137_v4 = vrot.slane %v5136_v49, 2 }
 0x298   : > { %4505 = vmatpush1.bf16.msra.mxu0 %v8440_v34  ;;  %4731 = vmatpush1.bf16.msra.mxu1 %v8442_v63  ;;  %v5117_v44 = vadd.f32 %v5116_v53, %v5115_v62  ;;  %v4881_v34 = vmax.f32 %v8824_v1, 0.0  ;;  %v8857_v63 = vadd.f32 %v3862_v10, %v11563_v23  ;;  %v5131_v55 = vadd.f32 %v5130_v38, %v5129_v11 }
 0x299   : > { %8578 = vmatprep.subr.bf16.mxu0 %v9386_v7  ;;  %8600 = vmatprep.subr.bf16.mxu1 %v9387_v52  ;;  %v5124_v60 = vadd.f32 %v5123_v50, %v5122_v30  ;;  %v4882_v43 = vmax.f32 %v8825_v19, 0.0  ;;  %v5138_v41 = vadd.f32 %v5137_v4, %v5136_v49  ;;  %v3866_v7 = vpop.f32.mrb[40].mxu1  ;;  %v3642_v52 = vpop.f32.mrb[41].mxu0  ;;  %v5239_v15 = vadd.f32 %v4883_v58, %v4867_v59  ;;  %v13125_v4 = vld [vmem:[#allocation19_spill] sm:$0xff] }
 0x29a   : > { %4450 = vmatmul.mubr.bf16.gmra.mrb[112].mxu0 %v13123_v54  ;;  %4676 = vmatmul.mubr.bf16.gmra.mrb[112].mxu1 %v13123_v54  ;;  %v5118_v37 = vrot.slane %v5117_v44, 1  ;;  %v5225_v14 = vadd.f32 %v4881_v34, %v4865_v47  ;;  %v4884_v57 = vmax.f32 %v8857_v63, 0.0  ;;  %v5132_v61 = vrot.slane %v5131_v55, 1  ;;  %v3868_v40 = vpop.f32.mrb[41].mxu1  ;;  %v3644_v32 = vpop.f32.mrb[42].mxu0 }
 0x29b   : > { %4459 = vmatprep.mubr.bf16.mxu0 %v13124_v0  ;;  %4685 = vmatprep.mubr.bf16.mxu1 %v13124_v0  ;;  %v5125_v13 = vrot.slane %v5124_v60, 1  ;;  %v5232_v17 = vadd.f32 %v4882_v43, %v4866_v26  ;;  %v5139_v20 = vrot.slane %v5138_v41, 1  ;;  %v3870_v9 = vpop.f32.mrb[42].mxu1  ;;  %v3646_v11 = vpop.f32.mrb[43].mxu0  ;;  %v5240_v53 = vrot.slane %v5239_v15, 4  ;;  %v13126_v0 = vld [vmem:[#allocation24_spill] sm:$0xff] }
 0x29c   : > { %v5119_v62 = vadd.f32 %v5118_v37, %v5117_v44  ;;  %v5226_v28 = vrot.slane %v5225_v14, 4  ;;  %v5246_v3 = vadd.f32 %v4884_v57, %v4868_v8  ;;  %v5133_v30 = vadd.f32 %v5132_v61, %v5131_v55  ;;  %v3872_v47 = vpop.f32.mrb[43].mxu1  ;;  %v11632_v37 = vpop.f32.mrb[44].mxu0 }
 0x29d   : > { %v5126_v10 = vadd.f32 %v5125_v13, %v5124_v60  ;;  %v5233_v49 = vrot.slane %v5232_v17, 4  ;;  %v5140_v38 = vadd.f32 %v5139_v20, %v5138_v41  ;;  %v5241_v26 = vadd.f32 %v5240_v53, %v5239_v15  ;;  %v11638_v13 = vpop.f32.mrb[44].mxu1  ;;  %v11640_v15 = vpop.f32.mrb[45].mxu0 }
 0x29e   : > { %v5985_v1 = vpack.c.bf16 %v5119_v62, %v5119_v62  ;;  %v5227_v50 = vadd.f32 %v5226_v28, %v5225_v14  ;;  %v5247_v35 = vrot.slane %v5246_v3, 4  ;;  %v5987_v19 = vpack.c.bf16 %v5133_v30, %v5133_v30  ;;  %v11646_v30 = vpop.f32.mrb[46].mxu0 }
 0x29f   : > { %v5986_v59 = vpack.c.bf16 %v5126_v10, %v5126_v10  ;;  %v5234_v54 = vadd.f32 %v5233_v49, %v5232_v17  ;;  %v5988_v8 = vpack.c.bf16 %v5140_v38, %v5140_v38  ;;  %v5242_v58 = vrot.slane %v5241_v26, 2  ;;  %v11651_v38 = vpop.f32.mrb[47].mxu0 }
 0x2a0   : > { %v11624_v44 = vunpack.c.l.b16 %v5985_v1  ;;  %v5228_v34 = vrot.slane %v5227_v50, 2  ;;  %v5248_v63 = vadd.f32 %v5247_v35, %v5246_v3  ;;  %v11628_v55 = vunpack.c.l.b16 %v5987_v19  ;;  %v11644_v3 = vpop.f32.mrb[45].mxu1 }
 0x2a1   : > { %v11630_v60 = vunpack.c.l.b16 %v5986_v59  ;;  %v5235_v43 = vrot.slane %v5234_v54, 2  ;;  %v11635_v41 = vunpack.c.l.b16 %v5988_v8  ;;  %v8826_v61 = vadd.f32 %v3640_v33, %v11544_v24  ;;  %v11649_v33 = vpop.f32.mrb[46].mxu1 }
 0x2a2   : > { %4460 = vmatmul.mubr.bf16.gmra.mrb[116].mxu0 %v13125_v4  ;;  %4686 = vmatmul.mubr.bf16.gmra.mrb[116].mxu1 %v13125_v4  ;;  %v5229_v14 = vadd.f32 %v5228_v34, %v5227_v50  ;;  %v5249_v57 = vrot.slane %v5248_v63, 2  ;;  %v5243_v17 = vadd.f32 %v5242_v58, %v5241_v26  ;;  %v8858_v20 = vadd.f32 %v3866_v7, %v11555_v6  ;;  %v11653_v7 = vpop.f32.mrb[47].mxu1 }
 0x2a3   : > { %4469 = vmatprep.mubr.bf16.mxu0 %v13126_v0  ;;  %4695 = vmatprep.mubr.bf16.mxu1 %v13126_v0  ;;  %v5236_v62 = vadd.f32 %v5235_v43, %v5234_v54  ;;  %v8827_v28 = vadd.f32 %v3642_v52, %v11559_v22  ;;  %v4897_v49 = vmax.f32 %v8826_v61, 0.0  ;;  %v8859_v1 = vadd.f32 %v3868_v40, %v11563_v23  ;;  %v13127_v0 = vld [vmem:[#allocation20_spill] sm:$0xff] }
 0x2a4   : > { %v5230_v10 = vrot.slane %v5229_v14, 1  ;;  %v5250_v53 = vadd.f32 %v5249_v57, %v5248_v63  ;;  %v5244_v50 = vrot.slane %v5243_v17, 1  ;;  %v4899_v19 = vmax.f32 %v8858_v20, 0.0 }
 0x2a5   : > { %v5237_v35 = vrot.slane %v5236_v62, 1  ;;  %v4898_v59 = vmax.f32 %v8827_v28, 0.0  ;;  %v4900_v54 = vmax.f32 %v8859_v1, 0.0  ;;  %v8828_v4 = vadd.f32 %v3644_v32, %v11544_v24 }
 0x2a6   : > { %v5231_v52 = vadd.f32 %v5230_v10, %v5229_v14  ;;  %v5251_v26 = vrot.slane %v5250_v53, 1  ;;  %v5245_v8 = vadd.f32 %v5244_v50, %v5243_v17  ;;  %v8860_v63 = vadd.f32 %v3870_v9, %v11555_v6  ;;  %v13128_v14 = vld [vmem:[#allocation26_spill] sm:$0xff] }
 0x2a7   : > { %v5238_v34 = vadd.f32 %v5237_v35, %v5236_v62  ;;  %v8829_v40 = vadd.f32 %v3646_v11, %v11559_v22  ;;  %v4913_v57 = vmax.f32 %v8828_v4, 0.0  ;;  %v8861_v61 = vadd.f32 %v3872_v47, %v11563_v23  ;;  %v11662_v62 = vpop.f32.mrb[48].mxu0 }
 0x2a8   : > { %v6001_v58 = vpack.c.bf16 %v5231_v52, %v5231_v52  ;;  %v5252_v43 = vadd.f32 %v5251_v26, %v5250_v53  ;;  %v6003_v20 = vpack.c.bf16 %v5245_v8, %v5245_v8  ;;  %v4915_v32 = vmax.f32 %v8860_v63, 0.0  ;;  %v11665_v53 = vpop.f32.mrb[48].mxu1  ;;  %v11667_v50 = vpop.f32.mrb[49].mxu0 }
 0x2a9   : > { %v6002_v28 = vpack.c.bf16 %v5238_v34, %v5238_v34  ;;  %v4914_v17 = vmax.f32 %v8829_v40, 0.0  ;;  %v5337_v10 = vadd.f32 %v4913_v57, %v4897_v49  ;;  %v4916_v1 = vmax.f32 %v8861_v61, 0.0  ;;  %v11669_v4 = vpop.f32.mrb[49].mxu1  ;;  %v11671_v8 = vpop.f32.mrb[50].mxu0 }
 0x2aa   : > { %4470 = vmatmul.mubr.bf16.gmra.mrb[120].mxu0 %v13127_v0  ;;  %4696 = vmatmul.mubr.bf16.gmra.mrb[120].mxu1 %v13127_v0  ;;  %v6527_v9 = vunpack.c.l.b16 %v6001_v58  ;;  %v6004_v11 = vpack.c.bf16 %v5252_v43, %v5252_v43  ;;  %v6529_v47 = vunpack.c.l.b16 %v6003_v20  ;;  %v5351_v52 = vadd.f32 %v4915_v32, %v4899_v19  ;;  %v11677_v0 = vpop.f32.mrb[50].mxu1  ;;  %v11679_v58 = vpop.f32.mrb[51].mxu0 }
 0x2ab   : > { %4479 = vmatprep.mubr.bf16.mxu0 %v13128_v14  ;;  %4705 = vmatprep.mubr.bf16.mxu1 %v13128_v14  ;;  %v6528_v35 = vunpack.c.l.b16 %v6002_v28  ;;  %v5344_v26 = vadd.f32 %v4914_v17, %v4898_v59  ;;  %v5338_v40 = vrot.slane %v5337_v10, 4  ;;  %v5358_v49 = vadd.f32 %v4916_v1, %v4900_v54  ;;  %v11689_v61 = vpop.f32.mrb[51].mxu1  ;;  %v13129_v17 = vld [vmem:[#allocation21_spill] sm:$0xff] }
 0x2ac   : > { %v11675_v34 = vsel %vm6635_vm2, %v6527_v9, %v11624_v44  ;;  %v6530_v63 = vunpack.c.l.b16 %v6004_v11  ;;  %v11683_v43 = vsel %vm6635_vm2, %v6529_v47, %v11628_v55  ;;  %v5352_v59 = vrot.slane %v5351_v52, 4 }
 0x2ad   : > { %v11687_v19 = vsel %vm6635_vm2, %v6528_v35, %v11630_v60  ;;  %v5345_v57 = vrot.slane %v5344_v26, 4  ;;  %v5339_v54 = vadd.f32 %v5338_v40, %v5337_v10  ;;  %v5359_v14 = vrot.slane %v5358_v49, 4  ;;  %v11711_v40 = vpop.f32.mrb[52].mxu1 }
 0x2ae   : > { %v11693_v44 = vsel %vm6635_vm2, %v6530_v63, %v11635_v41  ;;  %v8830_v20 = vadd.f32 %v11632_v37, %v11544_v24  ;;  %v5353_v28 = vadd.f32 %v5352_v59, %v5351_v52  ;;  %v8862_v32 = vadd.f32 %v11638_v13, %v11555_v6  ;;  %v11706_v13 = vpop.f32.mrb[52].mxu0 }
 0x2af   : > { %v5346_v55 = vadd.f32 %v5345_v57, %v5344_v26  ;;  %v8831_v60 = vadd.f32 %v11640_v15, %v11559_v22  ;;  %v5340_v9 = vrot.slane %v5339_v54, 2  ;;  %v5360_v11 = vadd.f32 %v5359_v14, %v5358_v49 }
 0x2b0   : > { %v4929_v1 = vmax.f32 %v8830_v20, 0.0  ;;  %v8863_v41 = vadd.f32 %v11644_v3, %v11563_v23  ;;  %v5354_v37 = vrot.slane %v5353_v28, 2  ;;  %v4931_v47 = vmax.f32 %v8862_v32, 0.0  ;;  %v11713_v3 = vpop.f32.mrb[53].mxu0  ;;  %v11719_v20 = vpop.f32.mrb[53].mxu1 }
 0x2b1   : > { %v5347_v10 = vrot.slane %v5346_v55, 2  ;;  %v4930_v35 = vmax.f32 %v8831_v60, 0.0  ;;  %v5341_v15 = vadd.f32 %v5340_v9, %v5339_v54  ;;  %v5361_v52 = vrot.slane %v5360_v11, 2  ;;  %v11721_v54 = vpop.f32.mrb[54].mxu0  ;;  %v11725_v9 = vpop.f32.mrb[54].mxu1 }
 0x2b2   : > { %4480 = vmatmul.mubr.bf16.gmra.mrb[124].mxu0 %v13129_v17  ;;  %4706 = vmatmul.mubr.bf16.gmra.mrb[124].mxu1 %v13129_v17  ;;  %v4932_v26 = vmax.f32 %v8863_v41, 0.0  ;;  %v8832_v63 = vadd.f32 %v11646_v30, %v11544_v24  ;;  %v5355_v49 = vadd.f32 %v5354_v37, %v5353_v28  ;;  %v8864_v57 = vadd.f32 %v11649_v33, %v11555_v6  ;;  %v11727_v28 = vpop.f32.mrb[55].mxu0 }
 0x2b3   : > { %4522 = vmatprep.mubr.bf16.mxu0 %v12953_v16  ;;  %4748 = vmatprep.mubr.bf16.mxu1 %v12953_v16  ;;  %v5348_v59 = vadd.f32 %v5347_v10, %v5346_v55  ;;  %v8833_v14 = vadd.f32 %v11651_v38, %v11559_v22  ;;  %v5342_v32 = vrot.slane %v5341_v15, 1  ;;  %v5362_v60 = vadd.f32 %v5361_v52, %v5360_v11  ;;  %v11729_v10 = vpop.f32.mrb[55].mxu1  ;;  %v9388_v38 = vld [vmem:[#allocation7] sm:$0xff]   ;;  %v9390_v52 = vld [vmem:[#allocation7 + $0x48] sm:$0xff]  }
 0x2b4   : > { %v4945_v17 = vmax.f32 %v8832_v63, 0.0  ;;  %v8865_v30 = vadd.f32 %v11653_v7, %v11563_v23  ;;  %v5356_v55 = vrot.slane %v5355_v49, 1  ;;  %v4947_v33 = vmax.f32 %v8864_v57, 0.0  ;;  %v9389_v11 = vld [vmem:[#allocation7 + $0x80] sm:$0xff]  }
 0x2b5   : > { %v5349_v41 = vrot.slane %v5348_v59, 1  ;;  %v4946_v37 = vmax.f32 %v8833_v14, 0.0  ;;  %v5343_v48 = vadd.f32 %v5342_v32, %v5341_v15  ;;  %v5363_v39 = vrot.slane %v5362_v60, 1 }
 0x2b6   : > { %v5449_v29 = vadd.f32 %v4945_v17, %v4929_v1  ;;  %v4948_v31 = vmax.f32 %v8865_v30, 0.0  ;;  %v5357_v63 = vadd.f32 %v5356_v55, %v5355_v49  ;;  %v5463_v7 = vadd.f32 %v4947_v33, %v4931_v47  ;;  %v11734_v30 = vpop.f32.mrb[56].mxu0  ;;  %v9392_v47 = vld [vmem:[#allocation7 + $0x8] sm:$0xff]  }
 0x2b7   : > { %v5350_v12 = vadd.f32 %v5349_v41, %v5348_v59  ;;  %v5456_v46 = vadd.f32 %v4946_v37, %v4930_v35  ;;  %v6017_v2 = vpack.c.bf16 %v5343_v48, %v5343_v48  ;;  %v5364_v18 = vadd.f32 %v5363_v39, %v5362_v60  ;;  %v11737_v59 = vpop.f32.mrb[56].mxu1 }
 0x2b8   : > { %v5450_v57 = vrot.slane %v5449_v29, 4  ;;  %v5470_v14 = vadd.f32 %v4948_v31, %v4932_v26  ;;  %v6019_v15 = vpack.c.bf16 %v5357_v63, %v5357_v63  ;;  %v5464_v32 = vrot.slane %v5463_v7, 4  ;;  %v11739_v31 = vpop.f32.mrb[57].mxu0  ;;  %v11741_v33 = vpop.f32.mrb[57].mxu1 }
 0x2b9   : > { %v6018_v1 = vpack.c.bf16 %v5350_v12, %v5350_v12  ;;  %v5457_v17 = vrot.slane %v5456_v46, 4  ;;  %v6543_v35 = vunpack.c.l.b16 %v6017_v2  ;;  %v6020_v49 = vpack.c.bf16 %v5364_v18, %v5364_v18  ;;  %v9394_v12 = vld [vmem:[#allocation7 + $0x50] sm:$0xff]   ;;  %v11743_v37 = vpop.f32.mrb[58].mxu0 }
 0x2ba   : > { %4523 = vmatmul.mubr.bf16.vlgmr.msra.gmra.mrb[96].mxu0 %v13130_v25  ;;  %4749 = vmatmul.mubr.bf16.vlgmr.msra.gmra.mrb[96].mxu1 %v13130_v25  ;;  %v5451_v48 = vadd.f32 %v5450_v57, %v5449_v29  ;;  %v5471_v39 = vrot.slane %v5470_v14, 4  ;;  %v9393_v25 = vld [vmem:[#allocation7 + $0x88] sm:$0xff]   ;;  %v6545_v26 = vunpack.c.l.b16 %v6019_v15  ;;  %v5465_v55 = vadd.f32 %v5464_v32, %v5463_v7  ;;  %v9396_v32 = vld [vmem:[#allocation7 + $0x10] sm:$0xff]  }
 0x2bb   : > { %4532 = vmatprep.mubr.bf16.mxu0 %v12953_v16  ;;  %4758 = vmatprep.mubr.bf16.mxu1 %v12953_v16  ;;  %v6544_v60 = vunpack.c.l.b16 %v6018_v1  ;;  %v5458_v41 = vadd.f32 %v5457_v17, %v5456_v46  ;;  %v11747_v2 = vsel %vm6637_vm3, %v6543_v35, %v11675_v34  ;;  %v6546_v18 = vunpack.c.l.b16 %v6020_v49  ;;  %v9395_v34 = vld [vmem:[#allocation7 + $0xd0] sm:$0xff]  }
 0x2bc   : > { %8579 = vmatpush3.bf16.msra.mxu0 %v9388_v38  ;;  %8601 = vmatpush3.bf16.msra.mxu1 %v9389_v11  ;;  %v5452_v29 = vrot.slane %v5451_v48, 2  ;;  %v5472_v38 = vadd.f32 %v5471_v39, %v5470_v14  ;;  %v11749_v11 = vpop.f32.mrb[58].mxu1  ;;  %v11755_v63 = vsel %vm6637_vm3, %v6545_v26, %v11683_v43  ;;  %v8834_v43 = vadd.f32 %v11662_v62, %v11544_v24  ;;  %v13133_v39 = vld [vmem:[#allocation27_spill] sm:$0xff] }
 0x2bd   : > { %8580 = vmatprep.subr.bf16.mxu0 %v9390_v52  ;;  %8602 = vmatprep.subr.bf16.mxu1 %v9391_v21  ;;  %v11751_v52 = vpop.f32.mrb[59].mxu0  ;;  %v11759_v46 = vsel %vm6637_vm3, %v6544_v60, %v11687_v19  ;;  %v5466_v21 = vrot.slane %v5465_v55, 2  ;;  %v5459_v7 = vrot.slane %v5458_v41, 2  ;;  %v11761_v57 = vpop.f32.mrb[59].mxu1  ;;  %v11765_v14 = vsel %vm6637_vm3, %v6546_v18, %v11693_v44  ;;  %v9397_v19 = vld [vmem:[#allocation7 + $0x90] sm:$0xff]   ;;  %v9398_v44 = vld [vmem:[#allocation7 + $0x58] sm:$0xff]  }
 0x2be   : > { %13131 = vst [vmem:[#allocation53_spill] sm:$0xff] %v11759_v46  ;;  %13132 = vst [vmem:[#allocation54_spill] sm:$0xff] %v11765_v14  ;;  %v5453_v15 = vadd.f32 %v5452_v29, %v5451_v48  ;;  %v5473_v1 = vrot.slane %v5472_v38, 2  ;;  %v8866_v49 = vadd.f32 %v11665_v53, %v11555_v6  ;;  %v4961_v60 = vmax.f32 %v8834_v43, 0.0  ;;  %v11778_v18 = vpop.f32.mrb[60].mxu0  ;;  %v9401_v43 = vld [vmem:[#allocation7 + $0x98] sm:$0xff]  }
 0x2bf   : > { %v5467_v17 = vadd.f32 %v5466_v21, %v5465_v55  ;;  %v5460_v35 = vadd.f32 %v5459_v7, %v5458_v41  ;;  %v8867_v62 = vadd.f32 %v11669_v4, %v11563_v23  ;;  %v8836_v4 = vadd.f32 %v11671_v8, %v11544_v24  ;;  %v11783_v21 = vpop.f32.mrb[60].mxu1  ;;  %v11785_v7 = vpop.f32.mrb[61].mxu0  ;;  %v9402_v8 = vld [vmem:[#allocation7 + $0x60] sm:$0xff]  }
 0x2c0   : > { %8581 = vmatpush3.bf16.msra.mxu0 %v9392_v47  ;;  %8603 = vmatpush3.bf16.msra.mxu1 %v9393_v25  ;;  %v8835_v47 = vadd.f32 %v11667_v50, %v11559_v22  ;;  %v5454_v48 = vrot.slane %v5453_v15, 1  ;;  %v5474_v26 = vadd.f32 %v5473_v1, %v5472_v38  ;;  %v9399_v25 = vld [vmem:[#allocation7 + $0xd8] sm:$0xff]   ;;  %v4963_v53 = vmax.f32 %v8866_v49, 0.0  ;;  %v9403_v46 = vld [vmem:[#allocation7 + $0xe0] sm:$0xff]  }
 0x2c1   : > { %8582 = vmatprep.subr.bf16.mxu0 %v9394_v12  ;;  %v5468_v12 = vrot.slane %v5467_v17, 1  ;;  %v5461_v55 = vrot.slane %v5460_v35, 1  ;;  %8604 = vmatprep.subr.bf16.mxu1 %v9395_v34  ;;  %v4964_v38 = vmax.f32 %v8867_v62, 0.0  ;;  %v9400_v1 = vld [vmem:[#allocation7 + $0x18] sm:$0xff]   ;;  %v8837_v34 = vadd.f32 %v11679_v58, %v11559_v22 }
 0x2c2   : > { %4533 = vmatmul.mubr.bf16.gmra.mrb[100].mxu0 %v13133_v39  ;;  %4759 = vmatmul.mubr.bf16.gmra.mrb[100].mxu1 %v13133_v39  ;;  %v4962_v41 = vmax.f32 %v8835_v47, 0.0  ;;  %v5455_v50 = vadd.f32 %v5454_v48, %v5453_v15  ;;  %v5475_v29 = vrot.slane %v5474_v26, 1  ;;  %v8868_v39 = vadd.f32 %v11677_v0, %v11555_v6  ;;  %v11791_v15 = vpop.f32.mrb[61].mxu1  ;;  %v11793_v48 = vpop.f32.mrb[62].mxu0 }
 0x2c3   : > { %4542 = vmatprep.mubr.bf16.mxu0 %v12953_v16  ;;  %4768 = vmatprep.mubr.bf16.mxu1 %v12953_v16  ;;  %v5469_v49 = vadd.f32 %v5468_v12, %v5467_v17  ;;  %v5462_v47 = vadd.f32 %v5461_v55, %v5460_v35  ;;  %v11797_v17 = vpop.f32.mrb[62].mxu1  ;;  %v11799_v35 = vpop.f32.mrb[63].mxu0  ;;  %v4978_v55 = vmax.f32 %v8837_v34, 0.0 }
 0x2c4   : > { %8583 = vmatpush3.bf16.msra.mxu0 %v9396_v32  ;;  %8605 = vmatpush3.bf16.msra.mxu1 %v9397_v19  ;;  %v6033_v62 = vpack.c.bf16 %v5455_v50, %v5455_v50  ;;  %v5476_v27 = vadd.f32 %v5475_v29, %v5474_v26  ;;  %v4977_v32 = vmax.f32 %v8836_v4, 0.0  ;;  %v8869_v19 = vadd.f32 %v11689_v61, %v11563_v23  ;;  %v11801_v14 = vpop.f32.mrb[63].mxu1  ;;  %v9404_v29 = vld [vmem:[#allocation7 + $0x20] sm:$0xff]  }
 0x2c5   : > { %8584 = vmatprep.subr.bf16.mxu0 %v9398_v44  ;;  %8606 = vmatprep.subr.bf16.mxu1 %v9399_v25  ;;  %v6035_v0 = vpack.c.bf16 %v5469_v49, %v5469_v49  ;;  %v6034_v12 = vpack.c.bf16 %v5462_v47, %v5462_v47  ;;  %v4979_v58 = vmax.f32 %v8868_v39, 0.0  ;;  %v9405_v61 = vld [vmem:[#allocation7 + $0xa0] sm:$0xff]   ;;  %v5568_v25 = vadd.f32 %v4978_v55, %v4962_v41  ;;  %v13134_v49 = vld [vmem:[#allocation29_spill] sm:$0xff]  ;;  %v9406_v47 = vld [vmem:[#allocation7 + $0x68] sm:$0xff]  }
 0x2c6   : > { %v6559_v44 = vunpack.c.l.b16 %v6033_v62  ;;  %v6036_v45 = vpack.c.bf16 %v5476_v27, %v5476_v27  ;;  %v5561_v50 = vadd.f32 %v4977_v32, %v4961_v60  ;;  %v4980_v26 = vmax.f32 %v8869_v19, 0.0  ;;  %v9407_v39 = vld [vmem:[#allocation7 + $0xe8] sm:$0xff]  }
 0x2c7   : > { %v6561_v4 = vunpack.c.l.b16 %v6035_v0  ;;  %v11803_v36 = vunpack.c.l.b16 %v6034_v12  ;;  %v5575_v5 = vadd.f32 %v4979_v58, %v4963_v53  ;;  %v8839_v62 = vadd.f32 %v11713_v3, %v11559_v22  ;;  %v9409_v32 = vld [vmem:[#allocation7 + $0xa8] sm:$0xff]  }
 0x2c8   : > { %8585 = vmatpush3.bf16.msra.mxu0 %v9400_v1  ;;  %8607 = vmatpush3.bf16.msra.mxu1 %v9401_v43  ;;  %v11808_v34 = vsel %vm6639_vm4, %v6559_v44, %v11747_v2  ;;  %v11810_v27 = vunpack.c.l.b16 %v6036_v45  ;;  %v5562_v60 = vrot.slane %v5561_v50, 4  ;;  %v5582_v1 = vadd.f32 %v4980_v26, %v4964_v38 }
 0x2c9   : > { %8586 = vmatprep.subr.bf16.mxu0 %v9402_v8  ;;  %v11816_v53 = vsel %vm6639_vm4, %v6561_v4, %v11755_v63  ;;  %v5576_v41 = vrot.slane %v5575_v5, 4  ;;  %v5569_v43 = vrot.slane %v5568_v25, 4  ;;  %v8838_v8 = vadd.f32 %v11706_v13, %v11544_v24  ;;  %8608 = vmatprep.subr.bf16.mxu1 %v9403_v46  ;;  %v9408_v63 = vld [vmem:[#allocation7 + $0x28] sm:$0xff]   ;;  %v9410_v46 = vld [vmem:[#allocation7 + $0x70] sm:$0xff]  }
 0x2ca   : > { %4543 = vmatmul.mubr.bf16.gmra.mrb[104].mxu0 %v13134_v49  ;;  %4769 = vmatmul.mubr.bf16.gmra.mrb[104].mxu1 %v13134_v49  ;;  %v5563_v45 = vadd.f32 %v5562_v60, %v5561_v50  ;;  %v5583_v2 = vrot.slane %v5582_v1, 4  ;;  %v8870_v38 = vadd.f32 %v11711_v40, %v11555_v6  ;;  %v8871_v13 = vadd.f32 %v11719_v20, %v11563_v23  ;;  %v9412_v49 = vld [vmem:[#allocation7 + $0x30] sm:$0xff]  }
 0x2cb   : > { %4552 = vmatprep.mubr.bf16.mxu0 %v12953_v16  ;;  %4778 = vmatprep.mubr.bf16.mxu1 %v12953_v16  ;;  %v5577_v19 = vadd.f32 %v5576_v41, %v5575_v5  ;;  %v5570_v0 = vadd.f32 %v5569_v43, %v5568_v25  ;;  %v4993_v12 = vmax.f32 %v8838_v8, 0.0  ;;  %v4994_v40 = vmax.f32 %v8839_v62, 0.0  ;;  %v9414_v43 = vld [vmem:[#allocation7 + $0x78] sm:$0xff]  }
 0x2cc   : > { %8587 = vmatpush3.bf16.msra.mxu0 %v9404_v29  ;;  %8609 = vmatpush3.bf16.msra.mxu1 %v9405_v61  ;;  %v5564_v58 = vrot.slane %v5563_v45, 2  ;;  %v5584_v55 = vadd.f32 %v5583_v2, %v5582_v1  ;;  %v4995_v44 = vmax.f32 %v8870_v38, 0.0  ;;  %v4996_v3 = vmax.f32 %v8871_v13, 0.0  ;;  %v9411_v61 = vld [vmem:[#allocation7 + $0xf0] sm:$0xff]   ;;  %v9415_v8 = vld [vmem:[#allocation7 + $0xf8] sm:$0xff]  }
 0x2cd   : > { %8588 = vmatprep.subr.bf16.mxu0 %v9406_v47  ;;  %8610 = vmatprep.subr.bf16.mxu1 %v9407_v39  ;;  %v5578_v50 = vrot.slane %v5577_v19, 2  ;;  %v5571_v26 = vrot.slane %v5570_v0, 2  ;;  %v8840_v29 = vadd.f32 %v11721_v54, %v11544_v24  ;;  %v8872_v25 = vadd.f32 %v11725_v9, %v11555_v6  ;;  %v9413_v47 = vld [vmem:[#allocation7 + $0xb0] sm:$0xff]   ;;  %v13135_v54 = vld [vmem:[#allocation30_spill] sm:$0xff] }
 0x2ce   : > { %v5565_v5 = vadd.f32 %v5564_v58, %v5563_v45  ;;  %v5585_v4 = vrot.slane %v5584_v55, 2  ;;  %v8841_v20 = vadd.f32 %v11727_v28, %v11559_v22  ;;  %v8873_v41 = vadd.f32 %v11729_v10, %v11563_v23  ;;  %v9417_v58 = vld [vmem:[#allocation7 + $0xb8] sm:$0xff]  }
 0x2cf   : > { %v5579_v39 = vadd.f32 %v5578_v50, %v5577_v19  ;;  %v5572_v60 = vadd.f32 %v5571_v26, %v5570_v0  ;;  %v5009_v1 = vmax.f32 %v8840_v29, 0.0  ;;  %v5011_v2 = vmax.f32 %v8872_v25, 0.0 }
 0x2d0   : > { %8589 = vmatpush3.bf16.msra.mxu0 %v9408_v63  ;;  %8611 = vmatpush3.bf16.msra.mxu1 %v9409_v32  ;;  %v5566_v45 = vrot.slane %v5565_v5, 1  ;;  %v5586_v9 = vadd.f32 %v5585_v4, %v5584_v55  ;;  %v5010_v38 = vmax.f32 %v8841_v20, 0.0  ;;  %v5012_v32 = vmax.f32 %v8873_v41, 0.0  ;;  %v9418_v4 = vld [vmem:[#allocation7 + $0x140] sm:$0xff]  }
 0x2d1   : > { %8590 = vmatprep.subr.bf16.mxu0 %v9410_v46  ;;  %v5580_v28 = vrot.slane %v5579_v39, 1  ;;  %v5573_v62 = vrot.slane %v5572_v60, 1  ;;  %v5673_v63 = vadd.f32 %v5009_v1, %v4993_v12  ;;  %8612 = vmatprep.subr.bf16.mxu1 %v9411_v61  ;;  %v5687_v0 = vadd.f32 %v5011_v2, %v4995_v44  ;;  %v9416_v46 = vld [vmem:[#allocation7 + $0x38] sm:$0xff]  }
 0x2d2   : > { %4553 = vmatmul.mubr.bf16.gmra.mrb[108].mxu0 %v13135_v54  ;;  %4779 = vmatmul.mubr.bf16.gmra.mrb[108].mxu1 %v13135_v54  ;;  %v5567_v10 = vadd.f32 %v5566_v45, %v5565_v5  ;;  %v5587_v19 = vrot.slane %v5586_v9, 1  ;;  %v5680_v13 = vadd.f32 %v5010_v38, %v4994_v40  ;;  %v5694_v29 = vadd.f32 %v5012_v32, %v4996_v3  ;;  %v9419_v40 = vld [vmem:[#allocation7 + $0x1c0] sm:$0xff]  }
 0x2d3   : > { %4562 = vmatprep.mubr.bf16.mxu0 %v12953_v16  ;;  %4788 = vmatprep.mubr.bf16.mxu1 %v12953_v16  ;;  %v5581_v55 = vadd.f32 %v5580_v28, %v5579_v39  ;;  %v5574_v50 = vadd.f32 %v5573_v62, %v5572_v60  ;;  %v5674_v26 = vrot.slane %v5673_v63, 4  ;;  %v5688_v20 = vrot.slane %v5687_v0, 4 }
 0x2d4   : > { %8591 = vmatpush3.bf16.msra.mxu0 %v9412_v49  ;;  %8613 = vmatpush3.bf16.msra.mxu1 %v9413_v47  ;;  %v6049_v12 = vpack.c.bf16 %v5567_v10, %v5567_v10  ;;  %v5588_v25 = vadd.f32 %v5587_v19, %v5586_v9  ;;  %v5681_v1 = vrot.slane %v5680_v13, 4  ;;  %v5695_v44 = vrot.slane %v5694_v29, 4 }
 0x2d5   : > { %8592 = vmatprep.subr.bf16.mxu0 %v9414_v43  ;;  %8614 = vmatprep.subr.bf16.mxu1 %v9415_v8  ;;  %v6051_v61 = vpack.c.bf16 %v5581_v55, %v5581_v55  ;;  %v6050_v5 = vpack.c.bf16 %v5574_v50, %v5574_v50  ;;  %v5675_v41 = vadd.f32 %v5674_v26, %v5673_v63 }
 0x2d6   : > { %v11839_v49 = vunpack.c.l.b16 %v6049_v12  ;;  %v6052_v47 = vpack.c.bf16 %v5588_v25, %v5588_v25  ;;  %v5689_v54 = vadd.f32 %v5688_v20, %v5687_v0  ;;  %v5682_v39 = vadd.f32 %v5681_v1, %v5680_v13 }
 0x2d7   : > { %v11841_v3 = vunpack.c.l.b16 %v6051_v61  ;;  %v11843_v60 = vunpack.c.l.b16 %v6050_v5  ;;  %v5676_v43 = vrot.slane %v5675_v41, 2  ;;  %v5696_v8 = vadd.f32 %v5695_v44, %v5694_v29 }
 0x2d8   : > { %8593 = vmatpush3.bf16.msra.mxu0 %v9416_v46  ;;  %8615 = vmatpush3.bf16.msra.mxu1 %v9417_v58  ;;  %v11846_v45 = vunpack.c.l.b16 %v6052_v47  ;;  %v5690_v9 = vrot.slane %v5689_v54, 2  ;;  %v5683_v2 = vrot.slane %v5682_v39, 2  ;;  %v8842_v38 = vadd.f32 %v11734_v30, %v11544_v24 }
 0x2d9   : > { %8622 = vmatprep.subr.bf16.mxu0 %v9418_v4  ;;  %v5677_v28 = vadd.f32 %v5676_v43, %v5675_v41  ;;  %v5697_v62 = vrot.slane %v5696_v8, 2  ;;  %v8874_v63 = vadd.f32 %v11737_v59, %v11555_v6  ;;  %v8843_v32 = vadd.f32 %v11739_v31, %v11559_v22  ;;  %8644 = vmatprep.subr.bf16.mxu1 %v9419_v40 }
 0x2da   : > { %4563 = vmatmul.mubr.bf16.gmra.mrb[112].mxu0 %v13029_v51  ;;  %4789 = vmatmul.mubr.bf16.gmra.mrb[112].mxu1 %v13029_v51  ;;  %v5691_v10 = vadd.f32 %v5690_v9, %v5689_v54  ;;  %v5684_v19 = vadd.f32 %v5683_v2, %v5682_v39  ;;  %v5025_v0 = vmax.f32 %v8842_v38, 0.0  ;;  %v8875_v30 = vadd.f32 %v11741_v33, %v11563_v23 }
 0x2db   : > { %4572 = vmatprep.mubr.bf16.mxu0 %v12953_v16  ;;  %4798 = vmatprep.mubr.bf16.mxu1 %v12953_v16  ;;  %v5678_v51 = vrot.slane %v5677_v28, 1  ;;  %v5698_v13 = vadd.f32 %v5697_v62, %v5696_v8  ;;  %v5027_v46 = vmax.f32 %v8874_v63, 0.0  ;;  %v5026_v58 = vmax.f32 %v8843_v32, 0.0 }
 0x2dc   : > { %v5692_v55 = vrot.slane %v5691_v10, 1  ;;  %v5685_v50 = vrot.slane %v5684_v19, 1  ;;  %v5028_v26 = vmax.f32 %v8875_v30, 0.0  ;;  %v8844_v59 = vadd.f32 %v11743_v37, %v11544_v24 }
 0x2dd   : > { %v5679_v31 = vadd.f32 %v5678_v51, %v5677_v28  ;;  %v5699_v29 = vrot.slane %v5698_v13, 1  ;;  %v8876_v4 = vadd.f32 %v11749_v11, %v11555_v6  ;;  %v8845_v12 = vadd.f32 %v11751_v52, %v11559_v22 }
 0x2de   : > { %v5693_v25 = vadd.f32 %v5692_v55, %v5691_v10  ;;  %v5686_v33 = vadd.f32 %v5685_v50, %v5684_v19  ;;  %v5041_v20 = vmax.f32 %v8844_v59, 0.0  ;;  %v8877_v1 = vadd.f32 %v11761_v57, %v11563_v23 }
 0x2df   : > { %v6065_v61 = vpack.c.bf16 %v5679_v31, %v5679_v31  ;;  %v5700_v5 = vadd.f32 %v5699_v29, %v5698_v13  ;;  %v5043_v41 = vmax.f32 %v8876_v4, 0.0  ;;  %v5042_v44 = vmax.f32 %v8845_v12, 0.0 }
 0x2e0   : > { %v6067_v37 = vpack.c.bf16 %v5693_v25, %v5693_v25  ;;  %v6066_v40 = vpack.c.bf16 %v5686_v33, %v5686_v33  ;;  %v5785_v47 = vadd.f32 %v5041_v20, %v5025_v0  ;;  %v5044_v54 = vmax.f32 %v8877_v1, 0.0 }
 0x2e1   : > { %v11870_v11 = vunpack.c.l.b16 %v6065_v61  ;;  %v6068_v52 = vpack.c.bf16 %v5700_v5, %v5700_v5  ;;  %v5799_v39 = vadd.f32 %v5043_v41, %v5027_v46  ;;  %v5792_v43 = vadd.f32 %v5042_v44, %v5026_v58 }
 0x2e2   : > { %4573 = vmatmul.mubr.bf16.gmra.mrb[116].mxu0 %v13046_v42  ;;  %4799 = vmatmul.mubr.bf16.gmra.mrb[116].mxu1 %v13046_v42  ;;  %v11873_v57 = vunpack.c.l.b16 %v6067_v37  ;;  %v11875_v8 = vunpack.c.l.b16 %v6066_v40  ;;  %v5786_v9 = vrot.slane %v5785_v47, 4  ;;  %v5806_v2 = vadd.f32 %v5044_v54, %v5028_v26 }
 0x2e3   : > { %4582 = vmatprep.mubr.bf16.mxu0 %v12953_v16  ;;  %4808 = vmatprep.mubr.bf16.mxu1 %v12953_v16  ;;  %v11877_v38 = vunpack.c.l.b16 %v6068_v52  ;;  %v5800_v28 = vrot.slane %v5799_v39, 4  ;;  %v5793_v62 = vrot.slane %v5792_v43, 4  ;;  %v8846_v42 = vadd.f32 %v11778_v18, %v11544_v24 }
 0x2e4   : > { %v5787_v63 = vadd.f32 %v5786_v9, %v5785_v47  ;;  %v5807_v32 = vrot.slane %v5806_v2, 4  ;;  %v8878_v10 = vadd.f32 %v11783_v21, %v11555_v6  ;;  %v8847_v19 = vadd.f32 %v11785_v7, %v11559_v22 }
 0x2e5   : > { %v5801_v0 = vadd.f32 %v5800_v28, %v5799_v39  ;;  %v5794_v30 = vadd.f32 %v5793_v62, %v5792_v43  ;;  %v5057_v51 = vmax.f32 %v8846_v42, 0.0  ;;  %v8879_v13 = vadd.f32 %v11791_v15, %v11563_v23 }
 0x2e6   : > { %v5788_v46 = vrot.slane %v5787_v63, 2  ;;  %v5808_v58 = vadd.f32 %v5807_v32, %v5806_v2  ;;  %v5059_v55 = vmax.f32 %v8878_v10, 0.0  ;;  %v5058_v50 = vmax.f32 %v8847_v19, 0.0  ;;  %v13136_v2 = vld [vmem:[#allocation38_spill] sm:$0xff] }
 0x2e7   : > { %v5802_v26 = vrot.slane %v5801_v0, 2  ;;  %v5795_v18 = vrot.slane %v5794_v30, 2  ;;  %v5060_v59 = vmax.f32 %v8879_v13, 0.0  ;;  %v8848_v31 = vadd.f32 %v11793_v48, %v11544_v24  ;;  %v13137_v32 = vld [vmem:[#allocation50_spill] sm:$0xff]  ;;  %v13139_v13 = vld [vmem:[#allocation51_spill] sm:$0xff] }
 0x2e8   : > { %v5789_v21 = vadd.f32 %v5788_v46, %v5787_v63  ;;  %v5809_v7 = vrot.slane %v5808_v58, 2  ;;  %v8880_v29 = vadd.f32 %v11797_v17, %v11555_v6  ;;  %v8849_v15 = vadd.f32 %v11799_v35, %v11559_v22 }
 0x2e9   : > { %v5803_v4 = vadd.f32 %v5802_v26, %v5801_v0  ;;  %v5796_v12 = vadd.f32 %v5795_v18, %v5794_v30  ;;  %v5073_v25 = vmax.f32 %v8848_v31, 0.0  ;;  %v8881_v24 = vadd.f32 %v11801_v14, %v11563_v23  ;;  %v13141_v26 = vld [vmem:[#allocation53_spill] sm:$0xff] }
 0x2ea   : > { %4583 = vmatmul.mubr.bf16.gmra.mrb[120].mxu0 %v13063_v56  ;;  %4809 = vmatmul.mubr.bf16.gmra.mrb[120].mxu1 %v13063_v56  ;;  %v5790_v48 = vrot.slane %v5789_v21, 1  ;;  %v5810_v33 = vadd.f32 %v5809_v7, %v5808_v58  ;;  %v5075_v20 = vmax.f32 %v8880_v29, 0.0  ;;  %v5074_v1 = vmax.f32 %v8849_v15, 0.0  ;;  %v13142_v7 = vld [vmem:[#allocation54_spill] sm:$0xff] }
 0x2eb   : > { %4592 = vmatprep.mubr.bf16.mxu0 %v12953_v16  ;;  %4818 = vmatprep.mubr.bf16.mxu1 %v12953_v16  ;;  %v5804_v6 = vrot.slane %v5803_v4, 1  ;;  %v5797_v17 = vrot.slane %v5796_v12, 1  ;;  %v5897_v61 = vadd.f32 %v5073_v25, %v5057_v51  ;;  %v5076_v22 = vmax.f32 %v8881_v24, 0.0 }
 0x2ec   : > { %v5791_v35 = vadd.f32 %v5790_v48, %v5789_v21  ;;  %v5811_v56 = vrot.slane %v5810_v33, 1  ;;  %v5911_v5 = vadd.f32 %v5075_v20, %v5059_v55  ;;  %v5904_v41 = vadd.f32 %v5074_v1, %v5058_v50  ;;  %v9422_v1 = vld [vmem:[#allocation7 + $0x148] sm:$0xff]  }
 0x2ed   : > { %v5805_v44 = vadd.f32 %v5804_v6, %v5803_v4  ;;  %v5798_v37 = vadd.f32 %v5797_v17, %v5796_v12  ;;  %v5898_v40 = vrot.slane %v5897_v61, 4  ;;  %v5918_v47 = vadd.f32 %v5076_v22, %v5060_v59  ;;  %v9420_v12 = vld [vmem:[#allocation7 + $0x100] sm:$0xff]  }
 0x2ee   : > { %v6081_v54 = vpack.c.bf16 %v5791_v35, %v5791_v35  ;;  %v5812_v23 = vadd.f32 %v5811_v56, %v5810_v33  ;;  %v5912_v14 = vrot.slane %v5911_v5, 4  ;;  %v5905_v16 = vrot.slane %v5904_v41, 4  ;;  %v9421_v33 = vld [vmem:[#allocation7 + $0x180] sm:$0xff]   ;;  %v13143_v35 = vld [vmem:[#allocation49_spill] sm:$0xff] }
 0x2ef   : > { %v6083_v52 = vpack.c.bf16 %v5805_v44, %v5805_v44  ;;  %v6082_v39 = vpack.c.bf16 %v5798_v37, %v5798_v37  ;;  %v5899_v43 = vadd.f32 %v5898_v40, %v5897_v61  ;;  %v5919_v9 = vrot.slane %v5918_v47, 4  ;;  %v9423_v61 = vld [vmem:[#allocation7 + $0x1c8] sm:$0xff]  }
 0x2f0   : > { %v6607_v28 = vunpack.c.l.b16 %v6081_v54  ;;  %v6084_v62 = vpack.c.bf16 %v5812_v23, %v5812_v23  ;;  %v5913_v42 = vadd.f32 %v5912_v14, %v5911_v5  ;;  %v5906_v63 = vadd.f32 %v5905_v16, %v5904_v41  ;;  %v13145_v37 = vld [vmem:[#allocation52_spill] sm:$0xff] }
 0x2f1   : > { %v13138_v10 = vpack.c.b16 %v13137_v32, %v13137_v32  ;;  %v6609_v19 = vunpack.c.l.b16 %v6083_v52  ;;  %v6608_v0 = vunpack.c.l.b16 %v6082_v39  ;;  %v5900_v30 = vrot.slane %v5899_v43, 2  ;;  %v9426_v23 = vld [vmem:[#allocation7 + $0x150] sm:$0xff]   ;;  %v9430_v32 = vld [vmem:[#allocation7 + $0x158] sm:$0xff]  }
 0x2f2   : > { %4593 = vmatmul.mubr.bf16.gmra.mrb[124].mxu0 %v13136_v2  ;;  %4819 = vmatmul.mubr.bf16.gmra.mrb[124].mxu1 %v13136_v2  ;;  %v5920_v51 = vadd.f32 %v5919_v9, %v5918_v47  ;;  %v13140_v46 = vpack.c.b16 %v13139_v13, %v13139_v13  ;;  %v6610_v58 = vunpack.c.l.b16 %v6084_v62  ;;  %v5914_v55 = vrot.slane %v5913_v42, 2  ;;  %v9427_v16 = vld [vmem:[#allocation7 + $0x1d0] sm:$0xff]   ;;  %v9432_v13 = vld [vmem:[#allocation7 + $0x118] sm:$0xff]  }
 0x2f3   : > { %7586 = vmatprep.mubr.bf16.mxu0 %v13138_v10  ;;  %v5907_v50 = vrot.slane %v5906_v63, 2  ;;  %v6679_v18 = vsel %vm6639_vm4, %v11803_v36, %v13141_v26  ;;  %v5901_v59 = vadd.f32 %v5900_v30, %v5899_v43  ;;  %v6693_v29 = vsel %vm6639_vm4, %v11810_v27, %v13142_v7  ;;  %v9431_v30 = vld [vmem:[#allocation7 + $0x1d8] sm:$0xff]  }
 0x2f4   : > { %7626 = vmatprep.mubr.bf16.mxu1 %v13140_v46  ;;  %v5921_v31 = vrot.slane %v5920_v51, 2  ;;  %v6680_v21 = vsel %vm6641_vm5, %v11843_v60, %v6679_v18  ;;  %v5915_v15 = vadd.f32 %v5914_v55, %v5913_v42  ;;  %v6694_v24 = vsel %vm6641_vm5, %v11846_v45, %v6693_v29  ;;  %v9429_v42 = vld [vmem:[#allocation7 + $0x190] sm:$0xff]   ;;  %v9433_v46 = vld [vmem:[#allocation7 + $0x198] sm:$0xff]   ;;  %v9435_v55 = vld [vmem:[#allocation7 + $0x1e0] sm:$0xff]  }
 0x2f5   : > { %v5908_v4 = vadd.f32 %v5907_v50, %v5906_v63  ;;  %v6681_v25 = vsel %vm6643_vm6, %v11875_v8, %v6680_v21  ;;  %v5902_v48 = vrot.slane %v5901_v59, 1  ;;  %v6695_v60 = vsel %vm6643_vm6, %v11877_v38, %v6694_v24  ;;  %v6365_v50 = vld [vmem:[%s365_s19] sm:$0xff]  ;;  %v1018_v26 = vld [vmem:[#allocation5 + $0x8] sm:$0xff]  ;;  %v9436_v18 = vld [vmem:[#allocation7 + $0x120] sm:$0xff]  }
 0x2f6   : > { %v5922_v36 = vadd.f32 %v5921_v31, %v5920_v51  ;;  %v6682_v20 = vsel %vm6645_vm7, %v6608_v0, %v6681_v25  ;;  %v5916_v6 = vrot.slane %v5915_v15, 1  ;;  %v6696_v17 = vsel %vm6645_vm7, %v6610_v58, %v6695_v60  ;;  %v9434_v58 = vld [vmem:[#allocation7 + $0x160] sm:$0xff]   ;;  %6369 = vperm.xlu0 %9361, %v6365_v50   ;;  %v9438_v31 = vld [vmem:[#allocation7 + $0x168] sm:$0xff]   ;;  %v13147_v21 = vld [vmem:[#allocation41_spill] sm:$0xff] }
 0x2f7   : > { %v5909_v27 = vrot.slane %v5908_v4, 1  ;;  %v6673_v8 = vsel %vm6641_vm5, %v11839_v49, %v11808_v34  ;;  %v5903_v22 = vadd.f32 %v5902_v48, %v5901_v59  ;;  %v13144_v56 = vpack.c.b16 %v13143_v35, %v13143_v35  ;;  %v9424_v34 = vld [vmem:[#allocation7 + $0x108] sm:$0xff]   ;;  %v9437_v59 = vld [vmem:[#allocation7 + $0x1a0] sm:$0xff]  }
 0x2f8   : > { %v5923_v45 = vrot.slane %v5922_v36, 1  ;;  %v6674_v5 = vsel %vm6643_vm6, %v11870_v11, %v6673_v8  ;;  %v6687_v38 = vsel %vm6641_vm5, %v11841_v3, %v11816_v53  ;;  %v5917_v41 = vadd.f32 %v5916_v6, %v5915_v15  ;;  %v9425_v11 = vld [vmem:[#allocation7 + $0x188] sm:$0xff]  }
 0x2f9   : > { %v5910_v44 = vadd.f32 %v5909_v27, %v5908_v4  ;;  %v13146_v40 = vpack.c.b16 %v13145_v37, %v13145_v37  ;;  %v6675_v49 = vsel %vm6645_vm7, %v6607_v28, %v6674_v5  ;;  %v6097_v47 = vpack.c.bf16 %v5903_v22, %v5903_v22  ;;  %v9428_v28 = vld [vmem:[#allocation7 + $0x110] sm:$0xff]   ;;  %v9439_v15 = vld [vmem:[#allocation7 + $0x1e8] sm:$0xff]  }
 0x2fa   : > { %7587 = vmatmul.mubr.bf16.vlgmr.msra.gmra.mrb[128].mxu0 %v13144_v56  ;;  %v5924_v54 = vadd.f32 %v5923_v45, %v5922_v36  ;;  %v6688_v53 = vsel %vm6643_vm6, %v11873_v57, %v6687_v38  ;;  %v6099_v3 = vpack.c.bf16 %v5917_v41, %v5917_v41  ;;  %v13148_v7 = vsub.s32 0, %v13147_v21  ;;  %v9441_v60 = vld [vmem:[#allocation7 + $0x1a8] sm:$0xff]  }
 0x2fb   : > { %7627 = vmatmul.mubr.bf16.vlgmr.msra.gmra.mrb[128].mxu1 %v13146_v40  ;;  %8623 = vmatpush3.bf16.msra.mxu0 %v9420_v12  ;;  %v6098_v14 = vpack.c.bf16 %v5910_v44, %v5910_v44  ;;  %v6689_v52 = vsel %vm6645_vm7, %v6609_v19, %v6688_v53  ;;  %v6623_v39 = vunpack.c.l.b16 %v6097_v47  ;;  %v13149_v4 = vsub.s32 2, %v13147_v21  ;;  %v9444_v44 = vld [vmem:[#allocation7 + $0x130] sm:$0xff]   ;;  %v9446_v47 = vld [vmem:[#allocation7 + $0x178] sm:$0xff]  }
 0x2fc   : > { %8645 = vmatpush3.bf16.msra.mxu1 %v9421_v33  ;;  %8624 = vmatprep.subr.bf16.mxu0 %v9422_v1  ;;  %v6100_v43 = vpack.c.bf16 %v5924_v54, %v5924_v54  ;;  %v6625_v9 = vunpack.c.l.b16 %v6099_v3  ;;  %v11956_v29 = vrot.slane %v1018_v26, %v13148_v7  ;;  %v13150_v25 = vsub.s32 1, %v13147_v21  ;;  %v9440_v33 = vld [vmem:[#allocation7 + $0x128] sm:$0xff]   ;;  %v9442_v1 = vld [vmem:[#allocation7 + $0x170] sm:$0xff]   ;;  %v9447_v53 = vld [vmem:[#allocation7 + $0x1f8] sm:$0xff]  }
 0x2fd   : > { %8646 = vmatprep.subr.bf16.mxu1 %v9423_v61  ;;  %v6624_v2 = vunpack.c.l.b16 %v6098_v14  ;;  %v11943_v57 = vsel %vm6647_vm8, %v6623_v39, %v6675_v49  ;;  %v11960_v12 = vrot.slane %v1018_v26, %v13149_v4  ;;  %v13151_v48 = vsub.s32 3, %v13147_v21  ;;  %v4298_v27 = vpop.f32.mrb[64].mxu1  ;;  %v9443_v61 = vld [vmem:[#allocation7 + $0x1f0] sm:$0xff]  }
 0x2fe   : > { %v6626_v62 = vunpack.c.l.b16 %v6100_v43  ;;  %v11947_v10 = vsel %vm6647_vm8, %v6625_v9, %v6689_v52  ;;  %v11964_v24 = vrot.slane %v1018_v26, %v13150_v25  ;;  %v4300_v45 = vpop.f32.mrb[65].mxu1  ;;  %v9445_v49 = vld [vmem:[#allocation7 + $0x1b0] sm:$0xff]  }
 0x2ff   : > { %8625 = vmatpush3.bf16.msra.mxu0 %v9424_v34  ;;  %v6683_v63 = vsel %vm6647_vm8, %v6624_v2, %v6682_v20  ;;  %v11968_v36 = vrot.slane %v1018_v26, %v13151_v48  ;;  %v4072_v20 = vpop.f32.mrb[64].mxu0  ;;  %v8914_v8 = vadd.f32 %v4298_v27, %v11960_v12  ;;  %v4302_v38 = vpop.f32.mrb[66].mxu1  ;;  %v9448_v2 = vld [vmem:[#allocation7 + $0x138] sm:$0xff]  }
 0x300   : > { %8647 = vmatpush3.bf16.msra.mxu1 %v9425_v11  ;;  %8626 = vmatprep.subr.bf16.mxu0 %v9426_v23  ;;  %v6759_v19 = vpack.c.b16 %v6683_v63, %v6683_v63  ;;  %v6697_v0 = vsel %vm6647_vm8, %v6626_v62, %v6696_v17  ;;  %v8882_v6 = vadd.f32 %v4072_v20, %v11956_v29  ;;  %v4074_v17 = vpop.f32.mrb[65].mxu0  ;;  %v4304_v34 = vpop.f32.mrb[67].mxu1  ;;  %v9449_v63 = vld [vmem:[#allocation7 + $0x1b8] sm:$0xff]   ;;  %v9452_v20 = vld [vmem:[#allocation7 + $0x200] sm:$0xff]  }
 0x301   : > { %8648 = vmatprep.subr.bf16.mxu1 %v9427_v16  ;;  %v6761_v51 = vpack.c.b16 %v6697_v0, %v6697_v0  ;;  %v8883_v22 = vadd.f32 %v4074_v17, %v11964_v24  ;;  %v4076_v35 = vpop.f32.mrb[66].mxu0  ;;  %v8915_v56 = vadd.f32 %v4300_v45, %v11968_v36  ;;  %v8916_v37 = vadd.f32 %v4302_v38, %v11960_v12  ;;  %v9453_v17 = vld [vmem:[#allocation7 + $0x280] sm:$0xff]  }
 0x302   : > { %7666 = vmatprep.mubr.bf16.mxu0 %v6759_v19  ;;  %v8884_v5 = vadd.f32 %v4076_v35, %v11956_v29  ;;  %v4078_v41 = vpop.f32.mrb[67].mxu0  ;;  %v4837_v54 = vmax.f32 %v8882_v6, 0.0  ;;  %v8917_v23 = vadd.f32 %v4304_v34, %v11968_v36  ;;  %v4839_v3 = vmax.f32 %v8914_v8, 0.0  ;;  %v9450_v19 = vld [vmem:[#allocation7 + $0x240] sm:$0xff]  }
 0x303   : > { %8627 = vmatpush3.bf16.msra.mxu0 %v9428_v28  ;;  %7706 = vmatprep.mubr.bf16.mxu1 %v6761_v51  ;;  %v8885_v40 = vadd.f32 %v4078_v41, %v11964_v24  ;;  %v4838_v14 = vmax.f32 %v8883_v22, 0.0  ;;  %v4855_v16 = vmax.f32 %v8916_v37, 0.0  ;;  %v4840_v39 = vmax.f32 %v8915_v56, 0.0  ;;  %v9455_v56 = vld [vmem:[#allocation7 + $0x2c8] sm:$0xff]  }
 0x304   : > { %8649 = vmatpush3.bf16.msra.mxu1 %v9429_v42  ;;  %8628 = vmatprep.subr.bf16.mxu0 %v9430_v32  ;;  %v4853_v11 = vmax.f32 %v8884_v5, 0.0  ;;  %v4856_v9 = vmax.f32 %v8917_v23, 0.0  ;;  %v4082_v42 = vpop.f32.mrb[68].mxu0  ;;  %v6758_v32 = vpack.c.b16 %v11943_v57, %v11943_v57 }
 0x305   : > { %8650 = vmatprep.subr.bf16.mxu1 %v9431_v30  ;;  %v4854_v52 = vmax.f32 %v8885_v40, 0.0  ;;  %v5155_v28 = vadd.f32 %v4855_v16, %v4839_v3  ;;  %v8886_v51 = vadd.f32 %v4082_v42, %v11956_v29  ;;  %v9458_v16 = vld [vmem:[#allocation7 + $0x250] sm:$0xff]  }
 0x306   : > { %v5141_v43 = vadd.f32 %v4853_v11, %v4837_v54  ;;  %v5162_v30 = vadd.f32 %v4856_v9, %v4840_v39 }
 0x307   : > { %8629 = vmatpush3.bf16.msra.mxu0 %v9432_v13  ;;  %v5148_v62 = vadd.f32 %v4854_v52, %v4838_v14  ;;  %v4308_v13 = vpop.f32.mrb[68].mxu1  ;;  %v5156_v50 = vrot.slane %v5155_v28, 4  ;;  %v4869_v4 = vmax.f32 %v8886_v51, 0.0  ;;  %v9457_v14 = vld [vmem:[#allocation7 + $0x288] sm:$0xff]  }
 0x308   : > { %8651 = vmatpush3.bf16.msra.mxu1 %v9433_v46  ;;  %8630 = vmatprep.subr.bf16.mxu0 %v9434_v58  ;;  %v5142_v0 = vrot.slane %v5141_v43, 4  ;;  %v4084_v46 = vpop.f32.mrb[69].mxu0  ;;  %v6760_v58 = vpack.c.b16 %v11947_v10, %v11947_v10 }
 0x309   : > { %8652 = vmatprep.subr.bf16.mxu1 %v9435_v55  ;;  %v9451_v55 = vld [vmem:[#allocation7 + $0x2c0] sm:$0xff]   ;;  %v5149_v26 = vrot.slane %v5148_v62, 4  ;;  %v4086_v57 = vpop.f32.mrb[70].mxu0 }
 0x30a   : > { %v5143_v7 = vadd.f32 %v5142_v0, %v5141_v43  ;;  %v8888_v35 = vadd.f32 %v4086_v57, %v11956_v29 }
 0x30b   : > { %8631 = vmatpush3.bf16.msra.mxu0 %v9436_v18  ;;  %v8918_v18 = vadd.f32 %v4308_v13, %v11960_v12  ;;  %v5150_v10 = vadd.f32 %v5149_v26, %v5148_v62  ;;  %v9459_v62 = vld [vmem:[#allocation7 + $0x2d0] sm:$0xff]  }
 0x30c   : > { %8653 = vmatpush3.bf16.msra.mxu1 %v9437_v59  ;;  %8632 = vmatprep.subr.bf16.mxu0 %v9438_v31  ;;  %v8887_v59 = vadd.f32 %v4084_v46, %v11964_v24  ;;  %v4310_v31 = vpop.f32.mrb[69].mxu1  ;;  %v5144_v8 = vrot.slane %v5143_v7, 2  ;;  %v4885_v34 = vmax.f32 %v8888_v35, 0.0  ;;  %v9460_v26 = vld [vmem:[#allocation7 + $0x210] sm:$0xff]  }
 0x30d   : > { %8654 = vmatprep.subr.bf16.mxu1 %v9439_v15  ;;  %v5163_v15 = vrot.slane %v5162_v30, 4  ;;  %v8919_v25 = vadd.f32 %v4310_v31, %v11968_v36  ;;  %v4312_v48 = vpop.f32.mrb[70].mxu1  ;;  %v5151_v38 = vrot.slane %v5150_v10, 2 }
 0x30e   : > { %v4870_v6 = vmax.f32 %v8887_v59, 0.0  ;;  %v4314_v27 = vpop.f32.mrb[71].mxu1  ;;  %v8920_v41 = vadd.f32 %v4312_v48, %v11960_v12  ;;  %v5145_v37 = vadd.f32 %v5144_v8, %v5143_v7  ;;  %v5253_v43 = vadd.f32 %v4885_v34, %v4869_v4  ;;  %v9462_v4 = vld [vmem:[#allocation7 + $0x258] sm:$0xff]  }
 0x30f   : > { %8633 = vmatpush3.bf16.msra.mxu0 %v9440_v33  ;;  %v4088_v33 = vpop.f32.mrb[71].mxu0  ;;  %v5164_v22 = vadd.f32 %v5163_v15, %v5162_v30  ;;  %v4872_v45 = vmax.f32 %v8919_v25, 0.0  ;;  %v5152_v11 = vadd.f32 %v5151_v38, %v5150_v10  ;;  %v9461_v15 = vld [vmem:[#allocation7 + $0x290] sm:$0xff]  }
 0x310   : > { %8655 = vmatpush3.bf16.msra.mxu1 %v9441_v60  ;;  %8634 = vmatprep.subr.bf16.mxu0 %v9442_v1  ;;  %v5157_v60 = vadd.f32 %v5156_v50, %v5155_v28  ;;  %v4871_v1 = vmax.f32 %v8918_v18, 0.0  ;;  %v4887_v23 = vmax.f32 %v8920_v41, 0.0  ;;  %v11990_v3 = vpop.f32.mrb[72].mxu0  ;;  %v5146_v52 = vrot.slane %v5145_v37, 1 }
 0x311   : > { %8656 = vmatprep.subr.bf16.mxu1 %v9443_v61  ;;  %v9454_v61 = vld [vmem:[#allocation7 + $0x248] sm:$0xff]   ;;  %v5165_v40 = vrot.slane %v5164_v22, 2  ;;  %v4094_v28 = vpop.f32.mrb[73].mxu0  ;;  %v5254_v46 = vrot.slane %v5253_v43, 4 }
 0x312   : > { %v5158_v5 = vrot.slane %v5157_v60, 2  ;;  %v11992_v30 = vpop.f32.mrb[74].mxu0  ;;  %v5147_v51 = vadd.f32 %v5146_v52, %v5145_v37  ;;  %v9466_v37 = vld [vmem:[#allocation7 + $0x260] sm:$0xff]   ;;  %v8891_v52 = vadd.f32 %v4094_v28, %v11964_v24 }
 0x313   : > { %8635 = vmatpush3.bf16.msra.mxu0 %v9444_v44  ;;  %v8889_v44 = vadd.f32 %v4088_v33, %v11964_v24  ;;  %v5166_v39 = vadd.f32 %v5165_v40, %v5164_v22  ;;  %v11996_v50 = vpop.f32.mrb[75].mxu0  ;;  %v5255_v33 = vadd.f32 %v5254_v46, %v5253_v43 }
 0x314   : > { %8657 = vmatpush3.bf16.msra.mxu1 %v9445_v49  ;;  %8636 = vmatprep.subr.bf16.mxu0 %v9446_v47  ;;  %v8921_v49 = vadd.f32 %v4314_v27, %v11968_v36  ;;  %v9456_v47 = vld [vmem:[#allocation7 + $0x208] sm:$0xff]   ;;  %v5159_v54 = vadd.f32 %v5158_v5, %v5157_v60  ;;  %v5989_v25 = vpack.c.bf16 %v5147_v51, %v5147_v51  ;;  %v9463_v60 = vld [vmem:[#allocation7 + $0x2d8] sm:$0xff]   ;;  %v9469_v51 = vld [vmem:[#allocation7 + $0x2a0] sm:$0xff]   ;;  %v4902_v28 = vmax.f32 %v8891_v52, 0.0 }
 0x315   : > { %8658 = vmatprep.subr.bf16.mxu1 %v9447_v53  ;;  %v4886_v53 = vmax.f32 %v8889_v44, 0.0  ;;  %v5167_v13 = vrot.slane %v5166_v39, 1  ;;  %v5256_v8 = vrot.slane %v5255_v33, 2  ;;  %v9465_v44 = vld [vmem:[#allocation7 + $0x298] sm:$0xff]  }
 0x316   : > { %v4888_v9 = vmax.f32 %v8921_v49, 0.0  ;;  %v5160_v42 = vrot.slane %v5159_v54, 1 }
 0x317   : > { %8637 = vmatpush3.bf16.msra.mxu0 %v9448_v2  ;;  %v4318_v2 = vpop.f32.mrb[72].mxu1  ;;  %v5168_v48 = vadd.f32 %v5167_v13, %v5166_v39  ;;  %v5257_v34 = vadd.f32 %v5256_v8, %v5255_v33 }
 0x318   : > { %8659 = vmatpush3.bf16.msra.mxu1 %v9449_v63  ;;  %8666 = vmatprep.subr.bf16.mxu0 %v9450_v19  ;;  %v5153_v63 = vrot.slane %v5152_v11, 1  ;;  %v5260_v19 = vadd.f32 %v4886_v53, %v4870_v6  ;;  %v4320_v0 = vpop.f32.mrb[73].mxu1  ;;  %v5161_v18 = vadd.f32 %v5160_v42, %v5159_v54 }
 0x319   : > { %8688 = vmatprep.subr.bf16.mxu1 %v9451_v55  ;;  %v11994_v55 = vpop.f32.mrb[74].mxu1  ;;  %v12006_v41 = vpop.f32.mrb[76].mxu0 }
 0x31a   : > { %7667 = vmatmul.mubr.bf16.vlgmr.msra.gmra.mrb[132].mxu0 %v6758_v32  ;;  %v5267_v32 = vadd.f32 %v4887_v23, %v4871_v1  ;;  %v5154_v59 = vadd.f32 %v5153_v63, %v5152_v11  ;;  %v5261_v57 = vrot.slane %v5260_v19, 4  ;;  %v11998_v7 = vpop.f32.mrb[75].mxu1  ;;  %v5991_v10 = vpack.c.bf16 %v5161_v18, %v5161_v18  ;;  %v12014_v11 = vpop.f32.mrb[77].mxu0  ;;  %v9467_v23 = vld [vmem:[#allocation7 + $0x2e0] sm:$0xff]  }
 0x31b   : > { %7707 = vmatmul.mubr.bf16.vlgmr.msra.gmra.mrb[132].mxu1 %v6760_v58  ;;  %8667 = vmatpush3.bf16.msra.mxu0 %v9452_v20  ;;  %v5274_v58 = vadd.f32 %v4888_v9, %v4872_v45  ;;  %v9464_v45 = vld [vmem:[#allocation7 + $0x218] sm:$0xff]   ;;  %v12012_v54 = vpop.f32.mrb[76].mxu1  ;;  %v12020_v43 = vpop.f32.mrb[78].mxu0  ;;  %v5258_v9 = vrot.slane %v5257_v34, 1 }
 0x31c   : > { %8689 = vmatpush3.bf16.msra.mxu1 %v9453_v17  ;;  %8668 = vmatprep.subr.bf16.mxu0 %v9454_v61  ;;  %v5268_v31 = vrot.slane %v5267_v32, 4  ;;  %v5990_v1 = vpack.c.bf16 %v5154_v59, %v5154_v59  ;;  %v5262_v27 = vadd.f32 %v5261_v57, %v5260_v19  ;;  %v12000_v17 = vunpack.c.l.b16 %v5989_v25  ;;  %v12018_v39 = vpop.f32.mrb[77].mxu1  ;;  %v9468_v19 = vld [vmem:[#allocation7 + $0x220] sm:$0xff]   ;;  %v9471_v57 = vld [vmem:[#allocation7 + $0x2e8] sm:$0xff]  }
 0x31d   : > { %8690 = vmatprep.subr.bf16.mxu1 %v9455_v56  ;;  %v5275_v20 = vrot.slane %v5274_v58, 4  ;;  %v5992_v61 = vpack.c.bf16 %v5168_v48, %v5168_v48  ;;  %v12002_v35 = vunpack.c.l.b16 %v5991_v10  ;;  %v12023_v63 = vpop.f32.mrb[78].mxu1  ;;  %v5259_v18 = vadd.f32 %v5258_v9, %v5257_v34 }
 0x31e   : > { %v5269_v6 = vadd.f32 %v5268_v31, %v5267_v32  ;;  %v12004_v56 = vunpack.c.l.b16 %v5990_v1  ;;  %v5263_v38 = vrot.slane %v5262_v27, 2  ;;  %v12025_v32 = vpop.f32.mrb[79].mxu0  ;;  %v8924_v25 = vadd.f32 %v11994_v55, %v11960_v12  ;;  %v9472_v1 = vld [vmem:[#allocation7 + $0x228] sm:$0xff]  }
 0x31f   : > { %8669 = vmatpush3.bf16.msra.mxu0 %v9456_v47  ;;  %v5276_v22 = vadd.f32 %v5275_v20, %v5274_v58  ;;  %v12008_v40 = vunpack.c.l.b16 %v5992_v61  ;;  %v8890_v47 = vadd.f32 %v11990_v3, %v11956_v29  ;;  %v8923_v3 = vadd.f32 %v4320_v0, %v11968_v36  ;;  %v12027_v58 = vpop.f32.mrb[79].mxu1  ;;  %v9473_v55 = vld [vmem:[#allocation7 + $0x2a8] sm:$0xff]  }
 0x320   : > { %8691 = vmatpush3.bf16.msra.mxu1 %v9457_v14  ;;  %8670 = vmatprep.subr.bf16.mxu0 %v9458_v16  ;;  %v5270_v5 = vrot.slane %v5269_v6, 2  ;;  %v5264_v14 = vadd.f32 %v5263_v38, %v5262_v27  ;;  %v8922_v16 = vadd.f32 %v4318_v2, %v11960_v12  ;;  %v8892_v0 = vadd.f32 %v11992_v30, %v11956_v29 }
 0x321   : > { %8692 = vmatprep.subr.bf16.mxu1 %v9459_v62  ;;  %v5277_v49 = vrot.slane %v5276_v22, 2  ;;  %v4901_v42 = vmax.f32 %v8890_v47, 0.0  ;;  %v4904_v31 = vmax.f32 %v8923_v3, 0.0  ;;  %v8893_v48 = vadd.f32 %v11996_v50, %v11964_v24  ;;  %v12037_v8 = vpop.f32.mrb[80].mxu0 }
 0x322   : > { %v5271_v53 = vadd.f32 %v5270_v5, %v5269_v6  ;;  %v5265_v2 = vrot.slane %v5264_v14, 1  ;;  %v4903_v46 = vmax.f32 %v8922_v16, 0.0  ;;  %v6005_v33 = vpack.c.bf16 %v5259_v18, %v5259_v18 }
 0x323   : > { %8671 = vmatpush3.bf16.msra.mxu0 %v9460_v26  ;;  %v5278_v62 = vadd.f32 %v5277_v49, %v5276_v22  ;;  %v9470_v26 = vld [vmem:[#allocation7 + $0x268] sm:$0xff]   ;;  %v8925_v10 = vadd.f32 %v11998_v7, %v11968_v36  ;;  %v4919_v27 = vmax.f32 %v8924_v25, 0.0  ;;  %v4918_v61 = vmax.f32 %v8893_v48, 0.0  ;;  %v9474_v22 = vld [vmem:[#allocation7 + $0x270] sm:$0xff]  }
 0x324   : > { %8693 = vmatpush3.bf16.msra.mxu1 %v9461_v15  ;;  %8672 = vmatprep.subr.bf16.mxu0 %v9462_v4  ;;  %v5272_v13 = vrot.slane %v5271_v53, 1  ;;  %v5266_v4 = vadd.f32 %v5265_v2, %v5264_v14  ;;  %v9475_v7 = vld [vmem:[#allocation7 + $0x2f0] sm:$0xff]  }
 0x325   : > { %8694 = vmatprep.subr.bf16.mxu1 %v9463_v60  ;;  %v5279_v59 = vrot.slane %v5278_v62, 1  ;;  %v4917_v60 = vmax.f32 %v8892_v0, 0.0  ;;  %v4920_v38 = vmax.f32 %v8925_v10, 0.0  ;;  %v5379_v47 = vadd.f32 %v4919_v27, %v4903_v46 }
 0x326   : > { %v5273_v15 = vadd.f32 %v5272_v13, %v5271_v53  ;;  %v6006_v30 = vpack.c.bf16 %v5266_v4, %v5266_v4  ;;  %v8895_v4 = vadd.f32 %v12014_v11, %v11964_v24 }
 0x327   : > { %8673 = vmatpush3.bf16.msra.mxu0 %v9464_v45  ;;  %v5280_v20 = vadd.f32 %v5279_v59, %v5278_v62  ;;  %v6531_v45 = vunpack.c.l.b16 %v6005_v33  ;;  %v5365_v5 = vadd.f32 %v4917_v60, %v4901_v42  ;;  %v5386_v62 = vadd.f32 %v4920_v38, %v4904_v31 }
 0x328   : > { %8695 = vmatpush3.bf16.msra.mxu1 %v9465_v44  ;;  %8674 = vmatprep.subr.bf16.mxu0 %v9466_v37  ;;  %v6007_v6 = vpack.c.bf16 %v5273_v15, %v5273_v15  ;;  %v12039_v44 = vpop.f32.mrb[80].mxu1  ;;  %v12041_v37 = vpop.f32.mrb[81].mxu0  ;;  %v6532_v49 = vunpack.c.l.b16 %v6006_v30  ;;  %v5380_v2 = vrot.slane %v5379_v47, 4  ;;  %v8926_v15 = vadd.f32 %v12012_v54, %v11960_v12  ;;  %v9481_v54 = vld [vmem:[#allocation7 + $0x2b8] sm:$0xff]  }
 0x329   : > { %8696 = vmatprep.subr.bf16.mxu1 %v9467_v23  ;;  %v6008_v50 = vpack.c.bf16 %v5280_v20, %v5280_v20  ;;  %v5372_v23 = vadd.f32 %v4918_v61, %v4902_v28  ;;  %v12043_v53 = vpop.f32.mrb[81].mxu1  ;;  %v12045_v14 = vpop.f32.mrb[82].mxu0  ;;  %v12049_v16 = vsel %vm6635_vm2, %v6531_v45, %v12000_v17  ;;  %v5366_v9 = vrot.slane %v5365_v5, 4  ;;  %v9477_v28 = vld [vmem:[#allocation7 + $0x2b0] sm:$0xff]   ;;  %v9480_v20 = vld [vmem:[#allocation7 + $0x238] sm:$0xff]  }
 0x32a   : > { %v6533_v34 = vunpack.c.l.b16 %v6007_v6  ;;  %v12051_v42 = vpop.f32.mrb[82].mxu1  ;;  %v12053_v3 = vpop.f32.mrb[83].mxu0  ;;  %v12061_v13 = vsel %vm6635_vm2, %v6532_v49, %v12004_v56  ;;  %v5387_v31 = vrot.slane %v5386_v62, 4  ;;  %v9479_v56 = vld [vmem:[#allocation7 + $0x2f8] sm:$0xff]   ;;  %v5381_v0 = vadd.f32 %v5380_v2, %v5379_v47 }
 0x32b   : > { %8675 = vmatpush3.bf16.msra.mxu0 %v9468_v19  ;;  %v6534_v52 = vunpack.c.l.b16 %v6008_v50  ;;  %v9476_v19 = vld [vmem:[#allocation7 + $0x230] sm:$0xff]   ;;  %v5373_v17 = vrot.slane %v5372_v23, 4  ;;  %v12063_v46 = vpop.f32.mrb[83].mxu1  ;;  %v5367_v59 = vadd.f32 %v5366_v9, %v5365_v5  ;;  %v4935_v10 = vmax.f32 %v8926_v15, 0.0  ;;  %v12077_v6 = vpop.f32.mrb[84].mxu0 }
 0x32c   : > { %8697 = vmatpush3.bf16.msra.mxu1 %v9469_v51  ;;  %8676 = vmatprep.subr.bf16.mxu0 %v9470_v26  ;;  %v12057_v51 = vsel %vm6635_vm2, %v6533_v34, %v12002_v35  ;;  %v9478_v26 = vld [vmem:[#allocation7 + $0x278] sm:$0xff]   ;;  %v8894_v35 = vadd.f32 %v12006_v41, %v11956_v29  ;;  %v5388_v48 = vadd.f32 %v5387_v31, %v5386_v62  ;;  %v5382_v60 = vrot.slane %v5381_v0, 2 }
 0x32d   : > { %8698 = vmatprep.subr.bf16.mxu1 %v9471_v57  ;;  %v12067_v18 = vsel %vm6635_vm2, %v6534_v52, %v12008_v40  ;;  %v5374_v57 = vadd.f32 %v5373_v17, %v5372_v23  ;;  %v5368_v25 = vrot.slane %v5367_v59, 2  ;;  %v8927_v40 = vadd.f32 %v12018_v39, %v11968_v36  ;;  %v12083_v39 = vpop.f32.mrb[85].mxu0 }
 0x32e   : > { %v4933_v33 = vmax.f32 %v8894_v35, 0.0  ;;  %v5389_v27 = vrot.slane %v5388_v48, 2  ;;  %v8896_v61 = vadd.f32 %v12020_v43, %v11956_v29  ;;  %v8928_v50 = vadd.f32 %v12023_v63, %v11960_v12 }
 0x32f   : > { %8677 = vmatpush3.bf16.msra.mxu0 %v9472_v1  ;;  %v5375_v41 = vrot.slane %v5374_v57, 2  ;;  %v4934_v1 = vmax.f32 %v8895_v4, 0.0  ;;  %v5369_v30 = vadd.f32 %v5368_v25, %v5367_v59  ;;  %v4936_v11 = vmax.f32 %v8927_v40, 0.0 }
 0x330   : > { %8699 = vmatpush3.bf16.msra.mxu1 %v9473_v55  ;;  %8678 = vmatprep.subr.bf16.mxu0 %v9474_v22  ;;  %v12081_v55 = vpop.f32.mrb[84].mxu1  ;;  %v5383_v22 = vadd.f32 %v5382_v60, %v5381_v0  ;;  %v8897_v5 = vadd.f32 %v12025_v32, %v11964_v24  ;;  %v5390_v49 = vadd.f32 %v5389_v27, %v5388_v48  ;;  %v4949_v43 = vmax.f32 %v8896_v61, 0.0 }
 0x331   : > { %8700 = vmatprep.subr.bf16.mxu1 %v9475_v7  ;;  %v5376_v45 = vadd.f32 %v5375_v41, %v5374_v57  ;;  %v12089_v38 = vpop.f32.mrb[85].mxu1  ;;  %v12091_v7 = vpop.f32.mrb[86].mxu0  ;;  %v5370_v34 = vrot.slane %v5369_v30, 1  ;;  %v8929_v47 = vadd.f32 %v12027_v58, %v11968_v36  ;;  %v4951_v62 = vmax.f32 %v8928_v50, 0.0 }
 0x332   : > { %v12095_v23 = vpop.f32.mrb[86].mxu1  ;;  %v12097_v52 = vpop.f32.mrb[87].mxu0  ;;  %v5384_v9 = vrot.slane %v5383_v22, 1  ;;  %v5391_v17 = vrot.slane %v5390_v49, 1 }
 0x333   : > { %8679 = vmatpush3.bf16.msra.mxu0 %v9476_v19  ;;  %v5377_v63 = vrot.slane %v5376_v45, 1  ;;  %v4950_v19 = vmax.f32 %v8897_v5, 0.0  ;;  %v12099_v32 = vpop.f32.mrb[87].mxu1  ;;  %v5371_v2 = vadd.f32 %v5370_v34, %v5369_v30  ;;  %v5491_v35 = vadd.f32 %v4951_v62, %v4935_v10 }
 0x334   : > { %8701 = vmatpush3.bf16.msra.mxu1 %v9477_v28  ;;  %8680 = vmatprep.subr.bf16.mxu0 %v9478_v26  ;;  %v5477_v28 = vadd.f32 %v4949_v43, %v4933_v33  ;;  %v4952_v26 = vmax.f32 %v8929_v47, 0.0  ;;  %v5385_v59 = vadd.f32 %v5384_v9, %v5383_v22  ;;  %v5392_v0 = vadd.f32 %v5391_v17, %v5390_v49  ;;  %v12103_v33 = vpop.f32.mrb[88].mxu1 }
 0x335   : > { %8702 = vmatprep.subr.bf16.mxu1 %v9479_v56  ;;  %v5378_v31 = vadd.f32 %v5377_v63, %v5376_v45  ;;  %v5484_v58 = vadd.f32 %v4950_v19, %v4934_v1  ;;  %v6021_v56 = vpack.c.bf16 %v5371_v2, %v5371_v2  ;;  %v5492_v48 = vrot.slane %v5491_v35, 4  ;;  %v12107_v45 = vpop.f32.mrb[89].mxu1 }
 0x336   : > { %v5478_v57 = vrot.slane %v5477_v28, 4  ;;  %v5498_v15 = vadd.f32 %v4952_v26, %v4936_v11  ;;  %v6023_v4 = vpack.c.bf16 %v5385_v59, %v5385_v59  ;;  %v6024_v41 = vpack.c.bf16 %v5392_v0, %v5392_v0  ;;  %v12113_v43 = vpop.f32.mrb[90].mxu1 }
 0x337   : > { %8681 = vmatpush3.bf16.msra.mxu0 %v9480_v20  ;;  %v6022_v25 = vpack.c.bf16 %v5378_v31, %v5378_v31  ;;  %v5485_v40 = vrot.slane %v5484_v58, 4  ;;  %v12101_v20 = vpop.f32.mrb[88].mxu0  ;;  %v6547_v60 = vunpack.c.l.b16 %v6021_v56  ;;  %v5493_v61 = vadd.f32 %v5492_v48, %v5491_v35  ;;  %v12123_v2 = vpop.f32.mrb[91].mxu1 }
 0x338   : > { %8703 = vmatpush3.bf16.msra.mxu1 %v9481_v54  ;;  %v5479_v54 = vadd.f32 %v5478_v57, %v5477_v28  ;;  %v5499_v30 = vrot.slane %v5498_v15, 4  ;;  %v12105_v27 = vpop.f32.mrb[89].mxu0  ;;  %v6549_v10 = vunpack.c.l.b16 %v6023_v4  ;;  %v6550_v5 = vunpack.c.l.b16 %v6024_v41 }
 0x339   : > { %v6548_v1 = vunpack.c.l.b16 %v6022_v25  ;;  %v5486_v22 = vadd.f32 %v5485_v40, %v5484_v58  ;;  %v12109_v11 = vpop.f32.mrb[90].mxu0  ;;  %v6699_v50 = vsel %vm6637_vm3, %v6547_v60, %v12049_v16  ;;  %v5494_v62 = vrot.slane %v5493_v61, 2 }
 0x33a   : > { %v5480_v34 = vrot.slane %v5479_v54, 2  ;;  %v5500_v49 = vadd.f32 %v5499_v30, %v5498_v15  ;;  %v12115_v47 = vpop.f32.mrb[91].mxu0  ;;  %v6713_v9 = vsel %vm6637_vm3, %v6549_v10, %v12057_v51  ;;  %v12127_v16 = vsel %vm6637_vm3, %v6550_v5, %v12067_v18 }
 0x33b   : > { %v12121_v63 = vsel %vm6637_vm3, %v6548_v1, %v12061_v13  ;;  %v5487_v19 = vrot.slane %v5486_v22, 2  ;;  %v8898_v26 = vadd.f32 %v12037_v8, %v11956_v29  ;;  %v5495_v59 = vadd.f32 %v5494_v62, %v5493_v61 }
 0x33c   : > { %v5481_v17 = vadd.f32 %v5480_v34, %v5479_v54  ;;  %v5501_v28 = vrot.slane %v5500_v49, 2  ;;  %v8930_v51 = vadd.f32 %v12039_v44, %v11960_v12  ;;  %v8899_v13 = vadd.f32 %v12041_v37, %v11964_v24  ;;  %v12137_v25 = vpop.f32.mrb[92].mxu0  ;;  %v12141_v60 = vpop.f32.mrb[92].mxu1 }
 0x33d   : > { %v5488_v31 = vadd.f32 %v5487_v19, %v5486_v22  ;;  %v4965_v56 = vmax.f32 %v8898_v26, 0.0  ;;  %v8931_v18 = vadd.f32 %v12043_v53, %v11968_v36  ;;  %v5496_v0 = vrot.slane %v5495_v59, 1  ;;  %v12143_v37 = vpop.f32.mrb[93].mxu0  ;;  %v12149_v10 = vpop.f32.mrb[93].mxu1 }
 0x33e   : > { %v5482_v35 = vrot.slane %v5481_v17, 1  ;;  %v5502_v58 = vadd.f32 %v5501_v28, %v5500_v49  ;;  %v4967_v15 = vmax.f32 %v8930_v51, 0.0  ;;  %v4966_v4 = vmax.f32 %v8899_v13, 0.0  ;;  %v12151_v1 = vpop.f32.mrb[94].mxu0  ;;  %v12155_v34 = vpop.f32.mrb[94].mxu1 }
 0x33f   : > { %v5489_v57 = vrot.slane %v5488_v31, 1  ;;  %v4968_v40 = vmax.f32 %v8931_v18, 0.0  ;;  %v8900_v44 = vadd.f32 %v12045_v14, %v11956_v29  ;;  %v5497_v41 = vadd.f32 %v5496_v0, %v5495_v59  ;;  %v12157_v49 = vpop.f32.mrb[95].mxu0  ;;  %v12159_v28 = vpop.f32.mrb[95].mxu1 }
 0x340   : > { %v5483_v8 = vadd.f32 %v5482_v35, %v5481_v17  ;;  %v5503_v48 = vrot.slane %v5502_v58, 1  ;;  %v8932_v53 = vadd.f32 %v12051_v42, %v11960_v12  ;;  %v8901_v30 = vadd.f32 %v12053_v3, %v11964_v24 }
 0x341   : > { %v5490_v54 = vadd.f32 %v5489_v57, %v5488_v31  ;;  %v4981_v5 = vmax.f32 %v8900_v44, 0.0  ;;  %v8933_v14 = vadd.f32 %v12063_v46, %v11968_v36  ;;  %v6039_v62 = vpack.c.bf16 %v5497_v41, %v5497_v41 }
 0x342   : > { %v6037_v61 = vpack.c.bf16 %v5483_v8, %v5483_v8  ;;  %v5504_v22 = vadd.f32 %v5503_v48, %v5502_v58  ;;  %v4983_v42 = vmax.f32 %v8932_v53, 0.0  ;;  %v4982_v17 = vmax.f32 %v8901_v30, 0.0 }
 0x343   : > { %v6038_v19 = vpack.c.bf16 %v5490_v54, %v5490_v54  ;;  %v5589_v59 = vadd.f32 %v4981_v5, %v4965_v56  ;;  %v4984_v31 = vmax.f32 %v8933_v14, 0.0  ;;  %v6565_v51 = vunpack.c.l.b16 %v6039_v62 }
 0x344   : > { %v6563_v3 = vunpack.c.l.b16 %v6037_v61  ;;  %v6040_v26 = vpack.c.bf16 %v5504_v22, %v5504_v22  ;;  %v5603_v35 = vadd.f32 %v4983_v42, %v4967_v15  ;;  %v5596_v58 = vadd.f32 %v4982_v17, %v4966_v4 }
 0x345   : > { %v12161_v13 = vunpack.c.l.b16 %v6038_v19  ;;  %v5590_v0 = vrot.slane %v5589_v59, 4  ;;  %v5610_v57 = vadd.f32 %v4984_v31, %v4968_v40  ;;  %v12169_v8 = vsel %vm6639_vm4, %v6565_v51, %v6713_v9 }
 0x346   : > { %v12164_v46 = vsel %vm6639_vm4, %v6563_v3, %v6699_v50  ;;  %v12166_v18 = vunpack.c.l.b16 %v6040_v26  ;;  %v5604_v48 = vrot.slane %v5603_v35, 4  ;;  %v5597_v44 = vrot.slane %v5596_v58, 4 }
 0x347   : > { %v8902_v56 = vadd.f32 %v12077_v6, %v11956_v29  ;;  %v5591_v41 = vadd.f32 %v5590_v0, %v5589_v59  ;;  %v5611_v54 = vrot.slane %v5610_v57, 4  ;;  %v8934_v15 = vadd.f32 %v12081_v55, %v11960_v12 }
 0x348   : > { %v8903_v50 = vadd.f32 %v12083_v39, %v11964_v24  ;;  %v5605_v4 = vadd.f32 %v5604_v48, %v5603_v35  ;;  %v5598_v53 = vadd.f32 %v5597_v44, %v5596_v58  ;;  %v8935_v9 = vadd.f32 %v12089_v38, %v11968_v36 }
 0x349   : > { %v4997_v30 = vmax.f32 %v8902_v56, 0.0  ;;  %v5592_v40 = vrot.slane %v5591_v41, 2  ;;  %v5612_v61 = vadd.f32 %v5611_v54, %v5610_v57  ;;  %v4999_v22 = vmax.f32 %v8934_v15, 0.0 }
 0x34a   : > { %v4998_v5 = vmax.f32 %v8903_v50, 0.0  ;;  %v5606_v14 = vrot.slane %v5605_v4, 2  ;;  %v5599_v6 = vrot.slane %v5598_v53, 2  ;;  %v5000_v62 = vmax.f32 %v8935_v9, 0.0 }
 0x34b   : > { %v8904_v19 = vadd.f32 %v12091_v7, %v11956_v29  ;;  %v5593_v55 = vadd.f32 %v5592_v40, %v5591_v41  ;;  %v5613_v42 = vrot.slane %v5612_v61, 2  ;;  %v8936_v39 = vadd.f32 %v12095_v23, %v11960_v12 }
 0x34c   : > { %v8905_v17 = vadd.f32 %v12097_v52, %v11964_v24  ;;  %v5607_v3 = vadd.f32 %v5606_v14, %v5605_v4  ;;  %v5600_v38 = vadd.f32 %v5599_v6, %v5598_v53  ;;  %v8937_v59 = vadd.f32 %v12099_v32, %v11968_v36 }
 0x34d   : > { %v5013_v26 = vmax.f32 %v8904_v19, 0.0  ;;  %v5594_v31 = vrot.slane %v5593_v55, 1  ;;  %v5614_v51 = vadd.f32 %v5613_v42, %v5612_v61  ;;  %v5015_v35 = vmax.f32 %v8936_v39, 0.0 }
 0x34e   : > { %v5014_v58 = vmax.f32 %v8905_v17, 0.0  ;;  %v5608_v0 = vrot.slane %v5607_v3, 1  ;;  %v5601_v7 = vrot.slane %v5600_v38, 1  ;;  %v5016_v48 = vmax.f32 %v8937_v59, 0.0 }
 0x34f   : > { %v5701_v57 = vadd.f32 %v5013_v26, %v4997_v30  ;;  %v5595_v44 = vadd.f32 %v5594_v31, %v5593_v55  ;;  %v5615_v56 = vrot.slane %v5614_v51, 1  ;;  %v5715_v23 = vadd.f32 %v5015_v35, %v4999_v22 }
 0x350   : > { %v5708_v41 = vadd.f32 %v5014_v58, %v4998_v5  ;;  %v5609_v54 = vadd.f32 %v5608_v0, %v5607_v3  ;;  %v5602_v52 = vadd.f32 %v5601_v7, %v5600_v38  ;;  %v5722_v50 = vadd.f32 %v5016_v48, %v5000_v62 }
 0x351   : > { %v5702_v15 = vrot.slane %v5701_v57, 4  ;;  %v6053_v4 = vpack.c.bf16 %v5595_v44, %v5595_v44  ;;  %v5616_v53 = vadd.f32 %v5615_v56, %v5614_v51  ;;  %v5716_v9 = vrot.slane %v5715_v23, 4 }
 0x352   : > { %v5709_v32 = vrot.slane %v5708_v41, 4  ;;  %v6055_v40 = vpack.c.bf16 %v5609_v54, %v5609_v54  ;;  %v6054_v61 = vpack.c.bf16 %v5602_v52, %v5602_v52  ;;  %v5723_v6 = vrot.slane %v5722_v50, 4 }
 0x353   : > { %v5703_v14 = vadd.f32 %v5702_v15, %v5701_v57  ;;  %v12187_v19 = vunpack.c.l.b16 %v6053_v4  ;;  %v6056_v30 = vpack.c.bf16 %v5616_v53, %v5616_v53  ;;  %v5717_v42 = vadd.f32 %v5716_v9, %v5715_v23 }
 0x354   : > { %v5710_v55 = vadd.f32 %v5709_v32, %v5708_v41  ;;  %v12189_v39 = vunpack.c.l.b16 %v6055_v40  ;;  %v12191_v22 = vunpack.c.l.b16 %v6054_v61  ;;  %v5724_v17 = vadd.f32 %v5723_v6, %v5722_v50 }
 0x355   : > { %v5704_v5 = vrot.slane %v5703_v14, 2  ;;  %v12193_v62 = vunpack.c.l.b16 %v6056_v30  ;;  %v5718_v3 = vrot.slane %v5717_v42, 2  ;;  %v8906_v26 = vadd.f32 %v12101_v20, %v11956_v29 }
 0x356   : > { %v5711_v38 = vrot.slane %v5710_v55, 2  ;;  %v5725_v31 = vrot.slane %v5724_v17, 2  ;;  %v8938_v51 = vadd.f32 %v12103_v33, %v11960_v12  ;;  %v8907_v35 = vadd.f32 %v12105_v27, %v11964_v24 }
 0x357   : > { %v5705_v59 = vadd.f32 %v5704_v5, %v5703_v14  ;;  %v5719_v58 = vadd.f32 %v5718_v3, %v5717_v42  ;;  %v5029_v7 = vmax.f32 %v8906_v26, 0.0  ;;  %v8939_v57 = vadd.f32 %v12107_v45, %v11968_v36 }
 0x358   : > { %v5712_v0 = vadd.f32 %v5711_v38, %v5710_v55  ;;  %v5726_v44 = vadd.f32 %v5725_v31, %v5724_v17  ;;  %v5031_v56 = vmax.f32 %v8938_v51, 0.0  ;;  %v5030_v23 = vmax.f32 %v8907_v35, 0.0 }
 0x359   : > { %v5706_v48 = vrot.slane %v5705_v59, 1  ;;  %v5720_v41 = vrot.slane %v5719_v58, 1  ;;  %v5032_v54 = vmax.f32 %v8939_v57, 0.0  ;;  %v8908_v52 = vadd.f32 %v12109_v11, %v11956_v29 }
 0x35a   : > { %v5713_v20 = vrot.slane %v5712_v0, 1  ;;  %v5727_v15 = vrot.slane %v5726_v44, 1  ;;  %v8940_v27 = vadd.f32 %v12113_v43, %v11960_v12  ;;  %v8909_v50 = vadd.f32 %v12115_v47, %v11964_v24 }
 0x35b   : > { %v5707_v33 = vadd.f32 %v5706_v48, %v5705_v59  ;;  %v5721_v4 = vadd.f32 %v5720_v41, %v5719_v58  ;;  %v5045_v53 = vmax.f32 %v8908_v52, 0.0  ;;  %v8941_v9 = vadd.f32 %v12123_v2, %v11968_v36 }
 0x35c   : > { %v5714_v45 = vadd.f32 %v5713_v20, %v5712_v0  ;;  %v5728_v40 = vadd.f32 %v5727_v15, %v5726_v44  ;;  %v5047_v61 = vmax.f32 %v8940_v27, 0.0  ;;  %v5046_v14 = vmax.f32 %v8909_v50, 0.0 }
 0x35d   : > { %v6069_v32 = vpack.c.bf16 %v5707_v33, %v5707_v33  ;;  %v6071_v6 = vpack.c.bf16 %v5721_v4, %v5721_v4  ;;  %v5813_v30 = vadd.f32 %v5045_v53, %v5029_v7  ;;  %v5048_v42 = vmax.f32 %v8941_v9, 0.0 }
 0x35e   : > { %v6070_v11 = vpack.c.bf16 %v5714_v45, %v5714_v45  ;;  %v6072_v43 = vpack.c.bf16 %v5728_v40, %v5728_v40  ;;  %v5827_v5 = vadd.f32 %v5047_v61, %v5031_v56  ;;  %v5820_v17 = vadd.f32 %v5046_v14, %v5030_v23 }
 0x35f   : > { %v12211_v55 = vunpack.c.l.b16 %v6069_v32  ;;  %v12213_v47 = vunpack.c.l.b16 %v6071_v6  ;;  %v5814_v38 = vrot.slane %v5813_v30, 4  ;;  %v5834_v26 = vadd.f32 %v5048_v42, %v5032_v54 }
 0x360   : > { %v12215_v3 = vunpack.c.l.b16 %v6070_v11  ;;  %v12217_v2 = vunpack.c.l.b16 %v6072_v43  ;;  %v5828_v59 = vrot.slane %v5827_v5, 4  ;;  %v5821_v31 = vrot.slane %v5820_v17, 4 }
 0x361   : > { %v8910_v51 = vadd.f32 %v12137_v25, %v11956_v29  ;;  %v5815_v35 = vadd.f32 %v5814_v38, %v5813_v30  ;;  %v5835_v58 = vrot.slane %v5834_v26, 4  ;;  %v8942_v0 = vadd.f32 %v12141_v60, %v11960_v12 }
 0x362   : > { %v8911_v7 = vadd.f32 %v12143_v37, %v11964_v24  ;;  %v5829_v57 = vadd.f32 %v5828_v59, %v5827_v5  ;;  %v5822_v48 = vadd.f32 %v5821_v31, %v5820_v17  ;;  %v8943_v56 = vadd.f32 %v12149_v10, %v11968_v36 }
 0x363   : > { %v5061_v44 = vmax.f32 %v8910_v51, 0.0  ;;  %v5816_v23 = vrot.slane %v5815_v35, 2  ;;  %v5836_v41 = vadd.f32 %v5835_v58, %v5834_v26  ;;  %v5063_v20 = vmax.f32 %v8942_v0, 0.0 }
 0x364   : > { %v5062_v54 = vmax.f32 %v8911_v7, 0.0  ;;  %v5830_v52 = vrot.slane %v5829_v57, 2  ;;  %v5823_v25 = vrot.slane %v5822_v48, 2  ;;  %v5064_v33 = vmax.f32 %v8943_v56, 0.0 }
 0x365   : > { %v8912_v15 = vadd.f32 %v12151_v1, %v11956_v29  ;;  %v5817_v60 = vadd.f32 %v5816_v23, %v5815_v35  ;;  %v5837_v27 = vrot.slane %v5836_v41, 2  ;;  %v8944_v37 = vadd.f32 %v12155_v34, %v11960_v12 }
 0x366   : > { %v8913_v50 = vadd.f32 %v12157_v49, %v11964_v24  ;;  %v5831_v4 = vadd.f32 %v5830_v52, %v5829_v57  ;;  %v5824_v10 = vadd.f32 %v5823_v25, %v5822_v48  ;;  %v8945_v53 = vadd.f32 %v12159_v28, %v11968_v36 }
 0x367   : > { %v5077_v45 = vmax.f32 %v8912_v15, 0.0  ;;  %v5818_v9 = vrot.slane %v5817_v60, 1  ;;  %v5838_v32 = vadd.f32 %v5837_v27, %v5836_v41  ;;  %v5079_v40 = vmax.f32 %v8944_v37, 0.0  ;;  %v9482_v15 = vld [vmem:[#allocation7 + $0x340] sm:$0xff]  }
 0x368   : > { %v5078_v61 = vmax.f32 %v8913_v50, 0.0  ;;  %v5832_v14 = vrot.slane %v5831_v4, 1  ;;  %v5825_v29 = vrot.slane %v5824_v10, 1  ;;  %v5080_v6 = vmax.f32 %v8945_v53, 0.0  ;;  %8710 = vmatprep.subr.bf16.mxu0 %v9482_v15 }
 0x369   : > { %v5925_v1 = vadd.f32 %v5077_v45, %v5061_v44  ;;  %v5819_v11 = vadd.f32 %v5818_v9, %v5817_v60  ;;  %v5839_v30 = vrot.slane %v5838_v32, 1  ;;  %v5939_v12 = vadd.f32 %v5079_v40, %v5063_v20  ;;  %v9483_v60 = vld [vmem:[#allocation7 + $0x3c0] sm:$0xff]  }
 0x36a   : > { %v5932_v34 = vadd.f32 %v5078_v61, %v5062_v54  ;;  %v5833_v42 = vadd.f32 %v5832_v14, %v5831_v4  ;;  %v5826_v24 = vadd.f32 %v5825_v29, %v5824_v10  ;;  %v5946_v43 = vadd.f32 %v5080_v6, %v5064_v33  ;;  %8732 = vmatprep.subr.bf16.mxu1 %v9483_v60 }
 0x36b   : > { %v5926_v49 = vrot.slane %v5925_v1, 4  ;;  %v6085_v5 = vpack.c.bf16 %v5819_v11, %v5819_v11  ;;  %v5840_v17 = vadd.f32 %v5839_v30, %v5838_v32  ;;  %v5940_v38 = vrot.slane %v5939_v12, 4 }
 0x36c   : > { %v5933_v36 = vrot.slane %v5932_v34, 4  ;;  %v6087_v28 = vpack.c.bf16 %v5833_v42, %v5833_v42  ;;  %v6086_v26 = vpack.c.bf16 %v5826_v24, %v5826_v24  ;;  %v5947_v31 = vrot.slane %v5946_v43, 4 }
 0x36d   : > { %v5927_v59 = vadd.f32 %v5926_v49, %v5925_v1  ;;  %v6611_v51 = vunpack.c.l.b16 %v6085_v5  ;;  %v6088_v35 = vpack.c.bf16 %v5840_v17, %v5840_v17  ;;  %v5941_v58 = vadd.f32 %v5940_v38, %v5939_v12  ;;  %v9484_v49 = vld [vmem:[#allocation7 + $0x300] sm:$0xff]   ;;  %v9486_v38 = vld [vmem:[#allocation7 + $0x348] sm:$0xff]  }
 0x36e   : > { %v5934_v0 = vadd.f32 %v5933_v36, %v5932_v34  ;;  %v6613_v7 = vunpack.c.l.b16 %v6087_v28  ;;  %v6612_v57 = vunpack.c.l.b16 %v6086_v26  ;;  %v5948_v44 = vadd.f32 %v5947_v31, %v5946_v43  ;;  %v9485_v17 = vld [vmem:[#allocation7 + $0x380] sm:$0xff]   ;;  %v9487_v28 = vld [vmem:[#allocation7 + $0x3c8] sm:$0xff]   ;;  %v9490_v31 = vld [vmem:[#allocation7 + $0x350] sm:$0xff]  }
 0x36f   : > { %v5928_v48 = vrot.slane %v5927_v59, 2  ;;  %v6614_v56 = vunpack.c.l.b16 %v6088_v35  ;;  %v5942_v23 = vrot.slane %v5941_v58, 2  ;;  %v6707_v20 = vsel %vm6639_vm4, %v12161_v13, %v12121_v63  ;;  %v9488_v26 = vld [vmem:[#allocation7 + $0x308] sm:$0xff]   ;;  %v9515_v35 = vld [vmem:[#allocation5 + $0x8] sm:$0xff] }
 0x370   : > { %v5935_v41 = vrot.slane %v5934_v0, 2  ;;  %v5949_v52 = vrot.slane %v5948_v44, 2  ;;  %v6708_v25 = vsel %vm6641_vm5, %v12191_v22, %v6707_v20  ;;  %v6721_v33 = vsel %vm6639_vm4, %v12166_v18, %v12127_v16 }
 0x371   : > { %v5929_v54 = vadd.f32 %v5928_v48, %v5927_v59  ;;  %v5943_v27 = vadd.f32 %v5942_v23, %v5941_v58  ;;  %v6709_v50 = vsel %vm6643_vm6, %v12215_v3, %v6708_v25  ;;  %v6722_v4 = vsel %vm6641_vm5, %v12193_v62, %v6721_v33  ;;  %v9489_v59 = vld [vmem:[#allocation7 + $0x388] sm:$0xff]   ;;  %v9493_v23 = vld [vmem:[#allocation7 + $0x390] sm:$0xff]  }
 0x372   : > { %v5936_v37 = vadd.f32 %v5935_v41, %v5934_v0  ;;  %v5950_v13 = vadd.f32 %v5949_v52, %v5948_v44  ;;  %v6710_v10 = vsel %vm6645_vm7, %v6612_v57, %v6709_v50  ;;  %v6723_v22 = vsel %vm6643_vm6, %v12217_v2, %v6722_v4  ;;  %v9494_v41 = vld [vmem:[#allocation7 + $0x358] sm:$0xff]  }
 0x373   : > { %v5930_v63 = vrot.slane %v5929_v54, 1  ;;  %v5944_v16 = vrot.slane %v5943_v27, 1  ;;  %v6724_v45 = vsel %vm6645_vm7, %v6614_v56, %v6723_v22  ;;  %v6701_v3 = vsel %vm6641_vm5, %v12187_v19, %v12164_v46  ;;  %v9495_v52 = vld [vmem:[#allocation7 + $0x3d8] sm:$0xff]  }
 0x374   : > { %v5937_v18 = vrot.slane %v5936_v37, 1  ;;  %v5951_v9 = vrot.slane %v5950_v13, 1  ;;  %v6702_v62 = vsel %vm6643_vm6, %v12211_v55, %v6701_v3  ;;  %v6715_v32 = vsel %vm6641_vm5, %v12189_v39, %v12169_v8 }
 0x375   : > { %v5931_v53 = vadd.f32 %v5930_v63, %v5929_v54  ;;  %v5945_v2 = vadd.f32 %v5944_v16, %v5943_v27  ;;  %v6703_v61 = vsel %vm6645_vm7, %v6611_v51, %v6702_v62  ;;  %v6716_v14 = vsel %vm6643_vm6, %v12213_v47, %v6715_v32  ;;  %v9491_v51 = vld [vmem:[#allocation7 + $0x3d0] sm:$0xff]   ;;  %v9496_v27 = vld [vmem:[#allocation7 + $0x318] sm:$0xff]  }
 0x376   : > { %v5938_v40 = vadd.f32 %v5937_v18, %v5936_v37  ;;  %v5952_v1 = vadd.f32 %v5951_v9, %v5950_v13  ;;  %v6717_v46 = vsel %vm6645_vm7, %v6613_v7, %v6716_v14  ;;  %v13152_v58 = vsub.s32 4, %v13147_v21  ;;  %v9492_v7 = vld [vmem:[#allocation7 + $0x310] sm:$0xff]   ;;  %v9498_v13 = vld [vmem:[#allocation7 + $0x360] sm:$0xff]  }
 0x377   : > { %v6101_v29 = vpack.c.bf16 %v5931_v53, %v5931_v53  ;;  %v6103_v19 = vpack.c.bf16 %v5945_v2, %v5945_v2  ;;  %v13153_v57 = vsub.s32 6, %v13147_v21  ;;  %v13154_v44 = vsub.s32 5, %v13147_v21 }
 0x378   : > { %v6102_v6 = vpack.c.bf16 %v5938_v40, %v5938_v40  ;;  %v6104_v30 = vpack.c.bf16 %v5952_v1, %v5952_v1  ;;  %v12269_v0 = vrot.slane %v9515_v35, %v13152_v58  ;;  %v13155_v20 = vsub.s32 7, %v13147_v21  ;;  %v9497_v21 = vld [vmem:[#allocation7 + $0x398] sm:$0xff]   ;;  %v8444_v40 = vld [vmem:[#allocation8] ss:$0 sm:$0xff]  ;;  %v9506_v58 = vld [vmem:[#allocation7 + $0x370] sm:$0xff]  }
 0x379   : > { %v6627_v11 = vunpack.c.l.b16 %v6101_v29  ;;  %v6629_v55 = vunpack.c.l.b16 %v6103_v19  ;;  %v12273_v48 = vrot.slane %v9515_v35, %v13153_v57  ;;  %v12277_v56 = vrot.slane %v9515_v35, %v13154_v44  ;;  %v6370_v19 = vpop.permute.xlu0 %6369 }
 0x37a   : > { %v6628_v12 = vunpack.c.l.b16 %v6102_v6  ;;  %v6630_v34 = vunpack.c.l.b16 %v6104_v30  ;;  %v12281_v54 = vrot.slane %v9515_v35, %v13155_v20  ;;  %v9501_v6 = vld [vmem:[#allocation7 + $0x3a0] sm:$0xff]   ;;  %v9505_v35 = vld [vmem:[#allocation7 + $0x3a8] sm:$0xff]  }
 0x37b   : > { %v6704_v8 = vsel %vm6647_vm8, %v6627_v11, %v6703_v61  ;;  %v6718_v42 = vsel %vm6647_vm8, %v6629_v55, %v6717_v46  ;;  %v9500_v61 = vld [vmem:[#allocation7 + $0x320] sm:$0xff]   ;;  %v9502_v11 = vld [vmem:[#allocation7 + $0x368] sm:$0xff]  }
 0x37c   : > { %v6711_v39 = vsel %vm6647_vm8, %v6628_v12, %v6710_v10  ;;  %v6725_v47 = vsel %vm6647_vm8, %v6630_v34, %v6724_v45  ;;  %v6762_v5 = vpack.c.b16 %v6704_v8, %v6704_v8  ;;  %v6764_v36 = vpack.c.b16 %v6718_v42, %v6718_v42  ;;  %v9499_v45 = vld [vmem:[#allocation7 + $0x3e0] sm:$0xff]   ;;  %v9503_v34 = vld [vmem:[#allocation7 + $0x3e8] sm:$0xff]  }
 0x37d   : > { %v6763_v24 = vpack.c.b16 %v6711_v39, %v6711_v39  ;;  %v6765_v43 = vpack.c.b16 %v6725_v47, %v6725_v47 }
 0x37f   : > { %7746 = vmatprep.mubr.bf16.mxu0 %v6763_v24  ;;  %7786 = vmatprep.mubr.bf16.mxu1 %v6765_v43 }
 0x380   : > { %7747 = vmatmul.mubr.bf16.vlgmr.msra.gmra.mrb[136].mxu0 %v6762_v5  ;;  %7787 = vmatmul.mubr.bf16.vlgmr.msra.gmra.mrb[136].mxu1 %v6764_v36 }
 0x381   : > { %8711 = vmatpush3.bf16.msra.mxu0 %v9484_v49  ;;  %8733 = vmatpush3.bf16.msra.mxu1 %v9485_v17  ;;  %v12292_v17 = vmul.f32 %v8444_v40, %v6370_v19 }
 0x382   : > { %8712 = vmatprep.subr.bf16.mxu0 %v9486_v38  ;;  %8734 = vmatprep.subr.bf16.mxu1 %v9487_v28  ;;  %v9504_v38 = vld [vmem:[#allocation7 + $0x328] sm:$0xff]  }
 0x385   : > { %8713 = vmatpush3.bf16.msra.mxu0 %v9488_v26  ;;  %8735 = vmatpush3.bf16.msra.mxu1 %v9489_v59 }
 0x386   : > { %8714 = vmatprep.subr.bf16.mxu0 %v9490_v31  ;;  %8736 = vmatprep.subr.bf16.mxu1 %v9491_v51 }
 0x389   : > { %8715 = vmatpush3.bf16.msra.mxu0 %v9492_v7  ;;  %8737 = vmatpush3.bf16.msra.mxu1 %v9493_v23 }
 0x38a   : > { %8716 = vmatprep.subr.bf16.mxu0 %v9494_v41  ;;  %8738 = vmatprep.subr.bf16.mxu1 %v9495_v52  ;;  %v9507_v52 = vld [vmem:[#allocation7 + $0x3f0] sm:$0xff]  }
 0x38d   : > { %v4524_v25 = vpop.f32.mrb[96].mxu0  ;;  %v4750_v15 = vpop.f32.mrb[96].mxu1  ;;  %8717 = vmatpush3.bf16.msra.mxu0 %v9496_v27  ;;  %8739 = vmatpush3.bf16.msra.mxu1 %v9497_v21  ;;  %v9508_v21 = vld [vmem:[#allocation7 + $0x330] sm:$0xff]  }
 0x38e   : > { %v8946_v33 = vadd.f32 %v4524_v25, %v12269_v0  ;;  %v4526_v60 = vpop.f32.mrb[97].mxu0  ;;  %v8978_v37 = vadd.f32 %v4750_v15, %v12273_v48  ;;  %v4752_v4 = vpop.f32.mrb[97].mxu1  ;;  %8718 = vmatprep.subr.bf16.mxu0 %v9498_v13  ;;  %8740 = vmatprep.subr.bf16.mxu1 %v9499_v45  ;;  %v9510_v45 = vld [vmem:[#allocation7 + $0x378] sm:$0xff]  }
 0x38f   : > { %v8947_v50 = vadd.f32 %v4526_v60, %v12277_v56  ;;  %v4528_v63 = vpop.f32.mrb[98].mxu0  ;;  %v8979_v10 = vadd.f32 %v4752_v4, %v12281_v54  ;;  %v4754_v16 = vpop.f32.mrb[98].mxu1 }
 0x390   : > { %v8948_v22 = vadd.f32 %v4528_v63, %v12269_v0  ;;  %v4530_v18 = vpop.f32.mrb[99].mxu0  ;;  %v8980_v3 = vadd.f32 %v4754_v16, %v12273_v48  ;;  %v4756_v9 = vpop.f32.mrb[99].mxu1  ;;  %v4841_v62 = vmax.f32 %v8946_v33, 0.0  ;;  %v4843_v14 = vmax.f32 %v8978_v37, 0.0 }
 0x391   : > { %v8949_v53 = vadd.f32 %v4530_v18, %v12277_v56  ;;  %v8981_v2 = vadd.f32 %v4756_v9, %v12281_v54  ;;  %v4842_v29 = vmax.f32 %v8947_v50, 0.0  ;;  %v4844_v30 = vmax.f32 %v8979_v10, 0.0  ;;  %8719 = vmatpush3.bf16.msra.mxu0 %v9500_v61  ;;  %8741 = vmatpush3.bf16.msra.mxu1 %v9501_v6  ;;  %v9509_v18 = vld [vmem:[#allocation7 + $0x3b0] sm:$0xff]  }
 0x392   : > { %v4857_v32 = vmax.f32 %v8948_v22, 0.0  ;;  %v4859_v1 = vmax.f32 %v8980_v3, 0.0  ;;  %8720 = vmatprep.subr.bf16.mxu0 %v9502_v11  ;;  %8742 = vmatprep.subr.bf16.mxu1 %v9503_v34 }
 0x393   : > { %v4858_v46 = vmax.f32 %v8949_v53, 0.0  ;;  %v4860_v12 = vmax.f32 %v8981_v2, 0.0 }
 0x394   : > { %v5169_v55 = vadd.f32 %v4857_v32, %v4841_v62  ;;  %v5183_v8 = vadd.f32 %v4859_v1, %v4843_v14  ;;  %v9511_v32 = vld [vmem:[#allocation7 + $0x3f8] sm:$0xff]  }
 0x395   : > { %v5176_v39 = vadd.f32 %v4858_v46, %v4842_v29  ;;  %v4534_v42 = vpop.f32.mrb[100].mxu0  ;;  %v5190_v47 = vadd.f32 %v4860_v12, %v4844_v30  ;;  %v4760_v43 = vpop.f32.mrb[100].mxu1  ;;  %8721 = vmatpush3.bf16.msra.mxu0 %v9504_v38  ;;  %8743 = vmatpush3.bf16.msra.mxu1 %v9505_v35 }
 0x396   : > { %v5170_v24 = vrot.slane %v5169_v55, 4  ;;  %v8950_v49 = vadd.f32 %v4534_v42, %v12269_v0  ;;  %v4536_v5 = vpop.f32.mrb[101].mxu0  ;;  %v5184_v36 = vrot.slane %v5183_v8, 4  ;;  %v8982_v26 = vadd.f32 %v4760_v43, %v12273_v48  ;;  %v4762_v31 = vpop.f32.mrb[101].mxu1  ;;  %8722 = vmatprep.subr.bf16.mxu0 %v9506_v58  ;;  %8744 = vmatprep.subr.bf16.mxu1 %v9507_v52 }
 0x397   : > { %v5177_v28 = vrot.slane %v5176_v39, 4  ;;  %v8951_v59 = vadd.f32 %v4536_v5, %v12277_v56  ;;  %v4538_v51 = vpop.f32.mrb[102].mxu0  ;;  %v5191_v57 = vrot.slane %v5190_v47, 4  ;;  %v8983_v23 = vadd.f32 %v4762_v31, %v12281_v54  ;;  %v4764_v41 = vpop.f32.mrb[102].mxu1 }
 0x398   : > { %v5171_v7 = vadd.f32 %v5170_v24, %v5169_v55  ;;  %v4873_v44 = vmax.f32 %v8950_v49, 0.0  ;;  %v4540_v20 = vpop.f32.mrb[103].mxu0  ;;  %v5185_v25 = vadd.f32 %v5184_v36, %v5183_v8  ;;  %v4875_v15 = vmax.f32 %v8982_v26, 0.0  ;;  %v4766_v27 = vpop.f32.mrb[103].mxu1  ;;  %v9512_v55 = vld [vmem:[#allocation7 + $0x338] sm:$0xff]  }
 0x399   : > { %v5178_v33 = vadd.f32 %v5177_v28, %v5176_v39  ;;  %v4874_v60 = vmax.f32 %v8951_v59, 0.0  ;;  %v5192_v50 = vadd.f32 %v5191_v57, %v5190_v47  ;;  %v4876_v4 = vmax.f32 %v8983_v23, 0.0  ;;  %8723 = vmatpush3.bf16.msra.mxu0 %v9508_v21  ;;  %8745 = vmatpush3.bf16.msra.mxu1 %v9509_v18  ;;  %v9513_v47 = vld [vmem:[#allocation7 + $0x3b8] sm:$0xff]  }
 0x39a   : > { %v5172_v37 = vrot.slane %v5171_v7, 2  ;;  %v8952_v63 = vadd.f32 %v4538_v51, %v12269_v0  ;;  %v5186_v13 = vrot.slane %v5185_v25, 2  ;;  %v8984_v22 = vadd.f32 %v4764_v41, %v12273_v48  ;;  %8724 = vmatprep.subr.bf16.mxu0 %v9510_v45  ;;  %8746 = vmatprep.subr.bf16.mxu1 %v9511_v32 }
 0x39b   : > { %v5179_v10 = vrot.slane %v5178_v33, 2  ;;  %v8953_v16 = vadd.f32 %v4540_v20, %v12277_v56  ;;  %v5193_v53 = vrot.slane %v5192_v50, 2  ;;  %v8985_v62 = vadd.f32 %v4766_v27, %v12281_v54 }
 0x39c   : > { %v5173_v3 = vadd.f32 %v5172_v37, %v5171_v7  ;;  %v4889_v9 = vmax.f32 %v8952_v63, 0.0  ;;  %v5187_v2 = vadd.f32 %v5186_v13, %v5185_v25  ;;  %v4891_v61 = vmax.f32 %v8984_v22, 0.0 }
 0x39d   : > { %v5180_v40 = vadd.f32 %v5179_v10, %v5178_v33  ;;  %v4890_v14 = vmax.f32 %v8953_v16, 0.0  ;;  %v4544_v29 = vpop.f32.mrb[104].mxu0  ;;  %v5194_v46 = vadd.f32 %v5193_v53, %v5192_v50  ;;  %v4892_v6 = vmax.f32 %v8985_v62, 0.0  ;;  %v4770_v11 = vpop.f32.mrb[104].mxu1  ;;  %8725 = vmatpush3.bf16.msra.mxu0 %v9512_v55  ;;  %8747 = vmatpush3.bf16.msra.mxu1 %v9513_v47 }
 0x39e   : > { %v5174_v1 = vrot.slane %v5173_v3, 1  ;;  %v5281_v19 = vadd.f32 %v4889_v9, %v4873_v44  ;;  %v4546_v30 = vpop.f32.mrb[105].mxu0  ;;  %v5188_v12 = vrot.slane %v5187_v2, 1  ;;  %v5295_v8 = vadd.f32 %v4891_v61, %v4875_v15  ;;  %v4772_v42 = vpop.f32.mrb[105].mxu1 }
 0x39f   : > { %v5181_v34 = vrot.slane %v5180_v40, 1  ;;  %v5288_v39 = vadd.f32 %v4890_v14, %v4874_v60  ;;  %v4548_v24 = vpop.f32.mrb[106].mxu0  ;;  %v5195_v43 = vrot.slane %v5194_v46, 1  ;;  %v5302_v38 = vadd.f32 %v4892_v6, %v4876_v4  ;;  %v4774_v36 = vpop.f32.mrb[106].mxu1 }
 0x3a0   : > { %v5175_v49 = vadd.f32 %v5174_v1, %v5173_v3  ;;  %v5282_v5 = vrot.slane %v5281_v19, 4  ;;  %v4550_v28 = vpop.f32.mrb[107].mxu0  ;;  %v5189_v26 = vadd.f32 %v5188_v12, %v5187_v2  ;;  %v5296_v31 = vrot.slane %v5295_v8, 4  ;;  %v4776_v35 = vpop.f32.mrb[107].mxu1 }
 0x3a1   : > { %v5182_v59 = vadd.f32 %v5181_v34, %v5180_v40  ;;  %v5289_v51 = vrot.slane %v5288_v39, 4  ;;  %v5196_v7 = vadd.f32 %v5195_v43, %v5194_v46  ;;  %v5303_v44 = vrot.slane %v5302_v38, 4 }
 0x3a2   : > { %v5993_v58 = vpack.c.bf16 %v5175_v49, %v5175_v49  ;;  %v5283_v57 = vadd.f32 %v5282_v5, %v5281_v19  ;;  %v5995_v23 = vpack.c.bf16 %v5189_v26, %v5189_v26  ;;  %v5297_v20 = vadd.f32 %v5296_v31, %v5295_v8 }
 0x3a3   : > { %v5994_v41 = vpack.c.bf16 %v5182_v59, %v5182_v59  ;;  %v5290_v52 = vadd.f32 %v5289_v51, %v5288_v39  ;;  %v5996_v33 = vpack.c.bf16 %v5196_v7, %v5196_v7  ;;  %v5304_v60 = vadd.f32 %v5303_v44, %v5302_v38 }
 0x3a4   : > { %v6519_v25 = vunpack.c.l.b16 %v5993_v58  ;;  %v5284_v15 = vrot.slane %v5283_v57, 2  ;;  %v12301_v27 = vunpack.c.l.b16 %v5995_v23  ;;  %v5298_v50 = vrot.slane %v5297_v20, 2 }
 0x3a5   : > { %v12303_v37 = vunpack.c.l.b16 %v5994_v41  ;;  %v5291_v4 = vrot.slane %v5290_v52, 2  ;;  %v12305_v63 = vpop.f32.mrb[108].mxu0  ;;  %v12307_v21 = vunpack.c.l.b16 %v5996_v33  ;;  %v5305_v10 = vrot.slane %v5304_v60, 2  ;;  %v12310_v16 = vpop.f32.mrb[108].mxu1 }
 0x3a6   : > { %v5285_v13 = vadd.f32 %v5284_v15, %v5283_v57  ;;  %v8954_v22 = vadd.f32 %v4544_v29, %v12269_v0  ;;  %v12312_v18 = vpop.f32.mrb[109].mxu0  ;;  %v5299_v45 = vadd.f32 %v5298_v50, %v5297_v20  ;;  %v8986_v53 = vadd.f32 %v4770_v11, %v12273_v48  ;;  %v12316_v62 = vpop.f32.mrb[109].mxu1 }
 0x3a7   : > { %v5292_v3 = vadd.f32 %v5291_v4, %v5290_v52  ;;  %v8955_v9 = vadd.f32 %v4546_v30, %v12277_v56  ;;  %v12318_v32 = vpop.f32.mrb[110].mxu0  ;;  %v5306_v40 = vadd.f32 %v5305_v10, %v5304_v60  ;;  %v8987_v14 = vadd.f32 %v4772_v42, %v12281_v54  ;;  %v12321_v29 = vpop.f32.mrb[110].mxu1 }
 0x3a8   : > { %v5286_v2 = vrot.slane %v5285_v13, 1  ;;  %v4905_v61 = vmax.f32 %v8954_v22, 0.0  ;;  %v12323_v1 = vpop.f32.mrb[111].mxu0  ;;  %v5300_v46 = vrot.slane %v5299_v45, 1  ;;  %v4907_v6 = vmax.f32 %v8986_v53, 0.0  ;;  %v12325_v11 = vpop.f32.mrb[111].mxu1 }
 0x3a9   : > { %v5293_v19 = vrot.slane %v5292_v3, 1  ;;  %v4906_v55 = vmax.f32 %v8955_v9, 0.0  ;;  %v5307_v12 = vrot.slane %v5306_v40, 1  ;;  %v4908_v34 = vmax.f32 %v8987_v14, 0.0 }
 0x3aa   : > { %v5287_v30 = vadd.f32 %v5286_v2, %v5285_v13  ;;  %v8956_v8 = vadd.f32 %v4548_v24, %v12269_v0  ;;  %v5301_v39 = vadd.f32 %v5300_v46, %v5299_v45  ;;  %v8988_v49 = vadd.f32 %v4774_v36, %v12273_v48 }
 0x3ab   : > { %v5294_v47 = vadd.f32 %v5293_v19, %v5292_v3  ;;  %v8957_v42 = vadd.f32 %v4550_v28, %v12277_v56  ;;  %v5308_v5 = vadd.f32 %v5307_v12, %v5306_v40  ;;  %v8989_v26 = vadd.f32 %v4776_v35, %v12281_v54 }
 0x3ac   : > { %v6009_v43 = vpack.c.bf16 %v5287_v30, %v5287_v30  ;;  %v4921_v38 = vmax.f32 %v8956_v8, 0.0  ;;  %v6011_v59 = vpack.c.bf16 %v5301_v39, %v5301_v39  ;;  %v4923_v51 = vmax.f32 %v8988_v49, 0.0 }
 0x3ad   : > { %v6010_v31 = vpack.c.bf16 %v5294_v47, %v5294_v47  ;;  %v4922_v58 = vmax.f32 %v8957_v42, 0.0  ;;  %v12331_v7 = vpop.f32.mrb[112].mxu0  ;;  %v6012_v44 = vpack.c.bf16 %v5308_v5, %v5308_v5  ;;  %v4924_v23 = vmax.f32 %v8989_v26, 0.0  ;;  %v12333_v41 = vpop.f32.mrb[112].mxu1 }
 0x3ae   : > { %v6535_v57 = vunpack.c.l.b16 %v6009_v43  ;;  %v5393_v24 = vadd.f32 %v4921_v38, %v4905_v61  ;;  %v12335_v36 = vpop.f32.mrb[113].mxu0  ;;  %v6537_v28 = vunpack.c.l.b16 %v6011_v59  ;;  %v5407_v52 = vadd.f32 %v4923_v51, %v4907_v6  ;;  %v12337_v15 = vpop.f32.mrb[113].mxu1 }
 0x3af   : > { %v6536_v20 = vunpack.c.l.b16 %v6010_v31  ;;  %v5400_v33 = vadd.f32 %v4922_v58, %v4906_v55  ;;  %v12339_v35 = vpop.f32.mrb[114].mxu0  ;;  %v6538_v50 = vunpack.c.l.b16 %v6012_v44  ;;  %v5414_v13 = vadd.f32 %v4924_v23, %v4908_v34  ;;  %v12344_v10 = vpop.f32.mrb[114].mxu1 }
 0x3b0   : > { %v12342_v60 = vsel %vm6635_vm2, %v6535_v57, %v6519_v25  ;;  %v5394_v4 = vrot.slane %v5393_v24, 4  ;;  %v12346_v22 = vpop.f32.mrb[115].mxu0  ;;  %v12350_v45 = vsel %vm6635_vm2, %v6537_v28, %v12301_v27  ;;  %v5408_v53 = vrot.slane %v5407_v52, 4  ;;  %v12356_v2 = vpop.f32.mrb[115].mxu1 }
 0x3b1   : > { %v12354_v3 = vsel %vm6635_vm2, %v6536_v20, %v12303_v37  ;;  %v5401_v9 = vrot.slane %v5400_v33, 4  ;;  %v12360_v25 = vsel %vm6635_vm2, %v6538_v50, %v12307_v21  ;;  %v5415_v61 = vrot.slane %v5414_v13, 4 }
 0x3b2   : > { %v5395_v40 = vadd.f32 %v5394_v4, %v5393_v24  ;;  %v8958_v14 = vadd.f32 %v12305_v63, %v12269_v0  ;;  %v5409_v46 = vadd.f32 %v5408_v53, %v5407_v52  ;;  %v8990_v19 = vadd.f32 %v12310_v16, %v12273_v48 }
 0x3b3   : > { %v5402_v27 = vadd.f32 %v5401_v9, %v5400_v33  ;;  %v8959_v37 = vadd.f32 %v12312_v18, %v12277_v56  ;;  %v5416_v55 = vadd.f32 %v5415_v61, %v5414_v13  ;;  %v8991_v21 = vadd.f32 %v12316_v62, %v12281_v54 }
 0x3b4   : > { %v5396_v6 = vrot.slane %v5395_v40, 2  ;;  %v4937_v30 = vmax.f32 %v8958_v14, 0.0  ;;  %v5410_v12 = vrot.slane %v5409_v46, 2  ;;  %v4939_v8 = vmax.f32 %v8990_v19, 0.0 }
 0x3b5   : > { %v5403_v34 = vrot.slane %v5402_v27, 2  ;;  %v4938_v39 = vmax.f32 %v8959_v37, 0.0  ;;  %v12370_v47 = vpop.f32.mrb[116].mxu0  ;;  %v5417_v49 = vrot.slane %v5416_v55, 2  ;;  %v4940_v42 = vmax.f32 %v8991_v21, 0.0  ;;  %v12374_v43 = vpop.f32.mrb[116].mxu1 }
 0x3b6   : > { %v5397_v63 = vadd.f32 %v5396_v6, %v5395_v40  ;;  %v8960_v16 = vadd.f32 %v12318_v32, %v12269_v0  ;;  %v12376_v18 = vpop.f32.mrb[117].mxu0  ;;  %v5411_v5 = vadd.f32 %v5410_v12, %v5409_v46  ;;  %v8992_v62 = vadd.f32 %v12321_v29, %v12273_v48  ;;  %v12382_v59 = vpop.f32.mrb[117].mxu1 }
 0x3b7   : > { %v5404_v38 = vadd.f32 %v5403_v34, %v5402_v27  ;;  %v8961_v26 = vadd.f32 %v12323_v1, %v12277_v56  ;;  %v12384_v31 = vpop.f32.mrb[118].mxu0  ;;  %v5418_v58 = vadd.f32 %v5417_v49, %v5416_v55  ;;  %v8993_v32 = vadd.f32 %v12325_v11, %v12281_v54  ;;  %v12388_v44 = vpop.f32.mrb[118].mxu1 }
 0x3b8   : > { %v5398_v51 = vrot.slane %v5397_v63, 1  ;;  %v4953_v57 = vmax.f32 %v8960_v16, 0.0  ;;  %v12390_v24 = vpop.f32.mrb[119].mxu0  ;;  %v5412_v23 = vrot.slane %v5411_v5, 1  ;;  %v4955_v29 = vmax.f32 %v8992_v62, 0.0  ;;  %v12392_v52 = vpop.f32.mrb[119].mxu1 }
 0x3b9   : > { %v5405_v28 = vrot.slane %v5404_v38, 1  ;;  %v4954_v20 = vmax.f32 %v8961_v26, 0.0  ;;  %v5419_v33 = vrot.slane %v5418_v58, 1  ;;  %v4956_v4 = vmax.f32 %v8993_v32, 0.0 }
 0x3ba   : > { %v5399_v1 = vadd.f32 %v5398_v51, %v5397_v63  ;;  %v5505_v50 = vadd.f32 %v4953_v57, %v4937_v30  ;;  %v5413_v13 = vadd.f32 %v5412_v23, %v5411_v5  ;;  %v5519_v9 = vadd.f32 %v4955_v29, %v4939_v8 }
 0x3bb   : > { %v5406_v53 = vadd.f32 %v5405_v28, %v5404_v38  ;;  %v5512_v40 = vadd.f32 %v4954_v20, %v4938_v39  ;;  %v5420_v11 = vadd.f32 %v5419_v33, %v5418_v58  ;;  %v5526_v46 = vadd.f32 %v4956_v4, %v4940_v42 }
 0x3bc   : > { %v6025_v61 = vpack.c.bf16 %v5399_v1, %v5399_v1  ;;  %v5506_v14 = vrot.slane %v5505_v50, 4  ;;  %v6027_v27 = vpack.c.bf16 %v5413_v13, %v5413_v13  ;;  %v5520_v37 = vrot.slane %v5519_v9, 4 }
 0x3bd   : > { %v6026_v19 = vpack.c.bf16 %v5406_v53, %v5406_v53  ;;  %v5513_v6 = vrot.slane %v5512_v40, 4  ;;  %v12394_v55 = vpop.f32.mrb[120].mxu0  ;;  %v6028_v12 = vpack.c.bf16 %v5420_v11, %v5420_v11  ;;  %v5527_v63 = vrot.slane %v5526_v46, 4  ;;  %v12396_v30 = vpop.f32.mrb[120].mxu1 }
 0x3be   : > { %v6551_v21 = vunpack.c.l.b16 %v6025_v61  ;;  %v5507_v34 = vadd.f32 %v5506_v14, %v5505_v50  ;;  %v12398_v49 = vpop.f32.mrb[121].mxu0  ;;  %v6553_v8 = vunpack.c.l.b16 %v6027_v27  ;;  %v5521_v16 = vadd.f32 %v5520_v37, %v5519_v9  ;;  %v12400_v38 = vpop.f32.mrb[121].mxu1 }
 0x3bf   : > { %v6552_v39 = vunpack.c.l.b16 %v6026_v19  ;;  %v5514_v5 = vadd.f32 %v5513_v6, %v5512_v40  ;;  %v12402_v42 = vpop.f32.mrb[122].mxu0  ;;  %v6554_v26 = vunpack.c.l.b16 %v6028_v12  ;;  %v5528_v58 = vadd.f32 %v5527_v63, %v5526_v46  ;;  %v12406_v57 = vpop.f32.mrb[122].mxu1 }
 0x3c0   : > { %v6727_v62 = vsel %vm6637_vm3, %v6551_v21, %v12342_v60  ;;  %v5508_v51 = vrot.slane %v5507_v34, 2  ;;  %v12408_v32 = vpop.f32.mrb[123].mxu0  ;;  %v6741_v23 = vsel %vm6637_vm3, %v6553_v8, %v12350_v45  ;;  %v5522_v29 = vrot.slane %v5521_v16, 2  ;;  %v12416_v1 = vpop.f32.mrb[123].mxu1 }
 0x3c1   : > { %v12414_v28 = vsel %vm6637_vm3, %v6552_v39, %v12354_v3  ;;  %v5515_v20 = vrot.slane %v5514_v5, 2  ;;  %v12420_v60 = vsel %vm6637_vm3, %v6554_v26, %v12360_v25  ;;  %v5529_v50 = vrot.slane %v5528_v58, 2 }
 0x3c2   : > { %v5509_v33 = vadd.f32 %v5508_v51, %v5507_v34  ;;  %v8962_v4 = vadd.f32 %v12331_v7, %v12269_v0  ;;  %v5523_v13 = vadd.f32 %v5522_v29, %v5521_v16  ;;  %v8994_v45 = vadd.f32 %v12333_v41, %v12273_v48 }
 0x3c3   : > { %v5516_v53 = vadd.f32 %v5515_v20, %v5514_v5  ;;  %v8963_v3 = vadd.f32 %v12335_v36, %v12277_v56  ;;  %v5530_v40 = vadd.f32 %v5529_v50, %v5528_v58  ;;  %v8995_v25 = vadd.f32 %v12337_v15, %v12281_v54 }
 0x3c4   : > { %v5510_v9 = vrot.slane %v5509_v33, 1  ;;  %v4969_v61 = vmax.f32 %v8962_v4, 0.0  ;;  %v5524_v11 = vrot.slane %v5523_v13, 1  ;;  %v4971_v46 = vmax.f32 %v8994_v45, 0.0 }
 0x3c5   : > { %v5517_v14 = vrot.slane %v5516_v53, 1  ;;  %v4970_v27 = vmax.f32 %v8963_v3, 0.0  ;;  %v12430_v19 = vpop.f32.mrb[124].mxu0  ;;  %v5531_v37 = vrot.slane %v5530_v40, 1  ;;  %v4972_v6 = vmax.f32 %v8995_v25, 0.0  ;;  %v12434_v21 = vpop.f32.mrb[124].mxu1 }
 0x3c6   : > { %v5511_v7 = vadd.f32 %v5510_v9, %v5509_v33  ;;  %v8964_v41 = vadd.f32 %v12339_v35, %v12269_v0  ;;  %v12436_v36 = vpop.f32.mrb[125].mxu0  ;;  %v5525_v12 = vadd.f32 %v5524_v11, %v5523_v13  ;;  %v8996_v15 = vadd.f32 %v12344_v10, %v12273_v48  ;;  %v12442_v8 = vpop.f32.mrb[125].mxu1 }
 0x3c7   : > { %v5518_v34 = vadd.f32 %v5517_v14, %v5516_v53  ;;  %v8965_v63 = vadd.f32 %v12346_v22, %v12277_v56  ;;  %v12444_v39 = vpop.f32.mrb[126].mxu0  ;;  %v5532_v5 = vadd.f32 %v5531_v37, %v5530_v40  ;;  %v8997_v35 = vadd.f32 %v12356_v2, %v12281_v54  ;;  %v12448_v51 = vpop.f32.mrb[126].mxu1 }
 0x3c8   : > { %v6041_v16 = vpack.c.bf16 %v5511_v7, %v5511_v7  ;;  %v4985_v26 = vmax.f32 %v8964_v41, 0.0  ;;  %v12450_v58 = vpop.f32.mrb[127].mxu0  ;;  %v6043_v29 = vpack.c.bf16 %v5525_v12, %v5525_v12  ;;  %v4987_v10 = vmax.f32 %v8996_v15, 0.0  ;;  %v12452_v50 = vpop.f32.mrb[127].mxu1 }
 0x3c9   : > { %v6042_v20 = vpack.c.bf16 %v5518_v34, %v5518_v34  ;;  %v4986_v33 = vmax.f32 %v8965_v63, 0.0  ;;  %v6044_v4 = vpack.c.bf16 %v5532_v5, %v5532_v5  ;;  %v4988_v53 = vmax.f32 %v8997_v35, 0.0 }
 0x3ca   : > { %v6567_v22 = vunpack.c.l.b16 %v6041_v16  ;;  %v5617_v13 = vadd.f32 %v4985_v26, %v4969_v61  ;;  %v6569_v45 = vunpack.c.l.b16 %v6043_v29  ;;  %v5631_v9 = vadd.f32 %v4987_v10, %v4971_v46 }
 0x3cb   : > { %v12454_v3 = vunpack.c.l.b16 %v6042_v20  ;;  %v5624_v40 = vadd.f32 %v4986_v33, %v4970_v27  ;;  %v12459_v25 = vunpack.c.l.b16 %v6044_v4  ;;  %v5638_v14 = vadd.f32 %v4988_v53, %v4972_v6 }
 0x3cc   : > { %v12457_v2 = vsel %vm6639_vm4, %v6567_v22, %v6727_v62  ;;  %v5618_v11 = vrot.slane %v5617_v13, 4  ;;  %v12462_v7 = vsel %vm6639_vm4, %v6569_v45, %v6741_v23  ;;  %v5632_v37 = vrot.slane %v5631_v9, 4 }
 0x3cd   : > { %13156 = vst [vmem:[#allocation55_spill] sm:$0xff] %v12462_v7  ;;  %v5625_v41 = vrot.slane %v5624_v40, 4  ;;  %v8966_v61 = vadd.f32 %v12370_v47, %v12269_v0  ;;  %v12466_v12 = vpop.f32.mrb[128].mxu0  ;;  %v5639_v46 = vrot.slane %v5638_v14, 4  ;;  %v8998_v62 = vadd.f32 %v12374_v43, %v12273_v48 }
 0x3ce   : > { %v5619_v34 = vadd.f32 %v5618_v11, %v5617_v13  ;;  %v8967_v27 = vadd.f32 %v12376_v18, %v12277_v56  ;;  %v12472_v15 = vpop.f32.mrb[128].mxu1  ;;  %v12474_v6 = vpop.f32.mrb[129].mxu0  ;;  %v5633_v23 = vadd.f32 %v5632_v37, %v5631_v9  ;;  %v8999_v47 = vadd.f32 %v12382_v59, %v12281_v54 }
 0x3cf   : > { %v5626_v63 = vadd.f32 %v5625_v41, %v5624_v40  ;;  %v5001_v16 = vmax.f32 %v8966_v61, 0.0  ;;  %v12478_v5 = vpop.f32.mrb[129].mxu1  ;;  %v8597_v26 = vpop.f32.mrb[130].mxu0  ;;  %v5640_v29 = vadd.f32 %v5639_v46, %v5638_v14  ;;  %v5003_v20 = vmax.f32 %v8998_v62, 0.0 }
 0x3d0   : > { %v5620_v35 = vrot.slane %v5619_v34, 2  ;;  %v5002_v43 = vmax.f32 %v8967_v27, 0.0  ;;  %v8619_v10 = vpop.f32.mrb[130].mxu1  ;;  %v8598_v33 = vpop.f32.mrb[131].mxu0  ;;  %v5634_v18 = vrot.slane %v5633_v23, 2  ;;  %v5004_v4 = vmax.f32 %v8999_v47, 0.0 }
 0x3d1   : > { %v5627_v22 = vrot.slane %v5626_v63, 2  ;;  %v8968_v13 = vadd.f32 %v12384_v31, %v12269_v0  ;;  %v8620_v53 = vpop.f32.mrb[131].mxu1  ;;  %v5641_v9 = vrot.slane %v5640_v29, 2  ;;  %v9000_v59 = vadd.f32 %v12388_v44, %v12273_v48 }
 0x3d2   : > { %v5621_v45 = vadd.f32 %v5620_v35, %v5619_v34  ;;  %v8969_v40 = vadd.f32 %v12390_v24, %v12277_v56  ;;  %v5635_v11 = vadd.f32 %v5634_v18, %v5633_v23  ;;  %v9001_v41 = vadd.f32 %v12392_v52, %v12281_v54 }
 0x3d3   : > { %v5628_v14 = vadd.f32 %v5627_v22, %v5626_v63  ;;  %v5017_v37 = vmax.f32 %v8968_v13, 0.0  ;;  %v5642_v46 = vadd.f32 %v5641_v9, %v5640_v29  ;;  %v5019_v62 = vmax.f32 %v9000_v59, 0.0 }
 0x3d4   : > { %v5622_v61 = vrot.slane %v5621_v45, 1  ;;  %v5018_v27 = vmax.f32 %v8969_v40, 0.0  ;;  %v5636_v31 = vrot.slane %v5635_v11, 1  ;;  %v5020_v26 = vmax.f32 %v9001_v41, 0.0 }
 0x3d5   : > { %v5629_v47 = vrot.slane %v5628_v14, 1  ;;  %v5729_v34 = vadd.f32 %v5017_v37, %v5001_v16  ;;  %v5643_v10 = vrot.slane %v5642_v46, 1  ;;  %v5743_v44 = vadd.f32 %v5019_v62, %v5003_v20 }
 0x3d6   : > { %v5623_v35 = vadd.f32 %v5622_v61, %v5621_v45  ;;  %v5736_v33 = vadd.f32 %v5018_v27, %v5002_v43  ;;  %v5637_v53 = vadd.f32 %v5636_v31, %v5635_v11  ;;  %v5750_v63 = vadd.f32 %v5020_v26, %v5004_v4 }
 0x3d7   : > { %v5630_v24 = vadd.f32 %v5629_v47, %v5628_v14  ;;  %v5730_v23 = vrot.slane %v5729_v34, 4  ;;  %v5644_v22 = vadd.f32 %v5643_v10, %v5642_v46  ;;  %v5744_v13 = vrot.slane %v5743_v44, 4 }
 0x3d8   : > { %v6057_v18 = vpack.c.bf16 %v5623_v35, %v5623_v35  ;;  %v5737_v52 = vrot.slane %v5736_v33, 4  ;;  %v6059_v7 = vpack.c.bf16 %v5637_v53, %v5637_v53  ;;  %v5751_v59 = vrot.slane %v5750_v63, 4 }
 0x3d9   : > { %v6058_v29 = vpack.c.bf16 %v5630_v24, %v5630_v24  ;;  %v5731_v9 = vadd.f32 %v5730_v23, %v5729_v34  ;;  %v6060_v16 = vpack.c.bf16 %v5644_v22, %v5644_v22  ;;  %v5745_v37 = vadd.f32 %v5744_v13, %v5743_v44 }
 0x3da   : > { %v12488_v40 = vunpack.c.l.b16 %v6057_v18  ;;  %v5738_v45 = vadd.f32 %v5737_v52, %v5736_v33  ;;  %v12490_v41 = vunpack.c.l.b16 %v6059_v7  ;;  %v5752_v11 = vadd.f32 %v5751_v59, %v5750_v63 }
 0x3db   : > { %v12492_v20 = vunpack.c.l.b16 %v6058_v29  ;;  %v5732_v43 = vrot.slane %v5731_v9, 2  ;;  %v12494_v4 = vunpack.c.l.b16 %v6060_v16  ;;  %v5746_v14 = vrot.slane %v5745_v37, 2 }
 0x3dc   : > { %v5739_v61 = vrot.slane %v5738_v45, 2  ;;  %v8970_v46 = vadd.f32 %v12394_v55, %v12269_v0  ;;  %v5753_v27 = vrot.slane %v5752_v11, 2  ;;  %v9002_v31 = vadd.f32 %v12396_v30, %v12273_v48 }
 0x3dd   : > { %v5733_v62 = vadd.f32 %v5732_v43, %v5731_v9  ;;  %v8971_v7 = vadd.f32 %v12398_v49, %v12277_v56  ;;  %v5747_v47 = vadd.f32 %v5746_v14, %v5745_v37  ;;  %v9003_v35 = vadd.f32 %v12400_v38, %v12281_v54 }
 0x3de   : > { %v5740_v34 = vadd.f32 %v5739_v61, %v5738_v45  ;;  %v5033_v26 = vmax.f32 %v8970_v46, 0.0  ;;  %v5754_v44 = vadd.f32 %v5753_v27, %v5752_v11  ;;  %v5035_v33 = vmax.f32 %v9002_v31, 0.0 }
 0x3df   : > { %v5734_v10 = vrot.slane %v5733_v62, 1  ;;  %v5034_v53 = vmax.f32 %v8971_v7, 0.0  ;;  %v5748_v24 = vrot.slane %v5747_v47, 1  ;;  %v5036_v23 = vmax.f32 %v9003_v35, 0.0 }
 0x3e0   : > { %v5741_v55 = vrot.slane %v5740_v34, 1  ;;  %v8972_v63 = vadd.f32 %v12402_v42, %v12269_v0  ;;  %v5755_v18 = vrot.slane %v5754_v44, 1  ;;  %v9004_v49 = vadd.f32 %v12406_v57, %v12273_v48 }
 0x3e1   : > { %v5735_v30 = vadd.f32 %v5734_v10, %v5733_v62  ;;  %v8973_v22 = vadd.f32 %v12408_v32, %v12277_v56  ;;  %v5749_v13 = vadd.f32 %v5748_v24, %v5747_v47  ;;  %v9005_v29 = vadd.f32 %v12416_v1, %v12281_v54 }
 0x3e2   : > { %v5742_v38 = vadd.f32 %v5741_v55, %v5740_v34  ;;  %v5049_v52 = vmax.f32 %v8972_v63, 0.0  ;;  %v5756_v59 = vadd.f32 %v5755_v18, %v5754_v44  ;;  %v5051_v16 = vmax.f32 %v9004_v49, 0.0 }
 0x3e3   : > { %v6073_v9 = vpack.c.bf16 %v5735_v30, %v5735_v30  ;;  %v5050_v37 = vmax.f32 %v8973_v22, 0.0  ;;  %v6075_v45 = vpack.c.bf16 %v5749_v13, %v5749_v13  ;;  %v5052_v11 = vmax.f32 %v9005_v29, 0.0 }
 0x3e4   : > { %v6074_v42 = vpack.c.bf16 %v5742_v38, %v5742_v38  ;;  %v5841_v43 = vadd.f32 %v5049_v52, %v5033_v26  ;;  %v6076_v57 = vpack.c.bf16 %v5756_v59, %v5756_v59  ;;  %v5855_v61 = vadd.f32 %v5051_v16, %v5035_v33 }
 0x3e5   : > { %v12512_v14 = vunpack.c.l.b16 %v6073_v9  ;;  %v5848_v46 = vadd.f32 %v5050_v37, %v5034_v53  ;;  %v12514_v32 = vunpack.c.l.b16 %v6075_v45  ;;  %v5862_v31 = vadd.f32 %v5052_v11, %v5036_v23 }
 0x3e6   : > { %v12516_v62 = vunpack.c.l.b16 %v6074_v42  ;;  %v5842_v27 = vrot.slane %v5841_v43, 4  ;;  %v12518_v1 = vunpack.c.l.b16 %v6076_v57  ;;  %v5856_v7 = vrot.slane %v5855_v61, 4 }
 0x3e7   : > { %v5849_v47 = vrot.slane %v5848_v46, 4  ;;  %v8974_v34 = vadd.f32 %v12430_v19, %v12269_v0  ;;  %v5863_v35 = vrot.slane %v5862_v31, 4  ;;  %v9006_v10 = vadd.f32 %v12434_v21, %v12273_v48 }
 0x3e8   : > { %v5843_v26 = vadd.f32 %v5842_v27, %v5841_v43  ;;  %v8975_v44 = vadd.f32 %v12436_v36, %v12277_v56  ;;  %v5857_v33 = vadd.f32 %v5856_v7, %v5855_v61  ;;  %v9007_v55 = vadd.f32 %v12442_v8, %v12281_v54 }
 0x3e9   : > { %v5850_v53 = vadd.f32 %v5849_v47, %v5848_v46  ;;  %v5065_v24 = vmax.f32 %v8974_v34, 0.0  ;;  %v5864_v63 = vadd.f32 %v5863_v35, %v5862_v31  ;;  %v5067_v30 = vmax.f32 %v9006_v10, 0.0 }
 0x3ea   : > { %v5844_v23 = vrot.slane %v5843_v26, 2  ;;  %v5066_v18 = vmax.f32 %v8975_v44, 0.0  ;;  %v5858_v49 = vrot.slane %v5857_v33, 2  ;;  %v5068_v22 = vmax.f32 %v9007_v55, 0.0 }
 0x3eb   : > { %v5851_v19 = vrot.slane %v5850_v53, 2  ;;  %v8976_v13 = vadd.f32 %v12444_v39, %v12269_v0  ;;  %v5865_v38 = vrot.slane %v5864_v63, 2  ;;  %v9008_v36 = vadd.f32 %v12448_v51, %v12273_v48 }
 0x3ec   : > { %v5845_v21 = vadd.f32 %v5844_v23, %v5843_v26  ;;  %v8977_v52 = vadd.f32 %v12450_v58, %v12277_v56  ;;  %v5859_v29 = vadd.f32 %v5858_v49, %v5857_v33  ;;  %v9009_v59 = vadd.f32 %v12452_v50, %v12281_v54 }
 0x3ed   : > { %v5852_v8 = vadd.f32 %v5851_v19, %v5850_v53  ;;  %v5081_v9 = vmax.f32 %v8976_v13, 0.0  ;;  %v12536_v16 = vpop.f32.mrb[132].mxu0  ;;  %v5866_v45 = vadd.f32 %v5865_v38, %v5864_v63  ;;  %v5083_v42 = vmax.f32 %v9008_v36, 0.0 }
 0x3ee   : > { %v5846_v37 = vrot.slane %v5845_v21, 1  ;;  %v5082_v0 = vmax.f32 %v8977_v52, 0.0  ;;  %v12538_v39 = vpop.f32.mrb[132].mxu1  ;;  %v12540_v43 = vpop.f32.mrb[133].mxu0  ;;  %v5860_v48 = vrot.slane %v5859_v29, 1  ;;  %v5084_v56 = vmax.f32 %v9009_v59, 0.0 }
 0x3ef   : > { %v5853_v51 = vrot.slane %v5852_v8, 1  ;;  %v5953_v11 = vadd.f32 %v5081_v9, %v5065_v24  ;;  %v12542_v58 = vpop.f32.mrb[133].mxu1  ;;  %v8641_v57 = vpop.f32.mrb[134].mxu0  ;;  %v5867_v46 = vrot.slane %v5866_v45, 1  ;;  %v5967_v54 = vadd.f32 %v5083_v42, %v5067_v30 }
 0x3f0   : > { %v5847_v61 = vadd.f32 %v5846_v37, %v5845_v21  ;;  %v5960_v50 = vadd.f32 %v5082_v0, %v5066_v18  ;;  %v8663_v27 = vpop.f32.mrb[134].mxu1  ;;  %v8642_v31 = vpop.f32.mrb[135].mxu0  ;;  %v5861_v7 = vadd.f32 %v5860_v48, %v5859_v29  ;;  %v5974_v26 = vadd.f32 %v5084_v56, %v5068_v22 }
 0x3f1   : > { %v5854_v47 = vadd.f32 %v5853_v51, %v5852_v8  ;;  %v5954_v34 = vrot.slane %v5953_v11, 4  ;;  %v8664_v35 = vpop.f32.mrb[135].mxu1  ;;  %v5868_v44 = vadd.f32 %v5867_v46, %v5866_v45  ;;  %v5968_v33 = vrot.slane %v5967_v54, 4 }
 0x3f2   : > { %v6089_v10 = vpack.c.bf16 %v5847_v61, %v5847_v61  ;;  %v5961_v53 = vrot.slane %v5960_v50, 4  ;;  %v6091_v24 = vpack.c.bf16 %v5861_v7, %v5861_v7  ;;  %v5975_v63 = vrot.slane %v5974_v26, 4 }
 0x3f3   : > { %v6090_v55 = vpack.c.bf16 %v5854_v47, %v5854_v47  ;;  %v5955_v23 = vadd.f32 %v5954_v34, %v5953_v11  ;;  %v6092_v19 = vpack.c.bf16 %v5868_v44, %v5868_v44  ;;  %v5969_v13 = vadd.f32 %v5968_v33, %v5967_v54  ;;  %v13157_v47 = vld [vmem:[#allocation55_spill] sm:$0xff] }
 0x3f4   : > { %v6615_v49 = vunpack.c.l.b16 %v6089_v10  ;;  %v5962_v30 = vadd.f32 %v5961_v53, %v5960_v50  ;;  %v6617_v18 = vunpack.c.l.b16 %v6091_v24  ;;  %v5976_v36 = vadd.f32 %v5975_v63, %v5974_v26 }
 0x3f5   : > { %v6616_v21 = vunpack.c.l.b16 %v6090_v55  ;;  %v5956_v38 = vrot.slane %v5955_v23, 2  ;;  %v6618_v52 = vunpack.c.l.b16 %v6092_v19  ;;  %v5970_v29 = vrot.slane %v5969_v13, 2 }
 0x3f6   : > { %v5963_v22 = vrot.slane %v5962_v30, 2  ;;  %v8596_v8 = vadd.f32 %v12474_v6, %v12466_v12  ;;  %v5977_v59 = vrot.slane %v5976_v36, 2  ;;  %v8618_v37 = vadd.f32 %v12478_v5, %v12472_v15 }
 0x3f7   : > { %v5957_v9 = vadd.f32 %v5956_v38, %v5955_v23  ;;  %v6735_v45 = vsel %vm6639_vm4, %v12454_v3, %v12414_v28  ;;  %v5971_v42 = vadd.f32 %v5970_v29, %v5969_v13  ;;  %v6749_v15 = vsel %vm6639_vm4, %v12459_v25, %v12420_v60 }
 0x3f8   : > { %v5964_v0 = vadd.f32 %v5963_v22, %v5962_v30  ;;  %v7589_v48 = vadd.f32 %v8596_v8, %v12292_v17  ;;  %v6736_v51 = vsel %vm6641_vm5, %v12492_v20, %v6735_v45  ;;  %v5978_v56 = vadd.f32 %v5977_v59, %v5976_v36 }
 0x3f9   : > { %v5958_v11 = vrot.slane %v5957_v9, 1  ;;  %v6737_v12 = vsel %vm6643_vm6, %v12516_v62, %v6736_v51  ;;  %v5972_v6 = vrot.slane %v5971_v42, 1  ;;  %v6750_v17 = vsel %vm6641_vm5, %v12494_v4, %v6749_v15 }
 0x3fa   : > { %v5965_v5 = vrot.slane %v5964_v0, 1  ;;  %v7629_v57 = vadd.f32 %v8618_v37, %v7589_v48  ;;  %v6738_v28 = vsel %vm6645_vm7, %v6616_v21, %v6737_v12  ;;  %v5979_v61 = vrot.slane %v5978_v56, 1  ;;  %v8573_v12 = vld [vmem:[#allocation10] ss:$0 sm:$0xff] }
 0x3fb   : > { %v5959_v3 = vadd.f32 %v5958_v11, %v5957_v9  ;;  %v6729_v20 = vsel %vm6641_vm5, %v12488_v40, %v12457_v2  ;;  %v5973_v46 = vadd.f32 %v5972_v6, %v5971_v42  ;;  %v6751_v54 = vsel %vm6643_vm6, %v12518_v1, %v6750_v17 }
 0x3fc   : > { %v5966_v62 = vadd.f32 %v5965_v5, %v5964_v0  ;;  %v6730_v60 = vsel %vm6643_vm6, %v12512_v14, %v6729_v20  ;;  %v5980_v50 = vadd.f32 %v5979_v61, %v5978_v56  ;;  %v6752_v27 = vsel %vm6645_vm7, %v6618_v52, %v6751_v54 }
 0x3fd   : > { %v6105_v25 = vpack.c.bf16 %v5959_v3, %v5959_v3  ;;  %v6731_v31 = vsel %vm6645_vm7, %v6615_v49, %v6730_v60  ;;  %v6107_v7 = vpack.c.bf16 %v5973_v46, %v5973_v46  ;;  %v6743_v2 = vsel %vm6641_vm5, %v12490_v41, %v13157_v47 }
 0x3fe   : > { %v6106_v4 = vpack.c.bf16 %v5966_v62, %v5966_v62  ;;  %v8640_v40 = vadd.f32 %v12540_v43, %v12536_v16  ;;  %v6108_v1 = vpack.c.bf16 %v5980_v50, %v5980_v50  ;;  %v6744_v14 = vsel %vm6643_vm6, %v12514_v32, %v6743_v2 }
 0x3ff   : > { %v6631_v34 = vunpack.c.l.b16 %v6105_v25  ;;  %v8662_v26 = vadd.f32 %v12542_v58, %v12538_v39  ;;  %v6633_v35 = vunpack.c.l.b16 %v6107_v7  ;;  %v6745_v44 = vsel %vm6645_vm7, %v6617_v18, %v6744_v14 }
 0x400   : > { %v6632_v10 = vunpack.c.l.b16 %v6106_v4  ;;  %v7669_v33 = vadd.f32 %v8640_v40, %v7629_v57  ;;  %v6634_v53 = vunpack.c.l.b16 %v6108_v1 }
 0x401   : > { %v6732_v24 = vsel %vm6647_vm8, %v6631_v34, %v6731_v31  ;;  %v6746_v16 = vsel %vm6647_vm8, %v6633_v35, %v6745_v44 }
 0x402   : > { %v6739_v41 = vsel %vm6647_vm8, %v6632_v10, %v6738_v28  ;;  %v7709_v43 = vadd.f32 %v8662_v26, %v7669_v33  ;;  %v6753_v23 = vsel %vm6647_vm8, %v6634_v53, %v6752_v27  ;;  %v6766_v63 = vpack.c.b16 %v6732_v24, %v6732_v24 }
 0x403   : > { %v6767_v55 = vpack.c.b16 %v6739_v41, %v6739_v41  ;;  %v6769_v32 = vpack.c.b16 %v6753_v23, %v6753_v23  ;;  %v6768_v39 = vpack.c.b16 %v6746_v16, %v6746_v16 }
 0x405   : > { %7826 = vmatprep.mubr.bf16.mxu0 %v6767_v55  ;;  %7866 = vmatprep.mubr.bf16.mxu1 %v6769_v32 }
 0x406   : > { %7827 = vmatmul.mubr.bf16.vlgmr.msra.gmra.mrb[140].mxu0 %v6766_v63  ;;  %7867 = vmatmul.mubr.bf16.vlgmr.msra.gmra.mrb[140].mxu1 %v6768_v39 }
 0x453   : > { %v8682_v58 = vpop.f32.mrb[136].mxu0  ;;  %v8704_v49 = vpop.f32.mrb[136].mxu1 }
 0x454   : > { %v8683_v19 = vpop.f32.mrb[137].mxu0  ;;  %v8705_v30 = vpop.f32.mrb[137].mxu1 }
 0x455   : > { %v8684_v13 = vadd.f32 %v8683_v19, %v8682_v58  ;;  %v8685_v18 = vpop.f32.mrb[138].mxu0  ;;  %v8706_v21 = vadd.f32 %v8705_v30, %v8704_v49  ;;  %v8707_v38 = vpop.f32.mrb[138].mxu1 }
 0x456   : > { %v8686_v36 = vpop.f32.mrb[139].mxu0  ;;  %v8708_v29 = vpop.f32.mrb[139].mxu1 }
 0x457   : > { %v7749_v52 = vadd.f32 %v8684_v13, %v7709_v43 }
 0x459   : > { %v7789_v22 = vadd.f32 %v8706_v21, %v7749_v52 }
 0x4d9   : > { %v8726_v8 = vpop.f32.mrb[140].mxu0  ;;  %v8748_v9 = vpop.f32.mrb[140].mxu1 }
 0x4da   : > { %v8727_v59 = vpop.f32.mrb[141].mxu0  ;;  %v8749_v45 = vpop.f32.mrb[141].mxu1 }
 0x4db   : > { %v8728_v37 = vadd.f32 %v8727_v59, %v8726_v8  ;;  %v8729_v42 = vpop.f32.mrb[142].mxu0  ;;  %v8750_v0 = vadd.f32 %v8749_v45, %v8748_v9  ;;  %v8751_v48 = vpop.f32.mrb[142].mxu1 }
 0x4dc   : > { %v8730_v51 = vpop.f32.mrb[143].mxu0  ;;  %v8752_v56 = vpop.f32.mrb[143].mxu1 }
 0x4dd   : > { %v7829_v11 = vadd.f32 %v8728_v37, %v7789_v22 }
 0x4df   : > { %v7869_v15 = vadd.f32 %v8750_v0, %v7829_v11 }
 0x4e1   : > { %v7881_v6 = vadd.f32 %v8573_v12, %v7869_v15 }
 0x4e3   : > { %7882 = vst [vmem:[%s354_s10] sm:$0xff] %v7881_v6 }
 0x4e4   : > { %9669 = shalt.err (!%p9666_p0)
}
 0x4e5   : > { %s9670_s5 = scalar_lea.hbm %s12590_s13, 128  ;;  %s9674_s16 = scalar_lea.hbm %s12639_s7, 256 }
 0x4e6   : > { %p9671_p6 = scmp.ne.s32.totalorder %s12590_s13, %s9670_s5  ;;  %p9675_p12 = scmp.lt.u32.totalorder %s12590_s13, %s12639_s7 }
 0x4e7   : > { %p9676_p10 = scmp.lt.u32.totalorder %s9674_s16, %s9670_s5  ;;  %p9678_p3 = scmp.lt.u32.totalorder %s9670_s5, %s12590_s13 }
 0x4e8   : > { %p9672_p5 = pnand %p9671_p6, %p13158_p4 }
 0x4e9   : > { %p9677_p2 = por %p9676_p10, %p9675_p12 }
 0x4ea   : > { %p9673_p9 = pneg %p9672_p5 }
 0x4eb   : > { %p9679_p7 = por %p9678_p3, %p9677_p2 }
 0x4ed   : > { %p9680_p8 = pnand %p9679_p7, %p9673_p9 }
 0x4ef   : > { %9683 = shalt.err (!%p9680_p8)
}
 0x4f0   : > { %9287 = dma.vmem_to_hbm [thread:$0]  (%p13158_p4), %s12592_s8, 128, %s12590_s13, %s7884_s18  }
 0x4f1 PF: > { %p9319_p11 = scmp.ge.s32.totalorder %s9730_s27, 2  ;;  %s7909_s17 = sand.u32 1, %s9718_s24  }
 0x4f2   : > { %p13159_p13 = scmp.ne.s32.totalorder %s12835_s12, 0  ;;  %s7910_s20 = scalar_lea.sflag [#allocation4], %s7909_s17 }
 0x4f4   : > { %p9306_p1 = pnand %p9319_p11, %p13159_p13 }
 0x4f6   : > { %9713 = dma.done.wait (!%p9306_p1), %s7910_s20, 128  }
 0x4f7   : > { %9715 = vsyncadd (!%p9306_p1), %s7910_s20, 4294967168  ;;  %s13160_s10 = sld [smem:[#allocation16_spill]]  ;;  %p20_p0 = scmp.ge.s32.totalorder %s9807_s30, 4  }
 0x4f8   : > { %s13161_s24 = smov %s9722_s25  ;;  %s13162_s25 = smov %s9726_s26 }
 0x4f9   : > { %s13164_s27 = smov %s9807_s30  ;;  %22 = sbr.rel (!%p20_p0) target bundleno = 9 (0x9), region = 107 }
 0x4fd   : > { %s13163_s26 = smov %s13160_s10 }
 0x500   :  { %7915 = vsyncpa [#allocation3], 1 }
 0x501   :  { %7917 = vsyncpa [#allocation3 + $0x1], 1 }
 0x502   :  { %7918 = vsyncpa [#allocation6], 1 }
 0x503   :  { %7919 = vsyncpa [#allocation9], 1 }
 0x504   :  { %7920 = vsyncpa [#allocation4], 1 }
 0x505   :  { %7922 = vsyncpa [#allocation4 + $0x1], 1 }

</bundles_post_ra>
